<compile_context>
chip_gen: v6e
topology: v6e:2x2x1
jax: 0.10.0
libtpu: 0.0.40
codegen_flags: <defaults>
</compile_context>

<pallas_src>
import functools

import jax
import jax.numpy as jnp
from jax.experimental import pallas as pl
from jax.experimental.pallas import tpu as pltpu

_BN_EPS = 1e-5


# ----------------------------------------------------------------------------- kernel
def _basic_block_kernel(*refs, n_src, tap_plan, dw, m_dom, has_down):
    """Fused BasicBlock: relu(bn2(conv2(relu(bn1(conv1(x))))) + identity).

    refs = (src_0..src_{n_src-1}, mask, w1, sh1, w2, sh2, [wd], out, mid)
      src_i : (1, L, Cin)  bf16   flattened padded input (or stride phase)
      mask  : (m_dom, 1)   f32    1 on valid columns, 0 on the 2 garbage cols/row
      w*    : (9, Cin, Cout) bf16 per-tap weights (BN scale folded in)
      sh*   : (1, Cout)    f32    BN shift (downsample bias folded into sh2)
      out   : (1, m_dom, Cout) bf16
      mid   : (mid_len, Cout) f32 VMEM scratch: conv1 output with a zero pad ring
    """
    srcs = refs[:n_src]
    mask_ref = refs[n_src]
    w1_ref, b1_ref, w2_ref, b2_ref = refs[n_src + 1:n_src + 5]
    if has_down:
        wd_ref = refs[n_src + 5]
        out_ref, mid_ref = refs[n_src + 6:n_src + 8]
    else:
        wd_ref = None
        out_ref, mid_ref = refs[n_src + 5:n_src + 7]

    c_out = out_ref.shape[-1]
    mask = mask_ref[...]                                   # (m_dom, 1) f32

    # ---- conv1 (BN1 scale pre-folded) and the downsample conv share the 9 taps.
    acc1 = jnp.zeros((m_dom, c_out), jnp.float32)
    accd = jnp.zeros((m_dom, c_out), jnp.float32) if has_down else None
    for t, (si, off) in enumerate(tap_plan):
        x_tap = srcs[si][0, pl.ds(off, m_dom), :]          # (m_dom, c_in) bf16
        acc1 = acc1 + jnp.dot(x_tap, w1_ref[t],
                              preferred_element_type=jnp.float32)
        if has_down:
            accd = accd + jnp.dot(x_tap, wd_ref[t],
                                  preferred_element_type=jnp.float32)

    # BN1 shift + ReLU; zero the garbage columns so mid's pad ring stays zero.
    hidden = jnp.maximum(acc1 + b1_ref[...], 0.0) * mask

    # ---- stage conv1's output in VMEM for conv2's taps.  Only the head/tail
    # pad rings (dw+1 rows each) need zeroing; the interior is fully overwritten
    # by the masked `hidden` (its garbage columns act as horizontal padding).
    ring = jnp.zeros((dw + 1, c_out), jnp.float32)
    mid_ref[pl.ds(0, dw + 1), :] = ring
    mid_ref[pl.ds(dw + 1 + m_dom, dw + 1), :] = ring
    mid_ref[pl.ds(dw + 1, m_dom), :] = hidden

    # ---- identity path (downsample bias already folded into b2_ref).
    if has_down:
        identity = accd
    else:
        identity = srcs[0][0, pl.ds(dw + 1, m_dom), :].astype(jnp.float32)

    # ---- conv2 (BN2 scale pre-folded) + shift + residual + ReLU.
    acc2 = jnp.zeros((m_dom, c_out), jnp.float32)
    for ki in range(3):
        for kj in range(3):
            h_tap = mid_ref[pl.ds(ki * dw + kj, m_dom), :].astype(jnp.bfloat16)
            acc2 = acc2 + jnp.dot(h_tap, w2_ref[ki * 3 + kj],
                                  preferred_element_type=jnp.float32)

    y = jnp.maximum(acc2 + b2_ref[...] + identity, 0.0) * mask
    out_ref[0, :, :] = y.astype(out_ref.dtype)


# ----------------------------------------------------------------------------- glue
def _prep_tap_weights(w_oihw, scale):
    """(Cout, Cin, 3, 3) -> (9, Cin, Cout) bf16 with per-Cout scale folded in."""
    c_out, c_in = w_oihw.shape[0], w_oihw.shape[1]
    w = jnp.transpose(w_oihw, (2, 3, 1, 0)).reshape(9, c_in, c_out)
    return (w * scale.reshape(1, 1, c_out)).astype(jnp.bfloat16)


def _make_sources(y_dom, h_in, w_in, s):
    """Build flat tap-source arrays for a stride-s 3x3 conv (pad=1).

    y_dom: (N, h_in*(w_in+2), C) "domain form": row r = [x[r, 0:w_in] | 0 | 0].
    Conv tap (ki, kj) for flat output position p reads source[src][p + off],
    with (src, off) given by the tap plan built in `basic_block`.
    """
    n, _, c = y_dom.shape
    dwin = w_in + 2
    h_out = (h_in - 1) // s + 1
    w_out = (w_in - 1) // s + 1
    dw = w_out + 2

    # canonical flattened zero-padded input, shape (h_in+2)*dwin + 2 per image
    zpad = jnp.zeros((n, dwin + 1, c), y_dom.dtype)
    canon = jnp.concatenate([zpad, y_dom, zpad], axis=1)

    if s == 1:
        return [canon], h_out, w_out, dw

    # de-interleave the padded image into s*s phases, each padded to row length dw
    xp = canon[:, :(h_in + 2) * dwin, :].reshape(n, h_in + 2, dwin, c)
    srcs = []
    for pi in range(s):
        for pj in range(s):
            ph = xp[:, pi::s, pj::s, :][:, :h_out + 1, :w_out + 1, :]
            ph = jnp.pad(ph, ((0, 0),
                              (0, h_out + 1 - ph.shape[1]),
                              (0, dw - ph.shape[2]),
                              (0, 0)))
            ph = ph.reshape(n, (h_out + 1) * dw, c)
            srcs.append(jnp.pad(ph, ((0, 0), (0, 2), (0, 0))))
    return srcs, h_out, w_out, dw


def basic_block(y_dom, h_in, w_in, blk):
    """One fused BasicBlock as a single pallas_call. Returns (y_dom', H', W')."""
    n, _, c_in = y_dom.shape
    c_out = blk["conv1_w"].shape[0]
    s = int(blk["stride"])
    has_down = "down_w" in blk
    assert has_down or (s == 1 and c_in == c_out)

    srcs, h_out, w_out, dw = _make_sources(y_dom, h_in, w_in, s)
    n_src = len(srcs)
    l_src = srcs[0].shape[1]
    m_dom = h_out * dw

    # Fold eval-mode BN into scale (-> weights) and shift (-> kernel epilogue).
    sc1 = blk["bn1_gamma"] / jnp.sqrt(blk["bn1_var"] + _BN_EPS)
    sh1 = (blk["bn1_beta"] - blk["bn1_mean"] * sc1).reshape(1, c_out).astype(jnp.float32)
    sc2 = blk["bn2_gamma"] / jnp.sqrt(blk["bn2_var"] + _BN_EPS)
    sh2 = blk["bn2_beta"] - blk["bn2_mean"] * sc2
    if has_down:
        sh2 = sh2 + blk["down_b"]          # fold downsample conv bias into epilogue
    sh2 = sh2.reshape(1, c_out).astype(jnp.float32)
    w1 = _prep_tap_weights(blk["conv1_w"], sc1)
    w2 = _prep_tap_weights(blk["conv2_w"], sc2)

    # Validity mask for the conv output domain (2 garbage columns per row).
    col = jnp.arange(m_dom, dtype=jnp.int32) % dw
    mask = (col < w_out).astype(jnp.float32).reshape(m_dom, 1)

    # tap -> (source index, flat offset) for conv1 / downsample.
    tap_plan = tuple(((ki % s) * s + (kj % s), (ki // s) * dw + (kj // s))
                     for ki in range(3) for kj in range(3))

    args = list(srcs) + [mask, w1, sh1, w2, sh2]
    in_specs = [pl.BlockSpec((1, l_src, c_in), lambda i: (i, 0, 0))
                for _ in range(n_src)]
    in_specs += [
        pl.BlockSpec((m_dom, 1), lambda i: (0, 0)),
        pl.BlockSpec((9, c_in, c_out), lambda i: (0, 0, 0)),
        pl.BlockSpec((1, c_out), lambda i: (0, 0)),
        pl.BlockSpec((9, c_out, c_out), lambda i: (0, 0, 0)),
        pl.BlockSpec((1, c_out), lambda i: (0, 0)),
    ]
    if has_down:
        wd = _prep_tap_weights(blk["down_w"], jnp.ones((c_out,), jnp.float32))
        args += [wd]
        in_specs += [pl.BlockSpec((9, c_in, c_out), lambda i: (0, 0, 0))]

    mid_len = m_dom + 2 * (dw + 1)
    y_out = pl.pallas_call(
        functools.partial(_basic_block_kernel, n_src=n_src, tap_plan=tap_plan,
                          dw=dw, m_dom=m_dom, has_down=has_down),
        out_shape=jax.ShapeDtypeStruct((n, m_dom, c_out), jnp.bfloat16),
        grid=(n,),
        in_specs=in_specs,
        out_specs=pl.BlockSpec((1, m_dom, c_out), lambda i: (i, 0, 0)),
        scratch_shapes=[pltpu.VMEM((mid_len, c_out), jnp.float32)],
        compiler_params=pltpu.CompilerParams(
            dimension_semantics=("parallel",),
            vmem_limit_bytes=32 * 1024 * 1024),
    )(*args)
    return y_out, h_out, w_out


# ----------------------------------------------------------------------------- params
def init_custom_resnet_params(key, numC_input, num_layer, stride,
                              num_channels=None):
    if num_channels is None:
        num_channels = [numC_input * 2 ** (i + 1) for i in range(len(num_layer))]
    params = []
    curr = numC_input
    for i, (nl, s) in enumerate(zip(num_layer, stride)):
        out_c = num_channels[i]
        stage = []
        for b in range(nl):
            in_c = curr if b == 0 else out_c
            st = s if b == 0 else 1
            key, *ks = jax.random.split(key, 13)
            blk = {
                "stride": st,
                "conv1_w": 0.1 * jax.random.normal(ks[0], (out_c, in_c, 3, 3), jnp.float32),
                "bn1_gamma": 1.0 + 0.1 * jax.random.normal(ks[1], (out_c,), jnp.float32),
                "bn1_beta": 0.1 * jax.random.normal(ks[2], (out_c,), jnp.float32),
                "bn1_mean": 0.1 * jax.random.normal(ks[3], (out_c,), jnp.float32),
                "bn1_var": 1.0 + 0.1 * jnp.abs(jax.random.normal(ks[4], (out_c,), jnp.float32)),
                "conv2_w": 0.1 * jax.random.normal(ks[5], (out_c, out_c, 3, 3), jnp.float32),
                "bn2_gamma": 1.0 + 0.1 * jax.random.normal(ks[6], (out_c,), jnp.float32),
                "bn2_beta": 0.1 * jax.random.normal(ks[7], (out_c,), jnp.float32),
                "bn2_mean": 0.1 * jax.random.normal(ks[8], (out_c,), jnp.float32),
                "bn2_var": 1.0 + 0.1 * jnp.abs(jax.random.normal(ks[9], (out_c,), jnp.float32)),
            }
            if b == 0:  # downsample = nn.Conv2d(in_c, out_c, 3, stride, 1) (bias=True)
                blk["down_w"] = 0.1 * jax.random.normal(ks[10], (out_c, in_c, 3, 3), jnp.float32)
                blk["down_b"] = 0.1 * jax.random.normal(ks[11], (out_c,), jnp.float32)
            stage.append(blk)
        curr = out_c
        params.append(stage)
    return params


# ----------------------------------------------------------------------------- forward
def custom_resnet_forward(x_nchw, params, backbone_output_ids=None):
    if backbone_output_ids is None:
        backbone_output_ids = range(len(params))
    n, c, h, w = x_nchw.shape
    x_nhwc = jnp.transpose(x_nchw, (0, 2, 3, 1)).astype(jnp.bfloat16)
    # "domain form": rows of length w+2 = [w valid cols | 2 zero cols], flattened.
    y = jnp.pad(x_nhwc, ((0, 0), (0, 0), (0, 2), (0, 0))).reshape(n, h * (w + 2), c)
    feats = []
    for lid, stage in enumerate(params):
        for blk in stage:
            y, h, w = basic_block(y, h, w, blk)
        if lid in backbone_output_ids:
            cc = y.shape[-1]
            f = y.reshape(n, h, w + 2, cc)[:, :, :w, :]          # drop garbage cols
            feats.append(jnp.transpose(f, (0, 3, 1, 2)).astype(jnp.float32))
    return feats


# ----------------------------------------------------------------------------- main
if __name__ == "__main__":
    key = jax.random.PRNGKey(0)
    k_params, k_x = jax.random.split(key)

    numC_input = 4
    num_layer = [2, 2, 2]
    stride = [2, 2, 2]

    params = init_custom_resnet_params(k_params, numC_input, num_layer, stride)
    x = jax.random.normal(k_x, (2, numC_input, 16, 16), jnp.float32)  # NCHW

    fwd = jax.jit(lambda inp: custom_resnet_forward(inp, params))
    feats = fwd(x)
    for f in feats:
        jax.block_until_ready(f)

    expected = [(2, 8, 8, 8), (2, 16, 4, 4), (2, 32, 2, 2)]
    assert [tuple(f.shape) for f in feats] == expected, \
        [tuple(f.shape) for f in feats]
    assert all(f.dtype == jnp.float32 for f in feats)
    assert all(bool(jnp.all(jnp.isfinite(f))) for f in feats)
    print("KERNEL_OK")
</pallas_src>

<mosaic_0001>
module attributes {stable_mosaic.version = 11 : i64} {
  func.func @_basic_block_kernel(%arg0: i32, %arg1: memref<1x92x4xbf16, #tpu.memory_space<vmem>>, %arg2: memref<1x92x4xbf16, #tpu.memory_space<vmem>>, %arg3: memref<1x92x4xbf16, #tpu.memory_space<vmem>>, %arg4: memref<1x92x4xbf16, #tpu.memory_space<vmem>>, %arg5: memref<80x1xf32, #tpu.memory_space<vmem>>, %arg6: memref<9x4x8xbf16, #tpu.memory_space<vmem>>, %arg7: memref<1x8xf32, #tpu.memory_space<vmem>>, %arg8: memref<9x8x8xbf16, #tpu.memory_space<vmem>>, %arg9: memref<1x8xf32, #tpu.memory_space<vmem>>, %arg10: memref<9x4x8xbf16, #tpu.memory_space<vmem>>, %arg11: memref<1x80x8xbf16, #tpu.memory_space<vmem>>, %arg12: memref<102x8xf32, #tpu.memory_space<vmem>>) attributes {dimension_semantics = [#tpu.dimension_semantics<parallel>], iteration_bounds = array<i64: 2>, scalar_prefetch = 0 : i64, scratch_operands = 1 : i64, tpu.core_type = #tpu.core_type<tc>, window_params = [{transform_indices = @transform_0, window_bounds = array<i64: 1, 92, 4>}, {transform_indices = @transform_1, window_bounds = array<i64: 1, 92, 4>}, {transform_indices = @transform_2, window_bounds = array<i64: 1, 92, 4>}, {transform_indices = @transform_3, window_bounds = array<i64: 1, 92, 4>}, {pipeline_mode = #tpu.pipeline_mode<synchronous>, transform_indices = @transform_4, window_bounds = array<i64: 80, 1>}, {pipeline_mode = #tpu.pipeline_mode<synchronous>, transform_indices = @transform_5, window_bounds = array<i64: 9, 4, 8>}, {pipeline_mode = #tpu.pipeline_mode<synchronous>, transform_indices = @transform_6, window_bounds = array<i64: 1, 8>}, {pipeline_mode = #tpu.pipeline_mode<synchronous>, transform_indices = @transform_7, window_bounds = array<i64: 9, 8, 8>}, {pipeline_mode = #tpu.pipeline_mode<synchronous>, transform_indices = @transform_8, window_bounds = array<i64: 1, 8>}, {pipeline_mode = #tpu.pipeline_mode<synchronous>, transform_indices = @transform_9, window_bounds = array<i64: 9, 4, 8>}, {transform_indices = @transform_10, window_bounds = array<i64: 1, 80, 8>}]} {
    %c0 = arith.constant 0 : index
    %c0_0 = arith.constant 0 : index
    %0 = vector.load %arg5[%c0, %c0_0] : memref<80x1xf32, #tpu.memory_space<vmem>>, vector<80x1xf32>
    %cst = arith.constant 0.000000e+00 : f32
    %1 = vector.broadcast %cst : f32 to vector<80x8xf32>
    %cst_1 = arith.constant 0.000000e+00 : f32
    %2 = vector.broadcast %cst_1 : f32 to vector<80x8xf32>
    %c0_2 = arith.constant 0 : index
    %c0_3 = arith.constant 0 : index
    %c0_4 = arith.constant 0 : index
    %3 = vector.load %arg1[%c0_2, %c0_3, %c0_4] : memref<1x92x4xbf16, #tpu.memory_space<vmem>>, vector<1x80x4xbf16>
    %4 = vector.shape_cast %3 : vector<1x80x4xbf16> to vector<80x4xbf16>
    %c0_5 = arith.constant 0 : index
    %c0_6 = arith.constant 0 : index
    %c0_7 = arith.constant 0 : index
    %5 = vector.load %arg6[%c0_5, %c0_6, %c0_7] : memref<9x4x8xbf16, #tpu.memory_space<vmem>>, vector<1x4x8xbf16>
    %6 = vector.shape_cast %5 : vector<1x4x8xbf16> to vector<4x8xbf16>
    %cst_8 = arith.constant dense<0.000000e+00> : vector<80x8xf32>
    %7 = tpu.matmul %4, %6, %cst_8 {dimension_numbers = #tpu.dot_dimension_numbers<[1], [0], [0], [1], [0, 0, 1, 1], [], []>} : vector<80x4xbf16>, vector<4x8xbf16>, vector<80x8xf32> -> vector<80x8xf32>
    %8 = arith.addf %1, %7 : vector<80x8xf32>
    %c0_9 = arith.constant 0 : index
    %c0_10 = arith.constant 0 : index
    %c0_11 = arith.constant 0 : index
    %9 = vector.load %arg10[%c0_9, %c0_10, %c0_11] : memref<9x4x8xbf16, #tpu.memory_space<vmem>>, vector<1x4x8xbf16>
    %10 = vector.shape_cast %9 : vector<1x4x8xbf16> to vector<4x8xbf16>
    %cst_12 = arith.constant dense<0.000000e+00> : vector<80x8xf32>
    %11 = tpu.matmul %4, %10, %cst_12 {dimension_numbers = #tpu.dot_dimension_numbers<[1], [0], [0], [1], [0, 0, 1, 1], [], []>} : vector<80x4xbf16>, vector<4x8xbf16>, vector<80x8xf32> -> vector<80x8xf32>
    %12 = arith.addf %2, %11 : vector<80x8xf32>
    %c0_13 = arith.constant 0 : index
    %c0_14 = arith.constant 0 : index
    %c0_15 = arith.constant 0 : index
    %13 = vector.load %arg2[%c0_13, %c0_14, %c0_15] : memref<1x92x4xbf16, #tpu.memory_space<vmem>>, vector<1x80x4xbf16>
    %14 = vector.shape_cast %13 : vector<1x80x4xbf16> to vector<80x4xbf16>
    %c1 = arith.constant 1 : index
    %c0_16 = arith.constant 0 : index
    %c0_17 = arith.constant 0 : index
    %15 = vector.load %arg6[%c1, %c0_16, %c0_17] : memref<9x4x8xbf16, #tpu.memory_space<vmem>>, vector<1x4x8xbf16>
    %16 = vector.shape_cast %15 : vector<1x4x8xbf16> to vector<4x8xbf16>
    %cst_18 = arith.constant dense<0.000000e+00> : vector<80x8xf32>
    %17 = tpu.matmul %14, %16, %cst_18 {dimension_numbers = #tpu.dot_dimension_numbers<[1], [0], [0], [1], [0, 0, 1, 1], [], []>} : vector<80x4xbf16>, vector<4x8xbf16>, vector<80x8xf32> -> vector<80x8xf32>
    %18 = arith.addf %8, %17 : vector<80x8xf32>
    %c1_19 = arith.constant 1 : index
    %c0_20 = arith.constant 0 : index
    %c0_21 = arith.constant 0 : index
    %19 = vector.load %arg10[%c1_19, %c0_20, %c0_21] : memref<9x4x8xbf16, #tpu.memory_space<vmem>>, vector<1x4x8xbf16>
    %20 = vector.shape_cast %19 : vector<1x4x8xbf16> to vector<4x8xbf16>
    %cst_22 = arith.constant dense<0.000000e+00> : vector<80x8xf32>
    %21 = tpu.matmul %14, %20, %cst_22 {dimension_numbers = #tpu.dot_dimension_numbers<[1], [0], [0], [1], [0, 0, 1, 1], [], []>} : vector<80x4xbf16>, vector<4x8xbf16>, vector<80x8xf32> -> vector<80x8xf32>
    %22 = arith.addf %12, %21 : vector<80x8xf32>
    %c0_23 = arith.constant 0 : index
    %c1_24 = arith.constant 1 : index
    %c0_25 = arith.constant 0 : index
    %23 = vector.load %arg1[%c0_23, %c1_24, %c0_25] : memref<1x92x4xbf16, #tpu.memory_space<vmem>>, vector<1x80x4xbf16>
    %24 = vector.shape_cast %23 : vector<1x80x4xbf16> to vector<80x4xbf16>
    %c2 = arith.constant 2 : index
    %c0_26 = arith.constant 0 : index
    %c0_27 = arith.constant 0 : index
    %25 = vector.load %arg6[%c2, %c0_26, %c0_27] : memref<9x4x8xbf16, #tpu.memory_space<vmem>>, vector<1x4x8xbf16>
    %26 = vector.shape_cast %25 : vector<1x4x8xbf16> to vector<4x8xbf16>
    %cst_28 = arith.constant dense<0.000000e+00> : vector<80x8xf32>
    %27 = tpu.matmul %24, %26, %cst_28 {dimension_numbers = #tpu.dot_dimension_numbers<[1], [0], [0], [1], [0, 0, 1, 1], [], []>} : vector<80x4xbf16>, vector<4x8xbf16>, vector<80x8xf32> -> vector<80x8xf32>
    %28 = arith.addf %18, %27 : vector<80x8xf32>
    %c2_29 = arith.constant 2 : index
    %c0_30 = arith.constant 0 : index
    %c0_31 = arith.constant 0 : index
    %29 = vector.load %arg10[%c2_29, %c0_30, %c0_31] : memref<9x4x8xbf16, #tpu.memory_space<vmem>>, vector<1x4x8xbf16>
    %30 = vector.shape_cast %29 : vector<1x4x8xbf16> to vector<4x8xbf16>
    %cst_32 = arith.constant dense<0.000000e+00> : vector<80x8xf32>
    %31 = tpu.matmul %24, %30, %cst_32 {dimension_numbers = #tpu.dot_dimension_numbers<[1], [0], [0], [1], [0, 0, 1, 1], [], []>} : vector<80x4xbf16>, vector<4x8xbf16>, vector<80x8xf32> -> vector<80x8xf32>
    %32 = arith.addf %22, %31 : vector<80x8xf32>
    %c0_33 = arith.constant 0 : index
    %c0_34 = arith.constant 0 : index
    %c0_35 = arith.constant 0 : index
    %33 = vector.load %arg3[%c0_33, %c0_34, %c0_35] : memref<1x92x4xbf16, #tpu.memory_space<vmem>>, vector<1x80x4xbf16>
    %34 = vector.shape_cast %33 : vector<1x80x4xbf16> to vector<80x4xbf16>
    %c3 = arith.constant 3 : index
    %c0_36 = arith.constant 0 : index
    %c0_37 = arith.constant 0 : index
    %35 = vector.load %arg6[%c3, %c0_36, %c0_37] : memref<9x4x8xbf16, #tpu.memory_space<vmem>>, vector<1x4x8xbf16>
    %36 = vector.shape_cast %35 : vector<1x4x8xbf16> to vector<4x8xbf16>
    %cst_38 = arith.constant dense<0.000000e+00> : vector<80x8xf32>
    %37 = tpu.matmul %34, %36, %cst_38 {dimension_numbers = #tpu.dot_dimension_numbers<[1], [0], [0], [1], [0, 0, 1, 1], [], []>} : vector<80x4xbf16>, vector<4x8xbf16>, vector<80x8xf32> -> vector<80x8xf32>
    %38 = arith.addf %28, %37 : vector<80x8xf32>
    %c3_39 = arith.constant 3 : index
    %c0_40 = arith.constant 0 : index
    %c0_41 = arith.constant 0 : index
    %39 = vector.load %arg10[%c3_39, %c0_40, %c0_41] : memref<9x4x8xbf16, #tpu.memory_space<vmem>>, vector<1x4x8xbf16>
    %40 = vector.shape_cast %39 : vector<1x4x8xbf16> to vector<4x8xbf16>
    %cst_42 = arith.constant dense<0.000000e+00> : vector<80x8xf32>
    %41 = tpu.matmul %34, %40, %cst_42 {dimension_numbers = #tpu.dot_dimension_numbers<[1], [0], [0], [1], [0, 0, 1, 1], [], []>} : vector<80x4xbf16>, vector<4x8xbf16>, vector<80x8xf32> -> vector<80x8xf32>
    %42 = arith.addf %32, %41 : vector<80x8xf32>
    %c0_43 = arith.constant 0 : index
    %c0_44 = arith.constant 0 : index
    %c0_45 = arith.constant 0 : index
    %43 = vector.load %arg4[%c0_43, %c0_44, %c0_45] : memref<1x92x4xbf16, #tpu.memory_space<vmem>>, vector<1x80x4xbf16>
    %44 = vector.shape_cast %43 : vector<1x80x4xbf16> to vector<80x4xbf16>
    %c4 = arith.constant 4 : index
    %c0_46 = arith.constant 0 : index
    %c0_47 = arith.constant 0 : index
    %45 = vector.load %arg6[%c4, %c0_46, %c0_47] : memref<9x4x8xbf16, #tpu.memory_space<vmem>>, vector<1x4x8xbf16>
    %46 = vector.shape_cast %45 : vector<1x4x8xbf16> to vector<4x8xbf16>
    %cst_48 = arith.constant dense<0.000000e+00> : vector<80x8xf32>
    %47 = tpu.matmul %44, %46, %cst_48 {dimension_numbers = #tpu.dot_dimension_numbers<[1], [0], [0], [1], [0, 0, 1, 1], [], []>} : vector<80x4xbf16>, vector<4x8xbf16>, vector<80x8xf32> -> vector<80x8xf32>
    %48 = arith.addf %38, %47 : vector<80x8xf32>
    %c4_49 = arith.constant 4 : index
    %c0_50 = arith.constant 0 : index
    %c0_51 = arith.constant 0 : index
    %49 = vector.load %arg10[%c4_49, %c0_50, %c0_51] : memref<9x4x8xbf16, #tpu.memory_space<vmem>>, vector<1x4x8xbf16>
    %50 = vector.shape_cast %49 : vector<1x4x8xbf16> to vector<4x8xbf16>
    %cst_52 = arith.constant dense<0.000000e+00> : vector<80x8xf32>
    %51 = tpu.matmul %44, %50, %cst_52 {dimension_numbers = #tpu.dot_dimension_numbers<[1], [0], [0], [1], [0, 0, 1, 1], [], []>} : vector<80x4xbf16>, vector<4x8xbf16>, vector<80x8xf32> -> vector<80x8xf32>
    %52 = arith.addf %42, %51 : vector<80x8xf32>
    %c0_53 = arith.constant 0 : index
    %c1_54 = arith.constant 1 : index
    %c0_55 = arith.constant 0 : index
    %53 = vector.load %arg3[%c0_53, %c1_54, %c0_55] : memref<1x92x4xbf16, #tpu.memory_space<vmem>>, vector<1x80x4xbf16>
    %54 = vector.shape_cast %53 : vector<1x80x4xbf16> to vector<80x4xbf16>
    %c5 = arith.constant 5 : index
    %c0_56 = arith.constant 0 : index
    %c0_57 = arith.constant 0 : index
    %55 = vector.load %arg6[%c5, %c0_56, %c0_57] : memref<9x4x8xbf16, #tpu.memory_space<vmem>>, vector<1x4x8xbf16>
    %56 = vector.shape_cast %55 : vector<1x4x8xbf16> to vector<4x8xbf16>
    %cst_58 = arith.constant dense<0.000000e+00> : vector<80x8xf32>
    %57 = tpu.matmul %54, %56, %cst_58 {dimension_numbers = #tpu.dot_dimension_numbers<[1], [0], [0], [1], [0, 0, 1, 1], [], []>} : vector<80x4xbf16>, vector<4x8xbf16>, vector<80x8xf32> -> vector<80x8xf32>
    %58 = arith.addf %48, %57 : vector<80x8xf32>
    %c5_59 = arith.constant 5 : index
    %c0_60 = arith.constant 0 : index
    %c0_61 = arith.constant 0 : index
    %59 = vector.load %arg10[%c5_59, %c0_60, %c0_61] : memref<9x4x8xbf16, #tpu.memory_space<vmem>>, vector<1x4x8xbf16>
    %60 = vector.shape_cast %59 : vector<1x4x8xbf16> to vector<4x8xbf16>
    %cst_62 = arith.constant dense<0.000000e+00> : vector<80x8xf32>
    %61 = tpu.matmul %54, %60, %cst_62 {dimension_numbers = #tpu.dot_dimension_numbers<[1], [0], [0], [1], [0, 0, 1, 1], [], []>} : vector<80x4xbf16>, vector<4x8xbf16>, vector<80x8xf32> -> vector<80x8xf32>
    %62 = arith.addf %52, %61 : vector<80x8xf32>
    %c0_63 = arith.constant 0 : index
    %c10 = arith.constant 10 : index
    %c0_64 = arith.constant 0 : index
    %63 = vector.load %arg1[%c0_63, %c10, %c0_64] : memref<1x92x4xbf16, #tpu.memory_space<vmem>>, vector<1x80x4xbf16>
    %64 = vector.shape_cast %63 : vector<1x80x4xbf16> to vector<80x4xbf16>
    %c6 = arith.constant 6 : index
    %c0_65 = arith.constant 0 : index
    %c0_66 = arith.constant 0 : index
    %65 = vector.load %arg6[%c6, %c0_65, %c0_66] : memref<9x4x8xbf16, #tpu.memory_space<vmem>>, vector<1x4x8xbf16>
    %66 = vector.shape_cast %65 : vector<1x4x8xbf16> to vector<4x8xbf16>
    %cst_67 = arith.constant dense<0.000000e+00> : vector<80x8xf32>
    %67 = tpu.matmul %64, %66, %cst_67 {dimension_numbers = #tpu.dot_dimension_numbers<[1], [0], [0], [1], [0, 0, 1, 1], [], []>} : vector<80x4xbf16>, vector<4x8xbf16>, vector<80x8xf32> -> vector<80x8xf32>
    %68 = arith.addf %58, %67 : vector<80x8xf32>
    %c6_68 = arith.constant 6 : index
    %c0_69 = arith.constant 0 : index
    %c0_70 = arith.constant 0 : index
    %69 = vector.load %arg10[%c6_68, %c0_69, %c0_70] : memref<9x4x8xbf16, #tpu.memory_space<vmem>>, vector<1x4x8xbf16>
    %70 = vector.shape_cast %69 : vector<1x4x8xbf16> to vector<4x8xbf16>
    %cst_71 = arith.constant dense<0.000000e+00> : vector<80x8xf32>
    %71 = tpu.matmul %64, %70, %cst_71 {dimension_numbers = #tpu.dot_dimension_numbers<[1], [0], [0], [1], [0, 0, 1, 1], [], []>} : vector<80x4xbf16>, vector<4x8xbf16>, vector<80x8xf32> -> vector<80x8xf32>
    %72 = arith.addf %62, %71 : vector<80x8xf32>
    %c0_72 = arith.constant 0 : index
    %c10_73 = arith.constant 10 : index
    %c0_74 = arith.constant 0 : index
    %73 = vector.load %arg2[%c0_72, %c10_73, %c0_74] : memref<1x92x4xbf16, #tpu.memory_space<vmem>>, vector<1x80x4xbf16>
    %74 = vector.shape_cast %73 : vector<1x80x4xbf16> to vector<80x4xbf16>
    %c7 = arith.constant 7 : index
    %c0_75 = arith.constant 0 : index
    %c0_76 = arith.constant 0 : index
    %75 = vector.load %arg6[%c7, %c0_75, %c0_76] : memref<9x4x8xbf16, #tpu.memory_space<vmem>>, vector<1x4x8xbf16>
    %76 = vector.shape_cast %75 : vector<1x4x8xbf16> to vector<4x8xbf16>
    %cst_77 = arith.constant dense<0.000000e+00> : vector<80x8xf32>
    %77 = tpu.matmul %74, %76, %cst_77 {dimension_numbers = #tpu.dot_dimension_numbers<[1], [0], [0], [1], [0, 0, 1, 1], [], []>} : vector<80x4xbf16>, vector<4x8xbf16>, vector<80x8xf32> -> vector<80x8xf32>
    %78 = arith.addf %68, %77 : vector<80x8xf32>
    %c7_78 = arith.constant 7 : index
    %c0_79 = arith.constant 0 : index
    %c0_80 = arith.constant 0 : index
    %79 = vector.load %arg10[%c7_78, %c0_79, %c0_80] : memref<9x4x8xbf16, #tpu.memory_space<vmem>>, vector<1x4x8xbf16>
    %80 = vector.shape_cast %79 : vector<1x4x8xbf16> to vector<4x8xbf16>
    %cst_81 = arith.constant dense<0.000000e+00> : vector<80x8xf32>
    %81 = tpu.matmul %74, %80, %cst_81 {dimension_numbers = #tpu.dot_dimension_numbers<[1], [0], [0], [1], [0, 0, 1, 1], [], []>} : vector<80x4xbf16>, vector<4x8xbf16>, vector<80x8xf32> -> vector<80x8xf32>
    %82 = arith.addf %72, %81 : vector<80x8xf32>
    %c0_82 = arith.constant 0 : index
    %c11 = arith.constant 11 : index
    %c0_83 = arith.constant 0 : index
    %83 = vector.load %arg1[%c0_82, %c11, %c0_83] : memref<1x92x4xbf16, #tpu.memory_space<vmem>>, vector<1x80x4xbf16>
    %84 = vector.shape_cast %83 : vector<1x80x4xbf16> to vector<80x4xbf16>
    %c8 = arith.constant 8 : index
    %c0_84 = arith.constant 0 : index
    %c0_85 = arith.constant 0 : index
    %85 = vector.load %arg6[%c8, %c0_84, %c0_85] : memref<9x4x8xbf16, #tpu.memory_space<vmem>>, vector<1x4x8xbf16>
    %86 = vector.shape_cast %85 : vector<1x4x8xbf16> to vector<4x8xbf16>
    %cst_86 = arith.constant dense<0.000000e+00> : vector<80x8xf32>
    %87 = tpu.matmul %84, %86, %cst_86 {dimension_numbers = #tpu.dot_dimension_numbers<[1], [0], [0], [1], [0, 0, 1, 1], [], []>} : vector<80x4xbf16>, vector<4x8xbf16>, vector<80x8xf32> -> vector<80x8xf32>
    %88 = arith.addf %78, %87 : vector<80x8xf32>
    %c8_87 = arith.constant 8 : index
    %c0_88 = arith.constant 0 : index
    %c0_89 = arith.constant 0 : index
    %89 = vector.load %arg10[%c8_87, %c0_88, %c0_89] : memref<9x4x8xbf16, #tpu.memory_space<vmem>>, vector<1x4x8xbf16>
    %90 = vector.shape_cast %89 : vector<1x4x8xbf16> to vector<4x8xbf16>
    %cst_90 = arith.constant dense<0.000000e+00> : vector<80x8xf32>
    %91 = tpu.matmul %84, %90, %cst_90 {dimension_numbers = #tpu.dot_dimension_numbers<[1], [0], [0], [1], [0, 0, 1, 1], [], []>} : vector<80x4xbf16>, vector<4x8xbf16>, vector<80x8xf32> -> vector<80x8xf32>
    %92 = arith.addf %82, %91 : vector<80x8xf32>
    %c0_91 = arith.constant 0 : index
    %c0_92 = arith.constant 0 : index
    %93 = vector.load %arg7[%c0_91, %c0_92] : memref<1x8xf32, #tpu.memory_space<vmem>>, vector<1x8xf32>
    %94 = vector.broadcast %93 : vector<1x8xf32> to vector<80x8xf32>
    %95 = arith.addf %88, %94 : vector<80x8xf32>
    %cst_93 = arith.constant 0.000000e+00 : f32
    %96 = vector.broadcast %cst_93 : f32 to vector<80x8xf32>
    %97 = arith.maximumf %95, %96 : vector<80x8xf32>
    %98 = vector.broadcast %0 : vector<80x1xf32> to vector<80x8xf32>
    %99 = arith.mulf %97, %98 : vector<80x8xf32>
    %cst_94 = arith.constant 0.000000e+00 : f32
    %100 = vector.broadcast %cst_94 : f32 to vector<11x8xf32>
    %c0_95 = arith.constant 0 : index
    %c0_96 = arith.constant 0 : index
    %101 = vector.load %arg12[%c0_95, %c0_96] : memref<102x8xf32, #tpu.memory_space<vmem>>, vector<11x8xf32>
    tpu.vector_store %arg12[%c0_95, %c0_96], %100 {strides = array<i32>} : memref<102x8xf32, #tpu.memory_space<vmem>>, vector<11x8xf32>,
    %c91 = arith.constant 91 : index
    %c0_97 = arith.constant 0 : index
    %102 = vector.load %arg12[%c91, %c0_97] : memref<102x8xf32, #tpu.memory_space<vmem>>, vector<11x8xf32>
    tpu.vector_store %arg12[%c91, %c0_97], %100 {strides = array<i32>} : memref<102x8xf32, #tpu.memory_space<vmem>>, vector<11x8xf32>,
    %c11_98 = arith.constant 11 : index
    %c0_99 = arith.constant 0 : index
    %103 = vector.load %arg12[%c11_98, %c0_99] : memref<102x8xf32, #tpu.memory_space<vmem>>, vector<80x8xf32>
    tpu.vector_store %arg12[%c11_98, %c0_99], %99 {strides = array<i32>} : memref<102x8xf32, #tpu.memory_space<vmem>>, vector<80x8xf32>,
    %cst_100 = arith.constant 0.000000e+00 : f32
    %104 = vector.broadcast %cst_100 : f32 to vector<80x8xf32>
    %c0_101 = arith.constant 0 : index
    %c0_102 = arith.constant 0 : index
    %105 = vector.load %arg12[%c0_101, %c0_102] : memref<102x8xf32, #tpu.memory_space<vmem>>, vector<80x8xf32>
    %106 = arith.truncf %105 : vector<80x8xf32> to vector<80x8xbf16>
    %c0_103 = arith.constant 0 : index
    %c0_104 = arith.constant 0 : index
    %c0_105 = arith.constant 0 : index
    %107 = vector.load %arg8[%c0_103, %c0_104, %c0_105] : memref<9x8x8xbf16, #tpu.memory_space<vmem>>, vector<1x8x8xbf16>
    %108 = vector.shape_cast %107 : vector<1x8x8xbf16> to vector<8x8xbf16>
    %cst_106 = arith.constant dense<0.000000e+00> : vector<80x8xf32>
    %109 = tpu.matmul %106, %108, %cst_106 {dimension_numbers = #tpu.dot_dimension_numbers<[1], [0], [0], [1], [0, 0, 1, 1], [], []>} : vector<80x8xbf16>, vector<8x8xbf16>, vector<80x8xf32> -> vector<80x8xf32>
    %110 = arith.addf %104, %109 : vector<80x8xf32>
    %c1_107 = arith.constant 1 : index
    %c0_108 = arith.constant 0 : index
    %111 = vector.load %arg12[%c1_107, %c0_108] : memref<102x8xf32, #tpu.memory_space<vmem>>, vector<80x8xf32>
    %112 = arith.truncf %111 : vector<80x8xf32> to vector<80x8xbf16>
    %c1_109 = arith.constant 1 : index
    %c0_110 = arith.constant 0 : index
    %c0_111 = arith.constant 0 : index
    %113 = vector.load %arg8[%c1_109, %c0_110, %c0_111] : memref<9x8x8xbf16, #tpu.memory_space<vmem>>, vector<1x8x8xbf16>
    %114 = vector.shape_cast %113 : vector<1x8x8xbf16> to vector<8x8xbf16>
    %cst_112 = arith.constant dense<0.000000e+00> : vector<80x8xf32>
    %115 = tpu.matmul %112, %114, %cst_112 {dimension_numbers = #tpu.dot_dimension_numbers<[1], [0], [0], [1], [0, 0, 1, 1], [], []>} : vector<80x8xbf16>, vector<8x8xbf16>, vector<80x8xf32> -> vector<80x8xf32>
    %116 = arith.addf %110, %115 : vector<80x8xf32>
    %c2_113 = arith.constant 2 : index
    %c0_114 = arith.constant 0 : index
    %117 = vector.load %arg12[%c2_113, %c0_114] : memref<102x8xf32, #tpu.memory_space<vmem>>, vector<80x8xf32>
    %118 = arith.truncf %117 : vector<80x8xf32> to vector<80x8xbf16>
    %c2_115 = arith.constant 2 : index
    %c0_116 = arith.constant 0 : index
    %c0_117 = arith.constant 0 : index
    %119 = vector.load %arg8[%c2_115, %c0_116, %c0_117] : memref<9x8x8xbf16, #tpu.memory_space<vmem>>, vector<1x8x8xbf16>
    %120 = vector.shape_cast %119 : vector<1x8x8xbf16> to vector<8x8xbf16>
    %cst_118 = arith.constant dense<0.000000e+00> : vector<80x8xf32>
    %121 = tpu.matmul %118, %120, %cst_118 {dimension_numbers = #tpu.dot_dimension_numbers<[1], [0], [0], [1], [0, 0, 1, 1], [], []>} : vector<80x8xbf16>, vector<8x8xbf16>, vector<80x8xf32> -> vector<80x8xf32>
    %122 = arith.addf %116, %121 : vector<80x8xf32>
    %c10_119 = arith.constant 10 : index
    %c0_120 = arith.constant 0 : index
    %123 = vector.load %arg12[%c10_119, %c0_120] : memref<102x8xf32, #tpu.memory_space<vmem>>, vector<80x8xf32>
    %124 = arith.truncf %123 : vector<80x8xf32> to vector<80x8xbf16>
    %c3_121 = arith.constant 3 : index
    %c0_122 = arith.constant 0 : index
    %c0_123 = arith.constant 0 : index
    %125 = vector.load %arg8[%c3_121, %c0_122, %c0_123] : memref<9x8x8xbf16, #tpu.memory_space<vmem>>, vector<1x8x8xbf16>
    %126 = vector.shape_cast %125 : vector<1x8x8xbf16> to vector<8x8xbf16>
    %cst_124 = arith.constant dense<0.000000e+00> : vector<80x8xf32>
    %127 = tpu.matmul %124, %126, %cst_124 {dimension_numbers = #tpu.dot_dimension_numbers<[1], [0], [0], [1], [0, 0, 1, 1], [], []>} : vector<80x8xbf16>, vector<8x8xbf16>, vector<80x8xf32> -> vector<80x8xf32>
    %128 = arith.addf %122, %127 : vector<80x8xf32>
    %c11_125 = arith.constant 11 : index
    %c0_126 = arith.constant 0 : index
    %129 = vector.load %arg12[%c11_125, %c0_126] : memref<102x8xf32, #tpu.memory_space<vmem>>, vector<80x8xf32>
    %130 = arith.truncf %129 : vector<80x8xf32> to vector<80x8xbf16>
    %c4_127 = arith.constant 4 : index
    %c0_128 = arith.constant 0 : index
    %c0_129 = arith.constant 0 : index
    %131 = vector.load %arg8[%c4_127, %c0_128, %c0_129] : memref<9x8x8xbf16, #tpu.memory_space<vmem>>, vector<1x8x8xbf16>
    %132 = vector.shape_cast %131 : vector<1x8x8xbf16> to vector<8x8xbf16>
    %cst_130 = arith.constant dense<0.000000e+00> : vector<80x8xf32>
    %133 = tpu.matmul %130, %132, %cst_130 {dimension_numbers = #tpu.dot_dimension_numbers<[1], [0], [0], [1], [0, 0, 1, 1], [], []>} : vector<80x8xbf16>, vector<8x8xbf16>, vector<80x8xf32> -> vector<80x8xf32>
    %134 = arith.addf %128, %133 : vector<80x8xf32>
    %c12 = arith.constant 12 : index
    %c0_131 = arith.constant 0 : index
    %135 = vector.load %arg12[%c12, %c0_131] : memref<102x8xf32, #tpu.memory_space<vmem>>, vector<80x8xf32>
    %136 = arith.truncf %135 : vector<80x8xf32> to vector<80x8xbf16>
    %c5_132 = arith.constant 5 : index
    %c0_133 = arith.constant 0 : index
    %c0_134 = arith.constant 0 : index
    %137 = vector.load %arg8[%c5_132, %c0_133, %c0_134] : memref<9x8x8xbf16, #tpu.memory_space<vmem>>, vector<1x8x8xbf16>
    %138 = vector.shape_cast %137 : vector<1x8x8xbf16> to vector<8x8xbf16>
    %cst_135 = arith.constant dense<0.000000e+00> : vector<80x8xf32>
    %139 = tpu.matmul %136, %138, %cst_135 {dimension_numbers = #tpu.dot_dimension_numbers<[1], [0], [0], [1], [0, 0, 1, 1], [], []>} : vector<80x8xbf16>, vector<8x8xbf16>, vector<80x8xf32> -> vector<80x8xf32>
    %140 = arith.addf %134, %139 : vector<80x8xf32>
    %c20 = arith.constant 20 : index
    %c0_136 = arith.constant 0 : index
    %141 = vector.load %arg12[%c20, %c0_136] : memref<102x8xf32, #tpu.memory_space<vmem>>, vector<80x8xf32>
    %142 = arith.truncf %141 : vector<80x8xf32> to vector<80x8xbf16>
    %c6_137 = arith.constant 6 : index
    %c0_138 = arith.constant 0 : index
    %c0_139 = arith.constant 0 : index
    %143 = vector.load %arg8[%c6_137, %c0_138, %c0_139] : memref<9x8x8xbf16, #tpu.memory_space<vmem>>, vector<1x8x8xbf16>
    %144 = vector.shape_cast %143 : vector<1x8x8xbf16> to vector<8x8xbf16>
    %cst_140 = arith.constant dense<0.000000e+00> : vector<80x8xf32>
    %145 = tpu.matmul %142, %144, %cst_140 {dimension_numbers = #tpu.dot_dimension_numbers<[1], [0], [0], [1], [0, 0, 1, 1], [], []>} : vector<80x8xbf16>, vector<8x8xbf16>, vector<80x8xf32> -> vector<80x8xf32>
    %146 = arith.addf %140, %145 : vector<80x8xf32>
    %c21 = arith.constant 21 : index
    %c0_141 = arith.constant 0 : index
    %147 = vector.load %arg12[%c21, %c0_141] : memref<102x8xf32, #tpu.memory_space<vmem>>, vector<80x8xf32>
    %148 = arith.truncf %147 : vector<80x8xf32> to vector<80x8xbf16>
    %c7_142 = arith.constant 7 : index
    %c0_143 = arith.constant 0 : index
    %c0_144 = arith.constant 0 : index
    %149 = vector.load %arg8[%c7_142, %c0_143, %c0_144] : memref<9x8x8xbf16, #tpu.memory_space<vmem>>, vector<1x8x8xbf16>
    %150 = vector.shape_cast %149 : vector<1x8x8xbf16> to vector<8x8xbf16>
    %cst_145 = arith.constant dense<0.000000e+00> : vector<80x8xf32>
    %151 = tpu.matmul %148, %150, %cst_145 {dimension_numbers = #tpu.dot_dimension_numbers<[1], [0], [0], [1], [0, 0, 1, 1], [], []>} : vector<80x8xbf16>, vector<8x8xbf16>, vector<80x8xf32> -> vector<80x8xf32>
    %152 = arith.addf %146, %151 : vector<80x8xf32>
    %c22 = arith.constant 22 : index
    %c0_146 = arith.constant 0 : index
    %153 = vector.load %arg12[%c22, %c0_146] : memref<102x8xf32, #tpu.memory_space<vmem>>, vector<80x8xf32>
    %154 = arith.truncf %153 : vector<80x8xf32> to vector<80x8xbf16>
    %c8_147 = arith.constant 8 : index
    %c0_148 = arith.constant 0 : index
    %c0_149 = arith.constant 0 : index
    %155 = vector.load %arg8[%c8_147, %c0_148, %c0_149] : memref<9x8x8xbf16, #tpu.memory_space<vmem>>, vector<1x8x8xbf16>
    %156 = vector.shape_cast %155 : vector<1x8x8xbf16> to vector<8x8xbf16>
    %cst_150 = arith.constant dense<0.000000e+00> : vector<80x8xf32>
    %157 = tpu.matmul %154, %156, %cst_150 {dimension_numbers = #tpu.dot_dimension_numbers<[1], [0], [0], [1], [0, 0, 1, 1], [], []>} : vector<80x8xbf16>, vector<8x8xbf16>, vector<80x8xf32> -> vector<80x8xf32>
    %158 = arith.addf %152, %157 : vector<80x8xf32>
    %c0_151 = arith.constant 0 : index
    %c0_152 = arith.constant 0 : index
    %159 = vector.load %arg9[%c0_151, %c0_152] : memref<1x8xf32, #tpu.memory_space<vmem>>, vector<1x8xf32>
    %160 = vector.broadcast %159 : vector<1x8xf32> to vector<80x8xf32>
    %161 = arith.addf %158, %160 : vector<80x8xf32>
    %162 = arith.addf %161, %92 : vector<80x8xf32>
    %cst_153 = arith.constant 0.000000e+00 : f32
    %163 = vector.broadcast %cst_153 : f32 to vector<80x8xf32>
    %164 = arith.maximumf %162, %163 : vector<80x8xf32>
    %165 = vector.broadcast %0 : vector<80x1xf32> to vector<80x8xf32>
    %166 = arith.mulf %164, %165 : vector<80x8xf32>
    %167 = arith.truncf %166 : vector<80x8xf32> to vector<80x8xbf16>
    %c0_154 = arith.constant 0 : index
    %c0_155 = arith.constant 0 : index
    %c0_156 = arith.constant 0 : index
    %168 = vector.load %arg11[%c0_154, %c0_155, %c0_156] : memref<1x80x8xbf16, #tpu.memory_space<vmem>>, vector<1x80x8xbf16>
    %169 = vector.shape_cast %168 : vector<1x80x8xbf16> to vector<80x8xbf16>
    %170 = vector.shape_cast %167 : vector<80x8xbf16> to vector<1x80x8xbf16>
    tpu.vector_store %arg11[%c0_154, %c0_155, %c0_156], %170 {strides = array<i32>} : memref<1x80x8xbf16, #tpu.memory_space<vmem>>, vector<1x80x8xbf16>,
    return
  }
  func.func @transform_0(%arg0: i32) -> (i32, i32, i32) {
    %c0_i32 = arith.constant 0 : i32
    %c0_i32_0 = arith.constant 0 : i32
    %c0_i32_1 = arith.constant 0 : i32
    return %arg0, %c0_i32, %c0_i32_0 : i32, i32, i32
  }
  func.func @transform_1(%arg0: i32) -> (i32, i32, i32) {
    %c0_i32 = arith.constant 0 : i32
    %c0_i32_0 = arith.constant 0 : i32
    %c0_i32_1 = arith.constant 0 : i32
    return %arg0, %c0_i32, %c0_i32_0 : i32, i32, i32
  }
  func.func @transform_2(%arg0: i32) -> (i32, i32, i32) {
    %c0_i32 = arith.constant 0 : i32
    %c0_i32_0 = arith.constant 0 : i32
    %c0_i32_1 = arith.constant 0 : i32
    return %arg0, %c0_i32, %c0_i32_0 : i32, i32, i32
  }
  func.func @transform_3(%arg0: i32) -> (i32, i32, i32) {
    %c0_i32 = arith.constant 0 : i32
    %c0_i32_0 = arith.constant 0 : i32
    %c0_i32_1 = arith.constant 0 : i32
    return %arg0, %c0_i32, %c0_i32_0 : i32, i32, i32
  }
  func.func @transform_4(%arg0: i32) -> (i32, i32) {
    %c0_i32 = arith.constant 0 : i32
    %c0_i32_0 = arith.constant 0 : i32
    %c0_i32_1 = arith.constant 0 : i32
    return %c0_i32, %c0_i32_0 : i32, i32
  }
  func.func @transform_5(%arg0: i32) -> (i32, i32, i32) {
    %c0_i32 = arith.constant 0 : i32
    %c0_i32_0 = arith.constant 0 : i32
    %c0_i32_1 = arith.constant 0 : i32
    %c0_i32_2 = arith.constant 0 : i32
    return %c0_i32, %c0_i32_0, %c0_i32_1 : i32, i32, i32
  }
  func.func @transform_6(%arg0: i32) -> (i32, i32) {
    %c0_i32 = arith.constant 0 : i32
    %c0_i32_0 = arith.constant 0 : i32
    %c0_i32_1 = arith.constant 0 : i32
    return %c0_i32, %c0_i32_0 : i32, i32
  }
  func.func @transform_7(%arg0: i32) -> (i32, i32, i32) {
    %c0_i32 = arith.constant 0 : i32
    %c0_i32_0 = arith.constant 0 : i32
    %c0_i32_1 = arith.constant 0 : i32
    %c0_i32_2 = arith.constant 0 : i32
    return %c0_i32, %c0_i32_0, %c0_i32_1 : i32, i32, i32
  }
  func.func @transform_8(%arg0: i32) -> (i32, i32) {
    %c0_i32 = arith.constant 0 : i32
    %c0_i32_0 = arith.constant 0 : i32
    %c0_i32_1 = arith.constant 0 : i32
    return %c0_i32, %c0_i32_0 : i32, i32
  }
  func.func @transform_9(%arg0: i32) -> (i32, i32, i32) {
    %c0_i32 = arith.constant 0 : i32
    %c0_i32_0 = arith.constant 0 : i32
    %c0_i32_1 = arith.constant 0 : i32
    %c0_i32_2 = arith.constant 0 : i32
    return %c0_i32, %c0_i32_0, %c0_i32_1 : i32, i32, i32
  }
  func.func @transform_10(%arg0: i32) -> (i32, i32, i32) {
    %c0_i32 = arith.constant 0 : i32
    %c0_i32_0 = arith.constant 0 : i32
    %c0_i32_1 = arith.constant 0 : i32
    return %arg0, %c0_i32, %c0_i32_0 : i32, i32, i32
  }
}

module attributes {stable_mosaic.version = 11 : i64} {
  func.func @_basic_block_kernel(%arg0: i32, %arg1: memref<1x102x8xbf16, #tpu.memory_space<vmem>>, %arg2: memref<80x1xf32, #tpu.memory_space<vmem>>, %arg3: memref<9x8x8xbf16, #tpu.memory_space<vmem>>, %arg4: memref<1x8xf32, #tpu.memory_space<vmem>>, %arg5: memref<9x8x8xbf16, #tpu.memory_space<vmem>>, %arg6: memref<1x8xf32, #tpu.memory_space<vmem>>, %arg7: memref<1x80x8xbf16, #tpu.memory_space<vmem>>, %arg8: memref<102x8xf32, #tpu.memory_space<vmem>>) attributes {dimension_semantics = [#tpu.dimension_semantics<parallel>], iteration_bounds = array<i64: 2>, scalar_prefetch = 0 : i64, scratch_operands = 1 : i64, tpu.core_type = #tpu.core_type<tc>, window_params = [{transform_indices = @transform_0, window_bounds = array<i64: 1, 102, 8>}, {pipeline_mode = #tpu.pipeline_mode<synchronous>, transform_indices = @transform_1, window_bounds = array<i64: 80, 1>}, {pipeline_mode = #tpu.pipeline_mode<synchronous>, transform_indices = @transform_2, window_bounds = array<i64: 9, 8, 8>}, {pipeline_mode = #tpu.pipeline_mode<synchronous>, transform_indices = @transform_3, window_bounds = array<i64: 1, 8>}, {pipeline_mode = #tpu.pipeline_mode<synchronous>, transform_indices = @transform_4, window_bounds = array<i64: 9, 8, 8>}, {pipeline_mode = #tpu.pipeline_mode<synchronous>, transform_indices = @transform_5, window_bounds = array<i64: 1, 8>}, {transform_indices = @transform_6, window_bounds = array<i64: 1, 80, 8>}]} {
    %c0 = arith.constant 0 : index
    %c0_0 = arith.constant 0 : index
    %0 = vector.load %arg2[%c0, %c0_0] : memref<80x1xf32, #tpu.memory_space<vmem>>, vector<80x1xf32>
    %cst = arith.constant 0.000000e+00 : f32
    %1 = vector.broadcast %cst : f32 to vector<80x8xf32>
    %c0_1 = arith.constant 0 : index
    %c0_2 = arith.constant 0 : index
    %c0_3 = arith.constant 0 : index
    %2 = vector.load %arg1[%c0_1, %c0_2, %c0_3] : memref<1x102x8xbf16, #tpu.memory_space<vmem>>, vector<1x80x8xbf16>
    %3 = vector.shape_cast %2 : vector<1x80x8xbf16> to vector<80x8xbf16>
    %c0_4 = arith.constant 0 : index
    %c0_5 = arith.constant 0 : index
    %c0_6 = arith.constant 0 : index
    %4 = vector.load %arg3[%c0_4, %c0_5, %c0_6] : memref<9x8x8xbf16, #tpu.memory_space<vmem>>, vector<1x8x8xbf16>
    %5 = vector.shape_cast %4 : vector<1x8x8xbf16> to vector<8x8xbf16>
    %cst_7 = arith.constant dense<0.000000e+00> : vector<80x8xf32>
    %6 = tpu.matmul %3, %5, %cst_7 {dimension_numbers = #tpu.dot_dimension_numbers<[1], [0], [0], [1], [0, 0, 1, 1], [], []>} : vector<80x8xbf16>, vector<8x8xbf16>, vector<80x8xf32> -> vector<80x8xf32>
    %7 = arith.addf %1, %6 : vector<80x8xf32>
    %c0_8 = arith.constant 0 : index
    %c1 = arith.constant 1 : index
    %c0_9 = arith.constant 0 : index
    %8 = vector.load %arg1[%c0_8, %c1, %c0_9] : memref<1x102x8xbf16, #tpu.memory_space<vmem>>, vector<1x80x8xbf16>
    %9 = vector.shape_cast %8 : vector<1x80x8xbf16> to vector<80x8xbf16>
    %c1_10 = arith.constant 1 : index
    %c0_11 = arith.constant 0 : index
    %c0_12 = arith.constant 0 : index
    %10 = vector.load %arg3[%c1_10, %c0_11, %c0_12] : memref<9x8x8xbf16, #tpu.memory_space<vmem>>, vector<1x8x8xbf16>
    %11 = vector.shape_cast %10 : vector<1x8x8xbf16> to vector<8x8xbf16>
    %cst_13 = arith.constant dense<0.000000e+00> : vector<80x8xf32>
    %12 = tpu.matmul %9, %11, %cst_13 {dimension_numbers = #tpu.dot_dimension_numbers<[1], [0], [0], [1], [0, 0, 1, 1], [], []>} : vector<80x8xbf16>, vector<8x8xbf16>, vector<80x8xf32> -> vector<80x8xf32>
    %13 = arith.addf %7, %12 : vector<80x8xf32>
    %c0_14 = arith.constant 0 : index
    %c2 = arith.constant 2 : index
    %c0_15 = arith.constant 0 : index
    %14 = vector.load %arg1[%c0_14, %c2, %c0_15] : memref<1x102x8xbf16, #tpu.memory_space<vmem>>, vector<1x80x8xbf16>
    %15 = vector.shape_cast %14 : vector<1x80x8xbf16> to vector<80x8xbf16>
    %c2_16 = arith.constant 2 : index
    %c0_17 = arith.constant 0 : index
    %c0_18 = arith.constant 0 : index
    %16 = vector.load %arg3[%c2_16, %c0_17, %c0_18] : memref<9x8x8xbf16, #tpu.memory_space<vmem>>, vector<1x8x8xbf16>
    %17 = vector.shape_cast %16 : vector<1x8x8xbf16> to vector<8x8xbf16>
    %cst_19 = arith.constant dense<0.000000e+00> : vector<80x8xf32>
    %18 = tpu.matmul %15, %17, %cst_19 {dimension_numbers = #tpu.dot_dimension_numbers<[1], [0], [0], [1], [0, 0, 1, 1], [], []>} : vector<80x8xbf16>, vector<8x8xbf16>, vector<80x8xf32> -> vector<80x8xf32>
    %19 = arith.addf %13, %18 : vector<80x8xf32>
    %c0_20 = arith.constant 0 : index
    %c10 = arith.constant 10 : index
    %c0_21 = arith.constant 0 : index
    %20 = vector.load %arg1[%c0_20, %c10, %c0_21] : memref<1x102x8xbf16, #tpu.memory_space<vmem>>, vector<1x80x8xbf16>
    %21 = vector.shape_cast %20 : vector<1x80x8xbf16> to vector<80x8xbf16>
    %c3 = arith.constant 3 : index
    %c0_22 = arith.constant 0 : index
    %c0_23 = arith.constant 0 : index
    %22 = vector.load %arg3[%c3, %c0_22, %c0_23] : memref<9x8x8xbf16, #tpu.memory_space<vmem>>, vector<1x8x8xbf16>
    %23 = vector.shape_cast %22 : vector<1x8x8xbf16> to vector<8x8xbf16>
    %cst_24 = arith.constant dense<0.000000e+00> : vector<80x8xf32>
    %24 = tpu.matmul %21, %23, %cst_24 {dimension_numbers = #tpu.dot_dimension_numbers<[1], [0], [0], [1], [0, 0, 1, 1], [], []>} : vector<80x8xbf16>, vector<8x8xbf16>, vector<80x8xf32> -> vector<80x8xf32>
    %25 = arith.addf %19, %24 : vector<80x8xf32>
    %c0_25 = arith.constant 0 : index
    %c11 = arith.constant 11 : index
    %c0_26 = arith.constant 0 : index
    %26 = vector.load %arg1[%c0_25, %c11, %c0_26] : memref<1x102x8xbf16, #tpu.memory_space<vmem>>, vector<1x80x8xbf16>
    %27 = vector.shape_cast %26 : vector<1x80x8xbf16> to vector<80x8xbf16>
    %c4 = arith.constant 4 : index
    %c0_27 = arith.constant 0 : index
    %c0_28 = arith.constant 0 : index
    %28 = vector.load %arg3[%c4, %c0_27, %c0_28] : memref<9x8x8xbf16, #tpu.memory_space<vmem>>, vector<1x8x8xbf16>
    %29 = vector.shape_cast %28 : vector<1x8x8xbf16> to vector<8x8xbf16>
    %cst_29 = arith.constant dense<0.000000e+00> : vector<80x8xf32>
    %30 = tpu.matmul %27, %29, %cst_29 {dimension_numbers = #tpu.dot_dimension_numbers<[1], [0], [0], [1], [0, 0, 1, 1], [], []>} : vector<80x8xbf16>, vector<8x8xbf16>, vector<80x8xf32> -> vector<80x8xf32>
    %31 = arith.addf %25, %30 : vector<80x8xf32>
    %c0_30 = arith.constant 0 : index
    %c12 = arith.constant 12 : index
    %c0_31 = arith.constant 0 : index
    %32 = vector.load %arg1[%c0_30, %c12, %c0_31] : memref<1x102x8xbf16, #tpu.memory_space<vmem>>, vector<1x80x8xbf16>
    %33 = vector.shape_cast %32 : vector<1x80x8xbf16> to vector<80x8xbf16>
    %c5 = arith.constant 5 : index
    %c0_32 = arith.constant 0 : index
    %c0_33 = arith.constant 0 : index
    %34 = vector.load %arg3[%c5, %c0_32, %c0_33] : memref<9x8x8xbf16, #tpu.memory_space<vmem>>, vector<1x8x8xbf16>
    %35 = vector.shape_cast %34 : vector<1x8x8xbf16> to vector<8x8xbf16>
    %cst_34 = arith.constant dense<0.000000e+00> : vector<80x8xf32>
    %36 = tpu.matmul %33, %35, %cst_34 {dimension_numbers = #tpu.dot_dimension_numbers<[1], [0], [0], [1], [0, 0, 1, 1], [], []>} : vector<80x8xbf16>, vector<8x8xbf16>, vector<80x8xf32> -> vector<80x8xf32>
    %37 = arith.addf %31, %36 : vector<80x8xf32>
    %c0_35 = arith.constant 0 : index
    %c20 = arith.constant 20 : index
    %c0_36 = arith.constant 0 : index
    %38 = vector.load %arg1[%c0_35, %c20, %c0_36] : memref<1x102x8xbf16, #tpu.memory_space<vmem>>, vector<1x80x8xbf16>
    %39 = vector.shape_cast %38 : vector<1x80x8xbf16> to vector<80x8xbf16>
    %c6 = arith.constant 6 : index
    %c0_37 = arith.constant 0 : index
    %c0_38 = arith.constant 0 : index
    %40 = vector.load %arg3[%c6, %c0_37, %c0_38] : memref<9x8x8xbf16, #tpu.memory_space<vmem>>, vector<1x8x8xbf16>
    %41 = vector.shape_cast %40 : vector<1x8x8xbf16> to vector<8x8xbf16>
    %cst_39 = arith.constant dense<0.000000e+00> : vector<80x8xf32>
    %42 = tpu.matmul %39, %41, %cst_39 {dimension_numbers = #tpu.dot_dimension_numbers<[1], [0], [0], [1], [0, 0, 1, 1], [], []>} : vector<80x8xbf16>, vector<8x8xbf16>, vector<80x8xf32> -> vector<80x8xf32>
    %43 = arith.addf %37, %42 : vector<80x8xf32>
    %c0_40 = arith.constant 0 : index
    %c21 = arith.constant 21 : index
    %c0_41 = arith.constant 0 : index
    %44 = vector.load %arg1[%c0_40, %c21, %c0_41] : memref<1x102x8xbf16, #tpu.memory_space<vmem>>, vector<1x80x8xbf16>
    %45 = vector.shape_cast %44 : vector<1x80x8xbf16> to vector<80x8xbf16>
    %c7 = arith.constant 7 : index
    %c0_42 = arith.constant 0 : index
    %c0_43 = arith.constant 0 : index
    %46 = vector.load %arg3[%c7, %c0_42, %c0_43] : memref<9x8x8xbf16, #tpu.memory_space<vmem>>, vector<1x8x8xbf16>
    %47 = vector.shape_cast %46 : vector<1x8x8xbf16> to vector<8x8xbf16>
    %cst_44 = arith.constant dense<0.000000e+00> : vector<80x8xf32>
    %48 = tpu.matmul %45, %47, %cst_44 {dimension_numbers = #tpu.dot_dimension_numbers<[1], [0], [0], [1], [0, 0, 1, 1], [], []>} : vector<80x8xbf16>, vector<8x8xbf16>, vector<80x8xf32> -> vector<80x8xf32>
    %49 = arith.addf %43, %48 : vector<80x8xf32>
    %c0_45 = arith.constant 0 : index
    %c22 = arith.constant 22 : index
    %c0_46 = arith.constant 0 : index
    %50 = vector.load %arg1[%c0_45, %c22, %c0_46] : memref<1x102x8xbf16, #tpu.memory_space<vmem>>, vector<1x80x8xbf16>
    %51 = vector.shape_cast %50 : vector<1x80x8xbf16> to vector<80x8xbf16>
    %c8 = arith.constant 8 : index
    %c0_47 = arith.constant 0 : index
    %c0_48 = arith.constant 0 : index
    %52 = vector.load %arg3[%c8, %c0_47, %c0_48] : memref<9x8x8xbf16, #tpu.memory_space<vmem>>, vector<1x8x8xbf16>
    %53 = vector.shape_cast %52 : vector<1x8x8xbf16> to vector<8x8xbf16>
    %cst_49 = arith.constant dense<0.000000e+00> : vector<80x8xf32>
    %54 = tpu.matmul %51, %53, %cst_49 {dimension_numbers = #tpu.dot_dimension_numbers<[1], [0], [0], [1], [0, 0, 1, 1], [], []>} : vector<80x8xbf16>, vector<8x8xbf16>, vector<80x8xf32> -> vector<80x8xf32>
    %55 = arith.addf %49, %54 : vector<80x8xf32>
    %c0_50 = arith.constant 0 : index
    %c0_51 = arith.constant 0 : index
    %56 = vector.load %arg4[%c0_50, %c0_51] : memref<1x8xf32, #tpu.memory_space<vmem>>, vector<1x8xf32>
    %57 = vector.broadcast %56 : vector<1x8xf32> to vector<80x8xf32>
    %58 = arith.addf %55, %57 : vector<80x8xf32>
    %cst_52 = arith.constant 0.000000e+00 : f32
    %59 = vector.broadcast %cst_52 : f32 to vector<80x8xf32>
    %60 = arith.maximumf %58, %59 : vector<80x8xf32>
    %61 = vector.broadcast %0 : vector<80x1xf32> to vector<80x8xf32>
    %62 = arith.mulf %60, %61 : vector<80x8xf32>
    %cst_53 = arith.constant 0.000000e+00 : f32
    %63 = vector.broadcast %cst_53 : f32 to vector<11x8xf32>
    %c0_54 = arith.constant 0 : index
    %c0_55 = arith.constant 0 : index
    %64 = vector.load %arg8[%c0_54, %c0_55] : memref<102x8xf32, #tpu.memory_space<vmem>>, vector<11x8xf32>
    tpu.vector_store %arg8[%c0_54, %c0_55], %63 {strides = array<i32>} : memref<102x8xf32, #tpu.memory_space<vmem>>, vector<11x8xf32>,
    %c91 = arith.constant 91 : index
    %c0_56 = arith.constant 0 : index
    %65 = vector.load %arg8[%c91, %c0_56] : memref<102x8xf32, #tpu.memory_space<vmem>>, vector<11x8xf32>
    tpu.vector_store %arg8[%c91, %c0_56], %63 {strides = array<i32>} : memref<102x8xf32, #tpu.memory_space<vmem>>, vector<11x8xf32>,
    %c11_57 = arith.constant 11 : index
    %c0_58 = arith.constant 0 : index
    %66 = vector.load %arg8[%c11_57, %c0_58] : memref<102x8xf32, #tpu.memory_space<vmem>>, vector<80x8xf32>
    tpu.vector_store %arg8[%c11_57, %c0_58], %62 {strides = array<i32>} : memref<102x8xf32, #tpu.memory_space<vmem>>, vector<80x8xf32>,
    %c0_59 = arith.constant 0 : index
    %c11_60 = arith.constant 11 : index
    %c0_61 = arith.constant 0 : index
    %67 = vector.load %arg1[%c0_59, %c11_60, %c0_61] : memref<1x102x8xbf16, #tpu.memory_space<vmem>>, vector<1x80x8xbf16>
    %68 = vector.shape_cast %67 : vector<1x80x8xbf16> to vector<80x8xbf16>
    %69 = arith.extf %68 : vector<80x8xbf16> to vector<80x8xf32>
    %cst_62 = arith.constant 0.000000e+00 : f32
    %70 = vector.broadcast %cst_62 : f32 to vector<80x8xf32>
    %c0_63 = arith.constant 0 : index
    %c0_64 = arith.constant 0 : index
    %71 = vector.load %arg8[%c0_63, %c0_64] : memref<102x8xf32, #tpu.memory_space<vmem>>, vector<80x8xf32>
    %72 = arith.truncf %71 : vector<80x8xf32> to vector<80x8xbf16>
    %c0_65 = arith.constant 0 : index
    %c0_66 = arith.constant 0 : index
    %c0_67 = arith.constant 0 : index
    %73 = vector.load %arg5[%c0_65, %c0_66, %c0_67] : memref<9x8x8xbf16, #tpu.memory_space<vmem>>, vector<1x8x8xbf16>
    %74 = vector.shape_cast %73 : vector<1x8x8xbf16> to vector<8x8xbf16>
    %cst_68 = arith.constant dense<0.000000e+00> : vector<80x8xf32>
    %75 = tpu.matmul %72, %74, %cst_68 {dimension_numbers = #tpu.dot_dimension_numbers<[1], [0], [0], [1], [0, 0, 1, 1], [], []>} : vector<80x8xbf16>, vector<8x8xbf16>, vector<80x8xf32> -> vector<80x8xf32>
    %76 = arith.addf %70, %75 : vector<80x8xf32>
    %c1_69 = arith.constant 1 : index
    %c0_70 = arith.constant 0 : index
    %77 = vector.load %arg8[%c1_69, %c0_70] : memref<102x8xf32, #tpu.memory_space<vmem>>, vector<80x8xf32>
    %78 = arith.truncf %77 : vector<80x8xf32> to vector<80x8xbf16>
    %c1_71 = arith.constant 1 : index
    %c0_72 = arith.constant 0 : index
    %c0_73 = arith.constant 0 : index
    %79 = vector.load %arg5[%c1_71, %c0_72, %c0_73] : memref<9x8x8xbf16, #tpu.memory_space<vmem>>, vector<1x8x8xbf16>
    %80 = vector.shape_cast %79 : vector<1x8x8xbf16> to vector<8x8xbf16>
    %cst_74 = arith.constant dense<0.000000e+00> : vector<80x8xf32>
    %81 = tpu.matmul %78, %80, %cst_74 {dimension_numbers = #tpu.dot_dimension_numbers<[1], [0], [0], [1], [0, 0, 1, 1], [], []>} : vector<80x8xbf16>, vector<8x8xbf16>, vector<80x8xf32> -> vector<80x8xf32>
    %82 = arith.addf %76, %81 : vector<80x8xf32>
    %c2_75 = arith.constant 2 : index
    %c0_76 = arith.constant 0 : index
    %83 = vector.load %arg8[%c2_75, %c0_76] : memref<102x8xf32, #tpu.memory_space<vmem>>, vector<80x8xf32>
    %84 = arith.truncf %83 : vector<80x8xf32> to vector<80x8xbf16>
    %c2_77 = arith.constant 2 : index
    %c0_78 = arith.constant 0 : index
    %c0_79 = arith.constant 0 : index
    %85 = vector.load %arg5[%c2_77, %c0_78, %c0_79] : memref<9x8x8xbf16, #tpu.memory_space<vmem>>, vector<1x8x8xbf16>
    %86 = vector.shape_cast %85 : vector<1x8x8xbf16> to vector<8x8xbf16>
    %cst_80 = arith.constant dense<0.000000e+00> : vector<80x8xf32>
    %87 = tpu.matmul %84, %86, %cst_80 {dimension_numbers = #tpu.dot_dimension_numbers<[1], [0], [0], [1], [0, 0, 1, 1], [], []>} : vector<80x8xbf16>, vector<8x8xbf16>, vector<80x8xf32> -> vector<80x8xf32>
    %88 = arith.addf %82, %87 : vector<80x8xf32>
    %c10_81 = arith.constant 10 : index
    %c0_82 = arith.constant 0 : index
    %89 = vector.load %arg8[%c10_81, %c0_82] : memref<102x8xf32, #tpu.memory_space<vmem>>, vector<80x8xf32>
    %90 = arith.truncf %89 : vector<80x8xf32> to vector<80x8xbf16>
    %c3_83 = arith.constant 3 : index
    %c0_84 = arith.constant 0 : index
    %c0_85 = arith.constant 0 : index
    %91 = vector.load %arg5[%c3_83, %c0_84, %c0_85] : memref<9x8x8xbf16, #tpu.memory_space<vmem>>, vector<1x8x8xbf16>
    %92 = vector.shape_cast %91 : vector<1x8x8xbf16> to vector<8x8xbf16>
    %cst_86 = arith.constant dense<0.000000e+00> : vector<80x8xf32>
    %93 = tpu.matmul %90, %92, %cst_86 {dimension_numbers = #tpu.dot_dimension_numbers<[1], [0], [0], [1], [0, 0, 1, 1], [], []>} : vector<80x8xbf16>, vector<8x8xbf16>, vector<80x8xf32> -> vector<80x8xf32>
    %94 = arith.addf %88, %93 : vector<80x8xf32>
    %c11_87 = arith.constant 11 : index
    %c0_88 = arith.constant 0 : index
    %95 = vector.load %arg8[%c11_87, %c0_88] : memref<102x8xf32, #tpu.memory_space<vmem>>, vector<80x8xf32>
    %96 = arith.truncf %95 : vector<80x8xf32> to vector<80x8xbf16>
    %c4_89 = arith.constant 4 : index
    %c0_90 = arith.constant 0 : index
    %c0_91 = arith.constant 0 : index
    %97 = vector.load %arg5[%c4_89, %c0_90, %c0_91] : memref<9x8x8xbf16, #tpu.memory_space<vmem>>, vector<1x8x8xbf16>
    %98 = vector.shape_cast %97 : vector<1x8x8xbf16> to vector<8x8xbf16>
    %cst_92 = arith.constant dense<0.000000e+00> : vector<80x8xf32>
    %99 = tpu.matmul %96, %98, %cst_92 {dimension_numbers = #tpu.dot_dimension_numbers<[1], [0], [0], [1], [0, 0, 1, 1], [], []>} : vector<80x8xbf16>, vector<8x8xbf16>, vector<80x8xf32> -> vector<80x8xf32>
    %100 = arith.addf %94, %99 : vector<80x8xf32>
    %c12_93 = arith.constant 12 : index
    %c0_94 = arith.constant 0 : index
    %101 = vector.load %arg8[%c12_93, %c0_94] : memref<102x8xf32, #tpu.memory_space<vmem>>, vector<80x8xf32>
    %102 = arith.truncf %101 : vector<80x8xf32> to vector<80x8xbf16>
    %c5_95 = arith.constant 5 : index
    %c0_96 = arith.constant 0 : index
    %c0_97 = arith.constant 0 : index
    %103 = vector.load %arg5[%c5_95, %c0_96, %c0_97] : memref<9x8x8xbf16, #tpu.memory_space<vmem>>, vector<1x8x8xbf16>
    %104 = vector.shape_cast %103 : vector<1x8x8xbf16> to vector<8x8xbf16>
    %cst_98 = arith.constant dense<0.000000e+00> : vector<80x8xf32>
    %105 = tpu.matmul %102, %104, %cst_98 {dimension_numbers = #tpu.dot_dimension_numbers<[1], [0], [0], [1], [0, 0, 1, 1], [], []>} : vector<80x8xbf16>, vector<8x8xbf16>, vector<80x8xf32> -> vector<80x8xf32>
    %106 = arith.addf %100, %105 : vector<80x8xf32>
    %c20_99 = arith.constant 20 : index
    %c0_100 = arith.constant 0 : index
    %107 = vector.load %arg8[%c20_99, %c0_100] : memref<102x8xf32, #tpu.memory_space<vmem>>, vector<80x8xf32>
    %108 = arith.truncf %107 : vector<80x8xf32> to vector<80x8xbf16>
    %c6_101 = arith.constant 6 : index
    %c0_102 = arith.constant 0 : index
    %c0_103 = arith.constant 0 : index
    %109 = vector.load %arg5[%c6_101, %c0_102, %c0_103] : memref<9x8x8xbf16, #tpu.memory_space<vmem>>, vector<1x8x8xbf16>
    %110 = vector.shape_cast %109 : vector<1x8x8xbf16> to vector<8x8xbf16>
    %cst_104 = arith.constant dense<0.000000e+00> : vector<80x8xf32>
    %111 = tpu.matmul %108, %110, %cst_104 {dimension_numbers = #tpu.dot_dimension_numbers<[1], [0], [0], [1], [0, 0, 1, 1], [], []>} : vector<80x8xbf16>, vector<8x8xbf16>, vector<80x8xf32> -> vector<80x8xf32>
    %112 = arith.addf %106, %111 : vector<80x8xf32>
    %c21_105 = arith.constant 21 : index
    %c0_106 = arith.constant 0 : index
    %113 = vector.load %arg8[%c21_105, %c0_106] : memref<102x8xf32, #tpu.memory_space<vmem>>, vector<80x8xf32>
    %114 = arith.truncf %113 : vector<80x8xf32> to vector<80x8xbf16>
    %c7_107 = arith.constant 7 : index
    %c0_108 = arith.constant 0 : index
    %c0_109 = arith.constant 0 : index
    %115 = vector.load %arg5[%c7_107, %c0_108, %c0_109] : memref<9x8x8xbf16, #tpu.memory_space<vmem>>, vector<1x8x8xbf16>
    %116 = vector.shape_cast %115 : vector<1x8x8xbf16> to vector<8x8xbf16>
    %cst_110 = arith.constant dense<0.000000e+00> : vector<80x8xf32>
    %117 = tpu.matmul %114, %116, %cst_110 {dimension_numbers = #tpu.dot_dimension_numbers<[1], [0], [0], [1], [0, 0, 1, 1], [], []>} : vector<80x8xbf16>, vector<8x8xbf16>, vector<80x8xf32> -> vector<80x8xf32>
    %118 = arith.addf %112, %117 : vector<80x8xf32>
    %c22_111 = arith.constant 22 : index
    %c0_112 = arith.constant 0 : index
    %119 = vector.load %arg8[%c22_111, %c0_112] : memref<102x8xf32, #tpu.memory_space<vmem>>, vector<80x8xf32>
    %120 = arith.truncf %119 : vector<80x8xf32> to vector<80x8xbf16>
    %c8_113 = arith.constant 8 : index
    %c0_114 = arith.constant 0 : index
    %c0_115 = arith.constant 0 : index
    %121 = vector.load %arg5[%c8_113, %c0_114, %c0_115] : memref<9x8x8xbf16, #tpu.memory_space<vmem>>, vector<1x8x8xbf16>
    %122 = vector.shape_cast %121 : vector<1x8x8xbf16> to vector<8x8xbf16>
    %cst_116 = arith.constant dense<0.000000e+00> : vector<80x8xf32>
    %123 = tpu.matmul %120, %122, %cst_116 {dimension_numbers = #tpu.dot_dimension_numbers<[1], [0], [0], [1], [0, 0, 1, 1], [], []>} : vector<80x8xbf16>, vector<8x8xbf16>, vector<80x8xf32> -> vector<80x8xf32>
    %124 = arith.addf %118, %123 : vector<80x8xf32>
    %c0_117 = arith.constant 0 : index
    %c0_118 = arith.constant 0 : index
    %125 = vector.load %arg6[%c0_117, %c0_118] : memref<1x8xf32, #tpu.memory_space<vmem>>, vector<1x8xf32>
    %126 = vector.broadcast %125 : vector<1x8xf32> to vector<80x8xf32>
    %127 = arith.addf %124, %126 : vector<80x8xf32>
    %128 = arith.addf %127, %69 : vector<80x8xf32>
    %cst_119 = arith.constant 0.000000e+00 : f32
    %129 = vector.broadcast %cst_119 : f32 to vector<80x8xf32>
    %130 = arith.maximumf %128, %129 : vector<80x8xf32>
    %131 = vector.broadcast %0 : vector<80x1xf32> to vector<80x8xf32>
    %132 = arith.mulf %130, %131 : vector<80x8xf32>
    %133 = arith.truncf %132 : vector<80x8xf32> to vector<80x8xbf16>
    %c0_120 = arith.constant 0 : index
    %c0_121 = arith.constant 0 : index
    %c0_122 = arith.constant 0 : index
    %134 = vector.load %arg7[%c0_120, %c0_121, %c0_122] : memref<1x80x8xbf16, #tpu.memory_space<vmem>>, vector<1x80x8xbf16>
    %135 = vector.shape_cast %134 : vector<1x80x8xbf16> to vector<80x8xbf16>
    %136 = vector.shape_cast %133 : vector<80x8xbf16> to vector<1x80x8xbf16>
    tpu.vector_store %arg7[%c0_120, %c0_121, %c0_122], %136 {strides = array<i32>} : memref<1x80x8xbf16, #tpu.memory_space<vmem>>, vector<1x80x8xbf16>,
    return
  }
  func.func @transform_0(%arg0: i32) -> (i32, i32, i32) {
    %c0_i32 = arith.constant 0 : i32
    %c0_i32_0 = arith.constant 0 : i32
    %c0_i32_1 = arith.constant 0 : i32
    return %arg0, %c0_i32, %c0_i32_0 : i32, i32, i32
  }
  func.func @transform_1(%arg0: i32) -> (i32, i32) {
    %c0_i32 = arith.constant 0 : i32
    %c0_i32_0 = arith.constant 0 : i32
    %c0_i32_1 = arith.constant 0 : i32
    return %c0_i32, %c0_i32_0 : i32, i32
  }
  func.func @transform_2(%arg0: i32) -> (i32, i32, i32) {
    %c0_i32 = arith.constant 0 : i32
    %c0_i32_0 = arith.constant 0 : i32
    %c0_i32_1 = arith.constant 0 : i32
    %c0_i32_2 = arith.constant 0 : i32
    return %c0_i32, %c0_i32_0, %c0_i32_1 : i32, i32, i32
  }
  func.func @transform_3(%arg0: i32) -> (i32, i32) {
    %c0_i32 = arith.constant 0 : i32
    %c0_i32_0 = arith.constant 0 : i32
    %c0_i32_1 = arith.constant 0 : i32
    return %c0_i32, %c0_i32_0 : i32, i32
  }
  func.func @transform_4(%arg0: i32) -> (i32, i32, i32) {
    %c0_i32 = arith.constant 0 : i32
    %c0_i32_0 = arith.constant 0 : i32
    %c0_i32_1 = arith.constant 0 : i32
    %c0_i32_2 = arith.constant 0 : i32
    return %c0_i32, %c0_i32_0, %c0_i32_1 : i32, i32, i32
  }
  func.func @transform_5(%arg0: i32) -> (i32, i32) {
    %c0_i32 = arith.constant 0 : i32
    %c0_i32_0 = arith.constant 0 : i32
    %c0_i32_1 = arith.constant 0 : i32
    return %c0_i32, %c0_i32_0 : i32, i32
  }
  func.func @transform_6(%arg0: i32) -> (i32, i32, i32) {
    %c0_i32 = arith.constant 0 : i32
    %c0_i32_0 = arith.constant 0 : i32
    %c0_i32_1 = arith.constant 0 : i32
    return %arg0, %c0_i32, %c0_i32_0 : i32, i32, i32
  }
}

module attributes {stable_mosaic.version = 11 : i64} {
  func.func @_basic_block_kernel(%arg0: i32, %arg1: memref<1x32x8xbf16, #tpu.memory_space<vmem>>, %arg2: memref<1x32x8xbf16, #tpu.memory_space<vmem>>, %arg3: memref<1x32x8xbf16, #tpu.memory_space<vmem>>, %arg4: memref<1x32x8xbf16, #tpu.memory_space<vmem>>, %arg5: memref<24x1xf32, #tpu.memory_space<vmem>>, %arg6: memref<9x8x16xbf16, #tpu.memory_space<vmem>>, %arg7: memref<1x16xf32, #tpu.memory_space<vmem>>, %arg8: memref<9x16x16xbf16, #tpu.memory_space<vmem>>, %arg9: memref<1x16xf32, #tpu.memory_space<vmem>>, %arg10: memref<9x8x16xbf16, #tpu.memory_space<vmem>>, %arg11: memref<1x24x16xbf16, #tpu.memory_space<vmem>>, %arg12: memref<38x16xf32, #tpu.memory_space<vmem>>) attributes {dimension_semantics = [#tpu.dimension_semantics<parallel>], iteration_bounds = array<i64: 2>, scalar_prefetch = 0 : i64, scratch_operands = 1 : i64, tpu.core_type = #tpu.core_type<tc>, window_params = [{transform_indices = @transform_0, window_bounds = array<i64: 1, 32, 8>}, {transform_indices = @transform_1, window_bounds = array<i64: 1, 32, 8>}, {transform_indices = @transform_2, window_bounds = array<i64: 1, 32, 8>}, {transform_indices = @transform_3, window_bounds = array<i64: 1, 32, 8>}, {pipeline_mode = #tpu.pipeline_mode<synchronous>, transform_indices = @transform_4, window_bounds = array<i64: 24, 1>}, {pipeline_mode = #tpu.pipeline_mode<synchronous>, transform_indices = @transform_5, window_bounds = array<i64: 9, 8, 16>}, {pipeline_mode = #tpu.pipeline_mode<synchronous>, transform_indices = @transform_6, window_bounds = array<i64: 1, 16>}, {pipeline_mode = #tpu.pipeline_mode<synchronous>, transform_indices = @transform_7, window_bounds = array<i64: 9, 16, 16>}, {pipeline_mode = #tpu.pipeline_mode<synchronous>, transform_indices = @transform_8, window_bounds = array<i64: 1, 16>}, {pipeline_mode = #tpu.pipeline_mode<synchronous>, transform_indices = @transform_9, window_bounds = array<i64: 9, 8, 16>}, {transform_indices = @transform_10, window_bounds = array<i64: 1, 24, 16>}]} {
    %c0 = arith.constant 0 : index
    %c0_0 = arith.constant 0 : index
    %0 = vector.load %arg5[%c0, %c0_0] : memref<24x1xf32, #tpu.memory_space<vmem>>, vector<24x1xf32>
    %cst = arith.constant 0.000000e+00 : f32
    %1 = vector.broadcast %cst : f32 to vector<24x16xf32>
    %cst_1 = arith.constant 0.000000e+00 : f32
    %2 = vector.broadcast %cst_1 : f32 to vector<24x16xf32>
    %c0_2 = arith.constant 0 : index
    %c0_3 = arith.constant 0 : index
    %c0_4 = arith.constant 0 : index
    %3 = vector.load %arg1[%c0_2, %c0_3, %c0_4] : memref<1x32x8xbf16, #tpu.memory_space<vmem>>, vector<1x24x8xbf16>
    %4 = vector.shape_cast %3 : vector<1x24x8xbf16> to vector<24x8xbf16>
    %c0_5 = arith.constant 0 : index
    %c0_6 = arith.constant 0 : index
    %c0_7 = arith.constant 0 : index
    %5 = vector.load %arg6[%c0_5, %c0_6, %c0_7] : memref<9x8x16xbf16, #tpu.memory_space<vmem>>, vector<1x8x16xbf16>
    %6 = vector.shape_cast %5 : vector<1x8x16xbf16> to vector<8x16xbf16>
    %cst_8 = arith.constant dense<0.000000e+00> : vector<24x16xf32>
    %7 = tpu.matmul %4, %6, %cst_8 {dimension_numbers = #tpu.dot_dimension_numbers<[1], [0], [0], [1], [0, 0, 1, 1], [], []>} : vector<24x8xbf16>, vector<8x16xbf16>, vector<24x16xf32> -> vector<24x16xf32>
    %8 = arith.addf %1, %7 : vector<24x16xf32>
    %c0_9 = arith.constant 0 : index
    %c0_10 = arith.constant 0 : index
    %c0_11 = arith.constant 0 : index
    %9 = vector.load %arg10[%c0_9, %c0_10, %c0_11] : memref<9x8x16xbf16, #tpu.memory_space<vmem>>, vector<1x8x16xbf16>
    %10 = vector.shape_cast %9 : vector<1x8x16xbf16> to vector<8x16xbf16>
    %cst_12 = arith.constant dense<0.000000e+00> : vector<24x16xf32>
    %11 = tpu.matmul %4, %10, %cst_12 {dimension_numbers = #tpu.dot_dimension_numbers<[1], [0], [0], [1], [0, 0, 1, 1], [], []>} : vector<24x8xbf16>, vector<8x16xbf16>, vector<24x16xf32> -> vector<24x16xf32>
    %12 = arith.addf %2, %11 : vector<24x16xf32>
    %c0_13 = arith.constant 0 : index
    %c0_14 = arith.constant 0 : index
    %c0_15 = arith.constant 0 : index
    %13 = vector.load %arg2[%c0_13, %c0_14, %c0_15] : memref<1x32x8xbf16, #tpu.memory_space<vmem>>, vector<1x24x8xbf16>
    %14 = vector.shape_cast %13 : vector<1x24x8xbf16> to vector<24x8xbf16>
    %c1 = arith.constant 1 : index
    %c0_16 = arith.constant 0 : index
    %c0_17 = arith.constant 0 : index
    %15 = vector.load %arg6[%c1, %c0_16, %c0_17] : memref<9x8x16xbf16, #tpu.memory_space<vmem>>, vector<1x8x16xbf16>
    %16 = vector.shape_cast %15 : vector<1x8x16xbf16> to vector<8x16xbf16>
    %cst_18 = arith.constant dense<0.000000e+00> : vector<24x16xf32>
    %17 = tpu.matmul %14, %16, %cst_18 {dimension_numbers = #tpu.dot_dimension_numbers<[1], [0], [0], [1], [0, 0, 1, 1], [], []>} : vector<24x8xbf16>, vector<8x16xbf16>, vector<24x16xf32> -> vector<24x16xf32>
    %18 = arith.addf %8, %17 : vector<24x16xf32>
    %c1_19 = arith.constant 1 : index
    %c0_20 = arith.constant 0 : index
    %c0_21 = arith.constant 0 : index
    %19 = vector.load %arg10[%c1_19, %c0_20, %c0_21] : memref<9x8x16xbf16, #tpu.memory_space<vmem>>, vector<1x8x16xbf16>
    %20 = vector.shape_cast %19 : vector<1x8x16xbf16> to vector<8x16xbf16>
    %cst_22 = arith.constant dense<0.000000e+00> : vector<24x16xf32>
    %21 = tpu.matmul %14, %20, %cst_22 {dimension_numbers = #tpu.dot_dimension_numbers<[1], [0], [0], [1], [0, 0, 1, 1], [], []>} : vector<24x8xbf16>, vector<8x16xbf16>, vector<24x16xf32> -> vector<24x16xf32>
    %22 = arith.addf %12, %21 : vector<24x16xf32>
    %c0_23 = arith.constant 0 : index
    %c1_24 = arith.constant 1 : index
    %c0_25 = arith.constant 0 : index
    %23 = vector.load %arg1[%c0_23, %c1_24, %c0_25] : memref<1x32x8xbf16, #tpu.memory_space<vmem>>, vector<1x24x8xbf16>
    %24 = vector.shape_cast %23 : vector<1x24x8xbf16> to vector<24x8xbf16>
    %c2 = arith.constant 2 : index
    %c0_26 = arith.constant 0 : index
    %c0_27 = arith.constant 0 : index
    %25 = vector.load %arg6[%c2, %c0_26, %c0_27] : memref<9x8x16xbf16, #tpu.memory_space<vmem>>, vector<1x8x16xbf16>
    %26 = vector.shape_cast %25 : vector<1x8x16xbf16> to vector<8x16xbf16>
    %cst_28 = arith.constant dense<0.000000e+00> : vector<24x16xf32>
    %27 = tpu.matmul %24, %26, %cst_28 {dimension_numbers = #tpu.dot_dimension_numbers<[1], [0], [0], [1], [0, 0, 1, 1], [], []>} : vector<24x8xbf16>, vector<8x16xbf16>, vector<24x16xf32> -> vector<24x16xf32>
    %28 = arith.addf %18, %27 : vector<24x16xf32>
    %c2_29 = arith.constant 2 : index
    %c0_30 = arith.constant 0 : index
    %c0_31 = arith.constant 0 : index
    %29 = vector.load %arg10[%c2_29, %c0_30, %c0_31] : memref<9x8x16xbf16, #tpu.memory_space<vmem>>, vector<1x8x16xbf16>
    %30 = vector.shape_cast %29 : vector<1x8x16xbf16> to vector<8x16xbf16>
    %cst_32 = arith.constant dense<0.000000e+00> : vector<24x16xf32>
    %31 = tpu.matmul %24, %30, %cst_32 {dimension_numbers = #tpu.dot_dimension_numbers<[1], [0], [0], [1], [0, 0, 1, 1], [], []>} : vector<24x8xbf16>, vector<8x16xbf16>, vector<24x16xf32> -> vector<24x16xf32>
    %32 = arith.addf %22, %31 : vector<24x16xf32>
    %c0_33 = arith.constant 0 : index
    %c0_34 = arith.constant 0 : index
    %c0_35 = arith.constant 0 : index
    %33 = vector.load %arg3[%c0_33, %c0_34, %c0_35] : memref<1x32x8xbf16, #tpu.memory_space<vmem>>, vector<1x24x8xbf16>
    %34 = vector.shape_cast %33 : vector<1x24x8xbf16> to vector<24x8xbf16>
    %c3 = arith.constant 3 : index
    %c0_36 = arith.constant 0 : index
    %c0_37 = arith.constant 0 : index
    %35 = vector.load %arg6[%c3, %c0_36, %c0_37] : memref<9x8x16xbf16, #tpu.memory_space<vmem>>, vector<1x8x16xbf16>
    %36 = vector.shape_cast %35 : vector<1x8x16xbf16> to vector<8x16xbf16>
    %cst_38 = arith.constant dense<0.000000e+00> : vector<24x16xf32>
    %37 = tpu.matmul %34, %36, %cst_38 {dimension_numbers = #tpu.dot_dimension_numbers<[1], [0], [0], [1], [0, 0, 1, 1], [], []>} : vector<24x8xbf16>, vector<8x16xbf16>, vector<24x16xf32> -> vector<24x16xf32>
    %38 = arith.addf %28, %37 : vector<24x16xf32>
    %c3_39 = arith.constant 3 : index
    %c0_40 = arith.constant 0 : index
    %c0_41 = arith.constant 0 : index
    %39 = vector.load %arg10[%c3_39, %c0_40, %c0_41] : memref<9x8x16xbf16, #tpu.memory_space<vmem>>, vector<1x8x16xbf16>
    %40 = vector.shape_cast %39 : vector<1x8x16xbf16> to vector<8x16xbf16>
    %cst_42 = arith.constant dense<0.000000e+00> : vector<24x16xf32>
    %41 = tpu.matmul %34, %40, %cst_42 {dimension_numbers = #tpu.dot_dimension_numbers<[1], [0], [0], [1], [0, 0, 1, 1], [], []>} : vector<24x8xbf16>, vector<8x16xbf16>, vector<24x16xf32> -> vector<24x16xf32>
    %42 = arith.addf %32, %41 : vector<24x16xf32>
    %c0_43 = arith.constant 0 : index
    %c0_44 = arith.constant 0 : index
    %c0_45 = arith.constant 0 : index
    %43 = vector.load %arg4[%c0_43, %c0_44, %c0_45] : memref<1x32x8xbf16, #tpu.memory_space<vmem>>, vector<1x24x8xbf16>
    %44 = vector.shape_cast %43 : vector<1x24x8xbf16> to vector<24x8xbf16>
    %c4 = arith.constant 4 : index
    %c0_46 = arith.constant 0 : index
    %c0_47 = arith.constant 0 : index
    %45 = vector.load %arg6[%c4, %c0_46, %c0_47] : memref<9x8x16xbf16, #tpu.memory_space<vmem>>, vector<1x8x16xbf16>
    %46 = vector.shape_cast %45 : vector<1x8x16xbf16> to vector<8x16xbf16>
    %cst_48 = arith.constant dense<0.000000e+00> : vector<24x16xf32>
    %47 = tpu.matmul %44, %46, %cst_48 {dimension_numbers = #tpu.dot_dimension_numbers<[1], [0], [0], [1], [0, 0, 1, 1], [], []>} : vector<24x8xbf16>, vector<8x16xbf16>, vector<24x16xf32> -> vector<24x16xf32>
    %48 = arith.addf %38, %47 : vector<24x16xf32>
    %c4_49 = arith.constant 4 : index
    %c0_50 = arith.constant 0 : index
    %c0_51 = arith.constant 0 : index
    %49 = vector.load %arg10[%c4_49, %c0_50, %c0_51] : memref<9x8x16xbf16, #tpu.memory_space<vmem>>, vector<1x8x16xbf16>
    %50 = vector.shape_cast %49 : vector<1x8x16xbf16> to vector<8x16xbf16>
    %cst_52 = arith.constant dense<0.000000e+00> : vector<24x16xf32>
    %51 = tpu.matmul %44, %50, %cst_52 {dimension_numbers = #tpu.dot_dimension_numbers<[1], [0], [0], [1], [0, 0, 1, 1], [], []>} : vector<24x8xbf16>, vector<8x16xbf16>, vector<24x16xf32> -> vector<24x16xf32>
    %52 = arith.addf %42, %51 : vector<24x16xf32>
    %c0_53 = arith.constant 0 : index
    %c1_54 = arith.constant 1 : index
    %c0_55 = arith.constant 0 : index
    %53 = vector.load %arg3[%c0_53, %c1_54, %c0_55] : memref<1x32x8xbf16, #tpu.memory_space<vmem>>, vector<1x24x8xbf16>
    %54 = vector.shape_cast %53 : vector<1x24x8xbf16> to vector<24x8xbf16>
    %c5 = arith.constant 5 : index
    %c0_56 = arith.constant 0 : index
    %c0_57 = arith.constant 0 : index
    %55 = vector.load %arg6[%c5, %c0_56, %c0_57] : memref<9x8x16xbf16, #tpu.memory_space<vmem>>, vector<1x8x16xbf16>
    %56 = vector.shape_cast %55 : vector<1x8x16xbf16> to vector<8x16xbf16>
    %cst_58 = arith.constant dense<0.000000e+00> : vector<24x16xf32>
    %57 = tpu.matmul %54, %56, %cst_58 {dimension_numbers = #tpu.dot_dimension_numbers<[1], [0], [0], [1], [0, 0, 1, 1], [], []>} : vector<24x8xbf16>, vector<8x16xbf16>, vector<24x16xf32> -> vector<24x16xf32>
    %58 = arith.addf %48, %57 : vector<24x16xf32>
    %c5_59 = arith.constant 5 : index
    %c0_60 = arith.constant 0 : index
    %c0_61 = arith.constant 0 : index
    %59 = vector.load %arg10[%c5_59, %c0_60, %c0_61] : memref<9x8x16xbf16, #tpu.memory_space<vmem>>, vector<1x8x16xbf16>
    %60 = vector.shape_cast %59 : vector<1x8x16xbf16> to vector<8x16xbf16>
    %cst_62 = arith.constant dense<0.000000e+00> : vector<24x16xf32>
    %61 = tpu.matmul %54, %60, %cst_62 {dimension_numbers = #tpu.dot_dimension_numbers<[1], [0], [0], [1], [0, 0, 1, 1], [], []>} : vector<24x8xbf16>, vector<8x16xbf16>, vector<24x16xf32> -> vector<24x16xf32>
    %62 = arith.addf %52, %61 : vector<24x16xf32>
    %c0_63 = arith.constant 0 : index
    %c6 = arith.constant 6 : index
    %c0_64 = arith.constant 0 : index
    %63 = vector.load %arg1[%c0_63, %c6, %c0_64] : memref<1x32x8xbf16, #tpu.memory_space<vmem>>, vector<1x24x8xbf16>
    %64 = vector.shape_cast %63 : vector<1x24x8xbf16> to vector<24x8xbf16>
    %c6_65 = arith.constant 6 : index
    %c0_66 = arith.constant 0 : index
    %c0_67 = arith.constant 0 : index
    %65 = vector.load %arg6[%c6_65, %c0_66, %c0_67] : memref<9x8x16xbf16, #tpu.memory_space<vmem>>, vector<1x8x16xbf16>
    %66 = vector.shape_cast %65 : vector<1x8x16xbf16> to vector<8x16xbf16>
    %cst_68 = arith.constant dense<0.000000e+00> : vector<24x16xf32>
    %67 = tpu.matmul %64, %66, %cst_68 {dimension_numbers = #tpu.dot_dimension_numbers<[1], [0], [0], [1], [0, 0, 1, 1], [], []>} : vector<24x8xbf16>, vector<8x16xbf16>, vector<24x16xf32> -> vector<24x16xf32>
    %68 = arith.addf %58, %67 : vector<24x16xf32>
    %c6_69 = arith.constant 6 : index
    %c0_70 = arith.constant 0 : index
    %c0_71 = arith.constant 0 : index
    %69 = vector.load %arg10[%c6_69, %c0_70, %c0_71] : memref<9x8x16xbf16, #tpu.memory_space<vmem>>, vector<1x8x16xbf16>
    %70 = vector.shape_cast %69 : vector<1x8x16xbf16> to vector<8x16xbf16>
    %cst_72 = arith.constant dense<0.000000e+00> : vector<24x16xf32>
    %71 = tpu.matmul %64, %70, %cst_72 {dimension_numbers = #tpu.dot_dimension_numbers<[1], [0], [0], [1], [0, 0, 1, 1], [], []>} : vector<24x8xbf16>, vector<8x16xbf16>, vector<24x16xf32> -> vector<24x16xf32>
    %72 = arith.addf %62, %71 : vector<24x16xf32>
    %c0_73 = arith.constant 0 : index
    %c6_74 = arith.constant 6 : index
    %c0_75 = arith.constant 0 : index
    %73 = vector.load %arg2[%c0_73, %c6_74, %c0_75] : memref<1x32x8xbf16, #tpu.memory_space<vmem>>, vector<1x24x8xbf16>
    %74 = vector.shape_cast %73 : vector<1x24x8xbf16> to vector<24x8xbf16>
    %c7 = arith.constant 7 : index
    %c0_76 = arith.constant 0 : index
    %c0_77 = arith.constant 0 : index
    %75 = vector.load %arg6[%c7, %c0_76, %c0_77] : memref<9x8x16xbf16, #tpu.memory_space<vmem>>, vector<1x8x16xbf16>
    %76 = vector.shape_cast %75 : vector<1x8x16xbf16> to vector<8x16xbf16>
    %cst_78 = arith.constant dense<0.000000e+00> : vector<24x16xf32>
    %77 = tpu.matmul %74, %76, %cst_78 {dimension_numbers = #tpu.dot_dimension_numbers<[1], [0], [0], [1], [0, 0, 1, 1], [], []>} : vector<24x8xbf16>, vector<8x16xbf16>, vector<24x16xf32> -> vector<24x16xf32>
    %78 = arith.addf %68, %77 : vector<24x16xf32>
    %c7_79 = arith.constant 7 : index
    %c0_80 = arith.constant 0 : index
    %c0_81 = arith.constant 0 : index
    %79 = vector.load %arg10[%c7_79, %c0_80, %c0_81] : memref<9x8x16xbf16, #tpu.memory_space<vmem>>, vector<1x8x16xbf16>
    %80 = vector.shape_cast %79 : vector<1x8x16xbf16> to vector<8x16xbf16>
    %cst_82 = arith.constant dense<0.000000e+00> : vector<24x16xf32>
    %81 = tpu.matmul %74, %80, %cst_82 {dimension_numbers = #tpu.dot_dimension_numbers<[1], [0], [0], [1], [0, 0, 1, 1], [], []>} : vector<24x8xbf16>, vector<8x16xbf16>, vector<24x16xf32> -> vector<24x16xf32>
    %82 = arith.addf %72, %81 : vector<24x16xf32>
    %c0_83 = arith.constant 0 : index
    %c7_84 = arith.constant 7 : index
    %c0_85 = arith.constant 0 : index
    %83 = vector.load %arg1[%c0_83, %c7_84, %c0_85] : memref<1x32x8xbf16, #tpu.memory_space<vmem>>, vector<1x24x8xbf16>
    %84 = vector.shape_cast %83 : vector<1x24x8xbf16> to vector<24x8xbf16>
    %c8 = arith.constant 8 : index
    %c0_86 = arith.constant 0 : index
    %c0_87 = arith.constant 0 : index
    %85 = vector.load %arg6[%c8, %c0_86, %c0_87] : memref<9x8x16xbf16, #tpu.memory_space<vmem>>, vector<1x8x16xbf16>
    %86 = vector.shape_cast %85 : vector<1x8x16xbf16> to vector<8x16xbf16>
    %cst_88 = arith.constant dense<0.000000e+00> : vector<24x16xf32>
    %87 = tpu.matmul %84, %86, %cst_88 {dimension_numbers = #tpu.dot_dimension_numbers<[1], [0], [0], [1], [0, 0, 1, 1], [], []>} : vector<24x8xbf16>, vector<8x16xbf16>, vector<24x16xf32> -> vector<24x16xf32>
    %88 = arith.addf %78, %87 : vector<24x16xf32>
    %c8_89 = arith.constant 8 : index
    %c0_90 = arith.constant 0 : index
    %c0_91 = arith.constant 0 : index
    %89 = vector.load %arg10[%c8_89, %c0_90, %c0_91] : memref<9x8x16xbf16, #tpu.memory_space<vmem>>, vector<1x8x16xbf16>
    %90 = vector.shape_cast %89 : vector<1x8x16xbf16> to vector<8x16xbf16>
    %cst_92 = arith.constant dense<0.000000e+00> : vector<24x16xf32>
    %91 = tpu.matmul %84, %90, %cst_92 {dimension_numbers = #tpu.dot_dimension_numbers<[1], [0], [0], [1], [0, 0, 1, 1], [], []>} : vector<24x8xbf16>, vector<8x16xbf16>, vector<24x16xf32> -> vector<24x16xf32>
    %92 = arith.addf %82, %91 : vector<24x16xf32>
    %c0_93 = arith.constant 0 : index
    %c0_94 = arith.constant 0 : index
    %93 = vector.load %arg7[%c0_93, %c0_94] : memref<1x16xf32, #tpu.memory_space<vmem>>, vector<1x16xf32>
    %94 = vector.broadcast %93 : vector<1x16xf32> to vector<24x16xf32>
    %95 = arith.addf %88, %94 : vector<24x16xf32>
    %cst_95 = arith.constant 0.000000e+00 : f32
    %96 = vector.broadcast %cst_95 : f32 to vector<24x16xf32>
    %97 = arith.maximumf %95, %96 : vector<24x16xf32>
    %98 = vector.broadcast %0 : vector<24x1xf32> to vector<24x16xf32>
    %99 = arith.mulf %97, %98 : vector<24x16xf32>
    %cst_96 = arith.constant 0.000000e+00 : f32
    %100 = vector.broadcast %cst_96 : f32 to vector<7x16xf32>
    %c0_97 = arith.constant 0 : index
    %c0_98 = arith.constant 0 : index
    %101 = vector.load %arg12[%c0_97, %c0_98] : memref<38x16xf32, #tpu.memory_space<vmem>>, vector<7x16xf32>
    tpu.vector_store %arg12[%c0_97, %c0_98], %100 {strides = array<i32>} : memref<38x16xf32, #tpu.memory_space<vmem>>, vector<7x16xf32>,
    %c31 = arith.constant 31 : index
    %c0_99 = arith.constant 0 : index
    %102 = vector.load %arg12[%c31, %c0_99] : memref<38x16xf32, #tpu.memory_space<vmem>>, vector<7x16xf32>
    tpu.vector_store %arg12[%c31, %c0_99], %100 {strides = array<i32>} : memref<38x16xf32, #tpu.memory_space<vmem>>, vector<7x16xf32>,
    %c7_100 = arith.constant 7 : index
    %c0_101 = arith.constant 0 : index
    %103 = vector.load %arg12[%c7_100, %c0_101] : memref<38x16xf32, #tpu.memory_space<vmem>>, vector<24x16xf32>
    tpu.vector_store %arg12[%c7_100, %c0_101], %99 {strides = array<i32>} : memref<38x16xf32, #tpu.memory_space<vmem>>, vector<24x16xf32>,
    %cst_102 = arith.constant 0.000000e+00 : f32
    %104 = vector.broadcast %cst_102 : f32 to vector<24x16xf32>
    %c0_103 = arith.constant 0 : index
    %c0_104 = arith.constant 0 : index
    %105 = vector.load %arg12[%c0_103, %c0_104] : memref<38x16xf32, #tpu.memory_space<vmem>>, vector<24x16xf32>
    %106 = arith.truncf %105 : vector<24x16xf32> to vector<24x16xbf16>
    %c0_105 = arith.constant 0 : index
    %c0_106 = arith.constant 0 : index
    %c0_107 = arith.constant 0 : index
    %107 = vector.load %arg8[%c0_105, %c0_106, %c0_107] : memref<9x16x16xbf16, #tpu.memory_space<vmem>>, vector<1x16x16xbf16>
    %108 = vector.shape_cast %107 : vector<1x16x16xbf16> to vector<16x16xbf16>
    %cst_108 = arith.constant dense<0.000000e+00> : vector<24x16xf32>
    %109 = tpu.matmul %106, %108, %cst_108 {dimension_numbers = #tpu.dot_dimension_numbers<[1], [0], [0], [1], [0, 0, 1, 1], [], []>} : vector<24x16xbf16>, vector<16x16xbf16>, vector<24x16xf32> -> vector<24x16xf32>
    %110 = arith.addf %104, %109 : vector<24x16xf32>
    %c1_109 = arith.constant 1 : index
    %c0_110 = arith.constant 0 : index
    %111 = vector.load %arg12[%c1_109, %c0_110] : memref<38x16xf32, #tpu.memory_space<vmem>>, vector<24x16xf32>
    %112 = arith.truncf %111 : vector<24x16xf32> to vector<24x16xbf16>
    %c1_111 = arith.constant 1 : index
    %c0_112 = arith.constant 0 : index
    %c0_113 = arith.constant 0 : index
    %113 = vector.load %arg8[%c1_111, %c0_112, %c0_113] : memref<9x16x16xbf16, #tpu.memory_space<vmem>>, vector<1x16x16xbf16>
    %114 = vector.shape_cast %113 : vector<1x16x16xbf16> to vector<16x16xbf16>
    %cst_114 = arith.constant dense<0.000000e+00> : vector<24x16xf32>
    %115 = tpu.matmul %112, %114, %cst_114 {dimension_numbers = #tpu.dot_dimension_numbers<[1], [0], [0], [1], [0, 0, 1, 1], [], []>} : vector<24x16xbf16>, vector<16x16xbf16>, vector<24x16xf32> -> vector<24x16xf32>
    %116 = arith.addf %110, %115 : vector<24x16xf32>
    %c2_115 = arith.constant 2 : index
    %c0_116 = arith.constant 0 : index
    %117 = vector.load %arg12[%c2_115, %c0_116] : memref<38x16xf32, #tpu.memory_space<vmem>>, vector<24x16xf32>
    %118 = arith.truncf %117 : vector<24x16xf32> to vector<24x16xbf16>
    %c2_117 = arith.constant 2 : index
    %c0_118 = arith.constant 0 : index
    %c0_119 = arith.constant 0 : index
    %119 = vector.load %arg8[%c2_117, %c0_118, %c0_119] : memref<9x16x16xbf16, #tpu.memory_space<vmem>>, vector<1x16x16xbf16>
    %120 = vector.shape_cast %119 : vector<1x16x16xbf16> to vector<16x16xbf16>
    %cst_120 = arith.constant dense<0.000000e+00> : vector<24x16xf32>
    %121 = tpu.matmul %118, %120, %cst_120 {dimension_numbers = #tpu.dot_dimension_numbers<[1], [0], [0], [1], [0, 0, 1, 1], [], []>} : vector<24x16xbf16>, vector<16x16xbf16>, vector<24x16xf32> -> vector<24x16xf32>
    %122 = arith.addf %116, %121 : vector<24x16xf32>
    %c6_121 = arith.constant 6 : index
    %c0_122 = arith.constant 0 : index
    %123 = vector.load %arg12[%c6_121, %c0_122] : memref<38x16xf32, #tpu.memory_space<vmem>>, vector<24x16xf32>
    %124 = arith.truncf %123 : vector<24x16xf32> to vector<24x16xbf16>
    %c3_123 = arith.constant 3 : index
    %c0_124 = arith.constant 0 : index
    %c0_125 = arith.constant 0 : index
    %125 = vector.load %arg8[%c3_123, %c0_124, %c0_125] : memref<9x16x16xbf16, #tpu.memory_space<vmem>>, vector<1x16x16xbf16>
    %126 = vector.shape_cast %125 : vector<1x16x16xbf16> to vector<16x16xbf16>
    %cst_126 = arith.constant dense<0.000000e+00> : vector<24x16xf32>
    %127 = tpu.matmul %124, %126, %cst_126 {dimension_numbers = #tpu.dot_dimension_numbers<[1], [0], [0], [1], [0, 0, 1, 1], [], []>} : vector<24x16xbf16>, vector<16x16xbf16>, vector<24x16xf32> -> vector<24x16xf32>
    %128 = arith.addf %122, %127 : vector<24x16xf32>
    %c7_127 = arith.constant 7 : index
    %c0_128 = arith.constant 0 : index
    %129 = vector.load %arg12[%c7_127, %c0_128] : memref<38x16xf32, #tpu.memory_space<vmem>>, vector<24x16xf32>
    %130 = arith.truncf %129 : vector<24x16xf32> to vector<24x16xbf16>
    %c4_129 = arith.constant 4 : index
    %c0_130 = arith.constant 0 : index
    %c0_131 = arith.constant 0 : index
    %131 = vector.load %arg8[%c4_129, %c0_130, %c0_131] : memref<9x16x16xbf16, #tpu.memory_space<vmem>>, vector<1x16x16xbf16>
    %132 = vector.shape_cast %131 : vector<1x16x16xbf16> to vector<16x16xbf16>
    %cst_132 = arith.constant dense<0.000000e+00> : vector<24x16xf32>
    %133 = tpu.matmul %130, %132, %cst_132 {dimension_numbers = #tpu.dot_dimension_numbers<[1], [0], [0], [1], [0, 0, 1, 1], [], []>} : vector<24x16xbf16>, vector<16x16xbf16>, vector<24x16xf32> -> vector<24x16xf32>
    %134 = arith.addf %128, %133 : vector<24x16xf32>
    %c8_133 = arith.constant 8 : index
    %c0_134 = arith.constant 0 : index
    %135 = vector.load %arg12[%c8_133, %c0_134] : memref<38x16xf32, #tpu.memory_space<vmem>>, vector<24x16xf32>
    %136 = arith.truncf %135 : vector<24x16xf32> to vector<24x16xbf16>
    %c5_135 = arith.constant 5 : index
    %c0_136 = arith.constant 0 : index
    %c0_137 = arith.constant 0 : index
    %137 = vector.load %arg8[%c5_135, %c0_136, %c0_137] : memref<9x16x16xbf16, #tpu.memory_space<vmem>>, vector<1x16x16xbf16>
    %138 = vector.shape_cast %137 : vector<1x16x16xbf16> to vector<16x16xbf16>
    %cst_138 = arith.constant dense<0.000000e+00> : vector<24x16xf32>
    %139 = tpu.matmul %136, %138, %cst_138 {dimension_numbers = #tpu.dot_dimension_numbers<[1], [0], [0], [1], [0, 0, 1, 1], [], []>} : vector<24x16xbf16>, vector<16x16xbf16>, vector<24x16xf32> -> vector<24x16xf32>
    %140 = arith.addf %134, %139 : vector<24x16xf32>
    %c12 = arith.constant 12 : index
    %c0_139 = arith.constant 0 : index
    %141 = vector.load %arg12[%c12, %c0_139] : memref<38x16xf32, #tpu.memory_space<vmem>>, vector<24x16xf32>
    %142 = arith.truncf %141 : vector<24x16xf32> to vector<24x16xbf16>
    %c6_140 = arith.constant 6 : index
    %c0_141 = arith.constant 0 : index
    %c0_142 = arith.constant 0 : index
    %143 = vector.load %arg8[%c6_140, %c0_141, %c0_142] : memref<9x16x16xbf16, #tpu.memory_space<vmem>>, vector<1x16x16xbf16>
    %144 = vector.shape_cast %143 : vector<1x16x16xbf16> to vector<16x16xbf16>
    %cst_143 = arith.constant dense<0.000000e+00> : vector<24x16xf32>
    %145 = tpu.matmul %142, %144, %cst_143 {dimension_numbers = #tpu.dot_dimension_numbers<[1], [0], [0], [1], [0, 0, 1, 1], [], []>} : vector<24x16xbf16>, vector<16x16xbf16>, vector<24x16xf32> -> vector<24x16xf32>
    %146 = arith.addf %140, %145 : vector<24x16xf32>
    %c13 = arith.constant 13 : index
    %c0_144 = arith.constant 0 : index
    %147 = vector.load %arg12[%c13, %c0_144] : memref<38x16xf32, #tpu.memory_space<vmem>>, vector<24x16xf32>
    %148 = arith.truncf %147 : vector<24x16xf32> to vector<24x16xbf16>
    %c7_145 = arith.constant 7 : index
    %c0_146 = arith.constant 0 : index
    %c0_147 = arith.constant 0 : index
    %149 = vector.load %arg8[%c7_145, %c0_146, %c0_147] : memref<9x16x16xbf16, #tpu.memory_space<vmem>>, vector<1x16x16xbf16>
    %150 = vector.shape_cast %149 : vector<1x16x16xbf16> to vector<16x16xbf16>
    %cst_148 = arith.constant dense<0.000000e+00> : vector<24x16xf32>
    %151 = tpu.matmul %148, %150, %cst_148 {dimension_numbers = #tpu.dot_dimension_numbers<[1], [0], [0], [1], [0, 0, 1, 1], [], []>} : vector<24x16xbf16>, vector<16x16xbf16>, vector<24x16xf32> -> vector<24x16xf32>
    %152 = arith.addf %146, %151 : vector<24x16xf32>
    %c14 = arith.constant 14 : index
    %c0_149 = arith.constant 0 : index
    %153 = vector.load %arg12[%c14, %c0_149] : memref<38x16xf32, #tpu.memory_space<vmem>>, vector<24x16xf32>
    %154 = arith.truncf %153 : vector<24x16xf32> to vector<24x16xbf16>
    %c8_150 = arith.constant 8 : index
    %c0_151 = arith.constant 0 : index
    %c0_152 = arith.constant 0 : index
    %155 = vector.load %arg8[%c8_150, %c0_151, %c0_152] : memref<9x16x16xbf16, #tpu.memory_space<vmem>>, vector<1x16x16xbf16>
    %156 = vector.shape_cast %155 : vector<1x16x16xbf16> to vector<16x16xbf16>
    %cst_153 = arith.constant dense<0.000000e+00> : vector<24x16xf32>
    %157 = tpu.matmul %154, %156, %cst_153 {dimension_numbers = #tpu.dot_dimension_numbers<[1], [0], [0], [1], [0, 0, 1, 1], [], []>} : vector<24x16xbf16>, vector<16x16xbf16>, vector<24x16xf32> -> vector<24x16xf32>
    %158 = arith.addf %152, %157 : vector<24x16xf32>
    %c0_154 = arith.constant 0 : index
    %c0_155 = arith.constant 0 : index
    %159 = vector.load %arg9[%c0_154, %c0_155] : memref<1x16xf32, #tpu.memory_space<vmem>>, vector<1x16xf32>
    %160 = vector.broadcast %159 : vector<1x16xf32> to vector<24x16xf32>
    %161 = arith.addf %158, %160 : vector<24x16xf32>
    %162 = arith.addf %161, %92 : vector<24x16xf32>
    %cst_156 = arith.constant 0.000000e+00 : f32
    %163 = vector.broadcast %cst_156 : f32 to vector<24x16xf32>
    %164 = arith.maximumf %162, %163 : vector<24x16xf32>
    %165 = vector.broadcast %0 : vector<24x1xf32> to vector<24x16xf32>
    %166 = arith.mulf %164, %165 : vector<24x16xf32>
    %167 = arith.truncf %166 : vector<24x16xf32> to vector<24x16xbf16>
    %c0_157 = arith.constant 0 : index
    %c0_158 = arith.constant 0 : index
    %c0_159 = arith.constant 0 : index
    %168 = vector.load %arg11[%c0_157, %c0_158, %c0_159] : memref<1x24x16xbf16, #tpu.memory_space<vmem>>, vector<1x24x16xbf16>
    %169 = vector.shape_cast %168 : vector<1x24x16xbf16> to vector<24x16xbf16>
    %170 = vector.shape_cast %167 : vector<24x16xbf16> to vector<1x24x16xbf16>
    tpu.vector_store %arg11[%c0_157, %c0_158, %c0_159], %170 {strides = array<i32>} : memref<1x24x16xbf16, #tpu.memory_space<vmem>>, vector<1x24x16xbf16>,
    return
  }
  func.func @transform_0(%arg0: i32) -> (i32, i32, i32) {
    %c0_i32 = arith.constant 0 : i32
    %c0_i32_0 = arith.constant 0 : i32
    %c0_i32_1 = arith.constant 0 : i32
    return %arg0, %c0_i32, %c0_i32_0 : i32, i32, i32
  }
  func.func @transform_1(%arg0: i32) -> (i32, i32, i32) {
    %c0_i32 = arith.constant 0 : i32
    %c0_i32_0 = arith.constant 0 : i32
    %c0_i32_1 = arith.constant 0 : i32
    return %arg0, %c0_i32, %c0_i32_0 : i32, i32, i32
  }
  func.func @transform_2(%arg0: i32) -> (i32, i32, i32) {
    %c0_i32 = arith.constant 0 : i32
    %c0_i32_0 = arith.constant 0 : i32
    %c0_i32_1 = arith.constant 0 : i32
    return %arg0, %c0_i32, %c0_i32_0 : i32, i32, i32
  }
  func.func @transform_3(%arg0: i32) -> (i32, i32, i32) {
    %c0_i32 = arith.constant 0 : i32
    %c0_i32_0 = arith.constant 0 : i32
    %c0_i32_1 = arith.constant 0 : i32
    return %arg0, %c0_i32, %c0_i32_0 : i32, i32, i32
  }
  func.func @transform_4(%arg0: i32) -> (i32, i32) {
    %c0_i32 = arith.constant 0 : i32
    %c0_i32_0 = arith.constant 0 : i32
    %c0_i32_1 = arith.constant 0 : i32
    return %c0_i32, %c0_i32_0 : i32, i32
  }
  func.func @transform_5(%arg0: i32) -> (i32, i32, i32) {
    %c0_i32 = arith.constant 0 : i32
    %c0_i32_0 = arith.constant 0 : i32
    %c0_i32_1 = arith.constant 0 : i32
    %c0_i32_2 = arith.constant 0 : i32
    return %c0_i32, %c0_i32_0, %c0_i32_1 : i32, i32, i32
  }
  func.func @transform_6(%arg0: i32) -> (i32, i32) {
    %c0_i32 = arith.constant 0 : i32
    %c0_i32_0 = arith.constant 0 : i32
    %c0_i32_1 = arith.constant 0 : i32
    return %c0_i32, %c0_i32_0 : i32, i32
  }
  func.func @transform_7(%arg0: i32) -> (i32, i32, i32) {
    %c0_i32 = arith.constant 0 : i32
    %c0_i32_0 = arith.constant 0 : i32
    %c0_i32_1 = arith.constant 0 : i32
    %c0_i32_2 = arith.constant 0 : i32
    return %c0_i32, %c0_i32_0, %c0_i32_1 : i32, i32, i32
  }
  func.func @transform_8(%arg0: i32) -> (i32, i32) {
    %c0_i32 = arith.constant 0 : i32
    %c0_i32_0 = arith.constant 0 : i32
    %c0_i32_1 = arith.constant 0 : i32
    return %c0_i32, %c0_i32_0 : i32, i32
  }
  func.func @transform_9(%arg0: i32) -> (i32, i32, i32) {
    %c0_i32 = arith.constant 0 : i32
    %c0_i32_0 = arith.constant 0 : i32
    %c0_i32_1 = arith.constant 0 : i32
    %c0_i32_2 = arith.constant 0 : i32
    return %c0_i32, %c0_i32_0, %c0_i32_1 : i32, i32, i32
  }
  func.func @transform_10(%arg0: i32) -> (i32, i32, i32) {
    %c0_i32 = arith.constant 0 : i32
    %c0_i32_0 = arith.constant 0 : i32
    %c0_i32_1 = arith.constant 0 : i32
    return %arg0, %c0_i32, %c0_i32_0 : i32, i32, i32
  }
}

module attributes {stable_mosaic.version = 11 : i64} {
  func.func @_basic_block_kernel(%arg0: i32, %arg1: memref<1x38x16xbf16, #tpu.memory_space<vmem>>, %arg2: memref<24x1xf32, #tpu.memory_space<vmem>>, %arg3: memref<9x16x16xbf16, #tpu.memory_space<vmem>>, %arg4: memref<1x16xf32, #tpu.memory_space<vmem>>, %arg5: memref<9x16x16xbf16, #tpu.memory_space<vmem>>, %arg6: memref<1x16xf32, #tpu.memory_space<vmem>>, %arg7: memref<1x24x16xbf16, #tpu.memory_space<vmem>>, %arg8: memref<38x16xf32, #tpu.memory_space<vmem>>) attributes {dimension_semantics = [#tpu.dimension_semantics<parallel>], iteration_bounds = array<i64: 2>, scalar_prefetch = 0 : i64, scratch_operands = 1 : i64, tpu.core_type = #tpu.core_type<tc>, window_params = [{transform_indices = @transform_0, window_bounds = array<i64: 1, 38, 16>}, {pipeline_mode = #tpu.pipeline_mode<synchronous>, transform_indices = @transform_1, window_bounds = array<i64: 24, 1>}, {pipeline_mode = #tpu.pipeline_mode<synchronous>, transform_indices = @transform_2, window_bounds = array<i64: 9, 16, 16>}, {pipeline_mode = #tpu.pipeline_mode<synchronous>, transform_indices = @transform_3, window_bounds = array<i64: 1, 16>}, {pipeline_mode = #tpu.pipeline_mode<synchronous>, transform_indices = @transform_4, window_bounds = array<i64: 9, 16, 16>}, {pipeline_mode = #tpu.pipeline_mode<synchronous>, transform_indices = @transform_5, window_bounds = array<i64: 1, 16>}, {transform_indices = @transform_6, window_bounds = array<i64: 1, 24, 16>}]} {
    %c0 = arith.constant 0 : index
    %c0_0 = arith.constant 0 : index
    %0 = vector.load %arg2[%c0, %c0_0] : memref<24x1xf32, #tpu.memory_space<vmem>>, vector<24x1xf32>
    %cst = arith.constant 0.000000e+00 : f32
    %1 = vector.broadcast %cst : f32 to vector<24x16xf32>
    %c0_1 = arith.constant 0 : index
    %c0_2 = arith.constant 0 : index
    %c0_3 = arith.constant 0 : index
    %2 = vector.load %arg1[%c0_1, %c0_2, %c0_3] : memref<1x38x16xbf16, #tpu.memory_space<vmem>>, vector<1x24x16xbf16>
    %3 = vector.shape_cast %2 : vector<1x24x16xbf16> to vector<24x16xbf16>
    %c0_4 = arith.constant 0 : index
    %c0_5 = arith.constant 0 : index
    %c0_6 = arith.constant 0 : index
    %4 = vector.load %arg3[%c0_4, %c0_5, %c0_6] : memref<9x16x16xbf16, #tpu.memory_space<vmem>>, vector<1x16x16xbf16>
    %5 = vector.shape_cast %4 : vector<1x16x16xbf16> to vector<16x16xbf16>
    %cst_7 = arith.constant dense<0.000000e+00> : vector<24x16xf32>
    %6 = tpu.matmul %3, %5, %cst_7 {dimension_numbers = #tpu.dot_dimension_numbers<[1], [0], [0], [1], [0, 0, 1, 1], [], []>} : vector<24x16xbf16>, vector<16x16xbf16>, vector<24x16xf32> -> vector<24x16xf32>
    %7 = arith.addf %1, %6 : vector<24x16xf32>
    %c0_8 = arith.constant 0 : index
    %c1 = arith.constant 1 : index
    %c0_9 = arith.constant 0 : index
    %8 = vector.load %arg1[%c0_8, %c1, %c0_9] : memref<1x38x16xbf16, #tpu.memory_space<vmem>>, vector<1x24x16xbf16>
    %9 = vector.shape_cast %8 : vector<1x24x16xbf16> to vector<24x16xbf16>
    %c1_10 = arith.constant 1 : index
    %c0_11 = arith.constant 0 : index
    %c0_12 = arith.constant 0 : index
    %10 = vector.load %arg3[%c1_10, %c0_11, %c0_12] : memref<9x16x16xbf16, #tpu.memory_space<vmem>>, vector<1x16x16xbf16>
    %11 = vector.shape_cast %10 : vector<1x16x16xbf16> to vector<16x16xbf16>
    %cst_13 = arith.constant dense<0.000000e+00> : vector<24x16xf32>
    %12 = tpu.matmul %9, %11, %cst_13 {dimension_numbers = #tpu.dot_dimension_numbers<[1], [0], [0], [1], [0, 0, 1, 1], [], []>} : vector<24x16xbf16>, vector<16x16xbf16>, vector<24x16xf32> -> vector<24x16xf32>
    %13 = arith.addf %7, %12 : vector<24x16xf32>
    %c0_14 = arith.constant 0 : index
    %c2 = arith.constant 2 : index
    %c0_15 = arith.constant 0 : index
    %14 = vector.load %arg1[%c0_14, %c2, %c0_15] : memref<1x38x16xbf16, #tpu.memory_space<vmem>>, vector<1x24x16xbf16>
    %15 = vector.shape_cast %14 : vector<1x24x16xbf16> to vector<24x16xbf16>
    %c2_16 = arith.constant 2 : index
    %c0_17 = arith.constant 0 : index
    %c0_18 = arith.constant 0 : index
    %16 = vector.load %arg3[%c2_16, %c0_17, %c0_18] : memref<9x16x16xbf16, #tpu.memory_space<vmem>>, vector<1x16x16xbf16>
    %17 = vector.shape_cast %16 : vector<1x16x16xbf16> to vector<16x16xbf16>
    %cst_19 = arith.constant dense<0.000000e+00> : vector<24x16xf32>
    %18 = tpu.matmul %15, %17, %cst_19 {dimension_numbers = #tpu.dot_dimension_numbers<[1], [0], [0], [1], [0, 0, 1, 1], [], []>} : vector<24x16xbf16>, vector<16x16xbf16>, vector<24x16xf32> -> vector<24x16xf32>
    %19 = arith.addf %13, %18 : vector<24x16xf32>
    %c0_20 = arith.constant 0 : index
    %c6 = arith.constant 6 : index
    %c0_21 = arith.constant 0 : index
    %20 = vector.load %arg1[%c0_20, %c6, %c0_21] : memref<1x38x16xbf16, #tpu.memory_space<vmem>>, vector<1x24x16xbf16>
    %21 = vector.shape_cast %20 : vector<1x24x16xbf16> to vector<24x16xbf16>
    %c3 = arith.constant 3 : index
    %c0_22 = arith.constant 0 : index
    %c0_23 = arith.constant 0 : index
    %22 = vector.load %arg3[%c3, %c0_22, %c0_23] : memref<9x16x16xbf16, #tpu.memory_space<vmem>>, vector<1x16x16xbf16>
    %23 = vector.shape_cast %22 : vector<1x16x16xbf16> to vector<16x16xbf16>
    %cst_24 = arith.constant dense<0.000000e+00> : vector<24x16xf32>
    %24 = tpu.matmul %21, %23, %cst_24 {dimension_numbers = #tpu.dot_dimension_numbers<[1], [0], [0], [1], [0, 0, 1, 1], [], []>} : vector<24x16xbf16>, vector<16x16xbf16>, vector<24x16xf32> -> vector<24x16xf32>
    %25 = arith.addf %19, %24 : vector<24x16xf32>
    %c0_25 = arith.constant 0 : index
    %c7 = arith.constant 7 : index
    %c0_26 = arith.constant 0 : index
    %26 = vector.load %arg1[%c0_25, %c7, %c0_26] : memref<1x38x16xbf16, #tpu.memory_space<vmem>>, vector<1x24x16xbf16>
    %27 = vector.shape_cast %26 : vector<1x24x16xbf16> to vector<24x16xbf16>
    %c4 = arith.constant 4 : index
    %c0_27 = arith.constant 0 : index
    %c0_28 = arith.constant 0 : index
    %28 = vector.load %arg3[%c4, %c0_27, %c0_28] : memref<9x16x16xbf16, #tpu.memory_space<vmem>>, vector<1x16x16xbf16>
    %29 = vector.shape_cast %28 : vector<1x16x16xbf16> to vector<16x16xbf16>
    %cst_29 = arith.constant dense<0.000000e+00> : vector<24x16xf32>
    %30 = tpu.matmul %27, %29, %cst_29 {dimension_numbers = #tpu.dot_dimension_numbers<[1], [0], [0], [1], [0, 0, 1, 1], [], []>} : vector<24x16xbf16>, vector<16x16xbf16>, vector<24x16xf32> -> vector<24x16xf32>
    %31 = arith.addf %25, %30 : vector<24x16xf32>
    %c0_30 = arith.constant 0 : index
    %c8 = arith.constant 8 : index
    %c0_31 = arith.constant 0 : index
    %32 = vector.load %arg1[%c0_30, %c8, %c0_31] : memref<1x38x16xbf16, #tpu.memory_space<vmem>>, vector<1x24x16xbf16>
    %33 = vector.shape_cast %32 : vector<1x24x16xbf16> to vector<24x16xbf16>
    %c5 = arith.constant 5 : index
    %c0_32 = arith.constant 0 : index
    %c0_33 = arith.constant 0 : index
    %34 = vector.load %arg3[%c5, %c0_32, %c0_33] : memref<9x16x16xbf16, #tpu.memory_space<vmem>>, vector<1x16x16xbf16>
    %35 = vector.shape_cast %34 : vector<1x16x16xbf16> to vector<16x16xbf16>
    %cst_34 = arith.constant dense<0.000000e+00> : vector<24x16xf32>
    %36 = tpu.matmul %33, %35, %cst_34 {dimension_numbers = #tpu.dot_dimension_numbers<[1], [0], [0], [1], [0, 0, 1, 1], [], []>} : vector<24x16xbf16>, vector<16x16xbf16>, vector<24x16xf32> -> vector<24x16xf32>
    %37 = arith.addf %31, %36 : vector<24x16xf32>
    %c0_35 = arith.constant 0 : index
    %c12 = arith.constant 12 : index
    %c0_36 = arith.constant 0 : index
    %38 = vector.load %arg1[%c0_35, %c12, %c0_36] : memref<1x38x16xbf16, #tpu.memory_space<vmem>>, vector<1x24x16xbf16>
    %39 = vector.shape_cast %38 : vector<1x24x16xbf16> to vector<24x16xbf16>
    %c6_37 = arith.constant 6 : index
    %c0_38 = arith.constant 0 : index
    %c0_39 = arith.constant 0 : index
    %40 = vector.load %arg3[%c6_37, %c0_38, %c0_39] : memref<9x16x16xbf16, #tpu.memory_space<vmem>>, vector<1x16x16xbf16>
    %41 = vector.shape_cast %40 : vector<1x16x16xbf16> to vector<16x16xbf16>
    %cst_40 = arith.constant dense<0.000000e+00> : vector<24x16xf32>
    %42 = tpu.matmul %39, %41, %cst_40 {dimension_numbers = #tpu.dot_dimension_numbers<[1], [0], [0], [1], [0, 0, 1, 1], [], []>} : vector<24x16xbf16>, vector<16x16xbf16>, vector<24x16xf32> -> vector<24x16xf32>
    %43 = arith.addf %37, %42 : vector<24x16xf32>
    %c0_41 = arith.constant 0 : index
    %c13 = arith.constant 13 : index
    %c0_42 = arith.constant 0 : index
    %44 = vector.load %arg1[%c0_41, %c13, %c0_42] : memref<1x38x16xbf16, #tpu.memory_space<vmem>>, vector<1x24x16xbf16>
    %45 = vector.shape_cast %44 : vector<1x24x16xbf16> to vector<24x16xbf16>
    %c7_43 = arith.constant 7 : index
    %c0_44 = arith.constant 0 : index
    %c0_45 = arith.constant 0 : index
    %46 = vector.load %arg3[%c7_43, %c0_44, %c0_45] : memref<9x16x16xbf16, #tpu.memory_space<vmem>>, vector<1x16x16xbf16>
    %47 = vector.shape_cast %46 : vector<1x16x16xbf16> to vector<16x16xbf16>
    %cst_46 = arith.constant dense<0.000000e+00> : vector<24x16xf32>
    %48 = tpu.matmul %45, %47, %cst_46 {dimension_numbers = #tpu.dot_dimension_numbers<[1], [0], [0], [1], [0, 0, 1, 1], [], []>} : vector<24x16xbf16>, vector<16x16xbf16>, vector<24x16xf32> -> vector<24x16xf32>
    %49 = arith.addf %43, %48 : vector<24x16xf32>
    %c0_47 = arith.constant 0 : index
    %c14 = arith.constant 14 : index
    %c0_48 = arith.constant 0 : index
    %50 = vector.load %arg1[%c0_47, %c14, %c0_48] : memref<1x38x16xbf16, #tpu.memory_space<vmem>>, vector<1x24x16xbf16>
    %51 = vector.shape_cast %50 : vector<1x24x16xbf16> to vector<24x16xbf16>
    %c8_49 = arith.constant 8 : index
    %c0_50 = arith.constant 0 : index
    %c0_51 = arith.constant 0 : index
    %52 = vector.load %arg3[%c8_49, %c0_50, %c0_51] : memref<9x16x16xbf16, #tpu.memory_space<vmem>>, vector<1x16x16xbf16>
    %53 = vector.shape_cast %52 : vector<1x16x16xbf16> to vector<16x16xbf16>
    %cst_52 = arith.constant dense<0.000000e+00> : vector<24x16xf32>
    %54 = tpu.matmul %51, %53, %cst_52 {dimension_numbers = #tpu.dot_dimension_numbers<[1], [0], [0], [1], [0, 0, 1, 1], [], []>} : vector<24x16xbf16>, vector<16x16xbf16>, vector<24x16xf32> -> vector<24x16xf32>
    %55 = arith.addf %49, %54 : vector<24x16xf32>
    %c0_53 = arith.constant 0 : index
    %c0_54 = arith.constant 0 : index
    %56 = vector.load %arg4[%c0_53, %c0_54] : memref<1x16xf32, #tpu.memory_space<vmem>>, vector<1x16xf32>
    %57 = vector.broadcast %56 : vector<1x16xf32> to vector<24x16xf32>
    %58 = arith.addf %55, %57 : vector<24x16xf32>
    %cst_55 = arith.constant 0.000000e+00 : f32
    %59 = vector.broadcast %cst_55 : f32 to vector<24x16xf32>
    %60 = arith.maximumf %58, %59 : vector<24x16xf32>
    %61 = vector.broadcast %0 : vector<24x1xf32> to vector<24x16xf32>
    %62 = arith.mulf %60, %61 : vector<24x16xf32>
    %cst_56 = arith.constant 0.000000e+00 : f32
    %63 = vector.broadcast %cst_56 : f32 to vector<7x16xf32>
    %c0_57 = arith.constant 0 : index
    %c0_58 = arith.constant 0 : index
    %64 = vector.load %arg8[%c0_57, %c0_58] : memref<38x16xf32, #tpu.memory_space<vmem>>, vector<7x16xf32>
    tpu.vector_store %arg8[%c0_57, %c0_58], %63 {strides = array<i32>} : memref<38x16xf32, #tpu.memory_space<vmem>>, vector<7x16xf32>,
    %c31 = arith.constant 31 : index
    %c0_59 = arith.constant 0 : index
    %65 = vector.load %arg8[%c31, %c0_59] : memref<38x16xf32, #tpu.memory_space<vmem>>, vector<7x16xf32>
    tpu.vector_store %arg8[%c31, %c0_59], %63 {strides = array<i32>} : memref<38x16xf32, #tpu.memory_space<vmem>>, vector<7x16xf32>,
    %c7_60 = arith.constant 7 : index
    %c0_61 = arith.constant 0 : index
    %66 = vector.load %arg8[%c7_60, %c0_61] : memref<38x16xf32, #tpu.memory_space<vmem>>, vector<24x16xf32>
    tpu.vector_store %arg8[%c7_60, %c0_61], %62 {strides = array<i32>} : memref<38x16xf32, #tpu.memory_space<vmem>>, vector<24x16xf32>,
    %c0_62 = arith.constant 0 : index
    %c7_63 = arith.constant 7 : index
    %c0_64 = arith.constant 0 : index
    %67 = vector.load %arg1[%c0_62, %c7_63, %c0_64] : memref<1x38x16xbf16, #tpu.memory_space<vmem>>, vector<1x24x16xbf16>
    %68 = vector.shape_cast %67 : vector<1x24x16xbf16> to vector<24x16xbf16>
    %69 = arith.extf %68 : vector<24x16xbf16> to vector<24x16xf32>
    %cst_65 = arith.constant 0.000000e+00 : f32
    %70 = vector.broadcast %cst_65 : f32 to vector<24x16xf32>
    %c0_66 = arith.constant 0 : index
    %c0_67 = arith.constant 0 : index
    %71 = vector.load %arg8[%c0_66, %c0_67] : memref<38x16xf32, #tpu.memory_space<vmem>>, vector<24x16xf32>
    %72 = arith.truncf %71 : vector<24x16xf32> to vector<24x16xbf16>
    %c0_68 = arith.constant 0 : index
    %c0_69 = arith.constant 0 : index
    %c0_70 = arith.constant 0 : index
    %73 = vector.load %arg5[%c0_68, %c0_69, %c0_70] : memref<9x16x16xbf16, #tpu.memory_space<vmem>>, vector<1x16x16xbf16>
    %74 = vector.shape_cast %73 : vector<1x16x16xbf16> to vector<16x16xbf16>
    %cst_71 = arith.constant dense<0.000000e+00> : vector<24x16xf32>
    %75 = tpu.matmul %72, %74, %cst_71 {dimension_numbers = #tpu.dot_dimension_numbers<[1], [0], [0], [1], [0, 0, 1, 1], [], []>} : vector<24x16xbf16>, vector<16x16xbf16>, vector<24x16xf32> -> vector<24x16xf32>
    %76 = arith.addf %70, %75 : vector<24x16xf32>
    %c1_72 = arith.constant 1 : index
    %c0_73 = arith.constant 0 : index
    %77 = vector.load %arg8[%c1_72, %c0_73] : memref<38x16xf32, #tpu.memory_space<vmem>>, vector<24x16xf32>
    %78 = arith.truncf %77 : vector<24x16xf32> to vector<24x16xbf16>
    %c1_74 = arith.constant 1 : index
    %c0_75 = arith.constant 0 : index
    %c0_76 = arith.constant 0 : index
    %79 = vector.load %arg5[%c1_74, %c0_75, %c0_76] : memref<9x16x16xbf16, #tpu.memory_space<vmem>>, vector<1x16x16xbf16>
    %80 = vector.shape_cast %79 : vector<1x16x16xbf16> to vector<16x16xbf16>
    %cst_77 = arith.constant dense<0.000000e+00> : vector<24x16xf32>
    %81 = tpu.matmul %78, %80, %cst_77 {dimension_numbers = #tpu.dot_dimension_numbers<[1], [0], [0], [1], [0, 0, 1, 1], [], []>} : vector<24x16xbf16>, vector<16x16xbf16>, vector<24x16xf32> -> vector<24x16xf32>
    %82 = arith.addf %76, %81 : vector<24x16xf32>
    %c2_78 = arith.constant 2 : index
    %c0_79 = arith.constant 0 : index
    %83 = vector.load %arg8[%c2_78, %c0_79] : memref<38x16xf32, #tpu.memory_space<vmem>>, vector<24x16xf32>
    %84 = arith.truncf %83 : vector<24x16xf32> to vector<24x16xbf16>
    %c2_80 = arith.constant 2 : index
    %c0_81 = arith.constant 0 : index
    %c0_82 = arith.constant 0 : index
    %85 = vector.load %arg5[%c2_80, %c0_81, %c0_82] : memref<9x16x16xbf16, #tpu.memory_space<vmem>>, vector<1x16x16xbf16>
    %86 = vector.shape_cast %85 : vector<1x16x16xbf16> to vector<16x16xbf16>
    %cst_83 = arith.constant dense<0.000000e+00> : vector<24x16xf32>
    %87 = tpu.matmul %84, %86, %cst_83 {dimension_numbers = #tpu.dot_dimension_numbers<[1], [0], [0], [1], [0, 0, 1, 1], [], []>} : vector<24x16xbf16>, vector<16x16xbf16>, vector<24x16xf32> -> vector<24x16xf32>
    %88 = arith.addf %82, %87 : vector<24x16xf32>
    %c6_84 = arith.constant 6 : index
    %c0_85 = arith.constant 0 : index
    %89 = vector.load %arg8[%c6_84, %c0_85] : memref<38x16xf32, #tpu.memory_space<vmem>>, vector<24x16xf32>
    %90 = arith.truncf %89 : vector<24x16xf32> to vector<24x16xbf16>
    %c3_86 = arith.constant 3 : index
    %c0_87 = arith.constant 0 : index
    %c0_88 = arith.constant 0 : index
    %91 = vector.load %arg5[%c3_86, %c0_87, %c0_88] : memref<9x16x16xbf16, #tpu.memory_space<vmem>>, vector<1x16x16xbf16>
    %92 = vector.shape_cast %91 : vector<1x16x16xbf16> to vector<16x16xbf16>
    %cst_89 = arith.constant dense<0.000000e+00> : vector<24x16xf32>
    %93 = tpu.matmul %90, %92, %cst_89 {dimension_numbers = #tpu.dot_dimension_numbers<[1], [0], [0], [1], [0, 0, 1, 1], [], []>} : vector<24x16xbf16>, vector<16x16xbf16>, vector<24x16xf32> -> vector<24x16xf32>
    %94 = arith.addf %88, %93 : vector<24x16xf32>
    %c7_90 = arith.constant 7 : index
    %c0_91 = arith.constant 0 : index
    %95 = vector.load %arg8[%c7_90, %c0_91] : memref<38x16xf32, #tpu.memory_space<vmem>>, vector<24x16xf32>
    %96 = arith.truncf %95 : vector<24x16xf32> to vector<24x16xbf16>
    %c4_92 = arith.constant 4 : index
    %c0_93 = arith.constant 0 : index
    %c0_94 = arith.constant 0 : index
    %97 = vector.load %arg5[%c4_92, %c0_93, %c0_94] : memref<9x16x16xbf16, #tpu.memory_space<vmem>>, vector<1x16x16xbf16>
    %98 = vector.shape_cast %97 : vector<1x16x16xbf16> to vector<16x16xbf16>
    %cst_95 = arith.constant dense<0.000000e+00> : vector<24x16xf32>
    %99 = tpu.matmul %96, %98, %cst_95 {dimension_numbers = #tpu.dot_dimension_numbers<[1], [0], [0], [1], [0, 0, 1, 1], [], []>} : vector<24x16xbf16>, vector<16x16xbf16>, vector<24x16xf32> -> vector<24x16xf32>
    %100 = arith.addf %94, %99 : vector<24x16xf32>
    %c8_96 = arith.constant 8 : index
    %c0_97 = arith.constant 0 : index
    %101 = vector.load %arg8[%c8_96, %c0_97] : memref<38x16xf32, #tpu.memory_space<vmem>>, vector<24x16xf32>
    %102 = arith.truncf %101 : vector<24x16xf32> to vector<24x16xbf16>
    %c5_98 = arith.constant 5 : index
    %c0_99 = arith.constant 0 : index
    %c0_100 = arith.constant 0 : index
    %103 = vector.load %arg5[%c5_98, %c0_99, %c0_100] : memref<9x16x16xbf16, #tpu.memory_space<vmem>>, vector<1x16x16xbf16>
    %104 = vector.shape_cast %103 : vector<1x16x16xbf16> to vector<16x16xbf16>
    %cst_101 = arith.constant dense<0.000000e+00> : vector<24x16xf32>
    %105 = tpu.matmul %102, %104, %cst_101 {dimension_numbers = #tpu.dot_dimension_numbers<[1], [0], [0], [1], [0, 0, 1, 1], [], []>} : vector<24x16xbf16>, vector<16x16xbf16>, vector<24x16xf32> -> vector<24x16xf32>
    %106 = arith.addf %100, %105 : vector<24x16xf32>
    %c12_102 = arith.constant 12 : index
    %c0_103 = arith.constant 0 : index
    %107 = vector.load %arg8[%c12_102, %c0_103] : memref<38x16xf32, #tpu.memory_space<vmem>>, vector<24x16xf32>
    %108 = arith.truncf %107 : vector<24x16xf32> to vector<24x16xbf16>
    %c6_104 = arith.constant 6 : index
    %c0_105 = arith.constant 0 : index
    %c0_106 = arith.constant 0 : index
    %109 = vector.load %arg5[%c6_104, %c0_105, %c0_106] : memref<9x16x16xbf16, #tpu.memory_space<vmem>>, vector<1x16x16xbf16>
    %110 = vector.shape_cast %109 : vector<1x16x16xbf16> to vector<16x16xbf16>
    %cst_107 = arith.constant dense<0.000000e+00> : vector<24x16xf32>
    %111 = tpu.matmul %108, %110, %cst_107 {dimension_numbers = #tpu.dot_dimension_numbers<[1], [0], [0], [1], [0, 0, 1, 1], [], []>} : vector<24x16xbf16>, vector<16x16xbf16>, vector<24x16xf32> -> vector<24x16xf32>
    %112 = arith.addf %106, %111 : vector<24x16xf32>
    %c13_108 = arith.constant 13 : index
    %c0_109 = arith.constant 0 : index
    %113 = vector.load %arg8[%c13_108, %c0_109] : memref<38x16xf32, #tpu.memory_space<vmem>>, vector<24x16xf32>
    %114 = arith.truncf %113 : vector<24x16xf32> to vector<24x16xbf16>
    %c7_110 = arith.constant 7 : index
    %c0_111 = arith.constant 0 : index
    %c0_112 = arith.constant 0 : index
    %115 = vector.load %arg5[%c7_110, %c0_111, %c0_112] : memref<9x16x16xbf16, #tpu.memory_space<vmem>>, vector<1x16x16xbf16>
    %116 = vector.shape_cast %115 : vector<1x16x16xbf16> to vector<16x16xbf16>
    %cst_113 = arith.constant dense<0.000000e+00> : vector<24x16xf32>
    %117 = tpu.matmul %114, %116, %cst_113 {dimension_numbers = #tpu.dot_dimension_numbers<[1], [0], [0], [1], [0, 0, 1, 1], [], []>} : vector<24x16xbf16>, vector<16x16xbf16>, vector<24x16xf32> -> vector<24x16xf32>
    %118 = arith.addf %112, %117 : vector<24x16xf32>
    %c14_114 = arith.constant 14 : index
    %c0_115 = arith.constant 0 : index
    %119 = vector.load %arg8[%c14_114, %c0_115] : memref<38x16xf32, #tpu.memory_space<vmem>>, vector<24x16xf32>
    %120 = arith.truncf %119 : vector<24x16xf32> to vector<24x16xbf16>
    %c8_116 = arith.constant 8 : index
    %c0_117 = arith.constant 0 : index
    %c0_118 = arith.constant 0 : index
    %121 = vector.load %arg5[%c8_116, %c0_117, %c0_118] : memref<9x16x16xbf16, #tpu.memory_space<vmem>>, vector<1x16x16xbf16>
    %122 = vector.shape_cast %121 : vector<1x16x16xbf16> to vector<16x16xbf16>
    %cst_119 = arith.constant dense<0.000000e+00> : vector<24x16xf32>
    %123 = tpu.matmul %120, %122, %cst_119 {dimension_numbers = #tpu.dot_dimension_numbers<[1], [0], [0], [1], [0, 0, 1, 1], [], []>} : vector<24x16xbf16>, vector<16x16xbf16>, vector<24x16xf32> -> vector<24x16xf32>
    %124 = arith.addf %118, %123 : vector<24x16xf32>
    %c0_120 = arith.constant 0 : index
    %c0_121 = arith.constant 0 : index
    %125 = vector.load %arg6[%c0_120, %c0_121] : memref<1x16xf32, #tpu.memory_space<vmem>>, vector<1x16xf32>
    %126 = vector.broadcast %125 : vector<1x16xf32> to vector<24x16xf32>
    %127 = arith.addf %124, %126 : vector<24x16xf32>
    %128 = arith.addf %127, %69 : vector<24x16xf32>
    %cst_122 = arith.constant 0.000000e+00 : f32
    %129 = vector.broadcast %cst_122 : f32 to vector<24x16xf32>
    %130 = arith.maximumf %128, %129 : vector<24x16xf32>
    %131 = vector.broadcast %0 : vector<24x1xf32> to vector<24x16xf32>
    %132 = arith.mulf %130, %131 : vector<24x16xf32>
    %133 = arith.truncf %132 : vector<24x16xf32> to vector<24x16xbf16>
    %c0_123 = arith.constant 0 : index
    %c0_124 = arith.constant 0 : index
    %c0_125 = arith.constant 0 : index
    %134 = vector.load %arg7[%c0_123, %c0_124, %c0_125] : memref<1x24x16xbf16, #tpu.memory_space<vmem>>, vector<1x24x16xbf16>
    %135 = vector.shape_cast %134 : vector<1x24x16xbf16> to vector<24x16xbf16>
    %136 = vector.shape_cast %133 : vector<24x16xbf16> to vector<1x24x16xbf16>
    tpu.vector_store %arg7[%c0_123, %c0_124, %c0_125], %136 {strides = array<i32>} : memref<1x24x16xbf16, #tpu.memory_space<vmem>>, vector<1x24x16xbf16>,
    return
  }
  func.func @transform_0(%arg0: i32) -> (i32, i32, i32) {
    %c0_i32 = arith.constant 0 : i32
    %c0_i32_0 = arith.constant 0 : i32
    %c0_i32_1 = arith.constant 0 : i32
    return %arg0, %c0_i32, %c0_i32_0 : i32, i32, i32
  }
  func.func @transform_1(%arg0: i32) -> (i32, i32) {
    %c0_i32 = arith.constant 0 : i32
    %c0_i32_0 = arith.constant 0 : i32
    %c0_i32_1 = arith.constant 0 : i32
    return %c0_i32, %c0_i32_0 : i32, i32
  }
  func.func @transform_2(%arg0: i32) -> (i32, i32, i32) {
    %c0_i32 = arith.constant 0 : i32
    %c0_i32_0 = arith.constant 0 : i32
    %c0_i32_1 = arith.constant 0 : i32
    %c0_i32_2 = arith.constant 0 : i32
    return %c0_i32, %c0_i32_0, %c0_i32_1 : i32, i32, i32
  }
  func.func @transform_3(%arg0: i32) -> (i32, i32) {
    %c0_i32 = arith.constant 0 : i32
    %c0_i32_0 = arith.constant 0 : i32
    %c0_i32_1 = arith.constant 0 : i32
    return %c0_i32, %c0_i32_0 : i32, i32
  }
  func.func @transform_4(%arg0: i32) -> (i32, i32, i32) {
    %c0_i32 = arith.constant 0 : i32
    %c0_i32_0 = arith.constant 0 : i32
    %c0_i32_1 = arith.constant 0 : i32
    %c0_i32_2 = arith.constant 0 : i32
    return %c0_i32, %c0_i32_0, %c0_i32_1 : i32, i32, i32
  }
  func.func @transform_5(%arg0: i32) -> (i32, i32) {
    %c0_i32 = arith.constant 0 : i32
    %c0_i32_0 = arith.constant 0 : i32
    %c0_i32_1 = arith.constant 0 : i32
    return %c0_i32, %c0_i32_0 : i32, i32
  }
  func.func @transform_6(%arg0: i32) -> (i32, i32, i32) {
    %c0_i32 = arith.constant 0 : i32
    %c0_i32_0 = arith.constant 0 : i32
    %c0_i32_1 = arith.constant 0 : i32
    return %arg0, %c0_i32, %c0_i32_0 : i32, i32, i32
  }
}

module attributes {stable_mosaic.version = 11 : i64} {
  func.func @_basic_block_kernel(%arg0: i32, %arg1: memref<1x18x32xbf16, #tpu.memory_space<vmem>>, %arg2: memref<8x1xf32, #tpu.memory_space<vmem>>, %arg3: memref<9x32x32xbf16, #tpu.memory_space<vmem>>, %arg4: memref<1x32xf32, #tpu.memory_space<vmem>>, %arg5: memref<9x32x32xbf16, #tpu.memory_space<vmem>>, %arg6: memref<1x32xf32, #tpu.memory_space<vmem>>, %arg7: memref<1x8x32xbf16, #tpu.memory_space<vmem>>, %arg8: memref<18x32xf32, #tpu.memory_space<vmem>>) attributes {dimension_semantics = [#tpu.dimension_semantics<parallel>], iteration_bounds = array<i64: 2>, scalar_prefetch = 0 : i64, scratch_operands = 1 : i64, tpu.core_type = #tpu.core_type<tc>, window_params = [{transform_indices = @transform_0, window_bounds = array<i64: 1, 18, 32>}, {pipeline_mode = #tpu.pipeline_mode<synchronous>, transform_indices = @transform_1, window_bounds = array<i64: 8, 1>}, {pipeline_mode = #tpu.pipeline_mode<synchronous>, transform_indices = @transform_2, window_bounds = array<i64: 9, 32, 32>}, {pipeline_mode = #tpu.pipeline_mode<synchronous>, transform_indices = @transform_3, window_bounds = array<i64: 1, 32>}, {pipeline_mode = #tpu.pipeline_mode<synchronous>, transform_indices = @transform_4, window_bounds = array<i64: 9, 32, 32>}, {pipeline_mode = #tpu.pipeline_mode<synchronous>, transform_indices = @transform_5, window_bounds = array<i64: 1, 32>}, {transform_indices = @transform_6, window_bounds = array<i64: 1, 8, 32>}]} {
    %c0 = arith.constant 0 : index
    %c0_0 = arith.constant 0 : index
    %0 = vector.load %arg2[%c0, %c0_0] : memref<8x1xf32, #tpu.memory_space<vmem>>, vector<8x1xf32>
    %cst = arith.constant 0.000000e+00 : f32
    %1 = vector.broadcast %cst : f32 to vector<8x32xf32>
    %c0_1 = arith.constant 0 : index
    %c0_2 = arith.constant 0 : index
    %c0_3 = arith.constant 0 : index
    %2 = vector.load %arg1[%c0_1, %c0_2, %c0_3] : memref<1x18x32xbf16, #tpu.memory_space<vmem>>, vector<1x8x32xbf16>
    %3 = vector.shape_cast %2 : vector<1x8x32xbf16> to vector<8x32xbf16>
    %c0_4 = arith.constant 0 : index
    %c0_5 = arith.constant 0 : index
    %c0_6 = arith.constant 0 : index
    %4 = vector.load %arg3[%c0_4, %c0_5, %c0_6] : memref<9x32x32xbf16, #tpu.memory_space<vmem>>, vector<1x32x32xbf16>
    %5 = vector.shape_cast %4 : vector<1x32x32xbf16> to vector<32x32xbf16>
    %cst_7 = arith.constant dense<0.000000e+00> : vector<8x32xf32>
    %6 = tpu.matmul %3, %5, %cst_7 {dimension_numbers = #tpu.dot_dimension_numbers<[1], [0], [0], [1], [0, 0, 1, 1], [], []>} : vector<8x32xbf16>, vector<32x32xbf16>, vector<8x32xf32> -> vector<8x32xf32>
    %7 = arith.addf %1, %6 : vector<8x32xf32>
    %c0_8 = arith.constant 0 : index
    %c1 = arith.constant 1 : index
    %c0_9 = arith.constant 0 : index
    %8 = vector.load %arg1[%c0_8, %c1, %c0_9] : memref<1x18x32xbf16, #tpu.memory_space<vmem>>, vector<1x8x32xbf16>
    %9 = vector.shape_cast %8 : vector<1x8x32xbf16> to vector<8x32xbf16>
    %c1_10 = arith.constant 1 : index
    %c0_11 = arith.constant 0 : index
    %c0_12 = arith.constant 0 : index
    %10 = vector.load %arg3[%c1_10, %c0_11, %c0_12] : memref<9x32x32xbf16, #tpu.memory_space<vmem>>, vector<1x32x32xbf16>
    %11 = vector.shape_cast %10 : vector<1x32x32xbf16> to vector<32x32xbf16>
    %cst_13 = arith.constant dense<0.000000e+00> : vector<8x32xf32>
    %12 = tpu.matmul %9, %11, %cst_13 {dimension_numbers = #tpu.dot_dimension_numbers<[1], [0], [0], [1], [0, 0, 1, 1], [], []>} : vector<8x32xbf16>, vector<32x32xbf16>, vector<8x32xf32> -> vector<8x32xf32>
    %13 = arith.addf %7, %12 : vector<8x32xf32>
    %c0_14 = arith.constant 0 : index
    %c2 = arith.constant 2 : index
    %c0_15 = arith.constant 0 : index
    %14 = vector.load %arg1[%c0_14, %c2, %c0_15] : memref<1x18x32xbf16, #tpu.memory_space<vmem>>, vector<1x8x32xbf16>
    %15 = vector.shape_cast %14 : vector<1x8x32xbf16> to vector<8x32xbf16>
    %c2_16 = arith.constant 2 : index
    %c0_17 = arith.constant 0 : index
    %c0_18 = arith.constant 0 : index
    %16 = vector.load %arg3[%c2_16, %c0_17, %c0_18] : memref<9x32x32xbf16, #tpu.memory_space<vmem>>, vector<1x32x32xbf16>
    %17 = vector.shape_cast %16 : vector<1x32x32xbf16> to vector<32x32xbf16>
    %cst_19 = arith.constant dense<0.000000e+00> : vector<8x32xf32>
    %18 = tpu.matmul %15, %17, %cst_19 {dimension_numbers = #tpu.dot_dimension_numbers<[1], [0], [0], [1], [0, 0, 1, 1], [], []>} : vector<8x32xbf16>, vector<32x32xbf16>, vector<8x32xf32> -> vector<8x32xf32>
    %19 = arith.addf %13, %18 : vector<8x32xf32>
    %c0_20 = arith.constant 0 : index
    %c4 = arith.constant 4 : index
    %c0_21 = arith.constant 0 : index
    %20 = vector.load %arg1[%c0_20, %c4, %c0_21] : memref<1x18x32xbf16, #tpu.memory_space<vmem>>, vector<1x8x32xbf16>
    %21 = vector.shape_cast %20 : vector<1x8x32xbf16> to vector<8x32xbf16>
    %c3 = arith.constant 3 : index
    %c0_22 = arith.constant 0 : index
    %c0_23 = arith.constant 0 : index
    %22 = vector.load %arg3[%c3, %c0_22, %c0_23] : memref<9x32x32xbf16, #tpu.memory_space<vmem>>, vector<1x32x32xbf16>
    %23 = vector.shape_cast %22 : vector<1x32x32xbf16> to vector<32x32xbf16>
    %cst_24 = arith.constant dense<0.000000e+00> : vector<8x32xf32>
    %24 = tpu.matmul %21, %23, %cst_24 {dimension_numbers = #tpu.dot_dimension_numbers<[1], [0], [0], [1], [0, 0, 1, 1], [], []>} : vector<8x32xbf16>, vector<32x32xbf16>, vector<8x32xf32> -> vector<8x32xf32>
    %25 = arith.addf %19, %24 : vector<8x32xf32>
    %c0_25 = arith.constant 0 : index
    %c5 = arith.constant 5 : index
    %c0_26 = arith.constant 0 : index
    %26 = vector.load %arg1[%c0_25, %c5, %c0_26] : memref<1x18x32xbf16, #tpu.memory_space<vmem>>, vector<1x8x32xbf16>
    %27 = vector.shape_cast %26 : vector<1x8x32xbf16> to vector<8x32xbf16>
    %c4_27 = arith.constant 4 : index
    %c0_28 = arith.constant 0 : index
    %c0_29 = arith.constant 0 : index
    %28 = vector.load %arg3[%c4_27, %c0_28, %c0_29] : memref<9x32x32xbf16, #tpu.memory_space<vmem>>, vector<1x32x32xbf16>
    %29 = vector.shape_cast %28 : vector<1x32x32xbf16> to vector<32x32xbf16>
    %cst_30 = arith.constant dense<0.000000e+00> : vector<8x32xf32>
    %30 = tpu.matmul %27, %29, %cst_30 {dimension_numbers = #tpu.dot_dimension_numbers<[1], [0], [0], [1], [0, 0, 1, 1], [], []>} : vector<8x32xbf16>, vector<32x32xbf16>, vector<8x32xf32> -> vector<8x32xf32>
    %31 = arith.addf %25, %30 : vector<8x32xf32>
    %c0_31 = arith.constant 0 : index
    %c6 = arith.constant 6 : index
    %c0_32 = arith.constant 0 : index
    %32 = vector.load %arg1[%c0_31, %c6, %c0_32] : memref<1x18x32xbf16, #tpu.memory_space<vmem>>, vector<1x8x32xbf16>
    %33 = vector.shape_cast %32 : vector<1x8x32xbf16> to vector<8x32xbf16>
    %c5_33 = arith.constant 5 : index
    %c0_34 = arith.constant 0 : index
    %c0_35 = arith.constant 0 : index
    %34 = vector.load %arg3[%c5_33, %c0_34, %c0_35] : memref<9x32x32xbf16, #tpu.memory_space<vmem>>, vector<1x32x32xbf16>
    %35 = vector.shape_cast %34 : vector<1x32x32xbf16> to vector<32x32xbf16>
    %cst_36 = arith.constant dense<0.000000e+00> : vector<8x32xf32>
    %36 = tpu.matmul %33, %35, %cst_36 {dimension_numbers = #tpu.dot_dimension_numbers<[1], [0], [0], [1], [0, 0, 1, 1], [], []>} : vector<8x32xbf16>, vector<32x32xbf16>, vector<8x32xf32> -> vector<8x32xf32>
    %37 = arith.addf %31, %36 : vector<8x32xf32>
    %c0_37 = arith.constant 0 : index
    %c8 = arith.constant 8 : index
    %c0_38 = arith.constant 0 : index
    %38 = vector.load %arg1[%c0_37, %c8, %c0_38] : memref<1x18x32xbf16, #tpu.memory_space<vmem>>, vector<1x8x32xbf16>
    %39 = vector.shape_cast %38 : vector<1x8x32xbf16> to vector<8x32xbf16>
    %c6_39 = arith.constant 6 : index
    %c0_40 = arith.constant 0 : index
    %c0_41 = arith.constant 0 : index
    %40 = vector.load %arg3[%c6_39, %c0_40, %c0_41] : memref<9x32x32xbf16, #tpu.memory_space<vmem>>, vector<1x32x32xbf16>
    %41 = vector.shape_cast %40 : vector<1x32x32xbf16> to vector<32x32xbf16>
    %cst_42 = arith.constant dense<0.000000e+00> : vector<8x32xf32>
    %42 = tpu.matmul %39, %41, %cst_42 {dimension_numbers = #tpu.dot_dimension_numbers<[1], [0], [0], [1], [0, 0, 1, 1], [], []>} : vector<8x32xbf16>, vector<32x32xbf16>, vector<8x32xf32> -> vector<8x32xf32>
    %43 = arith.addf %37, %42 : vector<8x32xf32>
    %c0_43 = arith.constant 0 : index
    %c9 = arith.constant 9 : index
    %c0_44 = arith.constant 0 : index
    %44 = vector.load %arg1[%c0_43, %c9, %c0_44] : memref<1x18x32xbf16, #tpu.memory_space<vmem>>, vector<1x8x32xbf16>
    %45 = vector.shape_cast %44 : vector<1x8x32xbf16> to vector<8x32xbf16>
    %c7 = arith.constant 7 : index
    %c0_45 = arith.constant 0 : index
    %c0_46 = arith.constant 0 : index
    %46 = vector.load %arg3[%c7, %c0_45, %c0_46] : memref<9x32x32xbf16, #tpu.memory_space<vmem>>, vector<1x32x32xbf16>
    %47 = vector.shape_cast %46 : vector<1x32x32xbf16> to vector<32x32xbf16>
    %cst_47 = arith.constant dense<0.000000e+00> : vector<8x32xf32>
    %48 = tpu.matmul %45, %47, %cst_47 {dimension_numbers = #tpu.dot_dimension_numbers<[1], [0], [0], [1], [0, 0, 1, 1], [], []>} : vector<8x32xbf16>, vector<32x32xbf16>, vector<8x32xf32> -> vector<8x32xf32>
    %49 = arith.addf %43, %48 : vector<8x32xf32>
    %c0_48 = arith.constant 0 : index
    %c10 = arith.constant 10 : index
    %c0_49 = arith.constant 0 : index
    %50 = vector.load %arg1[%c0_48, %c10, %c0_49] : memref<1x18x32xbf16, #tpu.memory_space<vmem>>, vector<1x8x32xbf16>
    %51 = vector.shape_cast %50 : vector<1x8x32xbf16> to vector<8x32xbf16>
    %c8_50 = arith.constant 8 : index
    %c0_51 = arith.constant 0 : index
    %c0_52 = arith.constant 0 : index
    %52 = vector.load %arg3[%c8_50, %c0_51, %c0_52] : memref<9x32x32xbf16, #tpu.memory_space<vmem>>, vector<1x32x32xbf16>
    %53 = vector.shape_cast %52 : vector<1x32x32xbf16> to vector<32x32xbf16>
    %cst_53 = arith.constant dense<0.000000e+00> : vector<8x32xf32>
    %54 = tpu.matmul %51, %53, %cst_53 {dimension_numbers = #tpu.dot_dimension_numbers<[1], [0], [0], [1], [0, 0, 1, 1], [], []>} : vector<8x32xbf16>, vector<32x32xbf16>, vector<8x32xf32> -> vector<8x32xf32>
    %55 = arith.addf %49, %54 : vector<8x32xf32>
    %c0_54 = arith.constant 0 : index
    %c0_55 = arith.constant 0 : index
    %56 = vector.load %arg4[%c0_54, %c0_55] : memref<1x32xf32, #tpu.memory_space<vmem>>, vector<1x32xf32>
    %57 = vector.broadcast %56 : vector<1x32xf32> to vector<8x32xf32>
    %58 = arith.addf %55, %57 : vector<8x32xf32>
    %cst_56 = arith.constant 0.000000e+00 : f32
    %59 = vector.broadcast %cst_56 : f32 to vector<8x32xf32>
    %60 = arith.maximumf %58, %59 : vector<8x32xf32>
    %61 = vector.broadcast %0 : vector<8x1xf32> to vector<8x32xf32>
    %62 = arith.mulf %60, %61 : vector<8x32xf32>
    %cst_57 = arith.constant 0.000000e+00 : f32
    %63 = vector.broadcast %cst_57 : f32 to vector<5x32xf32>
    %c0_58 = arith.constant 0 : index
    %c0_59 = arith.constant 0 : index
    %64 = vector.load %arg8[%c0_58, %c0_59] : memref<18x32xf32, #tpu.memory_space<vmem>>, vector<5x32xf32>
    tpu.vector_store %arg8[%c0_58, %c0_59], %63 {strides = array<i32>} : memref<18x32xf32, #tpu.memory_space<vmem>>, vector<5x32xf32>,
    %c13 = arith.constant 13 : index
    %c0_60 = arith.constant 0 : index
    %65 = vector.load %arg8[%c13, %c0_60] : memref<18x32xf32, #tpu.memory_space<vmem>>, vector<5x32xf32>
    tpu.vector_store %arg8[%c13, %c0_60], %63 {strides = array<i32>} : memref<18x32xf32, #tpu.memory_space<vmem>>, vector<5x32xf32>,
    %c5_61 = arith.constant 5 : index
    %c0_62 = arith.constant 0 : index
    %66 = vector.load %arg8[%c5_61, %c0_62] : memref<18x32xf32, #tpu.memory_space<vmem>>, vector<8x32xf32>
    tpu.vector_store %arg8[%c5_61, %c0_62], %62 {strides = array<i32>} : memref<18x32xf32, #tpu.memory_space<vmem>>, vector<8x32xf32>,
    %c0_63 = arith.constant 0 : index
    %c5_64 = arith.constant 5 : index
    %c0_65 = arith.constant 0 : index
    %67 = vector.load %arg1[%c0_63, %c5_64, %c0_65] : memref<1x18x32xbf16, #tpu.memory_space<vmem>>, vector<1x8x32xbf16>
    %68 = vector.shape_cast %67 : vector<1x8x32xbf16> to vector<8x32xbf16>
    %69 = arith.extf %68 : vector<8x32xbf16> to vector<8x32xf32>
    %cst_66 = arith.constant 0.000000e+00 : f32
    %70 = vector.broadcast %cst_66 : f32 to vector<8x32xf32>
    %c0_67 = arith.constant 0 : index
    %c0_68 = arith.constant 0 : index
    %71 = vector.load %arg8[%c0_67, %c0_68] : memref<18x32xf32, #tpu.memory_space<vmem>>, vector<8x32xf32>
    %72 = arith.truncf %71 : vector<8x32xf32> to vector<8x32xbf16>
    %c0_69 = arith.constant 0 : index
    %c0_70 = arith.constant 0 : index
    %c0_71 = arith.constant 0 : index
    %73 = vector.load %arg5[%c0_69, %c0_70, %c0_71] : memref<9x32x32xbf16, #tpu.memory_space<vmem>>, vector<1x32x32xbf16>
    %74 = vector.shape_cast %73 : vector<1x32x32xbf16> to vector<32x32xbf16>
    %cst_72 = arith.constant dense<0.000000e+00> : vector<8x32xf32>
    %75 = tpu.matmul %72, %74, %cst_72 {dimension_numbers = #tpu.dot_dimension_numbers<[1], [0], [0], [1], [0, 0, 1, 1], [], []>} : vector<8x32xbf16>, vector<32x32xbf16>, vector<8x32xf32> -> vector<8x32xf32>
    %76 = arith.addf %70, %75 : vector<8x32xf32>
    %c1_73 = arith.constant 1 : index
    %c0_74 = arith.constant 0 : index
    %77 = vector.load %arg8[%c1_73, %c0_74] : memref<18x32xf32, #tpu.memory_space<vmem>>, vector<8x32xf32>
    %78 = arith.truncf %77 : vector<8x32xf32> to vector<8x32xbf16>
    %c1_75 = arith.constant 1 : index
    %c0_76 = arith.constant 0 : index
    %c0_77 = arith.constant 0 : index
    %79 = vector.load %arg5[%c1_75, %c0_76, %c0_77] : memref<9x32x32xbf16, #tpu.memory_space<vmem>>, vector<1x32x32xbf16>
    %80 = vector.shape_cast %79 : vector<1x32x32xbf16> to vector<32x32xbf16>
    %cst_78 = arith.constant dense<0.000000e+00> : vector<8x32xf32>
    %81 = tpu.matmul %78, %80, %cst_78 {dimension_numbers = #tpu.dot_dimension_numbers<[1], [0], [0], [1], [0, 0, 1, 1], [], []>} : vector<8x32xbf16>, vector<32x32xbf16>, vector<8x32xf32> -> vector<8x32xf32>
    %82 = arith.addf %76, %81 : vector<8x32xf32>
    %c2_79 = arith.constant 2 : index
    %c0_80 = arith.constant 0 : index
    %83 = vector.load %arg8[%c2_79, %c0_80] : memref<18x32xf32, #tpu.memory_space<vmem>>, vector<8x32xf32>
    %84 = arith.truncf %83 : vector<8x32xf32> to vector<8x32xbf16>
    %c2_81 = arith.constant 2 : index
    %c0_82 = arith.constant 0 : index
    %c0_83 = arith.constant 0 : index
    %85 = vector.load %arg5[%c2_81, %c0_82, %c0_83] : memref<9x32x32xbf16, #tpu.memory_space<vmem>>, vector<1x32x32xbf16>
    %86 = vector.shape_cast %85 : vector<1x32x32xbf16> to vector<32x32xbf16>
    %cst_84 = arith.constant dense<0.000000e+00> : vector<8x32xf32>
    %87 = tpu.matmul %84, %86, %cst_84 {dimension_numbers = #tpu.dot_dimension_numbers<[1], [0], [0], [1], [0, 0, 1, 1], [], []>} : vector<8x32xbf16>, vector<32x32xbf16>, vector<8x32xf32> -> vector<8x32xf32>
    %88 = arith.addf %82, %87 : vector<8x32xf32>
    %c4_85 = arith.constant 4 : index
    %c0_86 = arith.constant 0 : index
    %89 = vector.load %arg8[%c4_85, %c0_86] : memref<18x32xf32, #tpu.memory_space<vmem>>, vector<8x32xf32>
    %90 = arith.truncf %89 : vector<8x32xf32> to vector<8x32xbf16>
    %c3_87 = arith.constant 3 : index
    %c0_88 = arith.constant 0 : index
    %c0_89 = arith.constant 0 : index
    %91 = vector.load %arg5[%c3_87, %c0_88, %c0_89] : memref<9x32x32xbf16, #tpu.memory_space<vmem>>, vector<1x32x32xbf16>
    %92 = vector.shape_cast %91 : vector<1x32x32xbf16> to vector<32x32xbf16>
    %cst_90 = arith.constant dense<0.000000e+00> : vector<8x32xf32>
    %93 = tpu.matmul %90, %92, %cst_90 {dimension_numbers = #tpu.dot_dimension_numbers<[1], [0], [0], [1], [0, 0, 1, 1], [], []>} : vector<8x32xbf16>, vector<32x32xbf16>, vector<8x32xf32> -> vector<8x32xf32>
    %94 = arith.addf %88, %93 : vector<8x32xf32>
    %c5_91 = arith.constant 5 : index
    %c0_92 = arith.constant 0 : index
    %95 = vector.load %arg8[%c5_91, %c0_92] : memref<18x32xf32, #tpu.memory_space<vmem>>, vector<8x32xf32>
    %96 = arith.truncf %95 : vector<8x32xf32> to vector<8x32xbf16>
    %c4_93 = arith.constant 4 : index
    %c0_94 = arith.constant 0 : index
    %c0_95 = arith.constant 0 : index
    %97 = vector.load %arg5[%c4_93, %c0_94, %c0_95] : memref<9x32x32xbf16, #tpu.memory_space<vmem>>, vector<1x32x32xbf16>
    %98 = vector.shape_cast %97 : vector<1x32x32xbf16> to vector<32x32xbf16>
    %cst_96 = arith.constant dense<0.000000e+00> : vector<8x32xf32>
    %99 = tpu.matmul %96, %98, %cst_96 {dimension_numbers = #tpu.dot_dimension_numbers<[1], [0], [0], [1], [0, 0, 1, 1], [], []>} : vector<8x32xbf16>, vector<32x32xbf16>, vector<8x32xf32> -> vector<8x32xf32>
    %100 = arith.addf %94, %99 : vector<8x32xf32>
    %c6_97 = arith.constant 6 : index
    %c0_98 = arith.constant 0 : index
    %101 = vector.load %arg8[%c6_97, %c0_98] : memref<18x32xf32, #tpu.memory_space<vmem>>, vector<8x32xf32>
    %102 = arith.truncf %101 : vector<8x32xf32> to vector<8x32xbf16>
    %c5_99 = arith.constant 5 : index
    %c0_100 = arith.constant 0 : index
    %c0_101 = arith.constant 0 : index
    %103 = vector.load %arg5[%c5_99, %c0_100, %c0_101] : memref<9x32x32xbf16, #tpu.memory_space<vmem>>, vector<1x32x32xbf16>
    %104 = vector.shape_cast %103 : vector<1x32x32xbf16> to vector<32x32xbf16>
    %cst_102 = arith.constant dense<0.000000e+00> : vector<8x32xf32>
    %105 = tpu.matmul %102, %104, %cst_102 {dimension_numbers = #tpu.dot_dimension_numbers<[1], [0], [0], [1], [0, 0, 1, 1], [], []>} : vector<8x32xbf16>, vector<32x32xbf16>, vector<8x32xf32> -> vector<8x32xf32>
    %106 = arith.addf %100, %105 : vector<8x32xf32>
    %c8_103 = arith.constant 8 : index
    %c0_104 = arith.constant 0 : index
    %107 = vector.load %arg8[%c8_103, %c0_104] : memref<18x32xf32, #tpu.memory_space<vmem>>, vector<8x32xf32>
    %108 = arith.truncf %107 : vector<8x32xf32> to vector<8x32xbf16>
    %c6_105 = arith.constant 6 : index
    %c0_106 = arith.constant 0 : index
    %c0_107 = arith.constant 0 : index
    %109 = vector.load %arg5[%c6_105, %c0_106, %c0_107] : memref<9x32x32xbf16, #tpu.memory_space<vmem>>, vector<1x32x32xbf16>
    %110 = vector.shape_cast %109 : vector<1x32x32xbf16> to vector<32x32xbf16>
    %cst_108 = arith.constant dense<0.000000e+00> : vector<8x32xf32>
    %111 = tpu.matmul %108, %110, %cst_108 {dimension_numbers = #tpu.dot_dimension_numbers<[1], [0], [0], [1], [0, 0, 1, 1], [], []>} : vector<8x32xbf16>, vector<32x32xbf16>, vector<8x32xf32> -> vector<8x32xf32>
    %112 = arith.addf %106, %111 : vector<8x32xf32>
    %c9_109 = arith.constant 9 : index
    %c0_110 = arith.constant 0 : index
    %113 = vector.load %arg8[%c9_109, %c0_110] : memref<18x32xf32, #tpu.memory_space<vmem>>, vector<8x32xf32>
    %114 = arith.truncf %113 : vector<8x32xf32> to vector<8x32xbf16>
    %c7_111 = arith.constant 7 : index
    %c0_112 = arith.constant 0 : index
    %c0_113 = arith.constant 0 : index
    %115 = vector.load %arg5[%c7_111, %c0_112, %c0_113] : memref<9x32x32xbf16, #tpu.memory_space<vmem>>, vector<1x32x32xbf16>
    %116 = vector.shape_cast %115 : vector<1x32x32xbf16> to vector<32x32xbf16>
    %cst_114 = arith.constant dense<0.000000e+00> : vector<8x32xf32>
    %117 = tpu.matmul %114, %116, %cst_114 {dimension_numbers = #tpu.dot_dimension_numbers<[1], [0], [0], [1], [0, 0, 1, 1], [], []>} : vector<8x32xbf16>, vector<32x32xbf16>, vector<8x32xf32> -> vector<8x32xf32>
    %118 = arith.addf %112, %117 : vector<8x32xf32>
    %c10_115 = arith.constant 10 : index
    %c0_116 = arith.constant 0 : index
    %119 = vector.load %arg8[%c10_115, %c0_116] : memref<18x32xf32, #tpu.memory_space<vmem>>, vector<8x32xf32>
    %120 = arith.truncf %119 : vector<8x32xf32> to vector<8x32xbf16>
    %c8_117 = arith.constant 8 : index
    %c0_118 = arith.constant 0 : index
    %c0_119 = arith.constant 0 : index
    %121 = vector.load %arg5[%c8_117, %c0_118, %c0_119] : memref<9x32x32xbf16, #tpu.memory_space<vmem>>, vector<1x32x32xbf16>
    %122 = vector.shape_cast %121 : vector<1x32x32xbf16> to vector<32x32xbf16>
    %cst_120 = arith.constant dense<0.000000e+00> : vector<8x32xf32>
    %123 = tpu.matmul %120, %122, %cst_120 {dimension_numbers = #tpu.dot_dimension_numbers<[1], [0], [0], [1], [0, 0, 1, 1], [], []>} : vector<8x32xbf16>, vector<32x32xbf16>, vector<8x32xf32> -> vector<8x32xf32>
    %124 = arith.addf %118, %123 : vector<8x32xf32>
    %c0_121 = arith.constant 0 : index
    %c0_122 = arith.constant 0 : index
    %125 = vector.load %arg6[%c0_121, %c0_122] : memref<1x32xf32, #tpu.memory_space<vmem>>, vector<1x32xf32>
    %126 = vector.broadcast %125 : vector<1x32xf32> to vector<8x32xf32>
    %127 = arith.addf %124, %126 : vector<8x32xf32>
    %128 = arith.addf %127, %69 : vector<8x32xf32>
    %cst_123 = arith.constant 0.000000e+00 : f32
    %129 = vector.broadcast %cst_123 : f32 to vector<8x32xf32>
    %130 = arith.maximumf %128, %129 : vector<8x32xf32>
    %131 = vector.broadcast %0 : vector<8x1xf32> to vector<8x32xf32>
    %132 = arith.mulf %130, %131 : vector<8x32xf32>
    %133 = arith.truncf %132 : vector<8x32xf32> to vector<8x32xbf16>
    %c0_124 = arith.constant 0 : index
    %c0_125 = arith.constant 0 : index
    %c0_126 = arith.constant 0 : index
    %134 = vector.load %arg7[%c0_124, %c0_125, %c0_126] : memref<1x8x32xbf16, #tpu.memory_space<vmem>>, vector<1x8x32xbf16>
    %135 = vector.shape_cast %134 : vector<1x8x32xbf16> to vector<8x32xbf16>
    %136 = vector.shape_cast %133 : vector<8x32xbf16> to vector<1x8x32xbf16>
    tpu.vector_store %arg7[%c0_124, %c0_125, %c0_126], %136 {strides = array<i32>} : memref<1x8x32xbf16, #tpu.memory_space<vmem>>, vector<1x8x32xbf16>,
    return
  }
  func.func @transform_0(%arg0: i32) -> (i32, i32, i32) {
    %c0_i32 = arith.constant 0 : i32
    %c0_i32_0 = arith.constant 0 : i32
    %c0_i32_1 = arith.constant 0 : i32
    return %arg0, %c0_i32, %c0_i32_0 : i32, i32, i32
  }
  func.func @transform_1(%arg0: i32) -> (i32, i32) {
    %c0_i32 = arith.constant 0 : i32
    %c0_i32_0 = arith.constant 0 : i32
    %c0_i32_1 = arith.constant 0 : i32
    return %c0_i32, %c0_i32_0 : i32, i32
  }
  func.func @transform_2(%arg0: i32) -> (i32, i32, i32) {
    %c0_i32 = arith.constant 0 : i32
    %c0_i32_0 = arith.constant 0 : i32
    %c0_i32_1 = arith.constant 0 : i32
    %c0_i32_2 = arith.constant 0 : i32
    return %c0_i32, %c0_i32_0, %c0_i32_1 : i32, i32, i32
  }
  func.func @transform_3(%arg0: i32) -> (i32, i32) {
    %c0_i32 = arith.constant 0 : i32
    %c0_i32_0 = arith.constant 0 : i32
    %c0_i32_1 = arith.constant 0 : i32
    return %c0_i32, %c0_i32_0 : i32, i32
  }
  func.func @transform_4(%arg0: i32) -> (i32, i32, i32) {
    %c0_i32 = arith.constant 0 : i32
    %c0_i32_0 = arith.constant 0 : i32
    %c0_i32_1 = arith.constant 0 : i32
    %c0_i32_2 = arith.constant 0 : i32
    return %c0_i32, %c0_i32_0, %c0_i32_1 : i32, i32, i32
  }
  func.func @transform_5(%arg0: i32) -> (i32, i32) {
    %c0_i32 = arith.constant 0 : i32
    %c0_i32_0 = arith.constant 0 : i32
    %c0_i32_1 = arith.constant 0 : i32
    return %c0_i32, %c0_i32_0 : i32, i32
  }
  func.func @transform_6(%arg0: i32) -> (i32, i32, i32) {
    %c0_i32 = arith.constant 0 : i32
    %c0_i32_0 = arith.constant 0 : i32
    %c0_i32_1 = arith.constant 0 : i32
    return %arg0, %c0_i32, %c0_i32_0 : i32, i32, i32
  }
}

module attributes {stable_mosaic.version = 11 : i64} {
  func.func @_basic_block_kernel(%arg0: i32, %arg1: memref<1x14x16xbf16, #tpu.memory_space<vmem>>, %arg2: memref<1x14x16xbf16, #tpu.memory_space<vmem>>, %arg3: memref<1x14x16xbf16, #tpu.memory_space<vmem>>, %arg4: memref<1x14x16xbf16, #tpu.memory_space<vmem>>, %arg5: memref<8x1xf32, #tpu.memory_space<vmem>>, %arg6: memref<9x16x32xbf16, #tpu.memory_space<vmem>>, %arg7: memref<1x32xf32, #tpu.memory_space<vmem>>, %arg8: memref<9x32x32xbf16, #tpu.memory_space<vmem>>, %arg9: memref<1x32xf32, #tpu.memory_space<vmem>>, %arg10: memref<9x16x32xbf16, #tpu.memory_space<vmem>>, %arg11: memref<1x8x32xbf16, #tpu.memory_space<vmem>>, %arg12: memref<18x32xf32, #tpu.memory_space<vmem>>) attributes {dimension_semantics = [#tpu.dimension_semantics<parallel>], iteration_bounds = array<i64: 2>, scalar_prefetch = 0 : i64, scratch_operands = 1 : i64, tpu.core_type = #tpu.core_type<tc>, window_params = [{transform_indices = @transform_0, window_bounds = array<i64: 1, 14, 16>}, {transform_indices = @transform_1, window_bounds = array<i64: 1, 14, 16>}, {transform_indices = @transform_2, window_bounds = array<i64: 1, 14, 16>}, {transform_indices = @transform_3, window_bounds = array<i64: 1, 14, 16>}, {pipeline_mode = #tpu.pipeline_mode<synchronous>, transform_indices = @transform_4, window_bounds = array<i64: 8, 1>}, {pipeline_mode = #tpu.pipeline_mode<synchronous>, transform_indices = @transform_5, window_bounds = array<i64: 9, 16, 32>}, {pipeline_mode = #tpu.pipeline_mode<synchronous>, transform_indices = @transform_6, window_bounds = array<i64: 1, 32>}, {pipeline_mode = #tpu.pipeline_mode<synchronous>, transform_indices = @transform_7, window_bounds = array<i64: 9, 32, 32>}, {pipeline_mode = #tpu.pipeline_mode<synchronous>, transform_indices = @transform_8, window_bounds = array<i64: 1, 32>}, {pipeline_mode = #tpu.pipeline_mode<synchronous>, transform_indices = @transform_9, window_bounds = array<i64: 9, 16, 32>}, {transform_indices = @transform_10, window_bounds = array<i64: 1, 8, 32>}]} {
    %c0 = arith.constant 0 : index
    %c0_0 = arith.constant 0 : index
    %0 = vector.load %arg5[%c0, %c0_0] : memref<8x1xf32, #tpu.memory_space<vmem>>, vector<8x1xf32>
    %cst = arith.constant 0.000000e+00 : f32
    %1 = vector.broadcast %cst : f32 to vector<8x32xf32>
    %cst_1 = arith.constant 0.000000e+00 : f32
    %2 = vector.broadcast %cst_1 : f32 to vector<8x32xf32>
    %c0_2 = arith.constant 0 : index
    %c0_3 = arith.constant 0 : index
    %c0_4 = arith.constant 0 : index
    %3 = vector.load %arg1[%c0_2, %c0_3, %c0_4] : memref<1x14x16xbf16, #tpu.memory_space<vmem>>, vector<1x8x16xbf16>
    %4 = vector.shape_cast %3 : vector<1x8x16xbf16> to vector<8x16xbf16>
    %c0_5 = arith.constant 0 : index
    %c0_6 = arith.constant 0 : index
    %c0_7 = arith.constant 0 : index
    %5 = vector.load %arg6[%c0_5, %c0_6, %c0_7] : memref<9x16x32xbf16, #tpu.memory_space<vmem>>, vector<1x16x32xbf16>
    %6 = vector.shape_cast %5 : vector<1x16x32xbf16> to vector<16x32xbf16>
    %cst_8 = arith.constant dense<0.000000e+00> : vector<8x32xf32>
    %7 = tpu.matmul %4, %6, %cst_8 {dimension_numbers = #tpu.dot_dimension_numbers<[1], [0], [0], [1], [0, 0, 1, 1], [], []>} : vector<8x16xbf16>, vector<16x32xbf16>, vector<8x32xf32> -> vector<8x32xf32>
    %8 = arith.addf %1, %7 : vector<8x32xf32>
    %c0_9 = arith.constant 0 : index
    %c0_10 = arith.constant 0 : index
    %c0_11 = arith.constant 0 : index
    %9 = vector.load %arg10[%c0_9, %c0_10, %c0_11] : memref<9x16x32xbf16, #tpu.memory_space<vmem>>, vector<1x16x32xbf16>
    %10 = vector.shape_cast %9 : vector<1x16x32xbf16> to vector<16x32xbf16>
    %cst_12 = arith.constant dense<0.000000e+00> : vector<8x32xf32>
    %11 = tpu.matmul %4, %10, %cst_12 {dimension_numbers = #tpu.dot_dimension_numbers<[1], [0], [0], [1], [0, 0, 1, 1], [], []>} : vector<8x16xbf16>, vector<16x32xbf16>, vector<8x32xf32> -> vector<8x32xf32>
    %12 = arith.addf %2, %11 : vector<8x32xf32>
    %c0_13 = arith.constant 0 : index
    %c0_14 = arith.constant 0 : index
    %c0_15 = arith.constant 0 : index
    %13 = vector.load %arg2[%c0_13, %c0_14, %c0_15] : memref<1x14x16xbf16, #tpu.memory_space<vmem>>, vector<1x8x16xbf16>
    %14 = vector.shape_cast %13 : vector<1x8x16xbf16> to vector<8x16xbf16>
    %c1 = arith.constant 1 : index
    %c0_16 = arith.constant 0 : index
    %c0_17 = arith.constant 0 : index
    %15 = vector.load %arg6[%c1, %c0_16, %c0_17] : memref<9x16x32xbf16, #tpu.memory_space<vmem>>, vector<1x16x32xbf16>
    %16 = vector.shape_cast %15 : vector<1x16x32xbf16> to vector<16x32xbf16>
    %cst_18 = arith.constant dense<0.000000e+00> : vector<8x32xf32>
    %17 = tpu.matmul %14, %16, %cst_18 {dimension_numbers = #tpu.dot_dimension_numbers<[1], [0], [0], [1], [0, 0, 1, 1], [], []>} : vector<8x16xbf16>, vector<16x32xbf16>, vector<8x32xf32> -> vector<8x32xf32>
    %18 = arith.addf %8, %17 : vector<8x32xf32>
    %c1_19 = arith.constant 1 : index
    %c0_20 = arith.constant 0 : index
    %c0_21 = arith.constant 0 : index
    %19 = vector.load %arg10[%c1_19, %c0_20, %c0_21] : memref<9x16x32xbf16, #tpu.memory_space<vmem>>, vector<1x16x32xbf16>
    %20 = vector.shape_cast %19 : vector<1x16x32xbf16> to vector<16x32xbf16>
    %cst_22 = arith.constant dense<0.000000e+00> : vector<8x32xf32>
    %21 = tpu.matmul %14, %20, %cst_22 {dimension_numbers = #tpu.dot_dimension_numbers<[1], [0], [0], [1], [0, 0, 1, 1], [], []>} : vector<8x16xbf16>, vector<16x32xbf16>, vector<8x32xf32> -> vector<8x32xf32>
    %22 = arith.addf %12, %21 : vector<8x32xf32>
    %c0_23 = arith.constant 0 : index
    %c1_24 = arith.constant 1 : index
    %c0_25 = arith.constant 0 : index
    %23 = vector.load %arg1[%c0_23, %c1_24, %c0_25] : memref<1x14x16xbf16, #tpu.memory_space<vmem>>, vector<1x8x16xbf16>
    %24 = vector.shape_cast %23 : vector<1x8x16xbf16> to vector<8x16xbf16>
    %c2 = arith.constant 2 : index
    %c0_26 = arith.constant 0 : index
    %c0_27 = arith.constant 0 : index
    %25 = vector.load %arg6[%c2, %c0_26, %c0_27] : memref<9x16x32xbf16, #tpu.memory_space<vmem>>, vector<1x16x32xbf16>
    %26 = vector.shape_cast %25 : vector<1x16x32xbf16> to vector<16x32xbf16>
    %cst_28 = arith.constant dense<0.000000e+00> : vector<8x32xf32>
    %27 = tpu.matmul %24, %26, %cst_28 {dimension_numbers = #tpu.dot_dimension_numbers<[1], [0], [0], [1], [0, 0, 1, 1], [], []>} : vector<8x16xbf16>, vector<16x32xbf16>, vector<8x32xf32> -> vector<8x32xf32>
    %28 = arith.addf %18, %27 : vector<8x32xf32>
    %c2_29 = arith.constant 2 : index
    %c0_30 = arith.constant 0 : index
    %c0_31 = arith.constant 0 : index
    %29 = vector.load %arg10[%c2_29, %c0_30, %c0_31] : memref<9x16x32xbf16, #tpu.memory_space<vmem>>, vector<1x16x32xbf16>
    %30 = vector.shape_cast %29 : vector<1x16x32xbf16> to vector<16x32xbf16>
    %cst_32 = arith.constant dense<0.000000e+00> : vector<8x32xf32>
    %31 = tpu.matmul %24, %30, %cst_32 {dimension_numbers = #tpu.dot_dimension_numbers<[1], [0], [0], [1], [0, 0, 1, 1], [], []>} : vector<8x16xbf16>, vector<16x32xbf16>, vector<8x32xf32> -> vector<8x32xf32>
    %32 = arith.addf %22, %31 : vector<8x32xf32>
    %c0_33 = arith.constant 0 : index
    %c0_34 = arith.constant 0 : index
    %c0_35 = arith.constant 0 : index
    %33 = vector.load %arg3[%c0_33, %c0_34, %c0_35] : memref<1x14x16xbf16, #tpu.memory_space<vmem>>, vector<1x8x16xbf16>
    %34 = vector.shape_cast %33 : vector<1x8x16xbf16> to vector<8x16xbf16>
    %c3 = arith.constant 3 : index
    %c0_36 = arith.constant 0 : index
    %c0_37 = arith.constant 0 : index
    %35 = vector.load %arg6[%c3, %c0_36, %c0_37] : memref<9x16x32xbf16, #tpu.memory_space<vmem>>, vector<1x16x32xbf16>
    %36 = vector.shape_cast %35 : vector<1x16x32xbf16> to vector<16x32xbf16>
    %cst_38 = arith.constant dense<0.000000e+00> : vector<8x32xf32>
    %37 = tpu.matmul %34, %36, %cst_38 {dimension_numbers = #tpu.dot_dimension_numbers<[1], [0], [0], [1], [0, 0, 1, 1], [], []>} : vector<8x16xbf16>, vector<16x32xbf16>, vector<8x32xf32> -> vector<8x32xf32>
    %38 = arith.addf %28, %37 : vector<8x32xf32>
    %c3_39 = arith.constant 3 : index
    %c0_40 = arith.constant 0 : index
    %c0_41 = arith.constant 0 : index
    %39 = vector.load %arg10[%c3_39, %c0_40, %c0_41] : memref<9x16x32xbf16, #tpu.memory_space<vmem>>, vector<1x16x32xbf16>
    %40 = vector.shape_cast %39 : vector<1x16x32xbf16> to vector<16x32xbf16>
    %cst_42 = arith.constant dense<0.000000e+00> : vector<8x32xf32>
    %41 = tpu.matmul %34, %40, %cst_42 {dimension_numbers = #tpu.dot_dimension_numbers<[1], [0], [0], [1], [0, 0, 1, 1], [], []>} : vector<8x16xbf16>, vector<16x32xbf16>, vector<8x32xf32> -> vector<8x32xf32>
    %42 = arith.addf %32, %41 : vector<8x32xf32>
    %c0_43 = arith.constant 0 : index
    %c0_44 = arith.constant 0 : index
    %c0_45 = arith.constant 0 : index
    %43 = vector.load %arg4[%c0_43, %c0_44, %c0_45] : memref<1x14x16xbf16, #tpu.memory_space<vmem>>, vector<1x8x16xbf16>
    %44 = vector.shape_cast %43 : vector<1x8x16xbf16> to vector<8x16xbf16>
    %c4 = arith.constant 4 : index
    %c0_46 = arith.constant 0 : index
    %c0_47 = arith.constant 0 : index
    %45 = vector.load %arg6[%c4, %c0_46, %c0_47] : memref<9x16x32xbf16, #tpu.memory_space<vmem>>, vector<1x16x32xbf16>
    %46 = vector.shape_cast %45 : vector<1x16x32xbf16> to vector<16x32xbf16>
    %cst_48 = arith.constant dense<0.000000e+00> : vector<8x32xf32>
    %47 = tpu.matmul %44, %46, %cst_48 {dimension_numbers = #tpu.dot_dimension_numbers<[1], [0], [0], [1], [0, 0, 1, 1], [], []>} : vector<8x16xbf16>, vector<16x32xbf16>, vector<8x32xf32> -> vector<8x32xf32>
    %48 = arith.addf %38, %47 : vector<8x32xf32>
    %c4_49 = arith.constant 4 : index
    %c0_50 = arith.constant 0 : index
    %c0_51 = arith.constant 0 : index
    %49 = vector.load %arg10[%c4_49, %c0_50, %c0_51] : memref<9x16x32xbf16, #tpu.memory_space<vmem>>, vector<1x16x32xbf16>
    %50 = vector.shape_cast %49 : vector<1x16x32xbf16> to vector<16x32xbf16>
    %cst_52 = arith.constant dense<0.000000e+00> : vector<8x32xf32>
    %51 = tpu.matmul %44, %50, %cst_52 {dimension_numbers = #tpu.dot_dimension_numbers<[1], [0], [0], [1], [0, 0, 1, 1], [], []>} : vector<8x16xbf16>, vector<16x32xbf16>, vector<8x32xf32> -> vector<8x32xf32>
    %52 = arith.addf %42, %51 : vector<8x32xf32>
    %c0_53 = arith.constant 0 : index
    %c1_54 = arith.constant 1 : index
    %c0_55 = arith.constant 0 : index
    %53 = vector.load %arg3[%c0_53, %c1_54, %c0_55] : memref<1x14x16xbf16, #tpu.memory_space<vmem>>, vector<1x8x16xbf16>
    %54 = vector.shape_cast %53 : vector<1x8x16xbf16> to vector<8x16xbf16>
    %c5 = arith.constant 5 : index
    %c0_56 = arith.constant 0 : index
    %c0_57 = arith.constant 0 : index
    %55 = vector.load %arg6[%c5, %c0_56, %c0_57] : memref<9x16x32xbf16, #tpu.memory_space<vmem>>, vector<1x16x32xbf16>
    %56 = vector.shape_cast %55 : vector<1x16x32xbf16> to vector<16x32xbf16>
    %cst_58 = arith.constant dense<0.000000e+00> : vector<8x32xf32>
    %57 = tpu.matmul %54, %56, %cst_58 {dimension_numbers = #tpu.dot_dimension_numbers<[1], [0], [0], [1], [0, 0, 1, 1], [], []>} : vector<8x16xbf16>, vector<16x32xbf16>, vector<8x32xf32> -> vector<8x32xf32>
    %58 = arith.addf %48, %57 : vector<8x32xf32>
    %c5_59 = arith.constant 5 : index
    %c0_60 = arith.constant 0 : index
    %c0_61 = arith.constant 0 : index
    %59 = vector.load %arg10[%c5_59, %c0_60, %c0_61] : memref<9x16x32xbf16, #tpu.memory_space<vmem>>, vector<1x16x32xbf16>
    %60 = vector.shape_cast %59 : vector<1x16x32xbf16> to vector<16x32xbf16>
    %cst_62 = arith.constant dense<0.000000e+00> : vector<8x32xf32>
    %61 = tpu.matmul %54, %60, %cst_62 {dimension_numbers = #tpu.dot_dimension_numbers<[1], [0], [0], [1], [0, 0, 1, 1], [], []>} : vector<8x16xbf16>, vector<16x32xbf16>, vector<8x32xf32> -> vector<8x32xf32>
    %62 = arith.addf %52, %61 : vector<8x32xf32>
    %c0_63 = arith.constant 0 : index
    %c4_64 = arith.constant 4 : index
    %c0_65 = arith.constant 0 : index
    %63 = vector.load %arg1[%c0_63, %c4_64, %c0_65] : memref<1x14x16xbf16, #tpu.memory_space<vmem>>, vector<1x8x16xbf16>
    %64 = vector.shape_cast %63 : vector<1x8x16xbf16> to vector<8x16xbf16>
    %c6 = arith.constant 6 : index
    %c0_66 = arith.constant 0 : index
    %c0_67 = arith.constant 0 : index
    %65 = vector.load %arg6[%c6, %c0_66, %c0_67] : memref<9x16x32xbf16, #tpu.memory_space<vmem>>, vector<1x16x32xbf16>
    %66 = vector.shape_cast %65 : vector<1x16x32xbf16> to vector<16x32xbf16>
    %cst_68 = arith.constant dense<0.000000e+00> : vector<8x32xf32>
    %67 = tpu.matmul %64, %66, %cst_68 {dimension_numbers = #tpu.dot_dimension_numbers<[1], [0], [0], [1], [0, 0, 1, 1], [], []>} : vector<8x16xbf16>, vector<16x32xbf16>, vector<8x32xf32> -> vector<8x32xf32>
    %68 = arith.addf %58, %67 : vector<8x32xf32>
    %c6_69 = arith.constant 6 : index
    %c0_70 = arith.constant 0 : index
    %c0_71 = arith.constant 0 : index
    %69 = vector.load %arg10[%c6_69, %c0_70, %c0_71] : memref<9x16x32xbf16, #tpu.memory_space<vmem>>, vector<1x16x32xbf16>
    %70 = vector.shape_cast %69 : vector<1x16x32xbf16> to vector<16x32xbf16>
    %cst_72 = arith.constant dense<0.000000e+00> : vector<8x32xf32>
    %71 = tpu.matmul %64, %70, %cst_72 {dimension_numbers = #tpu.dot_dimension_numbers<[1], [0], [0], [1], [0, 0, 1, 1], [], []>} : vector<8x16xbf16>, vector<16x32xbf16>, vector<8x32xf32> -> vector<8x32xf32>
    %72 = arith.addf %62, %71 : vector<8x32xf32>
    %c0_73 = arith.constant 0 : index
    %c4_74 = arith.constant 4 : index
    %c0_75 = arith.constant 0 : index
    %73 = vector.load %arg2[%c0_73, %c4_74, %c0_75] : memref<1x14x16xbf16, #tpu.memory_space<vmem>>, vector<1x8x16xbf16>
    %74 = vector.shape_cast %73 : vector<1x8x16xbf16> to vector<8x16xbf16>
    %c7 = arith.constant 7 : index
    %c0_76 = arith.constant 0 : index
    %c0_77 = arith.constant 0 : index
    %75 = vector.load %arg6[%c7, %c0_76, %c0_77] : memref<9x16x32xbf16, #tpu.memory_space<vmem>>, vector<1x16x32xbf16>
    %76 = vector.shape_cast %75 : vector<1x16x32xbf16> to vector<16x32xbf16>
    %cst_78 = arith.constant dense<0.000000e+00> : vector<8x32xf32>
    %77 = tpu.matmul %74, %76, %cst_78 {dimension_numbers = #tpu.dot_dimension_numbers<[1], [0], [0], [1], [0, 0, 1, 1], [], []>} : vector<8x16xbf16>, vector<16x32xbf16>, vector<8x32xf32> -> vector<8x32xf32>
    %78 = arith.addf %68, %77 : vector<8x32xf32>
    %c7_79 = arith.constant 7 : index
    %c0_80 = arith.constant 0 : index
    %c0_81 = arith.constant 0 : index
    %79 = vector.load %arg10[%c7_79, %c0_80, %c0_81] : memref<9x16x32xbf16, #tpu.memory_space<vmem>>, vector<1x16x32xbf16>
    %80 = vector.shape_cast %79 : vector<1x16x32xbf16> to vector<16x32xbf16>
    %cst_82 = arith.constant dense<0.000000e+00> : vector<8x32xf32>
    %81 = tpu.matmul %74, %80, %cst_82 {dimension_numbers = #tpu.dot_dimension_numbers<[1], [0], [0], [1], [0, 0, 1, 1], [], []>} : vector<8x16xbf16>, vector<16x32xbf16>, vector<8x32xf32> -> vector<8x32xf32>
    %82 = arith.addf %72, %81 : vector<8x32xf32>
    %c0_83 = arith.constant 0 : index
    %c5_84 = arith.constant 5 : index
    %c0_85 = arith.constant 0 : index
    %83 = vector.load %arg1[%c0_83, %c5_84, %c0_85] : memref<1x14x16xbf16, #tpu.memory_space<vmem>>, vector<1x8x16xbf16>
    %84 = vector.shape_cast %83 : vector<1x8x16xbf16> to vector<8x16xbf16>
    %c8 = arith.constant 8 : index
    %c0_86 = arith.constant 0 : index
    %c0_87 = arith.constant 0 : index
    %85 = vector.load %arg6[%c8, %c0_86, %c0_87] : memref<9x16x32xbf16, #tpu.memory_space<vmem>>, vector<1x16x32xbf16>
    %86 = vector.shape_cast %85 : vector<1x16x32xbf16> to vector<16x32xbf16>
    %cst_88 = arith.constant dense<0.000000e+00> : vector<8x32xf32>
    %87 = tpu.matmul %84, %86, %cst_88 {dimension_numbers = #tpu.dot_dimension_numbers<[1], [0], [0], [1], [0, 0, 1, 1], [], []>} : vector<8x16xbf16>, vector<16x32xbf16>, vector<8x32xf32> -> vector<8x32xf32>
    %88 = arith.addf %78, %87 : vector<8x32xf32>
    %c8_89 = arith.constant 8 : index
    %c0_90 = arith.constant 0 : index
    %c0_91 = arith.constant 0 : index
    %89 = vector.load %arg10[%c8_89, %c0_90, %c0_91] : memref<9x16x32xbf16, #tpu.memory_space<vmem>>, vector<1x16x32xbf16>
    %90 = vector.shape_cast %89 : vector<1x16x32xbf16> to vector<16x32xbf16>
    %cst_92 = arith.constant dense<0.000000e+00> : vector<8x32xf32>
    %91 = tpu.matmul %84, %90, %cst_92 {dimension_numbers = #tpu.dot_dimension_numbers<[1], [0], [0], [1], [0, 0, 1, 1], [], []>} : vector<8x16xbf16>, vector<16x32xbf16>, vector<8x32xf32> -> vector<8x32xf32>
    %92 = arith.addf %82, %91 : vector<8x32xf32>
    %c0_93 = arith.constant 0 : index
    %c0_94 = arith.constant 0 : index
    %93 = vector.load %arg7[%c0_93, %c0_94] : memref<1x32xf32, #tpu.memory_space<vmem>>, vector<1x32xf32>
    %94 = vector.broadcast %93 : vector<1x32xf32> to vector<8x32xf32>
    %95 = arith.addf %88, %94 : vector<8x32xf32>
    %cst_95 = arith.constant 0.000000e+00 : f32
    %96 = vector.broadcast %cst_95 : f32 to vector<8x32xf32>
    %97 = arith.maximumf %95, %96 : vector<8x32xf32>
    %98 = vector.broadcast %0 : vector<8x1xf32> to vector<8x32xf32>
    %99 = arith.mulf %97, %98 : vector<8x32xf32>
    %cst_96 = arith.constant 0.000000e+00 : f32
    %100 = vector.broadcast %cst_96 : f32 to vector<5x32xf32>
    %c0_97 = arith.constant 0 : index
    %c0_98 = arith.constant 0 : index
    %101 = vector.load %arg12[%c0_97, %c0_98] : memref<18x32xf32, #tpu.memory_space<vmem>>, vector<5x32xf32>
    tpu.vector_store %arg12[%c0_97, %c0_98], %100 {strides = array<i32>} : memref<18x32xf32, #tpu.memory_space<vmem>>, vector<5x32xf32>,
    %c13 = arith.constant 13 : index
    %c0_99 = arith.constant 0 : index
    %102 = vector.load %arg12[%c13, %c0_99] : memref<18x32xf32, #tpu.memory_space<vmem>>, vector<5x32xf32>
    tpu.vector_store %arg12[%c13, %c0_99], %100 {strides = array<i32>} : memref<18x32xf32, #tpu.memory_space<vmem>>, vector<5x32xf32>,
    %c5_100 = arith.constant 5 : index
    %c0_101 = arith.constant 0 : index
    %103 = vector.load %arg12[%c5_100, %c0_101] : memref<18x32xf32, #tpu.memory_space<vmem>>, vector<8x32xf32>
    tpu.vector_store %arg12[%c5_100, %c0_101], %99 {strides = array<i32>} : memref<18x32xf32, #tpu.memory_space<vmem>>, vector<8x32xf32>,
    %cst_102 = arith.constant 0.000000e+00 : f32
    %104 = vector.broadcast %cst_102 : f32 to vector<8x32xf32>
    %c0_103 = arith.constant 0 : index
    %c0_104 = arith.constant 0 : index
    %105 = vector.load %arg12[%c0_103, %c0_104] : memref<18x32xf32, #tpu.memory_space<vmem>>, vector<8x32xf32>
    %106 = arith.truncf %105 : vector<8x32xf32> to vector<8x32xbf16>
    %c0_105 = arith.constant 0 : index
    %c0_106 = arith.constant 0 : index
    %c0_107 = arith.constant 0 : index
    %107 = vector.load %arg8[%c0_105, %c0_106, %c0_107] : memref<9x32x32xbf16, #tpu.memory_space<vmem>>, vector<1x32x32xbf16>
    %108 = vector.shape_cast %107 : vector<1x32x32xbf16> to vector<32x32xbf16>
    %cst_108 = arith.constant dense<0.000000e+00> : vector<8x32xf32>
    %109 = tpu.matmul %106, %108, %cst_108 {dimension_numbers = #tpu.dot_dimension_numbers<[1], [0], [0], [1], [0, 0, 1, 1], [], []>} : vector<8x32xbf16>, vector<32x32xbf16>, vector<8x32xf32> -> vector<8x32xf32>
    %110 = arith.addf %104, %109 : vector<8x32xf32>
    %c1_109 = arith.constant 1 : index
    %c0_110 = arith.constant 0 : index
    %111 = vector.load %arg12[%c1_109, %c0_110] : memref<18x32xf32, #tpu.memory_space<vmem>>, vector<8x32xf32>
    %112 = arith.truncf %111 : vector<8x32xf32> to vector<8x32xbf16>
    %c1_111 = arith.constant 1 : index
    %c0_112 = arith.constant 0 : index
    %c0_113 = arith.constant 0 : index
    %113 = vector.load %arg8[%c1_111, %c0_112, %c0_113] : memref<9x32x32xbf16, #tpu.memory_space<vmem>>, vector<1x32x32xbf16>
    %114 = vector.shape_cast %113 : vector<1x32x32xbf16> to vector<32x32xbf16>
    %cst_114 = arith.constant dense<0.000000e+00> : vector<8x32xf32>
    %115 = tpu.matmul %112, %114, %cst_114 {dimension_numbers = #tpu.dot_dimension_numbers<[1], [0], [0], [1], [0, 0, 1, 1], [], []>} : vector<8x32xbf16>, vector<32x32xbf16>, vector<8x32xf32> -> vector<8x32xf32>
    %116 = arith.addf %110, %115 : vector<8x32xf32>
    %c2_115 = arith.constant 2 : index
    %c0_116 = arith.constant 0 : index
    %117 = vector.load %arg12[%c2_115, %c0_116] : memref<18x32xf32, #tpu.memory_space<vmem>>, vector<8x32xf32>
    %118 = arith.truncf %117 : vector<8x32xf32> to vector<8x32xbf16>
    %c2_117 = arith.constant 2 : index
    %c0_118 = arith.constant 0 : index
    %c0_119 = arith.constant 0 : index
    %119 = vector.load %arg8[%c2_117, %c0_118, %c0_119] : memref<9x32x32xbf16, #tpu.memory_space<vmem>>, vector<1x32x32xbf16>
    %120 = vector.shape_cast %119 : vector<1x32x32xbf16> to vector<32x32xbf16>
    %cst_120 = arith.constant dense<0.000000e+00> : vector<8x32xf32>
    %121 = tpu.matmul %118, %120, %cst_120 {dimension_numbers = #tpu.dot_dimension_numbers<[1], [0], [0], [1], [0, 0, 1, 1], [], []>} : vector<8x32xbf16>, vector<32x32xbf16>, vector<8x32xf32> -> vector<8x32xf32>
    %122 = arith.addf %116, %121 : vector<8x32xf32>
    %c4_121 = arith.constant 4 : index
    %c0_122 = arith.constant 0 : index
    %123 = vector.load %arg12[%c4_121, %c0_122] : memref<18x32xf32, #tpu.memory_space<vmem>>, vector<8x32xf32>
    %124 = arith.truncf %123 : vector<8x32xf32> to vector<8x32xbf16>
    %c3_123 = arith.constant 3 : index
    %c0_124 = arith.constant 0 : index
    %c0_125 = arith.constant 0 : index
    %125 = vector.load %arg8[%c3_123, %c0_124, %c0_125] : memref<9x32x32xbf16, #tpu.memory_space<vmem>>, vector<1x32x32xbf16>
    %126 = vector.shape_cast %125 : vector<1x32x32xbf16> to vector<32x32xbf16>
    %cst_126 = arith.constant dense<0.000000e+00> : vector<8x32xf32>
    %127 = tpu.matmul %124, %126, %cst_126 {dimension_numbers = #tpu.dot_dimension_numbers<[1], [0], [0], [1], [0, 0, 1, 1], [], []>} : vector<8x32xbf16>, vector<32x32xbf16>, vector<8x32xf32> -> vector<8x32xf32>
    %128 = arith.addf %122, %127 : vector<8x32xf32>
    %c5_127 = arith.constant 5 : index
    %c0_128 = arith.constant 0 : index
    %129 = vector.load %arg12[%c5_127, %c0_128] : memref<18x32xf32, #tpu.memory_space<vmem>>, vector<8x32xf32>
    %130 = arith.truncf %129 : vector<8x32xf32> to vector<8x32xbf16>
    %c4_129 = arith.constant 4 : index
    %c0_130 = arith.constant 0 : index
    %c0_131 = arith.constant 0 : index
    %131 = vector.load %arg8[%c4_129, %c0_130, %c0_131] : memref<9x32x32xbf16, #tpu.memory_space<vmem>>, vector<1x32x32xbf16>
    %132 = vector.shape_cast %131 : vector<1x32x32xbf16> to vector<32x32xbf16>
    %cst_132 = arith.constant dense<0.000000e+00> : vector<8x32xf32>
    %133 = tpu.matmul %130, %132, %cst_132 {dimension_numbers = #tpu.dot_dimension_numbers<[1], [0], [0], [1], [0, 0, 1, 1], [], []>} : vector<8x32xbf16>, vector<32x32xbf16>, vector<8x32xf32> -> vector<8x32xf32>
    %134 = arith.addf %128, %133 : vector<8x32xf32>
    %c6_133 = arith.constant 6 : index
    %c0_134 = arith.constant 0 : index
    %135 = vector.load %arg12[%c6_133, %c0_134] : memref<18x32xf32, #tpu.memory_space<vmem>>, vector<8x32xf32>
    %136 = arith.truncf %135 : vector<8x32xf32> to vector<8x32xbf16>
    %c5_135 = arith.constant 5 : index
    %c0_136 = arith.constant 0 : index
    %c0_137 = arith.constant 0 : index
    %137 = vector.load %arg8[%c5_135, %c0_136, %c0_137] : memref<9x32x32xbf16, #tpu.memory_space<vmem>>, vector<1x32x32xbf16>
    %138 = vector.shape_cast %137 : vector<1x32x32xbf16> to vector<32x32xbf16>
    %cst_138 = arith.constant dense<0.000000e+00> : vector<8x32xf32>
    %139 = tpu.matmul %136, %138, %cst_138 {dimension_numbers = #tpu.dot_dimension_numbers<[1], [0], [0], [1], [0, 0, 1, 1], [], []>} : vector<8x32xbf16>, vector<32x32xbf16>, vector<8x32xf32> -> vector<8x32xf32>
    %140 = arith.addf %134, %139 : vector<8x32xf32>
    %c8_139 = arith.constant 8 : index
    %c0_140 = arith.constant 0 : index
    %141 = vector.load %arg12[%c8_139, %c0_140] : memref<18x32xf32, #tpu.memory_space<vmem>>, vector<8x32xf32>
    %142 = arith.truncf %141 : vector<8x32xf32> to vector<8x32xbf16>
    %c6_141 = arith.constant 6 : index
    %c0_142 = arith.constant 0 : index
    %c0_143 = arith.constant 0 : index
    %143 = vector.load %arg8[%c6_141, %c0_142, %c0_143] : memref<9x32x32xbf16, #tpu.memory_space<vmem>>, vector<1x32x32xbf16>
    %144 = vector.shape_cast %143 : vector<1x32x32xbf16> to vector<32x32xbf16>
    %cst_144 = arith.constant dense<0.000000e+00> : vector<8x32xf32>
    %145 = tpu.matmul %142, %144, %cst_144 {dimension_numbers = #tpu.dot_dimension_numbers<[1], [0], [0], [1], [0, 0, 1, 1], [], []>} : vector<8x32xbf16>, vector<32x32xbf16>, vector<8x32xf32> -> vector<8x32xf32>
    %146 = arith.addf %140, %145 : vector<8x32xf32>
    %c9 = arith.constant 9 : index
    %c0_145 = arith.constant 0 : index
    %147 = vector.load %arg12[%c9, %c0_145] : memref<18x32xf32, #tpu.memory_space<vmem>>, vector<8x32xf32>
    %148 = arith.truncf %147 : vector<8x32xf32> to vector<8x32xbf16>
    %c7_146 = arith.constant 7 : index
    %c0_147 = arith.constant 0 : index
    %c0_148 = arith.constant 0 : index
    %149 = vector.load %arg8[%c7_146, %c0_147, %c0_148] : memref<9x32x32xbf16, #tpu.memory_space<vmem>>, vector<1x32x32xbf16>
    %150 = vector.shape_cast %149 : vector<1x32x32xbf16> to vector<32x32xbf16>
    %cst_149 = arith.constant dense<0.000000e+00> : vector<8x32xf32>
    %151 = tpu.matmul %148, %150, %cst_149 {dimension_numbers = #tpu.dot_dimension_numbers<[1], [0], [0], [1], [0, 0, 1, 1], [], []>} : vector<8x32xbf16>, vector<32x32xbf16>, vector<8x32xf32> -> vector<8x32xf32>
    %152 = arith.addf %146, %151 : vector<8x32xf32>
    %c10 = arith.constant 10 : index
    %c0_150 = arith.constant 0 : index
    %153 = vector.load %arg12[%c10, %c0_150] : memref<18x32xf32, #tpu.memory_space<vmem>>, vector<8x32xf32>
    %154 = arith.truncf %153 : vector<8x32xf32> to vector<8x32xbf16>
    %c8_151 = arith.constant 8 : index
    %c0_152 = arith.constant 0 : index
    %c0_153 = arith.constant 0 : index
    %155 = vector.load %arg8[%c8_151, %c0_152, %c0_153] : memref<9x32x32xbf16, #tpu.memory_space<vmem>>, vector<1x32x32xbf16>
    %156 = vector.shape_cast %155 : vector<1x32x32xbf16> to vector<32x32xbf16>
    %cst_154 = arith.constant dense<0.000000e+00> : vector<8x32xf32>
    %157 = tpu.matmul %154, %156, %cst_154 {dimension_numbers = #tpu.dot_dimension_numbers<[1], [0], [0], [1], [0, 0, 1, 1], [], []>} : vector<8x32xbf16>, vector<32x32xbf16>, vector<8x32xf32> -> vector<8x32xf32>
    %158 = arith.addf %152, %157 : vector<8x32xf32>
    %c0_155 = arith.constant 0 : index
    %c0_156 = arith.constant 0 : index
    %159 = vector.load %arg9[%c0_155, %c0_156] : memref<1x32xf32, #tpu.memory_space<vmem>>, vector<1x32xf32>
    %160 = vector.broadcast %159 : vector<1x32xf32> to vector<8x32xf32>
    %161 = arith.addf %158, %160 : vector<8x32xf32>
    %162 = arith.addf %161, %92 : vector<8x32xf32>
    %cst_157 = arith.constant 0.000000e+00 : f32
    %163 = vector.broadcast %cst_157 : f32 to vector<8x32xf32>
    %164 = arith.maximumf %162, %163 : vector<8x32xf32>
    %165 = vector.broadcast %0 : vector<8x1xf32> to vector<8x32xf32>
    %166 = arith.mulf %164, %165 : vector<8x32xf32>
    %167 = arith.truncf %166 : vector<8x32xf32> to vector<8x32xbf16>
    %c0_158 = arith.constant 0 : index
    %c0_159 = arith.constant 0 : index
    %c0_160 = arith.constant 0 : index
    %168 = vector.load %arg11[%c0_158, %c0_159, %c0_160] : memref<1x8x32xbf16, #tpu.memory_space<vmem>>, vector<1x8x32xbf16>
    %169 = vector.shape_cast %168 : vector<1x8x32xbf16> to vector<8x32xbf16>
    %170 = vector.shape_cast %167 : vector<8x32xbf16> to vector<1x8x32xbf16>
    tpu.vector_store %arg11[%c0_158, %c0_159, %c0_160], %170 {strides = array<i32>} : memref<1x8x32xbf16, #tpu.memory_space<vmem>>, vector<1x8x32xbf16>,
    return
  }
  func.func @transform_0(%arg0: i32) -> (i32, i32, i32) {
    %c0_i32 = arith.constant 0 : i32
    %c0_i32_0 = arith.constant 0 : i32
    %c0_i32_1 = arith.constant 0 : i32
    return %arg0, %c0_i32, %c0_i32_0 : i32, i32, i32
  }
  func.func @transform_1(%arg0: i32) -> (i32, i32, i32) {
    %c0_i32 = arith.constant 0 : i32
    %c0_i32_0 = arith.constant 0 : i32
    %c0_i32_1 = arith.constant 0 : i32
    return %arg0, %c0_i32, %c0_i32_0 : i32, i32, i32
  }
  func.func @transform_2(%arg0: i32) -> (i32, i32, i32) {
    %c0_i32 = arith.constant 0 : i32
    %c0_i32_0 = arith.constant 0 : i32
    %c0_i32_1 = arith.constant 0 : i32
    return %arg0, %c0_i32, %c0_i32_0 : i32, i32, i32
  }
  func.func @transform_3(%arg0: i32) -> (i32, i32, i32) {
    %c0_i32 = arith.constant 0 : i32
    %c0_i32_0 = arith.constant 0 : i32
    %c0_i32_1 = arith.constant 0 : i32
    return %arg0, %c0_i32, %c0_i32_0 : i32, i32, i32
  }
  func.func @transform_4(%arg0: i32) -> (i32, i32) {
    %c0_i32 = arith.constant 0 : i32
    %c0_i32_0 = arith.constant 0 : i32
    %c0_i32_1 = arith.constant 0 : i32
    return %c0_i32, %c0_i32_0 : i32, i32
  }
  func.func @transform_5(%arg0: i32) -> (i32, i32, i32) {
    %c0_i32 = arith.constant 0 : i32
    %c0_i32_0 = arith.constant 0 : i32
    %c0_i32_1 = arith.constant 0 : i32
    %c0_i32_2 = arith.constant 0 : i32
    return %c0_i32, %c0_i32_0, %c0_i32_1 : i32, i32, i32
  }
  func.func @transform_6(%arg0: i32) -> (i32, i32) {
    %c0_i32 = arith.constant 0 : i32
    %c0_i32_0 = arith.constant 0 : i32
    %c0_i32_1 = arith.constant 0 : i32
    return %c0_i32, %c0_i32_0 : i32, i32
  }
  func.func @transform_7(%arg0: i32) -> (i32, i32, i32) {
    %c0_i32 = arith.constant 0 : i32
    %c0_i32_0 = arith.constant 0 : i32
    %c0_i32_1 = arith.constant 0 : i32
    %c0_i32_2 = arith.constant 0 : i32
    return %c0_i32, %c0_i32_0, %c0_i32_1 : i32, i32, i32
  }
  func.func @transform_8(%arg0: i32) -> (i32, i32) {
    %c0_i32 = arith.constant 0 : i32
    %c0_i32_0 = arith.constant 0 : i32
    %c0_i32_1 = arith.constant 0 : i32
    return %c0_i32, %c0_i32_0 : i32, i32
  }
  func.func @transform_9(%arg0: i32) -> (i32, i32, i32) {
    %c0_i32 = arith.constant 0 : i32
    %c0_i32_0 = arith.constant 0 : i32
    %c0_i32_1 = arith.constant 0 : i32
    %c0_i32_2 = arith.constant 0 : i32
    return %c0_i32, %c0_i32_0, %c0_i32_1 : i32, i32, i32
  }
  func.func @transform_10(%arg0: i32) -> (i32, i32, i32) {
    %c0_i32 = arith.constant 0 : i32
    %c0_i32_0 = arith.constant 0 : i32
    %c0_i32_1 = arith.constant 0 : i32
    return %arg0, %c0_i32, %c0_i32_0 : i32, i32, i32
  }
}

</mosaic_0001>

<bundles_post_ra>
// kernel: _lambda_.7
= control target key start
LH: loop header
LB: loop body
LE: loop exit
PB: predicated region body
PF: predicated region fallthrough
CT: control target
= control target key end

     0   :  { %s3642_s21 = smov 0   ;;  %s4489_s0 = inlined_call_operand.vmem [shape: bf16[2,102,8], index: 0, kind: input, shape index: {}]   ;;  %s4490_s1 = inlined_call_operand.vmem [shape: f32[80,1], index: 1, kind: input, shape index: {}]   ;;  %s4491_s2 = inlined_call_operand.vmem [shape: bf16[9,8,8], index: 2, kind: input, shape index: {}]   ;;  %s4492_s3 = inlined_call_operand.vmem [shape: f32[1,8], index: 3, kind: input, shape index: {}]   ;;  %s4493_s4 = inlined_call_operand.vmem [shape: bf16[9,8,8], index: 4, kind: input, shape index: {}]   ;;  %s4494_s5 = inlined_call_operand.vmem [shape: f32[1,8], index: 5, kind: input, shape index: {}]   ;;  %s4495_s6 = inlined_call_operand.vmem [shape: bf16[2,80,8], index: 6, kind: output, shape index: {}]  }
   0x1 LB: > { %s2875_s22 = sadd.s32 4294967295, %s3602_s21   ;;  %p2879_p0 = scmp.ge.s32.totalorder %s3602_s21, 1  ;;  %s3602_s21 = sphi %s3642_s21, %s16_s21  }
   0x2   : > { %p212_p1 = scmp.lt.s32.totalorder %s3602_s21, 3 }
   0x4   : > { %p213_p2 = pnand %p2879_p0, %p212_p1 }
   0x5   : > { %p242_p3 = scmp.lt.s32.totalorder (!%p213_p2), %s2875_s22, 1 }
   0x6   : > { %216 = sbr.rel (%p213_p2) target bundleno = 799 (0x31f), region = 44 }
   0xb   : > { %v2882_v0 = vld [vmem:[%s4491_s2 + $0x4] sm:$0xf]  ;;  %vm366_vm0 = vcmask 1043456   ;;  %v273_v1 = vld [vmem:[%s4491_s2] sm:$0xf]  ;;  %v3604_v2 = vmov 0.0  }
   0xc   : > { %3163 = vmatprep.subr.bf16.mxu0 %v3604_v2  ;;  %v368_v3 = vsel %vm366_vm0, %v2882_v0, 0  ;;  %3185 = vmatprep.subr.bf16.mxu1 %v3604_v2  ;;  %v454_v4 = vsel %vm366_vm0, %v273_v1, 0  ;;  %vm350_vm1 = vcmask 64512   ;;  %vm3605_vm2 = vmmov 0   ;;  %s4497_s22 = smov (!%p242_p3, %s2875_s22), 1 }
   0xd   : > { %3164 = vmatpush3.bf16.msra.mxu0 %v368_v3  ;;  %3186 = vmatpush3.bf16.msra.mxu1 %v454_v4  ;;  %1601 = vst.msk [vmem:[#allocation2] sm:$0xff] %vm350_vm1, %v3604_v2  ;;  %1604 = vst.msk [vmem:[#allocation2 + $0x5b] sm:$0xff] %vm350_vm1, %v3604_v2  ;;  %s3559_s27 = smul.u32 52, %s4497_s22  ;;  %v2906_v5 = vld [vmem:[%s4491_s2 + $0xc] sm:$0xf]  ;;  %vm535_vm4 = vcmask 1046528  }
   0xe   : > { %3165 = vmatprep.mubr.msk.bf16.mxu0 %vm3605_vm2, %v3604_v2  ;;  %3187 = vmatprep.mubr.msk.bf16.mxu1 %vm3605_vm2, %v3604_v2  ;;  %v716_v10 = vsel %vm366_vm0, %v2906_v5, 0  ;;  %v2899_v15 = vld [vmem:[%s4491_s2 + $0x8] sm:$0xf]  ;;  %vm305_vm3 = vsmask.f32 7424  ;;  %vm968_vm5 = vcmask 1045504  }
   0xf   : > { %3207 = vmatprep.subr.bf16.mxu0 %v3604_v2  ;;  %3229 = vmatprep.subr.bf16.mxu1 %v3604_v2  ;;  %s3679_s8 = scalar_lea.vmem %s4489_s0, %s3559_s27  ;;  %v563_v21 = vsel %vm366_vm0, %v2899_v15, 0  ;;  %v2925_v52 = vld [vmem:[%s4491_s2 + $0x14] sm:$0xf]  ;;  %v2918_v58 = vld [vmem:[%s4491_s2 + $0x10] sm:$0xf]  ;;  %vm1401_vm8 = vcmask 1044480  }
  0x10   : > { %v263_v6 = vld [vmem:[%s3679_s8] sm:$0xf]  ;;  %v3683_v7 = vld [vmem:[%s3679_s8 + $0x4] sm:$0xf]  ;;  %v3687_v9 = vld [vmem:[%s3679_s8 + $0x8] sm:$0xff]   ;;  %v996_v55 = vsel %vm366_vm0, %v2925_v52, 0 }
  0x11   : > { %v2883_v8 = vcombine.low %v263_v6, %v3683_v7  ;;  %v314_v13 = vshll.u32 %v3687_v9, 16  ;;  %v3693_v14 = vld [vmem:[%s3679_s8 + $0x10] sm:$0xff]   ;;  %v318_v19 = vshrl.u32 %v3687_v9, 16  ;;  %v3709_v25 = vld [vmem:[%s3679_s8 + $0x18] sm:$0xff]   ;;  %v3723_v31 = vld [vmem:[%s3679_s8 + $0x20] sm:$0xff]   ;;  %v537_v57 = vrot.slane %v3687_v9, 1 }
  0x12   : > { %v322_v20 = vshll.u32 %v3693_v14, 16  ;;  %v326_v27 = vshrl.u32 %v3693_v14, 16  ;;  %v330_v28 = vshll.u32 %v3709_v25, 16  ;;  %v334_v33 = vshrl.u32 %v3709_v25, 16  ;;  %v648_v38 = vld [vmem:[%s3679_s8 + $0x4] sm:$0xe] }
  0x13   : > { %v307_v11 = vshrl.u32 %v2883_v8, 16  ;;  %v309_v12 = vshll.u32 %v2883_v8, 16  ;;  %3188 = vmatmul.mubr.msk.bf16.vlgmr.msra.gmra.mxu1 %vm350_vm1, %v2883_v8  ;;  %v316_v17 = vrot.slane %v314_v13, 1  ;;  %v338_v34 = vshll.u32 %v3723_v31, 16  ;;  %v3744_v39 = vld [vmem:[%s3679_s8 + $0x8] sm:$0xf] }
  0x14   : > { %3191 = vmatprep.mubr.msk.bf16.mxu1 %vm3605_vm2, %v3604_v2  ;;  %3230 = vmatpush3.bf16.msra.mxu1 %v716_v10  ;;  %v324_v24 = vrot.slane %v322_v20, 1  ;;  %v332_v30 = vrot.slane %v330_v28, 1  ;;  %v3736_v37 = vld [vmem:[%s3679_s8 + $0x28] ss:$0 sps:$4 sm:$0x11]   ;;  %v342_v41 = vshrl.u32 %v3723_v31, 16  ;;  %v3750_v43 = vcombine.low %v648_v38, %v3744_v39 }
  0x15   : > { %v311_v16 = vrot.slane %v309_v12, 1  ;;  %3273 = vmatprep.subr.bf16.mxu1 %v3604_v2  ;;  %v320_v23 = vor.u32 %v318_v19, %v316_v17  ;;  %v340_v36 = vrot.slane %v338_v34, 1  ;;  %v346_v42 = vshll.u32 %v3736_v37, 16  ;;  %v3753_v44 = vld [vmem:[%s3679_s8 + $0xc] sm:$0xff]   ;;  %v529_v47 = vld [vmem:[%s3679_s8] sm:$0xe] }
  0x16   : > { %v328_v29 = vor.u32 %v326_v27, %v324_v24  ;;  %v336_v35 = vor.u32 %v334_v33, %v332_v30  ;;  %v689_v48 = vrot.slane %v3750_v43, 1  ;;  %v690_v49 = vrot.slane %v3753_v44, 1  ;;  %v3772_v54 = vld [vmem:[%s3679_s8 + $0x14] sm:$0xff]   ;;  %v3791_v63 = vld [vmem:[%s3679_s8 + $0x1c] sm:$0xff]   ;;  %v3805_v5 = vld [vmem:[%s3679_s8 + $0x24] sm:$0xff]   ;;  %s3560_s23 = smul.u32 40, %s4497_s22 }
  0x17   : > { %v312_v18 = vor.u32 %v311_v16, %v307_v11  ;;  %v325_v26 = vsel %vm305_vm3, %v320_v23, %v324_v24  ;;  %v344_v45 = vor.u32 %v342_v41, %v340_v36  ;;  %v348_v46 = vrot.slane %v346_v42, 1  ;;  %v3585_v10 = vld [vmem:[%s3679_s8 + $0x2c] ss:$0 sps:$4 sm:$0x11]   ;;  %v962_v13 = vld [vmem:[%s3679_s8 + $0x4] sm:$0xc] }
  0x18   : > { %v333_v32 = vsel %vm305_vm3, %v328_v29, %v332_v30  ;;  %v341_v40 = vsel %vm305_vm3, %v336_v35, %v340_v36  ;;  %v2900_v51 = vcombine.low %v529_v47, %v3683_v7  ;;  %v691_v53 = vsel %vm535_vm4, %v689_v48, %v690_v49  ;;  %v2944_v29 = vld [vmem:[%s4491_s2 + $0x1c] sm:$0xf]  ;;  %v2932_v36 = vld [vmem:[%s4491_s2 + $0x18] sm:$0xf]  ;;  %s4419_s25 = scalar_lea.vmem %s4495_s6, %s3560_s23 }
  0x19   : > { %v317_v22 = vsel %vm305_vm3, %v312_v18, %v316_v17  ;;  %v349_v50 = vsel %vm305_vm3, %v344_v45, %v348_v46  ;;  %v692_v59 = vrot.slane %v3772_v54, 1  ;;  %v877_v61 = vsel %vm366_vm0, %v2918_v58, 0  ;;  %v3889_v58 = vld [vmem:[%s3679_s8 + $0xc] sm:$0xf] }
  0x1a   : > { %3166 = vmatmul.mubr.msk.bf16.vlgmr.msra.gmra.mxu0 %vm350_vm1, %v317_v22  ;;  %v536_v56 = vrot.slane %v2900_v51, 1  ;;  %v539_v0 = vrot.slane %v3693_v14, 1  ;;  %v694_v1 = vrot.slane %v3791_v63, 1  ;;  %v541_v6 = vrot.slane %v3709_v25, 1 }
  0x1b   : > { %3208 = vmatpush3.bf16.msra.mxu0 %v563_v21  ;;  %3169 = vmatprep.mubr.msk.bf16.mxu0 %vm3605_vm2, %v3604_v2  ;;  %v693_v62 = vsel %vm535_vm4, %v690_v49, %v692_v59  ;;  %v696_v7 = vrot.slane %v3805_v5, 1  ;;  %v543_v11 = vrot.slane %v3723_v31, 1  ;;  %v698_v12 = vrot.slane %v3585_v10, 1 }
  0x1c   : > { %3192 = vmatmul.mubr.msk.bf16.gmra.mxu1 %vm350_vm1, %v3687_v9  ;;  %3251 = vmatprep.subr.bf16.mxu0 %v3604_v2  ;;  %v538_v60 = vsel %vm535_vm4, %v536_v56, %v537_v57  ;;  %v540_v3 = vsel %vm535_vm4, %v537_v57, %v539_v0  ;;  %v695_v4 = vsel %vm535_vm4, %v692_v59, %v694_v1  ;;  %v545_v17 = vrot.slane %v3736_v37, 1  ;;  %v1081_v57 = vld [vmem:[%s3679_s8 + $0x8] sm:$0xc] }
  0x1d   : > { %3195 = vmatprep.mubr.msk.bf16.mxu1 %vm3605_vm2, %v3604_v2  ;;  %v542_v8 = vsel %vm535_vm4, %v539_v0, %v541_v6  ;;  %v697_v9 = vsel %vm535_vm4, %v694_v1, %v696_v7  ;;  %v699_v15 = vsel %vm535_vm4, %v696_v7, %v698_v12  ;;  %v2926_v16 = vcombine.low %v962_v13, %v3744_v39 }
  0x1e   : > { %v809_v18 = vshrl.u32 %v3750_v43, 16  ;;  %v812_v19 = vshll.u32 %v3750_v43, 16  ;;  %v817_v20 = vshrl.u32 %v3753_v44, 16  ;;  %v820_v21 = vshll.u32 %v3753_v44, 16 }
  0x1f   : > { %v969_v22 = vrot.slane %v2926_v16, 2  ;;  %v970_v23 = vrot.slane %v3753_v44, 2  ;;  %v546_v24 = vsel %vm535_vm4, %v543_v11, %v545_v17  ;;  %v826_v34 = vshrl.u32 %v3772_v54, 16 }
  0x20   : > { %v819_v27 = vrot.slane %v817_v20, 1  ;;  %v822_v28 = vrot.slane %v820_v21, 2  ;;  %v829_v35 = vshll.u32 %v3772_v54, 16  ;;  %vm807_vm6 = vsmask.f32 6400 }
  0x21   : > { %v971_v30 = vsel %vm968_vm5, %v969_v22, %v970_v23  ;;  %v972_v37 = vrot.slane %v3772_v54, 2  ;;  %v828_v39 = vrot.slane %v826_v34, 1  ;;  %v1149_v41 = vsel %vm366_vm0, %v2932_v36, 0 }
  0x22   : > { %3170 = vmatmul.mubr.msk.bf16.gmra.mxu0 %vm350_vm1, %v325_v26  ;;  %v814_v26 = vrot.slane %v812_v19, 2  ;;  %v823_v33 = vor.u32 %v822_v28, %v819_v27  ;;  %v835_v44 = vshrl.u32 %v3791_v63, 16  ;;  %v838_v45 = vshll.u32 %v3791_v63, 16  ;;  %v259_v19 = vld [vmem:[%s4490_s1 + $0x30] sm:$0xff]  ;;  %v261_v27 = vld [vmem:[%s4490_s1 + $0x40] sm:$0xff] }
  0x23   : > { %3173 = vmatprep.mubr.msk.bf16.mxu0 %vm3605_vm2, %v3604_v2  ;;  %v973_v42 = vsel %vm968_vm5, %v970_v23, %v972_v37  ;;  %v974_v46 = vrot.slane %v3791_v63, 2  ;;  %v844_v52 = vshrl.u32 %v3805_v5, 16  ;;  %v3606_v54 = vmov 0   ;;  %v254_v63 = vld [vmem:[%s4490_s1 + $0x8] sm:$0xff] }
  0x24   : > { %3196 = vmatmul.mubr.msk.bf16.gmra.mxu1 %vm350_vm1, %v3693_v14  ;;  %v544_v14 = vsel %vm535_vm4, %v541_v6, %v543_v11  ;;  %v837_v48 = vrot.slane %v835_v44, 1  ;;  %v840_v49 = vrot.slane %v838_v45, 2  ;;  %3572 = vset.pattern.permute.xlu0 %v3606_v54  ;;  %v976_v56 = vrot.slane %v3805_v5, 2 }
  0x25   : > { %3199 = vmatprep.mubr.msk.bf16.mxu1 %vm3605_vm2, %v3604_v2  ;;  %3573 = vset.pattern.permute.xlu1 %v3606_v54  ;;  %v3898_v1 = vcombine.low %v1081_v57, %v3889_v58  ;;  %vm1240_vm7 = vsmask.f32 5376  ;;  %vm1602_vm9 = vcmask 59392   ;;  %vm2809_vm10 = vcmask 60416  }
  0x26   : > { %v841_v51 = vor.u32 %v840_v49, %v837_v48  ;;  %v977_v0 = vsel %vm968_vm5, %v974_v46, %v976_v56  ;;  %1603 = vst.msk [vmem:[#allocation2 + $0x8] sm:$0x7] %vm1602_vm9, %v3604_v2  ;;  %1605 = vst.msk [vmem:[#allocation2 + $0x63] sm:$0x7] %vm1602_vm9, %v3604_v2 }
  0x27   : > { %v1242_v10 = vshrl.u32 %v3898_v1, 16  ;;  %v1245_v11 = vshll.u32 %v3898_v1, 16 }
  0x29   : > { %v1244_v20 = vrot.slane %v1242_v10, 2  ;;  %v1247_v21 = vrot.slane %v1245_v11, 3  ;;  %v3593_v10 = vld [vmem:[%s3679_s8 + $0x30] ss:$0 sps:$4 sm:$0x33]  }
  0x2a   : > { %3174 = vmatmul.mubr.msk.bf16.gmra.mxu0 %vm350_vm1, %v333_v32 }
  0x2b   : > { %3177 = vmatprep.mubr.msk.bf16.mxu0 %vm3605_vm2, %v3604_v2  ;;  %v1248_v28 = vor.u32 %v1247_v21, %v1244_v20 }
  0x2c   : > { %3200 = vmatmul.mubr.msk.bf16.gmra.mxu1 %vm350_vm1, %v3709_v25  ;;  %v811_v25 = vrot.slane %v809_v18, 1  ;;  %v256_v18 = vld [vmem:[%s4490_s1 + $0x18] sm:$0xff] }
  0x2d   : > { %3203 = vmatprep.mubr.msk.bf16.mxu1 %vm3605_vm2, %v3604_v2 }
  0x2e   : > { %v815_v32 = vor.u32 %v814_v26, %v811_v25  ;;  %v258_v26 = vld [vmem:[%s4490_s1 + $0x28] sm:$0xff] }
  0x30   : > { %v824_v38 = vsel %vm807_vm6, %v815_v32, %v823_v33 }
  0x32   : > { %3178 = vmatmul.mubr.msk.bf16.gmra.mxu0 %vm350_vm1, %v341_v40  ;;  %v831_v40 = vrot.slane %v829_v35, 2 }
  0x33   : > { %3181 = vmatprep.mubr.msk.bf16.mxu0 %vm3605_vm2, %v3604_v2 }
  0x34   : > { %3204 = vmatmul.mubr.msk.bf16.gmra.mxu1 %vm350_vm1, %v3723_v31  ;;  %v1310_v31 = vsel %vm366_vm0, %v2944_v29, 0  ;;  %v832_v43 = vor.u32 %v831_v40, %v828_v39  ;;  %v262_v40 = vld [vmem:[%s4490_s1 + $0x48] sm:$0xff] }
  0x35   : > { %3231 = vmatprep.mubr.msk.bf16.mxu1 %vm3605_vm2, %v3604_v2 }
  0x36   : > { %v833_v47 = vsel %vm807_vm6, %v823_v33, %v832_v43  ;;  %v842_v59 = vsel %vm807_vm6, %v832_v43, %v841_v51  ;;  %v260_v33 = vld [vmem:[%s4490_s1 + $0x38] sm:$0xff] }
  0x3a   : > { %3182 = vmatmul.mubr.msk.bf16.gmra.mxu0 %vm350_vm1, %v349_v50  ;;  %v975_v50 = vsel %vm968_vm5, %v972_v37, %v974_v46  ;;  %v3950_v37 = vld [vmem:[%s3679_s8 + $0x20] sm:$0xff]  }
  0x3b   : > { %3209 = vmatprep.mubr.msk.bf16.mxu0 %vm3605_vm2, %v3604_v2  ;;  %v1268_v43 = vshrl.u32 %v3950_v37, 16  ;;  %v1271_v44 = vshll.u32 %v3950_v37, 16  ;;  %v1407_v20 = vrot.slane %v3950_v37, 3 }
  0x3c   : > { %3232 = vmatmul.mubr.msk.bf16.vlgmr.msra.gmra.mxu1 %vm350_vm1, %v691_v53  ;;  %v847_v53 = vshll.u32 %v3805_v5, 16 }
  0x3d   : > { %3235 = vmatprep.mubr.msk.bf16.mxu1 %vm3605_vm2, %v3604_v2  ;;  %3274 = vmatpush3.bf16.msra.mxu1 %v996_v55  ;;  %v253_v55 = vld [vmem:[%s4490_s1] sm:$0xff]  ;;  %v1270_v48 = vrot.slane %v1268_v43, 2  ;;  %v1273_v49 = vrot.slane %v1271_v44, 3 }
  0x3e   : > { %3317 = vmatprep.subr.bf16.mxu1 %v3604_v2  ;;  %1543 = vperm.xlu0 %3572, %v253_v55   ;;  %v2959_v43 = vld [vmem:[%s4493_s4 + $0x4] sm:$0xf] }
  0x42   : > { %3210 = vmatmul.mubr.msk.bf16.vlgmr.msra.gmra.mxu0 %vm350_vm1, %v538_v60  ;;  %v846_v60 = vrot.slane %v844_v52, 1  ;;  %1548 = vperm.xlu0 %3572, %v254_v63   ;;  %v1274_v52 = vor.u32 %v1273_v49, %v1270_v48 }
  0x43   : > { %3252 = vmatpush3.bf16.msra.mxu0 %v877_v61  ;;  %3213 = vmatprep.mubr.msk.bf16.mxu0 %vm3605_vm2, %v3604_v2  ;;  %v849_v61 = vrot.slane %v847_v53, 2 }
  0x44   : > { %3236 = vmatmul.mubr.msk.bf16.gmra.mxu1 %vm350_vm1, %v693_v62  ;;  %3295 = vmatprep.subr.bf16.mxu0 %v3604_v2  ;;  %v3587_v62 = vld [vmem:[%s3679_s8 + $0x2c] ss:$0 sps:$4 sm:$0x33]  }
  0x45   : > { %3239 = vmatprep.mubr.msk.bf16.mxu1 %vm3605_vm2, %v3604_v2  ;;  %v853_v5 = vshrl.u32 %v3587_v62, 16  ;;  %v856_v6 = vshll.u32 %v3587_v62, 16  ;;  %v978_v7 = vrot.slane %v3587_v62, 2 }
  0x47   : > { %v858_v16 = vrot.slane %v856_v6, 2  ;;  %v979_v17 = vsel %vm968_vm5, %v976_v56, %v978_v7 }
  0x4a   : > { %3214 = vmatmul.mubr.msk.bf16.gmra.mxu0 %vm350_vm1, %v540_v3  ;;  %v3901_v3 = vld [vmem:[%s3679_s8 + $0x10] sm:$0xff]  }
  0x4b   : > { %3217 = vmatprep.mubr.msk.bf16.mxu0 %vm3605_vm2, %v3604_v2  ;;  %v1250_v12 = vshrl.u32 %v3901_v3, 16  ;;  %v1253_v13 = vshll.u32 %v3901_v3, 16  ;;  %v1123_v39 = vrot.slane %v3901_v3, 2 }
  0x4c   : > { %3240 = vmatmul.mubr.msk.bf16.gmra.mxu1 %vm350_vm1, %v695_v4  ;;  %v850_v4 = vor.u32 %v849_v61, %v846_v60  ;;  %v3594_v60 = vld [vmem:[%s3679_s8 + $0x30] ss:$0 sps:$4 sm:$0x77]   ;;  %v1127_v61 = vrot.slane %v3950_v37, 2 }
  0x4d   : > { %3243 = vmatprep.mubr.msk.bf16.mxu1 %vm3605_vm2, %v3604_v2  ;;  %v1252_v22 = vrot.slane %v1250_v12, 2  ;;  %v1255_v23 = vrot.slane %v1253_v13, 3  ;;  %v1286_v63 = vshrl.u32 %v3594_v60, 16  ;;  %v1131_v12 = vrot.slane %v3593_v10, 2  ;;  %v1395_v13 = vld [vmem:[%s3679_s8 + $0x8] sm:$0x8] }
  0x4f   : > { %v1256_v29 = vor.u32 %v1255_v23, %v1252_v22 }
  0x51   : > { %v1257_v34 = vsel %vm1240_vm7, %v1248_v28, %v1256_v29 }
  0x52   : > { %3218 = vmatmul.mubr.msk.bf16.gmra.mxu0 %vm350_vm1, %v542_v8  ;;  %v255_v8 = vld [vmem:[%s4490_s1 + $0x10] sm:$0xff] }
  0x53   : > { %3221 = vmatprep.mubr.msk.bf16.mxu0 %vm3605_vm2, %v3604_v2  ;;  %1553 = vperm.xlu1 %3573, %v255_v8  }
  0x54   : > { %3244 = vmatmul.mubr.msk.bf16.gmra.mxu1 %vm350_vm1, %v697_v9  ;;  %v257_v9 = vld [vmem:[%s4490_s1 + $0x20] sm:$0xff] }
  0x55   : > { %3247 = vmatprep.mubr.msk.bf16.mxu1 %vm3605_vm2, %v3604_v2  ;;  %1563 = vperm.xlu0 %3572, %v257_v9  }
  0x57   : > { %1558 = vperm.xlu1 %3573, %v256_v18  }
  0x59   : > { %1573 = vperm.xlu0 %3572, %v259_v19  }
  0x5a   : > { %3222 = vmatmul.mubr.msk.bf16.gmra.mxu0 %vm350_vm1, %v544_v14  ;;  %v851_v14 = vsel %vm807_vm6, %v841_v51, %v850_v4 }
  0x5b   : > { %3225 = vmatprep.mubr.msk.bf16.mxu0 %vm3605_vm2, %v3604_v2  ;;  %1568 = vperm.xlu1 %3573, %v258_v26  }
  0x5c   : > { %3248 = vmatmul.mubr.msk.bf16.gmra.mxu1 %vm350_vm1, %v699_v15  ;;  %v855_v15 = vrot.slane %v853_v5, 1  ;;  %v1288_v5 = vrot.slane %v1286_v63, 2 }
  0x5d   : > { %3275 = vmatprep.mubr.msk.bf16.mxu1 %vm3605_vm2, %v3604_v2  ;;  %1583 = vperm.xlu0 %3572, %v261_v27  }
  0x5e   : > { %v859_v25 = vor.u32 %v858_v16, %v855_v15  ;;  %v2952_v15 = vcombine.low %v1395_v13, %v3889_v58 }
  0x5f   : > { %1578 = vperm.xlu1 %3573, %v260_v33  }
  0x60   : > { %v860_v32 = vsel %vm807_vm6, %v850_v4, %v859_v25  ;;  %v1402_v16 = vrot.slane %v2952_v15, 3 }
  0x62   : > { %3226 = vmatmul.mubr.msk.bf16.gmra.mxu0 %vm350_vm1, %v546_v24  ;;  %v3928_v24 = vld [vmem:[%s3679_s8 + $0x18] sm:$0xff]  }
  0x63   : > { %3253 = vmatprep.mubr.msk.bf16.mxu0 %vm3605_vm2, %v3604_v2  ;;  %1588 = vperm.xlu1 %3573, %v262_v40   ;;  %v1125_v51 = vrot.slane %v3928_v24, 2  ;;  %v1405_v19 = vrot.slane %v3928_v24, 3 }
  0x64   : > { %3276 = vmatmul.mubr.msk.bf16.vlgmr.msra.gmra.mxu1 %vm350_vm1, %v971_v30  ;;  %v1259_v30 = vshrl.u32 %v3928_v24, 16 }
  0x65   : > { %3279 = vmatprep.mubr.msk.bf16.mxu1 %vm3605_vm2, %v3604_v2  ;;  %3318 = vmatpush3.bf16.msra.mxu1 %v1310_v31  ;;  %v1262_v31 = vshll.u32 %v3928_v24, 16  ;;  %v1126_v55 = vsel %vm968_vm5, %v1123_v39, %v1125_v51  ;;  %v1411_v24 = vrot.slane %v3594_v60, 3 }
  0x66   : > { %3361 = vmatprep.subr.bf16.mxu1 %v3604_v2  ;;  %v1261_v35 = vrot.slane %v1259_v30, 2 }
  0x67   : > { %v1264_v36 = vrot.slane %v1262_v31, 3 }
  0x6a   : > { %3254 = vmatmul.mubr.msk.bf16.vlgmr.msra.gmra.mxu0 %vm350_vm1, %v824_v38  ;;  %v1122_v38 = vrot.slane %v3898_v1, 2  ;;  %v1128_v1 = vsel %vm968_vm5, %v1125_v51, %v1127_v61 }
  0x6b   : > { %3296 = vmatpush3.bf16.msra.mxu0 %v1149_v41  ;;  %3257 = vmatprep.mubr.msk.bf16.mxu0 %vm3605_vm2, %v3604_v2  ;;  %v2951_v41 = vld [vmem:[%s4491_s2 + $0x20] sm:$0xf] }
  0x6c   : > { %3280 = vmatmul.mubr.msk.bf16.gmra.mxu1 %vm350_vm1, %v973_v42  ;;  %3339 = vmatprep.subr.bf16.mxu0 %v3604_v2  ;;  %v1265_v42 = vor.u32 %v1264_v36, %v1261_v35  ;;  %v1124_v45 = vsel %vm968_vm5, %v1122_v38, %v1123_v39  ;;  %v1429_v46 = vsel %vm366_vm0, %v2951_v41, 0 }
  0x6d   : > { %3283 = vmatprep.mubr.msk.bf16.mxu1 %vm3605_vm2, %v3604_v2 }
  0x6e   : > { %v1275_v56 = vsel %vm1240_vm7, %v1265_v42, %v1274_v52 }
  0x72   : > { %3258 = vmatmul.mubr.msk.bf16.gmra.mxu0 %vm350_vm1, %v833_v47  ;;  %v1266_v47 = vsel %vm1240_vm7, %v1256_v29, %v1265_v42 }
  0x73   : > { %3261 = vmatprep.mubr.msk.bf16.mxu0 %vm3605_vm2, %v3604_v2 }
  0x74   : > { %3284 = vmatmul.mubr.msk.bf16.gmra.mxu1 %vm350_vm1, %v975_v50  ;;  %v3972_v50 = vld [vmem:[%s3679_s8 + $0x28] sm:$0xff]  }
  0x75   : > { %3287 = vmatprep.mubr.msk.bf16.mxu1 %vm3605_vm2, %v3604_v2  ;;  %v1277_v53 = vshrl.u32 %v3972_v50, 16  ;;  %v1280_v54 = vshll.u32 %v3972_v50, 16  ;;  %v1129_v7 = vrot.slane %v3972_v50, 2  ;;  %v1409_v21 = vrot.slane %v3972_v50, 3 }
  0x77   : > { %v1279_v57 = vrot.slane %v1277_v53, 2  ;;  %v1130_v9 = vsel %vm968_vm5, %v1127_v61, %v1129_v7  ;;  %v1410_v22 = vsel %vm1401_vm8, %v1407_v20, %v1409_v21  ;;  %v1412_v26 = vsel %vm1401_vm8, %v1409_v21, %v1411_v24 }
  0x7a   : > { %3262 = vmatmul.mubr.msk.bf16.gmra.mxu0 %vm350_vm1, %v842_v59  ;;  %v1282_v59 = vrot.slane %v1280_v54, 3 }
  0x7b   : > { %3265 = vmatprep.mubr.msk.bf16.mxu0 %vm3605_vm2, %v3604_v2 }
  0x7c   : > { %3288 = vmatmul.mubr.msk.bf16.gmra.mxu1 %vm350_vm1, %v977_v0  ;;  %v1283_v62 = vor.u32 %v1282_v59, %v1279_v57  ;;  %v1289_v0 = vshll.u32 %v3594_v60, 16 }
  0x7d   : > { %3291 = vmatprep.mubr.msk.bf16.mxu1 %vm3605_vm2, %v3604_v2 }
  0x7e   : > { %v1284_v4 = vsel %vm1240_vm7, %v1274_v52, %v1283_v62  ;;  %v1291_v6 = vrot.slane %v1289_v0, 3 }
  0x80   : > { %v1292_v8 = vor.u32 %v1291_v6, %v1288_v5 }
  0x82   : > { %3266 = vmatmul.mubr.msk.bf16.gmra.mxu0 %vm350_vm1, %v851_v14  ;;  %v1293_v11 = vsel %vm1240_vm7, %v1283_v62, %v1292_v8  ;;  %v1132_v14 = vsel %vm968_vm5, %v1129_v7, %v1131_v12 }
  0x83   : > { %3269 = vmatprep.mubr.msk.bf16.mxu0 %vm3605_vm2, %v3604_v2 }
  0x84   : > { %3292 = vmatmul.mubr.msk.bf16.gmra.mxu1 %vm350_vm1, %v979_v17  ;;  %v1403_v17 = vrot.slane %v3901_v3, 3  ;;  %v1408_v3 = vsel %vm1401_vm8, %v1405_v19, %v1407_v20 }
  0x85   : > { %3319 = vmatprep.mubr.msk.bf16.mxu1 %vm3605_vm2, %v3604_v2 }
  0x86   : > { %v1404_v18 = vsel %vm1401_vm8, %v1402_v16, %v1403_v17  ;;  %v1406_v58 = vsel %vm1401_vm8, %v1403_v17, %v1405_v19 }
  0x8a   : > { %3270 = vmatmul.mubr.msk.bf16.gmra.mxu0 %vm350_vm1, %v860_v32 }
  0x8b   : > { %3297 = vmatprep.mubr.msk.bf16.mxu0 %vm3605_vm2, %v3604_v2 }
  0x8c   : > { %3320 = vmatmul.mubr.msk.bf16.vlgmr.msra.gmra.mxu1 %vm350_vm1, %v1257_v34 }
  0x8d   : > { %3323 = vmatprep.mubr.msk.bf16.mxu1 %vm3605_vm2, %v3604_v2 }
  0x92   : > { %3298 = vmatmul.mubr.msk.bf16.vlgmr.msra.gmra.mxu0 %vm350_vm1, %v1124_v45 }
  0x93   : > { %3340 = vmatpush3.bf16.msra.mxu0 %v1429_v46  ;;  %3301 = vmatprep.mubr.msk.bf16.mxu0 %vm3605_vm2, %v3604_v2  ;;  %v1687_v46 = vsel %vm366_vm0, %v2959_v43, 0 }
  0x94   : > { %3324 = vmatmul.mubr.msk.bf16.gmra.mxu1 %vm350_vm1, %v1266_v47  ;;  %3383 = vmatprep.subr.bf16.mxu0 %v3604_v2 }
  0x95   : > { %3327 = vmatprep.mubr.msk.bf16.mxu1 %vm3605_vm2, %v3604_v2  ;;  %3362 = vmatpush3.bf16.msra.mxu1 %v1687_v46 }
  0x96   : > { %3405 = vmatprep.subr.bf16.mxu1 %v3604_v2 }
  0x9a   : > { %3302 = vmatmul.mubr.msk.bf16.gmra.mxu0 %vm350_vm1, %v1126_v55 }
  0x9b   : > { %3305 = vmatprep.mubr.msk.bf16.mxu0 %vm3605_vm2, %v3604_v2 }
  0x9c   : > { %3328 = vmatmul.mubr.msk.bf16.gmra.mxu1 %vm350_vm1, %v1275_v56 }
  0x9d   : > { %3331 = vmatprep.mubr.msk.bf16.mxu1 %vm3605_vm2, %v3604_v2 }
  0xa2   : > { %3306 = vmatmul.mubr.msk.bf16.gmra.mxu0 %vm350_vm1, %v1128_v1 }
  0xa3   : > { %3309 = vmatprep.mubr.msk.bf16.mxu0 %vm3605_vm2, %v3604_v2 }
  0xa4   : > { %3332 = vmatmul.mubr.msk.bf16.gmra.mxu1 %vm350_vm1, %v1284_v4 }
  0xa5   : > { %3335 = vmatprep.mubr.msk.bf16.mxu1 %vm3605_vm2, %v3604_v2 }
  0xaa   : > { %3310 = vmatmul.mubr.msk.bf16.gmra.mxu0 %vm350_vm1, %v1130_v9 }
  0xab   : > { %3313 = vmatprep.mubr.msk.bf16.mxu0 %vm3605_vm2, %v3604_v2 }
  0xac   : > { %3336 = vmatmul.mubr.msk.bf16.gmra.mxu1 %vm350_vm1, %v1293_v11 }
  0xad   : > { %3363 = vmatprep.mubr.msk.bf16.mxu1 %vm3605_vm2, %v3604_v2 }
  0xb2   : > { %3314 = vmatmul.mubr.msk.bf16.gmra.mxu0 %vm350_vm1, %v1132_v14 }
  0xb3   : > { %3341 = vmatprep.mubr.msk.bf16.mxu0 %vm3605_vm2, %v3604_v2 }
  0xba   : > { %3342 = vmatmul.mubr.msk.bf16.vlgmr.msra.gmra.mxu0 %vm350_vm1, %v1404_v18 }
  0xbb   : > { %3345 = vmatprep.mubr.msk.bf16.mxu0 %vm3605_vm2, %v3604_v2 }
  0xc2   : > { %3346 = vmatmul.mubr.msk.bf16.gmra.mxu0 %vm350_vm1, %v1406_v58 }
  0xc3   : > { %3349 = vmatprep.mubr.msk.bf16.mxu0 %vm3605_vm2, %v3604_v2 }
  0xca   : > { %3350 = vmatmul.mubr.msk.bf16.gmra.mxu0 %vm350_vm1, %v1408_v3 }
  0xcb   : > { %3353 = vmatprep.mubr.msk.bf16.mxu0 %vm3605_vm2, %v3604_v2 }
  0xd2   : > { %3354 = vmatmul.mubr.msk.bf16.gmra.mxu0 %vm350_vm1, %v1410_v22 }
  0xd3   : > { %3357 = vmatprep.mubr.msk.bf16.mxu0 %vm3605_vm2, %v3604_v2  ;;  %v490_v23 = vpop.f32.mrf.mxu1 }
  0xd5   : > { %v3189_v25 = vpop.f32.mrf.mxu1 }
  0xd7   : > { %v493_v27 = vpop.f32.mrf.mxu1 }
  0xd9   : > { %v3190_v28 = vpop.f32.mrf.mxu1 }
  0xda   : > { %v404_v29 = vpop.f32.mrf.mxu0  ;;  %3358 = vmatmul.mubr.msk.bf16.gmra.mxu0 %vm350_vm1, %v1412_v26  ;;  %v1653_v28 = vld [vmem:[%s4493_s4] sm:$0xf] }
  0xdb   : > { %v491_v30 = vadd.f32 %v490_v23, %v404_v29  ;;  %3385 = vmatprep.mubr.msk.bf16.mxu0 %vm3605_vm2, %v3604_v2 }
  0xdc   : > { %v3167_v31 = vpop.f32.mrf.mxu0  ;;  %v498_v32 = vpop.f32.mrf.mxu1 }
  0xdd   : > { %v1778_v31 = vsel %vm366_vm0, %v1653_v28, 0 }
  0xde   : > { %v407_v33 = vpop.f32.mrf.mxu0  ;;  %v3193_v34 = vpop.f32.mrf.mxu1  ;;  %3384 = vmatpush3.bf16.msra.mxu0 %v1778_v31 }
  0xdf   : > { %v494_v35 = vadd.f32 %v493_v27, %v407_v33  ;;  %3427 = vmatprep.subr.bf16.mxu0 %v3604_v2 }
  0xe0   : > { %v3168_v36 = vpop.f32.mrf.mxu0  ;;  %v501_v37 = vpop.f32.mrf.mxu1 }
  0xe2   : > { %v412_v38 = vpop.f32.mrf.mxu0  ;;  %v3194_v39 = vpop.f32.mrf.mxu1 }
  0xe3   : > { %v499_v40 = vadd.f32 %v498_v32, %v412_v38 }
  0xe4   : > { %v3171_v41 = vpop.f32.mrf.mxu0  ;;  %v506_v42 = vpop.f32.mrf.mxu1 }
  0xe6   : > { %v415_v44 = vpop.f32.mrf.mxu0  ;;  %v3197_v45 = vpop.f32.mrf.mxu1 }
  0xe7   : > { %v502_v47 = vadd.f32 %v501_v37, %v415_v44 }
  0xe8   : > { %v3172_v48 = vpop.f32.mrf.mxu0  ;;  %v509_v49 = vpop.f32.mrf.mxu1 }
  0xea   : > { %v420_v50 = vpop.f32.mrf.mxu0  ;;  %v3198_v51 = vpop.f32.mrf.mxu1 }
  0xeb   : > { %v507_v52 = vadd.f32 %v506_v42, %v420_v50 }
  0xec   : > { %v3175_v53 = vpop.f32.mrf.mxu0  ;;  %v514_v54 = vpop.f32.mrf.mxu1 }
  0xee   : > { %v423_v55 = vpop.f32.mrf.mxu0  ;;  %v3201_v56 = vpop.f32.mrf.mxu1 }
  0xef   : > { %v510_v57 = vadd.f32 %v509_v49, %v423_v55 }
  0xf0   : > { %v3176_v59 = vpop.f32.mrf.mxu0  ;;  %v517_v60 = vpop.f32.mrf.mxu1 }
  0xf2   : > { %v428_v61 = vpop.f32.mrf.mxu0  ;;  %v3202_v62 = vpop.f32.mrf.mxu1 }
  0xf3   : > { %v4047_v63 = vadd.f32 %v514_v54, %v428_v61 }
  0xf4   : > { %v3179_v0 = vpop.f32.mrf.mxu0  ;;  %v522_v1 = vpop.f32.mrf.mxu1 }
  0xf6   : > { %v431_v4 = vpop.f32.mrf.mxu0  ;;  %v3205_v5 = vpop.f32.mrf.mxu1 }
  0xf7   : > { %v4049_v6 = vadd.f32 %v517_v60, %v431_v4 }
  0xf8   : > { %v3180_v7 = vpop.f32.mrf.mxu0  ;;  %v525_v8 = vpop.f32.mrf.mxu1 }
  0xfa   : > { %v436_v9 = vpop.f32.mrf.mxu0  ;;  %v3206_v10 = vpop.f32.mrf.mxu1 }
  0xfb   : > { %v4051_v11 = vadd.f32 %v522_v1, %v436_v9 }
  0xfc   : > { %v3183_v12 = vpop.f32.mrf.mxu0  ;;  %v752_v13 = vpop.f32.mrf.mxu1 }
  0xfe   : > { %v439_v14 = vpop.f32.mrf.mxu0  ;;  %v3233_v15 = vpop.f32.mrf.mxu1 }
  0xff   : > { %v4053_v16 = vadd.f32 %v525_v8, %v439_v14 }
 0x100   : > { %v3184_v17 = vpop.f32.mrf.mxu0  ;;  %v755_v18 = vpop.f32.mrf.mxu1 }
 0x102   : > { %v599_v19 = vpop.f32.mrf.mxu0  ;;  %v3234_v58 = vpop.f32.mrf.mxu1 }
 0x103   : > { %v638_v20 = vadd.f32 %v599_v19, %v491_v30 }
 0x104   : > { %v3211_v3 = vpop.f32.mrf.mxu0  ;;  %v760_v21 = vpop.f32.mrf.mxu1 }
 0x105   : > { %v791_v22 = vadd.f32 %v752_v13, %v638_v20 }
 0x106   : > { %v602_v23 = vpop.f32.mrf.mxu0  ;;  %v3237_v24 = vpop.f32.mrf.mxu1 }
 0x107   : > { %v639_v25 = vadd.f32 %v602_v23, %v494_v35 }
 0x108   : > { %v3212_v26 = vpop.f32.mrf.mxu0  ;;  %v763_v27 = vpop.f32.mrf.mxu1 }
 0x109   : > { %v792_v29 = vadd.f32 %v755_v18, %v639_v25 }
 0x10a   : > { %v607_v30 = vpop.f32.mrf.mxu0  ;;  %v3238_v32 = vpop.f32.mrf.mxu1 }
 0x10b   : > { %v640_v33 = vadd.f32 %v607_v30, %v499_v40 }
 0x10c   : > { %v3215_v34 = vpop.f32.mrf.mxu0  ;;  %v768_v36 = vpop.f32.mrf.mxu1 }
 0x10d   : > { %v793_v37 = vadd.f32 %v760_v21, %v640_v33 }
 0x10e   : > { %v610_v38 = vpop.f32.mrf.mxu0  ;;  %v3241_v35 = vpop.f32.mrf.mxu1 }
 0x10f   : > { %v641_v39 = vadd.f32 %v610_v38, %v502_v47 }
 0x110   : > { %v3216_v41 = vpop.f32.mrf.mxu0  ;;  %v771_v42 = vpop.f32.mrf.mxu1 }
 0x111   : > { %v794_v43 = vadd.f32 %v763_v27, %v641_v39 }
 0x112   : > { %v615_v44 = vpop.f32.mrf.mxu0  ;;  %v3242_v45 = vpop.f32.mrf.mxu1 }
 0x113   : > { %v642_v46 = vadd.f32 %v615_v44, %v507_v52 }
 0x114   : > { %v3219_v48 = vpop.f32.mrf.mxu0  ;;  %v776_v49 = vpop.f32.mrf.mxu1 }
 0x115   : > { %v795_v50 = vadd.f32 %v768_v36, %v642_v46 }
 0x116   : > { %v618_v51 = vpop.f32.mrf.mxu0  ;;  %v3245_v53 = vpop.f32.mrf.mxu1 }
 0x117   : > { %v643_v40 = vadd.f32 %v618_v51, %v510_v57 }
 0x118   : > { %v3220_v54 = vpop.f32.mrf.mxu0  ;;  %v779_v55 = vpop.f32.mrf.mxu1 }
 0x119   : > { %v796_v56 = vadd.f32 %v771_v42, %v643_v40 }
 0x11a   : > { %v623_v59 = vpop.f32.mrf.mxu0  ;;  %v3246_v60 = vpop.f32.mrf.mxu1 }
 0x11b   : > { %v644_v61 = vadd.f32 %v623_v59, %v4047_v63 }
 0x11c   : > { %v3223_v47 = vpop.f32.mrf.mxu0  ;;  %v784_v62 = vpop.f32.mrf.mxu1 }
 0x11d   : > { %v797_v0 = vadd.f32 %v776_v49, %v644_v61 }
 0x11e   : > { %v626_v1 = vpop.f32.mrf.mxu0  ;;  %v3249_v4 = vpop.f32.mrf.mxu1 }
 0x11f   : > { %v645_v52 = vadd.f32 %v626_v1, %v4049_v6 }
 0x120   : > { %v3224_v5 = vpop.f32.mrf.mxu0  ;;  %v787_v7 = vpop.f32.mrf.mxu1 }
 0x121   : > { %v798_v8 = vadd.f32 %v779_v55, %v645_v52 }
 0x122   : > { %v631_v9 = vpop.f32.mrf.mxu0  ;;  %v3250_v10 = vpop.f32.mrf.mxu1 }
 0x123   : > { %v646_v57 = vadd.f32 %v631_v9, %v4051_v11 }
 0x124   : > { %v3227_v12 = vpop.f32.mrf.mxu0  ;;  %v1032_v13 = vpop.f32.mrf.mxu1 }
 0x125   : > { %v799_v14 = vadd.f32 %v784_v62, %v646_v57 }
 0x126   : > { %v634_v15 = vpop.f32.mrf.mxu0  ;;  %v3277_v17 = vpop.f32.mrf.mxu1 }
 0x127   : > { %v647_v63 = vadd.f32 %v634_v15, %v4053_v16 }
 0x128   : > { %v3228_v18 = vpop.f32.mrf.mxu0  ;;  %v1035_v19 = vpop.f32.mrf.mxu1 }
 0x129   : > { %v800_v58 = vadd.f32 %v787_v7, %v647_v63 }
 0x12a   : > { %v913_v20 = vpop.f32.mrf.mxu0  ;;  %v3278_v3 = vpop.f32.mrf.mxu1 }
 0x12b   : > { %v952_v6 = vadd.f32 %v913_v20, %v791_v22 }
 0x12c   : > { %v3255_v21 = vpop.f32.mrf.mxu0  ;;  %v1040_v23 = vpop.f32.mrf.mxu1 }
 0x12d   : > { %v4066_v24 = vadd.f32 %v1032_v13, %v952_v6 }
 0x12e   : > { %v916_v25 = vpop.f32.mrf.mxu0  ;;  %v3281_v26 = vpop.f32.mrf.mxu1 }
 0x12f   : > { %v953_v11 = vadd.f32 %v916_v25, %v792_v29 }
 0x130   : > { %v3256_v27 = vpop.f32.mrf.mxu0  ;;  %v1043_v28 = vpop.f32.mrf.mxu1 }
 0x131   : > { %v4068_v31 = vadd.f32 %v1035_v19, %v953_v11 }
 0x132   : > { %v921_v30 = vpop.f32.mrf.mxu0  ;;  %v3282_v32 = vpop.f32.mrf.mxu1 }
 0x133   : > { %v954_v16 = vadd.f32 %v921_v30, %v793_v37 }
 0x134   : > { %v3259_v33 = vpop.f32.mrf.mxu0  ;;  %v1048_v34 = vpop.f32.mrf.mxu1 }
 0x135   : > { %v4070_v36 = vadd.f32 %v1040_v23, %v954_v16 }
 0x136   : > { %v924_v38 = vpop.f32.mrf.mxu0  ;;  %v3285_v22 = vpop.f32.mrf.mxu1 }
 0x137   : > { %v955_v35 = vadd.f32 %v924_v38, %v794_v43 }
 0x138   : > { %v3260_v39 = vpop.f32.mrf.mxu0  ;;  %v1051_v41 = vpop.f32.mrf.mxu1 }
 0x139   : > { %v4072_v42 = vadd.f32 %v1043_v28, %v955_v35 }
 0x13a   : > { %v929_v44 = vpop.f32.mrf.mxu0  ;;  %v3286_v29 = vpop.f32.mrf.mxu1 }
 0x13b   : > { %v956_v45 = vadd.f32 %v929_v44, %v795_v50 }
 0x13c   : > { %v3263_v46 = vpop.f32.mrf.mxu0  ;;  %v1056_v48 = vpop.f32.mrf.mxu1 }
 0x13d   : > { %v4074_v49 = vadd.f32 %v1048_v34, %v956_v45 }
 0x13e   : > { %v932_v51 = vpop.f32.mrf.mxu0  ;;  %v3289_v37 = vpop.f32.mrf.mxu1 }
 0x13f   : > { %v957_v53 = vadd.f32 %v932_v51, %v796_v56 }
 0x140   : > { %v3264_v40 = vpop.f32.mrf.mxu0  ;;  %v1059_v54 = vpop.f32.mrf.mxu1 }
 0x141   : > { %v4076_v55 = vadd.f32 %v1051_v41, %v957_v53 }
 0x142   : > { %v937_v59 = vpop.f32.mrf.mxu0  ;;  %v3290_v43 = vpop.f32.mrf.mxu1 }
 0x143   : > { %v958_v60 = vadd.f32 %v937_v59, %v797_v0 }
 0x144   : > { %v3267_v61 = vpop.f32.mrf.mxu0  ;;  %v1064_v47 = vpop.f32.mrf.mxu1 }
 0x145   : > { %v4078_v62 = vadd.f32 %v1056_v48, %v958_v60 }
 0x146   : > { %v940_v1 = vpop.f32.mrf.mxu0  ;;  %v3293_v50 = vpop.f32.mrf.mxu1 }
 0x147   : > { %v959_v4 = vadd.f32 %v940_v1, %v798_v8 }
 0x148   : > { %v3268_v52 = vpop.f32.mrf.mxu0  ;;  %v1067_v5 = vpop.f32.mrf.mxu1 }
 0x149   : > { %v4080_v7 = vadd.f32 %v1059_v54, %v959_v4  ;;  %v4111_v52 = vld [vmem:[%s4492_s3] ss:$0 sm:$0xff] }
 0x14a   : > { %v945_v9 = vpop.f32.mrf.mxu0  ;;  %v3294_v56 = vpop.f32.mrf.mxu1 }
 0x14b   : > { %v960_v10 = vadd.f32 %v945_v9, %v799_v14 }
 0x14c   : > { %v3271_v57 = vpop.f32.mrf.mxu0  ;;  %v1346_v12 = vpop.f32.mrf.mxu1 }
 0x14d   : > { %v4082_v13 = vadd.f32 %v1064_v47, %v960_v10 }
 0x14e   : > { %v948_v15 = vpop.f32.mrf.mxu0  ;;  %v3321_v0 = vpop.f32.mrf.mxu1 }
 0x14f   : > { %v961_v17 = vadd.f32 %v948_v15, %v800_v58 }
 0x150   : > { %v3272_v63 = vpop.f32.mrf.mxu0  ;;  %v1349_v18 = vpop.f32.mrf.mxu1 }
 0x151   : > { %v4084_v19 = vadd.f32 %v1067_v5, %v961_v17 }
 0x152   : > { %v1185_v20 = vpop.f32.mrf.mxu0  ;;  %v3322_v8 = vpop.f32.mrf.mxu1 }
 0x153   : > { %v1224_v60 = vadd.f32 %v1185_v20, %v4066_v24  ;;  %v4115_v24 = vpop.permute.xlu0 %1543 }
 0x154   : > { %v3299_v3 = vpop.f32.mrf.mxu0  ;;  %v1354_v6 = vpop.f32.mrf.mxu1 }
 0x155   : > { %v1385_v1 = vadd.f32 %v1346_v12, %v1224_v60 }
 0x156   : > { %v1188_v21 = vpop.f32.mrf.mxu0  ;;  %v3325_v23 = vpop.f32.mrf.mxu1 }
 0x157   : > { %v1225_v50 = vadd.f32 %v1188_v21, %v4068_v31  ;;  %v4121_v21 = vpop.permute.xlu0 %1548 }
 0x158   : > { %v3300_v25 = vpop.f32.mrf.mxu0  ;;  %v1357_v26 = vpop.f32.mrf.mxu1 }
 0x159   : > { %v1386_v56 = vadd.f32 %v1349_v18, %v1225_v50 }
 0x15a   : > { %v1193_v14 = vpop.f32.mrf.mxu0  ;;  %v3326_v11 = vpop.f32.mrf.mxu1 }
 0x15b   : > { %v1226_v10 = vadd.f32 %v1193_v14, %v4070_v36 }
 0x15c   : > { %v3303_v27 = vpop.f32.mrf.mxu0  ;;  %v4086_v28 = vpop.f32.mrf.mxu1 }
 0x15d   : > { %v1387_v31 = vadd.f32 %v1354_v6, %v1226_v10 }
 0x15e   : > { %v1196_v30 = vpop.f32.mrf.mxu0  ;;  %v3329_v32 = vpop.f32.mrf.mxu1 }
 0x15f   : > { %v1227_v63 = vadd.f32 %v1196_v30, %v4072_v42  ;;  %v4126_v42 = vpop.permute.xlu1 %1553 }
 0x160   : > { %v3304_v58 = vpop.f32.mrf.mxu0  ;;  %v4088_v16 = vpop.f32.mrf.mxu1 }
 0x161   : > { %v1388_v25 = vadd.f32 %v1357_v26, %v1227_v63  ;;  %v2970_v58 = vld [vmem:[%s4493_s4 + $0x8] sm:$0xf] }
 0x162   : > { %v1201_v33 = vpop.f32.mrf.mxu0  ;;  %v3330_v34 = vpop.f32.mrf.mxu1 }
 0x163   : > { %v1228_v14 = vadd.f32 %v1201_v33, %v4074_v49  ;;  %v1638_v49 = vld [vmem:[#allocation2] sm:$0xff] }
 0x164   : > { %v3307_v38 = vpop.f32.mrf.mxu0  ;;  %v4090_v22 = vpop.f32.mrf.mxu1 }
 0x165   : > { %v1654_v38 = vld [vmem:[#allocation2 + $0x1] sm:$0xff]  ;;  %v1389_v33 = vadd.f32 %v4086_v28, %v1228_v14 }
 0x166   : > { %v1204_v35 = vpop.f32.mrf.mxu0  ;;  %v3333_v39 = vpop.f32.mrf.mxu1 }
 0x167   : > { %v1229_v34 = vadd.f32 %v1204_v35, %v4076_v55 }
 0x168   : > { %v3308_v41 = vpop.f32.mrf.mxu0  ;;  %v4092_v44 = vpop.f32.mrf.mxu1 }
 0x169   : > { %v1390_v28 = vadd.f32 %v4088_v16, %v1229_v34 }
 0x16a   : > { %v4094_v29 = vpop.f32.mrf.mxu0  ;;  %v3334_v45 = vpop.f32.mrf.mxu1 }
 0x16b   : > { %v2976_v45 = vld [vmem:[%s4493_s4 + $0xc] sm:$0xf] }
 0x16c   : > { %v3311_v46 = vpop.f32.mrf.mxu0  ;;  %v4096_v48 = vpop.f32.mrf.mxu1  ;;  %v2004_v50 = vsel %vm366_vm0, %v2976_v45, 0 }
 0x16e   : > { %v4098_v51 = vpop.f32.mrf.mxu0  ;;  %v3337_v37 = vpop.f32.mrf.mxu1 }
 0x170   : > { %v3312_v53 = vpop.f32.mrf.mxu0  ;;  %v4100_v40 = vpop.f32.mrf.mxu1 }
 0x172   : > { %v4102_v54 = vpop.f32.mrf.mxu0  ;;  %v3338_v59 = vpop.f32.mrf.mxu1 }
 0x173   : > { %v1886_v59 = vsel %vm366_vm0, %v2970_v58, 0 }
 0x174   : > { %v3315_v43 = vpop.f32.mrf.mxu0 }
 0x176   : > { %v4105_v61 = vpop.f32.mrf.mxu0 }
 0x178   : > { %v3316_v47 = vpop.f32.mrf.mxu0 }
 0x179   : > { %v4142_v47 = vpop.permute.xlu1 %1558 }
 0x17a   : > { %v1465_v4 = vpop.f32.mrf.mxu0 }
 0x17b   : > { %v1504_v5 = vadd.f32 %v1465_v4, %v1385_v1  ;;  %v1230_v4 = vadd.f32 %v4094_v29, %v4078_v62  ;;  %v1231_v62 = vadd.f32 %v4098_v51, %v4080_v7  ;;  %v4158_v29 = vpop.permute.xlu0 %1563 }
 0x17c   : > { %v3343_v9 = vpop.f32.mrf.mxu0 }
 0x17d   : > { %v1521_v57 = vadd.f32 %v4111_v52, %v1504_v5 }
 0x17e   : > { %v1468_v15 = vpop.f32.mrf.mxu0 }
 0x17f   : > { %v1531_v0 = vmax.f32 %v1521_v57, 0.0  ;;  %v1505_v12 = vadd.f32 %v1468_v15, %v1386_v56  ;;  %v1391_v15 = vadd.f32 %v4090_v22, %v1230_v4 }
 0x180   : > { %v3344_v17 = vpop.f32.mrf.mxu0 }
 0x181   : > { %v1591_v20 = vmul.f32 %v4115_v24, %v1531_v0  ;;  %v1522_v8 = vadd.f32 %v4111_v52, %v1505_v12 }
 0x182   : > { %v1473_v3 = vpop.f32.mrf.mxu0 }
 0x183   : > { %1606 = vst.msk [vmem:[#allocation2 + $0xb] sm:$0xff] %vm350_vm1, %v1591_v20  ;;  %v1532_v18 = vmax.f32 %v1522_v8, 0.0  ;;  %v1506_v36 = vadd.f32 %v1473_v3, %v1387_v31 }
 0x184   : > { %v3347_v23 = vpop.f32.mrf.mxu0 }
 0x185   : > { %v1592_v11 = vmul.f32 %v4121_v21, %v1532_v18  ;;  %v1523_v6 = vadd.f32 %v4111_v52, %v1506_v36  ;;  %v1392_v36 = vadd.f32 %v4092_v44, %v1231_v62  ;;  %v4167_v23 = vpop.permute.xlu1 %1568 }
 0x186   : > { %v1476_v27 = vpop.f32.mrf.mxu0 }
 0x187   : > { %1607 = vst.msk [vmem:[#allocation2 + $0x13] sm:$0xff] %vm350_vm1, %v1592_v11  ;;  %v1533_v30 = vmax.f32 %v1523_v6, 0.0  ;;  %v1507_v32 = vadd.f32 %v1476_v27, %v1388_v25  ;;  %v1232_v25 = vadd.f32 %v4102_v54, %v4082_v13  ;;  %v4180_v13 = vpop.permute.xlu0 %1573 }
 0x188   : > { %v3348_v26 = vpop.f32.mrf.mxu0 }
 0x189   : > { %v1593_v39 = vmul.f32 %v4126_v42, %v1533_v30  ;;  %v1524_v41 = vadd.f32 %v4111_v52, %v1507_v32  ;;  %v1393_v30 = vadd.f32 %v4096_v48, %v1232_v25  ;;  %v1233_v32 = vadd.f32 %v4105_v61, %v4084_v19 }
 0x18a   : > { %v1481_v46 = vpop.f32.mrf.mxu0  ;;  %v1655_v37 = vld [vmem:[#allocation2 + $0x9] sm:$0xff] }
 0x18b   : > { %v1639_v53 = vld [vmem:[#allocation2 + $0x8] sm:$0xff]  ;;  %1608 = vst.msk [vmem:[#allocation2 + $0x1b] sm:$0xff] %vm350_vm1, %v1593_v39  ;;  %v1534_v55 = vmax.f32 %v1524_v41, 0.0  ;;  %v1508_v35 = vadd.f32 %v1481_v46, %v1389_v33  ;;  %v1664_v43 = vpack.c.bf16 %v1655_v37, %v1654_v38  ;;  %v1394_v19 = vadd.f32 %v4100_v40, %v1233_v32  ;;  %v4200_v40 = vpop.permute.xlu0 %1583 }
 0x18c   : > { %v1648_v60 = vpack.c.bf16 %v1639_v53, %v1638_v49  ;;  %v3351_v1 = vpop.f32.mrf.mxu0  ;;  %v4188_v53 = vpop.permute.xlu1 %1578 }
 0x18d   : > { %v1594_v5 = vmul.f32 %v4142_v47, %v1534_v55  ;;  %v1525_v9 = vadd.f32 %v4111_v52, %v1508_v35  ;;  %3364 = vmatmul.mubr.msk.bf16.vlgmr.msra.gmra.mxu1 %vm350_vm1, %v1664_v43 }
 0x18e   : > { %3386 = vmatmul.mubr.msk.bf16.vlgmr.msra.gmra.mxu0 %vm350_vm1, %v1648_v60  ;;  %3406 = vmatpush3.bf16.msra.mxu1 %v1886_v59  ;;  %v1484_v56 = vpop.f32.mrf.mxu0  ;;  %v1656_v17 = vld [vmem:[#allocation2 + $0x11] sm:$0xff] }
 0x18f   : > { %3367 = vmatprep.mubr.msk.bf16.mxu1 %vm3605_vm2, %v3604_v2  ;;  %1609 = vst.msk [vmem:[#allocation2 + $0x23] sm:$0xff] %vm350_vm1, %v1594_v5  ;;  %v1535_v16 = vmax.f32 %v1525_v9, 0.0  ;;  %v1509_v10 = vadd.f32 %v1484_v56, %v1390_v28  ;;  %3389 = vmatprep.mubr.msk.bf16.mxu0 %vm3605_vm2, %v3604_v2  ;;  %v1640_v20 = vld [vmem:[#allocation2 + $0x10] sm:$0xff] }
 0x190   : > { %3428 = vmatpush3.bf16.msra.mxu0 %v2004_v50  ;;  %v3352_v57 = vpop.f32.mrf.mxu0  ;;  %3449 = vmatprep.subr.bf16.mxu1 %v3604_v2  ;;  %v4205_v62 = vpop.permute.xlu1 %1588 }
 0x191   : > { %3471 = vmatprep.subr.bf16.mxu0 %v3604_v2  ;;  %v1595_v0 = vmul.f32 %v4158_v29, %v1535_v16  ;;  %v1526_v12 = vadd.f32 %v4111_v52, %v1509_v10 }
 0x192   : > { %v1489_v31 = vpop.f32.mrf.mxu0  ;;  %v1657_v63 = vld [vmem:[#allocation2 + $0x19] sm:$0xff] }
 0x193   : > { %v1641_v8 = vld [vmem:[#allocation2 + $0x18] sm:$0xff]  ;;  %1610 = vst.msk [vmem:[#allocation2 + $0x2b] sm:$0xff] %vm350_vm1, %v1595_v0  ;;  %v1536_v7 = vmax.f32 %v1526_v12, 0.0  ;;  %v1510_v51 = vadd.f32 %v1489_v31, %v1391_v15  ;;  %v1665_v3 = vpack.c.bf16 %v1657_v63, %v1656_v17  ;;  %v1853_v63 = vld [vmem:[#allocation2 + $0x2] sm:$0xff] }
 0x194   : > { %v1649_v18 = vpack.c.bf16 %v1641_v8, %v1640_v20  ;;  %v3355_v22 = vpop.f32.mrf.mxu0  ;;  %v1854_v20 = vld [vmem:[#allocation2 + $0xa] sm:$0xff]  ;;  %v1972_v8 = vld [vmem:[#allocation2 + $0x12] sm:$0xff]  ;;  %v1856_v25 = vld [vmem:[#allocation2 + $0x1a] sm:$0xff] }
 0x195   : > { %v1596_v14 = vmul.f32 %v4167_v23, %v1536_v7  ;;  %v1527_v11 = vadd.f32 %v4111_v52, %v1510_v51  ;;  %3368 = vmatmul.mubr.msk.bf16.gmra.mxu1 %vm350_vm1, %v1665_v3  ;;  %v2982_v7 = vld [vmem:[%s4493_s4 + $0x10] sm:$0xf]  ;;  %v2988_v51 = vld [vmem:[%s4493_s4 + $0x14] sm:$0xf]  ;;  %v1863_v3 = vpack.c.bf16 %v1854_v20, %v1853_v63 }
 0x196   : > { %3390 = vmatmul.mubr.msk.bf16.gmra.mxu0 %vm350_vm1, %v1649_v18  ;;  %v1492_v6 = vpop.f32.mrf.mxu0  ;;  %3371 = vmatprep.mubr.msk.bf16.mxu1 %vm3605_vm2, %v3604_v2  ;;  %v1658_v26 = vld [vmem:[#allocation2 + $0x21] sm:$0xff]  ;;  %v1981_v18 = vpack.c.bf16 %v1972_v8, %v1854_v20  ;;  %v2240_v22 = vsel %vm366_vm0, %v2988_v51, 0 }
 0x197   : > { %3393 = vmatprep.mubr.msk.bf16.mxu0 %vm3605_vm2, %v3604_v2  ;;  %1611 = vst.msk [vmem:[#allocation2 + $0x33] sm:$0xff] %vm350_vm1, %v1596_v14  ;;  %v1537_v44 = vmax.f32 %v1527_v11, 0.0  ;;  %v1511_v27 = vadd.f32 %v1492_v6, %v1392_v36  ;;  %v1642_v33 = vld [vmem:[#allocation2 + $0x20] sm:$0xff]  ;;  %v2122_v36 = vsel %vm366_vm0, %v2982_v7, 0  ;;  %v1864_v11 = vpack.c.bf16 %v1856_v25, %v1972_v8 }
 0x198   : > { %v3356_v54 = vpop.f32.mrf.mxu0  ;;  %v1974_v14 = vld [vmem:[#allocation2 + $0x22] sm:$0xff] }
 0x199   : > { %v1597_v58 = vmul.f32 %v4180_v13, %v1537_v44  ;;  %v1528_v34 = vadd.f32 %v4111_v52, %v1511_v27  ;;  %v1982_v6 = vpack.c.bf16 %v1974_v14, %v1856_v25 }
 0x19a   : > { %v1497_v38 = vpop.f32.mrf.mxu0  ;;  %v1659_v49 = vld [vmem:[#allocation2 + $0x29] sm:$0xff] }
 0x19b   : > { %v1643_v39 = vld [vmem:[#allocation2 + $0x28] sm:$0xff]  ;;  %1612 = vst.msk [vmem:[#allocation2 + $0x3b] sm:$0xff] %vm350_vm1, %v1597_v58  ;;  %v1538_v41 = vmax.f32 %v1528_v34, 0.0  ;;  %v1512_v45 = vadd.f32 %v1497_v38, %v1393_v30  ;;  %v1666_v46 = vpack.c.bf16 %v1659_v49, %v1658_v26 }
 0x19c   : > { %v1650_v37 = vpack.c.bf16 %v1643_v39, %v1642_v33  ;;  %v3359_v48 = vpop.f32.mrf.mxu0  ;;  %v1858_v44 = vld [vmem:[#allocation2 + $0x2a] sm:$0xff] }
 0x19d   : > { %v1598_v61 = vmul.f32 %v4188_v53, %v1538_v41  ;;  %v1529_v59 = vadd.f32 %v4111_v52, %v1512_v45  ;;  %3372 = vmatmul.mubr.msk.bf16.gmra.mxu1 %vm350_vm1, %v1666_v46  ;;  %v1865_v54 = vpack.c.bf16 %v1858_v44, %v1974_v14  ;;  %v2090_v41 = vld [vmem:[#allocation2 + $0x13] sm:$0xff]  ;;  %v2089_v48 = vld [vmem:[#allocation2 + $0xb] sm:$0xff] }
 0x19e   : > { %3394 = vmatmul.mubr.msk.bf16.gmra.mxu0 %vm350_vm1, %v1650_v37  ;;  %v1500_v55 = vpop.f32.mrf.mxu0  ;;  %3375 = vmatprep.mubr.msk.bf16.mxu1 %vm3605_vm2, %v3604_v2  ;;  %v1660_v50 = vld [vmem:[#allocation2 + $0x31] sm:$0xff]  ;;  %v3000_v37 = vld [vmem:[%s4493_s4 + $0x1c] sm:$0xf] }
 0x19f   : > { %3397 = vmatprep.mubr.msk.bf16.mxu0 %vm3605_vm2, %v3604_v2  ;;  %1613 = vst.msk [vmem:[#allocation2 + $0x43] sm:$0xff] %vm350_vm1, %v1598_v61  ;;  %v1539_v35 = vmax.f32 %v1529_v59, 0.0  ;;  %v1513_v43 = vadd.f32 %v1500_v55, %v1394_v19  ;;  %v1644_v5 = vld [vmem:[#allocation2 + $0x30] sm:$0xff]  ;;  %v2994_v46 = vld [vmem:[%s4493_s4 + $0x18] sm:$0xf]  ;;  %v2099_v61 = vpack.c.bf16 %v2090_v41, %v2089_v48  ;;  %v2562_v48 = vld [vmem:[#allocation2 + $0x1e] sm:$0xff] }
 0x1a0   : > { %v3360_v60 = vpop.f32.mrf.mxu0  ;;  %v1976_v27 = vld [vmem:[#allocation2 + $0x32] sm:$0xff]  ;;  %v2358_v55 = vsel %vm366_vm0, %v2994_v46, 0 }
 0x1a1   : > { %v1599_v28 = vmul.f32 %v4200_v40, %v1539_v35  ;;  %v1530_v1 = vadd.f32 %v4111_v52, %v1513_v43  ;;  %v1983_v30 = vpack.c.bf16 %v1976_v27, %v1858_v44  ;;  %v4261_v45 = vld [vmem:[#allocation2 + $0x14] sm:$0xff]  ;;  %v2207_v19 = vld [vmem:[#allocation2 + $0xc] sm:$0xff]  ;;  %v2476_v35 = vsel %vm366_vm0, %v3000_v37, 0  ;;  %v2092_v43 = vld [vmem:[#allocation2 + $0x23] sm:$0xff] }
 0x1a2   : > { %v1661_v4 = vld [vmem:[#allocation2 + $0x39] sm:$0xff]  ;;  %v2217_v59 = vpack.c.bf16 %v4261_v45, %v2207_v19  ;;  %v2210_v60 = vld [vmem:[#allocation2 + $0x24] sm:$0xff] }
 0x1a3   : > { %v1645_v9 = vld [vmem:[#allocation2 + $0x38] sm:$0xff]  ;;  %1614 = vst.msk [vmem:[#allocation2 + $0x4b] sm:$0xff] %vm350_vm1, %v1599_v28  ;;  %v1540_v56 = vmax.f32 %v1530_v1, 0.0  ;;  %v1667_v16 = vpack.c.bf16 %v1661_v4, %v1660_v50  ;;  %v2445_v44 = vld [vmem:[#allocation2 + $0x25] sm:$0xff] }
 0x1a4   : > { %v1651_v10 = vpack.c.bf16 %v1645_v9, %v1644_v5  ;;  %v1860_v32 = vld [vmem:[#allocation2 + $0x3a] sm:$0xff] }
 0x1a5   : > { %v1600_v57 = vmul.f32 %v4205_v62, %v1540_v56  ;;  %3376 = vmatmul.mubr.msk.bf16.gmra.mxu1 %vm350_vm1, %v1667_v16  ;;  %v1866_v34 = vpack.c.bf16 %v1860_v32, %v1976_v27  ;;  %v2091_v28 = vld [vmem:[#allocation2 + $0x1b] sm:$0xff]  ;;  %v2094_v5 = vld [vmem:[#allocation2 + $0x33] sm:$0xff]  ;;  %v2093_v56 = vld [vmem:[#allocation2 + $0x2b] sm:$0xff] }
 0x1a6   : > { %3398 = vmatmul.mubr.msk.bf16.gmra.mxu0 %vm350_vm1, %v1651_v10  ;;  %3379 = vmatprep.mubr.msk.bf16.mxu1 %vm3605_vm2, %v3604_v2  ;;  %v1662_v52 = vld [vmem:[#allocation2 + $0x41] sm:$0xff]  ;;  %v2100_v50 = vpack.c.bf16 %v2092_v43, %v2091_v28  ;;  %v2212_v9 = vld [vmem:[#allocation2 + $0x34] sm:$0xff]  ;;  %v2211_v16 = vld [vmem:[#allocation2 + $0x2c] sm:$0xff]  ;;  %v2101_v10 = vpack.c.bf16 %v2094_v5, %v2093_v56 }
 0x1a7   : > { %3401 = vmatprep.mubr.msk.bf16.mxu0 %vm3605_vm2, %v3604_v2  ;;  %1615 = vst.msk [vmem:[#allocation2 + $0x53] sm:$0xff] %vm350_vm1, %v1600_v57  ;;  %v1646_v0 = vld [vmem:[#allocation2 + $0x40] sm:$0xff]  ;;  %v2219_v57 = vpack.c.bf16 %v2212_v9, %v2211_v16  ;;  %v2336_v27 = vpack.c.bf16 %v2211_v16, %v2210_v60  ;;  %v2561_v19 = vld [vmem:[#allocation2 + $0x16] sm:$0xff] }
 0x1a8   : > { %v1978_v58 = vld [vmem:[#allocation2 + $0x42] sm:$0xff] }
 0x1a9   : > { %v1984_v26 = vpack.c.bf16 %v1978_v58, %v1860_v32  ;;  %v2209_v1 = vld [vmem:[#allocation2 + $0x1c] sm:$0xff] }
 0x1aa   : > { %v1663_v15 = vld [vmem:[#allocation2 + $0x49] sm:$0xff]  ;;  %v2218_v4 = vpack.c.bf16 %v2210_v60, %v2209_v1  ;;  %v2335_v25 = vpack.c.bf16 %v2209_v1, %v4261_v45  ;;  %v2447_v32 = vld [vmem:[#allocation2 + $0x35] sm:$0xff]  ;;  %v2452_v45 = vld [vmem:[#allocation2 + $0x5d] sm:$0xff] }
 0x1ab   : > { %v1647_v12 = vld [vmem:[#allocation2 + $0x48] sm:$0xff]  ;;  %v1668_v17 = vpack.c.bf16 %v1663_v15, %v1662_v52  ;;  %v2566_v43 = vld [vmem:[#allocation2 + $0x3e] sm:$0xff]  ;;  %v2565_v60 = vld [vmem:[#allocation2 + $0x36] sm:$0xff] }
 0x1ac   : > { %v1652_v31 = vpack.c.bf16 %v1647_v12, %v1646_v0  ;;  %v1862_v38 = vld [vmem:[#allocation2 + $0x4a] sm:$0xff]  ;;  %v2095_v0 = vld [vmem:[#allocation2 + $0x3b] sm:$0xff]  ;;  %v2573_v28 = vpack.c.bf16 %v2566_v43, %v2565_v60 }
 0x1ad   : > { %3380 = vmatmul.mubr.msk.bf16.gmra.mxu1 %vm350_vm1, %v1668_v17  ;;  %v1867_v33 = vpack.c.bf16 %v1862_v38, %v1978_v58  ;;  %v2096_v52 = vld [vmem:[#allocation2 + $0x43] sm:$0xff]  ;;  %v2097_v7 = vld [vmem:[#allocation2 + $0x4b] sm:$0xff] }
 0x1ae   : > { %3402 = vmatmul.mubr.msk.bf16.gmra.mxu0 %vm350_vm1, %v1652_v31  ;;  %3407 = vmatprep.mubr.msk.bf16.mxu1 %vm3605_vm2, %v3604_v2  ;;  %v1980_v49 = vld [vmem:[#allocation2 + $0x52] sm:$0xff]  ;;  %v2214_v15 = vld [vmem:[#allocation2 + $0x44] sm:$0xff]  ;;  %v2213_v12 = vld [vmem:[#allocation2 + $0x3c] sm:$0xff]  ;;  %v2102_v17 = vpack.c.bf16 %v2096_v52, %v2095_v0 }
 0x1af   : > { %3429 = vmatprep.mubr.msk.bf16.mxu0 %vm3605_vm2, %v3604_v2  ;;  %v1985_v39 = vpack.c.bf16 %v1980_v49, %v1862_v38  ;;  %v2220_v31 = vpack.c.bf16 %v2214_v15, %v2213_v12  ;;  %v2098_v63 = vld [vmem:[#allocation2 + $0x53] sm:$0xff]  ;;  %v2337_v58 = vpack.c.bf16 %v2213_v12, %v2212_v9  ;;  %v2449_v38 = vld [vmem:[#allocation2 + $0x45] sm:$0xff] }
 0x1b0   : > { %v2215_v20 = vld [vmem:[#allocation2 + $0x4c] sm:$0xff]  ;;  %v2216_v8 = vld [vmem:[#allocation2 + $0x54] sm:$0xff]  ;;  %v2103_v51 = vpack.c.bf16 %v2098_v63, %v2097_v7  ;;  %v2570_v9 = vld [vmem:[#allocation2 + $0x5e] sm:$0xff] }
 0x1b1   : > { %v2338_v49 = vpack.c.bf16 %v2215_v20, %v2214_v15  ;;  %v2451_v41 = vld [vmem:[#allocation2 + $0x55] sm:$0xff] }
 0x1b2   : > { %v2457_v37 = vpack.c.bf16 %v2452_v45, %v2451_v41  ;;  %v2568_v1 = vld [vmem:[#allocation2 + $0x4e] sm:$0xff]  ;;  %v2569_v5 = vld [vmem:[#allocation2 + $0x56] sm:$0xff] }
 0x1b3   : > { %v2575_v56 = vpack.c.bf16 %v2570_v9, %v2569_v5 }
 0x1b5   : > { %3408 = vmatmul.mubr.msk.bf16.vlgmr.msra.gmra.mxu1 %vm350_vm1, %v1863_v3  ;;  %v2221_v3 = vpack.c.bf16 %v2216_v8, %v2215_v20 }
 0x1b6   : > { %3430 = vmatmul.mubr.msk.bf16.vlgmr.msra.gmra.mxu0 %vm350_vm1, %v1981_v18  ;;  %3450 = vmatpush3.bf16.msra.mxu1 %v2122_v36  ;;  %v2444_v18 = vld [vmem:[#allocation2 + $0x1d] sm:$0xff] }
 0x1b7   : > { %3411 = vmatprep.mubr.msk.bf16.mxu1 %vm3605_vm2, %v3604_v2  ;;  %3433 = vmatprep.mubr.msk.bf16.mxu0 %vm3605_vm2, %v3604_v2  ;;  %v3006_v36 = vld [vmem:[%s4493_s4 + $0x20] sm:$0xf] }
 0x1b8   : > { %3472 = vmatpush3.bf16.msra.mxu0 %v2240_v22  ;;  %3493 = vmatprep.subr.bf16.mxu1 %v3604_v2  ;;  %v2443_v22 = vld [vmem:[#allocation2 + $0x15] sm:$0xff] }
 0x1b9   : > { %3515 = vmatprep.subr.bf16.mxu0 %v3604_v2  ;;  %v2453_v14 = vpack.c.bf16 %v2444_v18, %v2443_v22 }
 0x1bd   : > { %3412 = vmatmul.mubr.msk.bf16.gmra.mxu1 %vm350_vm1, %v1864_v11  ;;  %v2594_v11 = vsel %vm366_vm0, %v3006_v36, 0 }
 0x1be   : > { %3434 = vmatmul.mubr.msk.bf16.gmra.mxu0 %vm350_vm1, %v1982_v6  ;;  %3415 = vmatprep.mubr.msk.bf16.mxu1 %vm3605_vm2, %v3604_v2  ;;  %v2446_v6 = vld [vmem:[#allocation2 + $0x2d] sm:$0xff] }
 0x1bf   : > { %3437 = vmatprep.mubr.msk.bf16.mxu0 %vm3605_vm2, %v3604_v2 }
 0x1c5   : > { %3416 = vmatmul.mubr.msk.bf16.gmra.mxu1 %vm350_vm1, %v1865_v54  ;;  %v2454_v54 = vpack.c.bf16 %v2446_v6, %v2445_v44 }
 0x1c6   : > { %3438 = vmatmul.mubr.msk.bf16.gmra.mxu0 %vm350_vm1, %v1983_v30  ;;  %3419 = vmatprep.mubr.msk.bf16.mxu1 %vm3605_vm2, %v3604_v2  ;;  %v2448_v30 = vld [vmem:[#allocation2 + $0x3d] sm:$0xff] }
 0x1c7   : > { %3441 = vmatprep.mubr.msk.bf16.mxu0 %vm3605_vm2, %v3604_v2 }
 0x1cd   : > { %3420 = vmatmul.mubr.msk.bf16.gmra.mxu1 %vm350_vm1, %v1866_v34  ;;  %v2455_v34 = vpack.c.bf16 %v2448_v30, %v2447_v32 }
 0x1ce   : > { %3442 = vmatmul.mubr.msk.bf16.gmra.mxu0 %vm350_vm1, %v1984_v26  ;;  %3423 = vmatprep.mubr.msk.bf16.mxu1 %vm3605_vm2, %v3604_v2  ;;  %v2450_v26 = vld [vmem:[#allocation2 + $0x4d] sm:$0xff] }
 0x1cf   : > { %3445 = vmatprep.mubr.msk.bf16.mxu0 %vm3605_vm2, %v3604_v2 }
 0x1d5   : > { %3424 = vmatmul.mubr.msk.bf16.gmra.mxu1 %vm350_vm1, %v1867_v33  ;;  %v2456_v33 = vpack.c.bf16 %v2450_v26, %v2449_v38 }
 0x1d6   : > { %3446 = vmatmul.mubr.msk.bf16.gmra.mxu0 %vm350_vm1, %v1985_v39  ;;  %3451 = vmatprep.mubr.msk.bf16.mxu1 %vm3605_vm2, %v3604_v2  ;;  %v2334_v39 = vld [vmem:[#allocation2 + $0x5c] sm:$0xff] }
 0x1d7   : > { %3473 = vmatprep.mubr.msk.bf16.mxu0 %vm3605_vm2, %v3604_v2  ;;  %v2339_v46 = vpack.c.bf16 %v2334_v39, %v2216_v8 }
 0x1dd   : > { %3452 = vmatmul.mubr.msk.bf16.vlgmr.msra.gmra.mxu1 %vm350_vm1, %v2099_v61  ;;  %v2571_v61 = vpack.c.bf16 %v2562_v48, %v2561_v19 }
 0x1de   : > { %3474 = vmatmul.mubr.msk.bf16.vlgmr.msra.gmra.mxu0 %vm350_vm1, %v2217_v59  ;;  %3494 = vmatpush3.bf16.msra.mxu1 %v2358_v55  ;;  %v2564_v59 = vld [vmem:[#allocation2 + $0x2e] sm:$0xff]  ;;  %v2563_v55 = vld [vmem:[#allocation2 + $0x26] sm:$0xff] }
 0x1df   : > { %3455 = vmatprep.mubr.msk.bf16.mxu1 %vm3605_vm2, %v3604_v2  ;;  %3477 = vmatprep.mubr.msk.bf16.mxu0 %vm3605_vm2, %v3604_v2 }
 0x1e0   : > { %3516 = vmatpush3.bf16.msra.mxu0 %v2476_v35  ;;  %3537 = vmatprep.subr.bf16.mxu1 %v3604_v2  ;;  %v2572_v35 = vpack.c.bf16 %v2564_v59, %v2563_v55 }
 0x1e5   : > { %3456 = vmatmul.mubr.msk.bf16.gmra.mxu1 %vm350_vm1, %v2100_v50  ;;  %v2567_v50 = vld [vmem:[#allocation2 + $0x46] sm:$0xff] }
 0x1e6   : > { %3478 = vmatmul.mubr.msk.bf16.gmra.mxu0 %vm350_vm1, %v2218_v4  ;;  %3459 = vmatprep.mubr.msk.bf16.mxu1 %vm3605_vm2, %v3604_v2  ;;  %v2574_v4 = vpack.c.bf16 %v2568_v1, %v2567_v50 }
 0x1e7   : > { %3481 = vmatprep.mubr.msk.bf16.mxu0 %vm3605_vm2, %v3604_v2 }
 0x1ed   : > { %3460 = vmatmul.mubr.msk.bf16.gmra.mxu1 %vm350_vm1, %v2101_v10 }
 0x1ee   : > { %3482 = vmatmul.mubr.msk.bf16.gmra.mxu0 %vm350_vm1, %v2219_v57  ;;  %3463 = vmatprep.mubr.msk.bf16.mxu1 %vm3605_vm2, %v3604_v2 }
 0x1ef   : > { %3485 = vmatprep.mubr.msk.bf16.mxu0 %vm3605_vm2, %v3604_v2 }
 0x1f5   : > { %3464 = vmatmul.mubr.msk.bf16.gmra.mxu1 %vm350_vm1, %v2102_v17 }
 0x1f6   : > { %3486 = vmatmul.mubr.msk.bf16.gmra.mxu0 %vm350_vm1, %v2220_v31  ;;  %3467 = vmatprep.mubr.msk.bf16.mxu1 %vm3605_vm2, %v3604_v2 }
 0x1f7   : > { %3489 = vmatprep.mubr.msk.bf16.mxu0 %vm3605_vm2, %v3604_v2 }
 0x1fd   : > { %3468 = vmatmul.mubr.msk.bf16.gmra.mxu1 %vm350_vm1, %v2103_v51 }
 0x1fe   : > { %3490 = vmatmul.mubr.msk.bf16.gmra.mxu0 %vm350_vm1, %v2221_v3  ;;  %3495 = vmatprep.mubr.msk.bf16.mxu1 %vm3605_vm2, %v3604_v2 }
 0x1ff   : > { %3517 = vmatprep.mubr.msk.bf16.mxu0 %vm3605_vm2, %v3604_v2 }
 0x205   : > { %3496 = vmatmul.mubr.msk.bf16.vlgmr.msra.gmra.mxu1 %vm350_vm1, %v2335_v25 }
 0x206   : > { %3518 = vmatmul.mubr.msk.bf16.vlgmr.msra.gmra.mxu0 %vm350_vm1, %v2453_v14  ;;  %3538 = vmatpush3.bf16.msra.mxu1 %v2594_v11 }
 0x207   : > { %3499 = vmatprep.mubr.msk.bf16.mxu1 %vm3605_vm2, %v3604_v2  ;;  %3521 = vmatprep.mubr.msk.bf16.mxu0 %vm3605_vm2, %v3604_v2 }
 0x20d   : > { %3500 = vmatmul.mubr.msk.bf16.gmra.mxu1 %vm350_vm1, %v2336_v27 }
 0x20e   : > { %3522 = vmatmul.mubr.msk.bf16.gmra.mxu0 %vm350_vm1, %v2454_v54  ;;  %3503 = vmatprep.mubr.msk.bf16.mxu1 %vm3605_vm2, %v3604_v2 }
 0x20f   : > { %3525 = vmatprep.mubr.msk.bf16.mxu0 %vm3605_vm2, %v3604_v2 }
 0x215   : > { %3504 = vmatmul.mubr.msk.bf16.gmra.mxu1 %vm350_vm1, %v2337_v58 }
 0x216   : > { %3526 = vmatmul.mubr.msk.bf16.gmra.mxu0 %vm350_vm1, %v2455_v34  ;;  %3507 = vmatprep.mubr.msk.bf16.mxu1 %vm3605_vm2, %v3604_v2 }
 0x217   : > { %3529 = vmatprep.mubr.msk.bf16.mxu0 %vm3605_vm2, %v3604_v2 }
 0x21d   : > { %3508 = vmatmul.mubr.msk.bf16.gmra.mxu1 %vm350_vm1, %v2338_v49 }
 0x21e   : > { %3530 = vmatmul.mubr.msk.bf16.gmra.mxu0 %vm350_vm1, %v2456_v33  ;;  %3511 = vmatprep.mubr.msk.bf16.mxu1 %vm3605_vm2, %v3604_v2 }
 0x21f   : > { %3533 = vmatprep.mubr.msk.bf16.mxu0 %vm3605_vm2, %v3604_v2 }
 0x225   : > { %3512 = vmatmul.mubr.msk.bf16.gmra.mxu1 %vm350_vm1, %v2339_v46 }
 0x226   : > { %3534 = vmatmul.mubr.msk.bf16.gmra.mxu0 %vm350_vm1, %v2457_v37  ;;  %3539 = vmatprep.mubr.msk.bf16.mxu1 %vm3605_vm2, %v3604_v2 }
 0x22d   : > { %3540 = vmatmul.mubr.msk.bf16.vlgmr.msra.gmra.mxu1 %vm350_vm1, %v2571_v61 }
 0x22e   : > { %3543 = vmatprep.mubr.msk.bf16.mxu1 %vm3605_vm2, %v3604_v2 }
 0x235   : > { %3544 = vmatmul.mubr.msk.bf16.gmra.mxu1 %vm350_vm1, %v2572_v35 }
 0x236   : > { %3547 = vmatprep.mubr.msk.bf16.mxu1 %vm3605_vm2, %v3604_v2 }
 0x23d   : > { %3548 = vmatmul.mubr.msk.bf16.gmra.mxu1 %vm350_vm1, %v2573_v28 }
 0x23e   : > { %3551 = vmatprep.mubr.msk.bf16.mxu1 %vm3605_vm2, %v3604_v2 }
 0x245   : > { %3552 = vmatmul.mubr.msk.bf16.gmra.mxu1 %vm350_vm1, %v2574_v4 }
 0x246   : > { %3555 = vmatprep.mubr.msk.bf16.mxu1 %vm3605_vm2, %v3604_v2 }
 0x24d   : > { %v1723_v16 = vpop.f32.mrf.mxu1  ;;  %3556 = vmatmul.mubr.msk.bf16.gmra.mxu1 %vm350_vm1, %v2575_v56 }
 0x24e   : > { %v1814_v10 = vpop.f32.mrf.mxu0 }
 0x24f   : > { %v1815_v57 = vadd.f32 %v1814_v10, %v1723_v16  ;;  %v3365_v52 = vpop.f32.mrf.mxu1 }
 0x250   : > { %v3387_v15 = vpop.f32.mrf.mxu0 }
 0x251   : > { %v1726_v0 = vpop.f32.mrf.mxu1 }
 0x252   : > { %v1817_v12 = vpop.f32.mrf.mxu0 }
 0x253   : > { %v1818_v17 = vadd.f32 %v1817_v12, %v1726_v0  ;;  %v3366_v31 = vpop.f32.mrf.mxu1 }
 0x254   : > { %v3388_v63 = vpop.f32.mrf.mxu0 }
 0x255   : > { %v1731_v20 = vpop.f32.mrf.mxu1 }
 0x256   : > { %v1822_v8 = vpop.f32.mrf.mxu0 }
 0x257   : > { %v1823_v7 = vadd.f32 %v1822_v8, %v1731_v20  ;;  %v3369_v51 = vpop.f32.mrf.mxu1 }
 0x258   : > { %v3391_v2 = vpop.f32.mrf.mxu0 }
 0x259   : > { %v1734_v3 = vpop.f32.mrf.mxu1 }
 0x25a   : > { %v1825_v18 = vpop.f32.mrf.mxu0 }
 0x25b   : > { %v1826_v36 = vadd.f32 %v1825_v18, %v1734_v3  ;;  %v3370_v22 = vpop.f32.mrf.mxu1 }
 0x25c   : > { %v3392_v25 = vpop.f32.mrf.mxu0 }
 0x25d   : > { %v1739_v14 = vpop.f32.mrf.mxu1 }
 0x25e   : > { %v1830_v11 = vpop.f32.mrf.mxu0 }
 0x25f   : > { %v1831_v6 = vadd.f32 %v1830_v11, %v1739_v14  ;;  %v3373_v44 = vpop.f32.mrf.mxu1 }
 0x260   : > { %v3395_v27 = vpop.f32.mrf.mxu0 }
 0x261   : > { %v1742_v54 = vpop.f32.mrf.mxu1 }
 0x262   : > { %v1833_v30 = vpop.f32.mrf.mxu0 }
 0x263   : > { %v1834_v32 = vadd.f32 %v1833_v30, %v1742_v54  ;;  %v3374_v58 = vpop.f32.mrf.mxu1 }
 0x264   : > { %v3396_v34 = vpop.f32.mrf.mxu0 }
 0x265   : > { %v1747_v26 = vpop.f32.mrf.mxu1 }
 0x266   : > { %v1838_v38 = vpop.f32.mrf.mxu0 }
 0x267   : > { %v1839_v49 = vadd.f32 %v1838_v38, %v1747_v26  ;;  %v3377_v33 = vpop.f32.mrf.mxu1 }
 0x268   : > { %v3399_v39 = vpop.f32.mrf.mxu0 }
 0x269   : > { %v1750_v41 = vpop.f32.mrf.mxu1 }
 0x26a   : > { %v1841_v45 = vpop.f32.mrf.mxu0 }
 0x26b   : > { %v1842_v46 = vadd.f32 %v1841_v45, %v1750_v41  ;;  %v3378_v37 = vpop.f32.mrf.mxu1 }
 0x26c   : > { %v3400_v48 = vpop.f32.mrf.mxu0 }
 0x26d   : > { %v1755_v19 = vpop.f32.mrf.mxu1 }
 0x26e   : > { %v1846_v61 = vpop.f32.mrf.mxu0 }
 0x26f   : > { %v1847_v59 = vadd.f32 %v1846_v61, %v1755_v19  ;;  %v3381_v55 = vpop.f32.mrf.mxu1 }
 0x270   : > { %v3403_v35 = vpop.f32.mrf.mxu0 }
 0x271   : > { %v1758_v43 = vpop.f32.mrf.mxu1 }
 0x272   : > { %v1849_v60 = vpop.f32.mrf.mxu0 }
 0x273   : > { %v1850_v28 = vadd.f32 %v1849_v60, %v1758_v43  ;;  %v3382_v1 = vpop.f32.mrf.mxu1 }
 0x274   : > { %v3404_v50 = vpop.f32.mrf.mxu0 }
 0x275   : > { %v1922_v4 = vpop.f32.mrf.mxu1 }
 0x276   : > { %v2040_v5 = vpop.f32.mrf.mxu0  ;;  %v1961_v9 = vadd.f32 %v1922_v4, %v1815_v57 }
 0x277   : > { %v3409_v56 = vpop.f32.mrf.mxu1 }
 0x278   : > { %v3431_v16 = vpop.f32.mrf.mxu0  ;;  %v2079_v10 = vadd.f32 %v2040_v5, %v1961_v9 }
 0x279   : > { %v1925_v52 = vpop.f32.mrf.mxu1 }
 0x27a   : > { %v2043_v15 = vpop.f32.mrf.mxu0  ;;  %v1962_v0 = vadd.f32 %v1925_v52, %v1818_v17 }
 0x27b   : > { %v3410_v12 = vpop.f32.mrf.mxu1 }
 0x27c   : > { %v3432_v31 = vpop.f32.mrf.mxu0  ;;  %v2080_v63 = vadd.f32 %v2043_v15, %v1962_v0 }
 0x27d   : > { %v1930_v20 = vpop.f32.mrf.mxu1 }
 0x27e   : > { %v2048_v8 = vpop.f32.mrf.mxu0  ;;  %v1963_v51 = vadd.f32 %v1930_v20, %v1823_v7 }
 0x27f   : > { %v3413_v2 = vpop.f32.mrf.mxu1 }
 0x280   : > { %v3435_v3 = vpop.f32.mrf.mxu0  ;;  %v2081_v18 = vadd.f32 %v2048_v8, %v1963_v51 }
 0x281   : > { %v1933_v22 = vpop.f32.mrf.mxu1 }
 0x282   : > { %v2051_v25 = vpop.f32.mrf.mxu0  ;;  %v1964_v14 = vadd.f32 %v1933_v22, %v1826_v36 }
 0x283   : > { %v3414_v11 = vpop.f32.mrf.mxu1 }
 0x284   : > { %v3436_v57 = vpop.f32.mrf.mxu0  ;;  %v2082_v44 = vadd.f32 %v2051_v25, %v1964_v14 }
 0x285   : > { %v1938_v27 = vpop.f32.mrf.mxu1 }
 0x286   : > { %v2056_v54 = vpop.f32.mrf.mxu0  ;;  %v1965_v30 = vadd.f32 %v1938_v27, %v1831_v6 }
 0x287   : > { %v3417_v58 = vpop.f32.mrf.mxu1 }
 0x288   : > { %v3439_v17 = vpop.f32.mrf.mxu0  ;;  %v2083_v34 = vadd.f32 %v2056_v54, %v1965_v30 }
 0x289   : > { %v1941_v26 = vpop.f32.mrf.mxu1 }
 0x28a   : > { %v2059_v38 = vpop.f32.mrf.mxu0  ;;  %v1966_v33 = vadd.f32 %v1941_v26, %v1834_v32 }
 0x28b   : > { %v3418_v39 = vpop.f32.mrf.mxu1 }
 0x28c   : > { %v3440_v7 = vpop.f32.mrf.mxu0  ;;  %v2084_v41 = vadd.f32 %v2059_v38, %v1966_v33 }
 0x28d   : > { %v1946_v45 = vpop.f32.mrf.mxu1 }
 0x28e   : > { %v2064_v37 = vpop.f32.mrf.mxu0  ;;  %v1967_v48 = vadd.f32 %v1946_v45, %v1839_v49 }
 0x28f   : > { %v3421_v19 = vpop.f32.mrf.mxu1 }
 0x290   : > { %v3443_v36 = vpop.f32.mrf.mxu0  ;;  %v2085_v61 = vadd.f32 %v2064_v37, %v1967_v48 }
 0x291   : > { %v1949_v55 = vpop.f32.mrf.mxu1 }
 0x292   : > { %v2067_v35 = vpop.f32.mrf.mxu0  ;;  %v1968_v43 = vadd.f32 %v1949_v55, %v1842_v46 }
 0x293   : > { %v3422_v60 = vpop.f32.mrf.mxu1 }
 0x294   : > { %v3444_v6 = vpop.f32.mrf.mxu0  ;;  %v2086_v1 = vadd.f32 %v2067_v35, %v1968_v43 }
 0x295   : > { %v1954_v50 = vpop.f32.mrf.mxu1 }
 0x296   : > { %v2072_v4 = vpop.f32.mrf.mxu0  ;;  %v1969_v5 = vadd.f32 %v1954_v50, %v1847_v59 }
 0x297   : > { %v3425_v9 = vpop.f32.mrf.mxu1 }
 0x298   : > { %v3447_v32 = vpop.f32.mrf.mxu0  ;;  %v2087_v56 = vadd.f32 %v2072_v4, %v1969_v5 }
 0x299   : > { %v1957_v16 = vpop.f32.mrf.mxu1 }
 0x29a   : > { %v2075_v52 = vpop.f32.mrf.mxu0  ;;  %v1970_v15 = vadd.f32 %v1957_v16, %v1850_v28 }
 0x29b   : > { %v3426_v0 = vpop.f32.mrf.mxu1 }
 0x29c   : > { %v3448_v49 = vpop.f32.mrf.mxu0  ;;  %v2088_v12 = vadd.f32 %v2075_v52, %v1970_v15 }
 0x29d   : > { %v2158_v31 = vpop.f32.mrf.mxu1 }
 0x29e   : > { %v2276_v20 = vpop.f32.mrf.mxu0  ;;  %v2197_v8 = vadd.f32 %v2158_v31, %v2079_v10 }
 0x29f   : > { %v3453_v51 = vpop.f32.mrf.mxu1 }
 0x2a0   : > { %v3475_v46 = vpop.f32.mrf.mxu0  ;;  %v4349_v2 = vadd.f32 %v2276_v20, %v2197_v8 }
 0x2a1   : > { %v2161_v3 = vpop.f32.mrf.mxu1 }
 0x2a2   : > { %v2279_v22 = vpop.f32.mrf.mxu0  ;;  %v2198_v25 = vadd.f32 %v2161_v3, %v2080_v63 }
 0x2a3   : > { %v3454_v59 = vpop.f32.mrf.mxu1 }
 0x2a4   : > { %v3476_v14 = vpop.f32.mrf.mxu0  ;;  %v4351_v11 = vadd.f32 %v2279_v22, %v2198_v25 }
 0x2a5   : > { %v2166_v57 = vpop.f32.mrf.mxu1 }
 0x2a6   : > { %v2284_v27 = vpop.f32.mrf.mxu0  ;;  %v2199_v28 = vadd.f32 %v2166_v57, %v2081_v18 }
 0x2a7   : > { %v3457_v54 = vpop.f32.mrf.mxu1 }
 0x2a8   : > { %v3479_v30 = vpop.f32.mrf.mxu0  ;;  %v4353_v58 = vadd.f32 %v2284_v27, %v2199_v28 }
 0x2a9   : > { %v2169_v17 = vpop.f32.mrf.mxu1 }
 0x2aa   : > { %v2287_v10 = vpop.f32.mrf.mxu0  ;;  %v2200_v26 = vadd.f32 %v2169_v17, %v2082_v44 }
 0x2ab   : > { %v3458_v38 = vpop.f32.mrf.mxu1 }
 0x2ac   : > { %v3480_v33 = vpop.f32.mrf.mxu0  ;;  %v4355_v39 = vadd.f32 %v2287_v10, %v2200_v26 }
 0x2ad   : > { %v2174_v7 = vpop.f32.mrf.mxu1 }
 0x2ae   : > { %v2292_v63 = vpop.f32.mrf.mxu0  ;;  %v2201_v45 = vadd.f32 %v2174_v7, %v2083_v34 }
 0x2af   : > { %v3461_v37 = vpop.f32.mrf.mxu1 }
 0x2b0   : > { %v3483_v48 = vpop.f32.mrf.mxu0  ;;  %v4357_v19 = vadd.f32 %v2292_v63, %v2201_v45 }
 0x2b1   : > { %v2177_v36 = vpop.f32.mrf.mxu1 }
 0x2b2   : > { %v2295_v18 = vpop.f32.mrf.mxu0  ;;  %v2202_v55 = vadd.f32 %v2177_v36, %v2084_v41 }
 0x2b3   : > { %v3462_v35 = vpop.f32.mrf.mxu1 }
 0x2b4   : > { %v3484_v43 = vpop.f32.mrf.mxu0  ;;  %v4359_v60 = vadd.f32 %v2295_v18, %v2202_v55 }
 0x2b5   : > { %v2182_v6 = vpop.f32.mrf.mxu1 }
 0x2b6   : > { %v2300_v44 = vpop.f32.mrf.mxu0  ;;  %v2203_v50 = vadd.f32 %v2182_v6, %v2085_v61 }
 0x2b7   : > { %v3465_v4 = vpop.f32.mrf.mxu1 }
 0x2b8   : > { %v3487_v5 = vpop.f32.mrf.mxu0  ;;  %v4361_v9 = vadd.f32 %v2300_v44, %v2203_v50 }
 0x2b9   : > { %v2185_v32 = vpop.f32.mrf.mxu1 }
 0x2ba   : > { %v2303_v34 = vpop.f32.mrf.mxu0  ;;  %v2204_v16 = vadd.f32 %v2185_v32, %v2086_v1 }
 0x2bb   : > { %v3466_v52 = vpop.f32.mrf.mxu1 }
 0x2bc   : > { %v3488_v15 = vpop.f32.mrf.mxu0  ;;  %v4363_v0 = vadd.f32 %v2303_v34, %v2204_v16  ;;  %v1616_v52 = vld [vmem:[%s3679_s8 + $0x4] sm:$0xe] }
 0x2bd   : > { %v2190_v49 = vpop.f32.mrf.mxu1  ;;  %v3051_v15 = vld [vmem:[%s3679_s8 + $0x8] sm:$0xff]  }
 0x2be   : > { %v2308_v41 = vpop.f32.mrf.mxu0  ;;  %v2205_v31 = vadd.f32 %v2190_v49, %v2087_v56 }
 0x2bf   : > { %v3469_v20 = vpop.f32.mrf.mxu1 }
 0x2c0   : > { %v3491_v8 = vpop.f32.mrf.mxu0  ;;  %v4365_v51 = vadd.f32 %v2308_v41, %v2205_v31 }
 0x2c1   : > { %v2193_v46 = vpop.f32.mrf.mxu1  ;;  %v3037_v8 = vunpack.c.l.bf16 %v3051_v15 }
 0x2c2   : > { %v2311_v61 = vpop.f32.mrf.mxu0  ;;  %v2206_v3 = vadd.f32 %v2193_v46, %v2088_v12  ;;  %v1627_v46 = vunpack.c.l.bf16 %v1616_v52 }
 0x2c3   : > { %v3470_v22 = vpop.f32.mrf.mxu1 }
 0x2c4   : > { %v3492_v25 = vpop.f32.mrf.mxu0  ;;  %v4367_v59 = vadd.f32 %v2311_v61, %v2206_v3 }
 0x2c5   : > { %v2394_v14 = vpop.f32.mrf.mxu1 }
 0x2c6   : > { %v2512_v1 = vpop.f32.mrf.mxu0  ;;  %v2433_v61 = vadd.f32 %v2394_v14, %v4349_v2 }
 0x2c7   : > { %v3497_v57 = vpop.f32.mrf.mxu1 }
 0x2c8   : > { %v3519_v27 = vpop.f32.mrf.mxu0 }
 0x2c9   : > { %v2397_v28 = vpop.f32.mrf.mxu1  ;;  %v2708_v27 = vrot.slane %v1627_v46, 3 }
 0x2ca   : > { %v2515_v54 = vpop.f32.mrf.mxu0 }
 0x2cb   : > { %v3498_v30 = vpop.f32.mrf.mxu1 }
 0x2cc   : > { %v3520_v17 = vpop.f32.mrf.mxu0  ;;  %v2709_v30 = vrot.slane %v3037_v8, 3 }
 0x2cd   : > { %v2402_v56 = vpop.f32.mrf.mxu1  ;;  %v3038_v17 = vunpack.c.h.bf16 %v3051_v15 }
 0x2ce   : > { %v2520_v10 = vpop.f32.mrf.mxu0  ;;  %v2710_v14 = vsel %vm1401_vm8, %v2708_v27, %v2709_v30 }
 0x2cf   : > { %v3501_v26 = vpop.f32.mrf.mxu1 }
 0x2d0   : > { %v3523_v38 = vpop.f32.mrf.mxu0  ;;  %v2551_v26 = vadd.f32 %v2512_v1, %v2433_v61  ;;  %v2435_v1 = vadd.f32 %v2402_v56, %v4353_v58 }
 0x2d1   : > { %v2405_v33 = vpop.f32.mrf.mxu1  ;;  %v2434_v38 = vadd.f32 %v2397_v28, %v4351_v11 }
 0x2d2   : > { %v4369_v7 = vpop.f32.mrf.mxu0  ;;  %v2436_v8 = vadd.f32 %v2405_v33, %v4355_v39 }
 0x2d3   : > { %v3502_v12 = vpop.f32.mrf.mxu1 }
 0x2d4   : > { %v3524_v63 = vpop.f32.mrf.mxu0  ;;  %v3052_v12 = vld [vmem:[%s3679_s8 + $0x10] sm:$0xff]  }
 0x2d5   : > { %v4371_v45 = vpop.f32.mrf.mxu1 }
 0x2d6   : > { %v4373_v37 = vpop.f32.mrf.mxu0  ;;  %v2437_v27 = vadd.f32 %v4371_v45, %v4357_v19 }
 0x2d7   : > { %v3505_v48 = vpop.f32.mrf.mxu1 }
 0x2d8   : > { %v3527_v36 = vpop.f32.mrf.mxu0  ;;  %v4403_v48 = vld [vmem:[%s4494_s5] ss:$0 sm:$0xff] }
 0x2d9   : > { %v4375_v18 = vpop.f32.mrf.mxu1 }
 0x2da   : > { %v4377_v55 = vpop.f32.mrf.mxu0 }
 0x2db   : > { %v3506_v35 = vpop.f32.mrf.mxu1 }
 0x2dc   : > { %v3528_v43 = vpop.f32.mrf.mxu0  ;;  %v2711_v35 = vrot.slane %v3038_v17, 3  ;;  %v2554_v17 = vadd.f32 %v4369_v7, %v2436_v8 }
 0x2dd   : > { %v4379_v6 = vpop.f32.mrf.mxu1  ;;  %v3041_v43 = vunpack.c.l.bf16 %v3052_v12 }
 0x2de   : > { %v4381_v44 = vpop.f32.mrf.mxu0 }
 0x2df   : > { %v3509_v50 = vpop.f32.mrf.mxu1  ;;  %v2713_v15 = vrot.slane %v3041_v43, 3  ;;  %v2438_v43 = vadd.f32 %v4375_v18, %v4359_v60 }
 0x2e0   : > { %v3531_v4 = vpop.f32.mrf.mxu0  ;;  %v2552_v50 = vadd.f32 %v2515_v54, %v2434_v38  ;;  %v3053_v54 = vld [vmem:[%s3679_s8 + $0x18] sm:$0xff]  }
 0x2e1   : > { %v4383_v5 = vpop.f32.mrf.mxu1  ;;  %v2714_v39 = vsel %vm1401_vm8, %v2711_v35, %v2713_v15  ;;  %v3046_v7 = vunpack.c.h.bf16 %v3053_v54 }
 0x2e2   : > { %v4385_v32 = vpop.f32.mrf.mxu0 }
 0x2e3   : > { %v3510_v34 = vpop.f32.mrf.mxu1  ;;  %v2719_v60 = vrot.slane %v3046_v7, 3 }
 0x2e4   : > { %v3532_v16 = vpop.f32.mrf.mxu0 }
 0x2e5   : > { %v4389_v49 = vpop.f32.mrf.mxu1  ;;  %v2712_v16 = vsel %vm1401_vm8, %v2709_v30, %v2711_v35  ;;  %v3045_v30 = vunpack.c.l.bf16 %v3053_v54 }
 0x2e6   : > { %v4391_v41 = vpop.f32.mrf.mxu0 }
 0x2e7   : > { %v3513_v31 = vpop.f32.mrf.mxu1  ;;  %v2717_v35 = vrot.slane %v3045_v30, 3 }
 0x2e8   : > { %v3535_v20 = vpop.f32.mrf.mxu0  ;;  %v3042_v31 = vunpack.c.h.bf16 %v3052_v12 }
 0x2e9   : > { %v4394_v3 = vpop.f32.mrf.mxu1  ;;  %v2553_v20 = vadd.f32 %v2520_v10, %v2435_v1 }
 0x2ea   : > { %v4396_v22 = vpop.f32.mrf.mxu0  ;;  %v2715_v33 = vrot.slane %v3042_v31, 3  ;;  %v2556_v31 = vadd.f32 %v4377_v55, %v2438_v43 }
 0x2eb   : > { %v3514_v25 = vpop.f32.mrf.mxu1 }
 0x2ec   : > { %v3536_v57 = vpop.f32.mrf.mxu0 }
 0x2ed   : > { %v2630_v63 = vpop.f32.mrf.mxu1 }
 0x2ee   : > { %v2669_v2 = vadd.f32 %v2630_v63, %v2551_v26 }
 0x2ef   : > { %v3541_v36 = vpop.f32.mrf.mxu1 }
 0x2f0   : > { %v2686_v4 = vadd.f32 %v4403_v48, %v2669_v2  ;;  %v2555_v2 = vadd.f32 %v4373_v37, %v2437_v27 }
 0x2f1   : > { %v2633_v11 = vpop.f32.mrf.mxu1 }
 0x2f2   : > { %v2739_v28 = vadd.f32 %v2710_v14, %v2686_v4  ;;  %v2670_v34 = vadd.f32 %v2633_v11, %v2552_v50  ;;  %v2716_v14 = vsel %vm1401_vm8, %v2713_v15, %v2715_v33  ;;  %v3054_v11 = vld [vmem:[%s3679_s8 + $0x20] sm:$0xff]  }
 0x2f3   : > { %v3542_v52 = vpop.f32.mrf.mxu1  ;;  %v3049_v18 = vunpack.c.l.bf16 %v3054_v11  ;;  %v3050_v55 = vunpack.c.h.bf16 %v3054_v11 }
 0x2f4   : > { %v2749_v46 = vmax.f32 %v2739_v28, 0.0  ;;  %v2687_v61 = vadd.f32 %v4403_v48, %v2670_v34  ;;  %v2718_v52 = vsel %vm1401_vm8, %v2715_v33, %v2717_v35  ;;  %v1625_v33 = vld [vmem:[%s3679_s8 + $0x28] sm:$0xf] }
 0x2f5   : > { %v2638_v25 = vpop.f32.mrf.mxu1 }
 0x2f6   : > { %v2759_v58 = vmul.f32 %v2749_v46, %v4115_v24  ;;  %v2740_v56 = vadd.f32 %v2712_v16, %v2687_v61  ;;  %v2671_v57 = vadd.f32 %v2638_v25, %v2553_v20  ;;  %v2439_v16 = vadd.f32 %v4379_v6, %v4361_v9 }
 0x2f7   : > { %v3545_v10 = vpop.f32.mrf.mxu1  ;;  %v2720_v25 = vsel %vm1401_vm8, %v2717_v35, %v2719_v60 }
 0x2f8   : > { %v3025_v24 = vpack.c.bf16 %v2759_v58, %v2759_v58  ;;  %v2750_v26 = vmax.f32 %v2740_v56, 0.0  ;;  %v2688_v38 = vadd.f32 %v4403_v48, %v2671_v57  ;;  %v2557_v6 = vadd.f32 %v4381_v44, %v2439_v16 }
 0x2f9   : > { %v2641_v12 = vpop.f32.mrf.mxu1  ;;  %v2721_v56 = vrot.slane %v3049_v18, 3  ;;  %v2440_v57 = vadd.f32 %v4383_v5, %v4363_v0  ;;  %v2723_v5 = vrot.slane %v3050_v55, 3 }
 0x2fa   : > { %2810 = vst.msk [vmem:[%s4419_s25] sm:$0xf] %vm2809_vm10, %v3025_v24  ;;  %v2760_v19 = vmul.f32 %v2750_v26, %v4121_v21  ;;  %v2741_v45 = vadd.f32 %v2714_v39, %v2688_v38  ;;  %v2672_v63 = vadd.f32 %v2641_v12, %v2554_v17  ;;  %v2441_v24 = vadd.f32 %v4389_v49, %v4365_v51 }
 0x2fb   : > { %v3546_v36 = vpop.f32.mrf.mxu1  ;;  %v2722_v26 = vsel %vm1401_vm8, %v2719_v60, %v2721_v56  ;;  %v1636_v38 = vunpack.c.l.bf16 %v1625_v33  ;;  %v2558_v12 = vadd.f32 %v4385_v32, %v2440_v57  ;;  %v2724_v35 = vsel %vm1401_vm8, %v2721_v56, %v2723_v5 }
 0x2fc   : > { %v3026_v50 = vpack.c.bf16 %v2760_v19, %v2760_v19  ;;  %v2751_v1 = vmax.f32 %v2741_v45, 0.0  ;;  %v2689_v4 = vadd.f32 %v4403_v48, %v2672_v63  ;;  %v2559_v49 = vadd.f32 %v4391_v41, %v2441_v24 }
 0x2fd   : > { %v2646_v28 = vpop.f32.mrf.mxu1  ;;  %v2725_v43 = vrot.slane %v1636_v38, 3 }
 0x2fe   : > { %2811 = vst.msk [vmem:[%s4419_s25 + $0x4] sm:$0xf] %vm2809_vm10, %v3026_v50  ;;  %v2761_v21 = vmul.f32 %v2751_v1, %v4126_v42  ;;  %v2742_v37 = vadd.f32 %v2716_v14, %v2689_v4  ;;  %v2673_v34 = vadd.f32 %v2646_v28, %v2555_v2  ;;  %v1626_v2 = vld [vmem:[%s3679_s8 + $0x2c] sm:$0x3]  ;;  %v2442_v50 = vadd.f32 %v4394_v3, %v4367_v59 }
 0x2ff   : > { %v3549_v15 = vpop.f32.mrf.mxu1  ;;  %v1637_v32 = vunpack.c.l.bf16 %v1626_v2 }
 0x300   : > { %v3027_v20 = vpack.c.bf16 %v2761_v21, %v2761_v21  ;;  %v2752_v8 = vmax.f32 %v2742_v37, 0.0  ;;  %v2690_v46 = vadd.f32 %v4403_v48, %v2673_v34  ;;  %v2726_v37 = vsel %vm1401_vm8, %v2723_v5, %v2725_v43 }
 0x301   : > { %v2649_v61 = vpop.f32.mrf.mxu1  ;;  %v2727_v16 = vrot.slane %v1637_v32, 3 }
 0x302   : > { %2812 = vst.msk [vmem:[%s4419_s25 + $0x8] sm:$0xf] %vm2809_vm10, %v3027_v20  ;;  %v2762_v42 = vmul.f32 %v2752_v8, %v4142_v47  ;;  %v2743_v54 = vadd.f32 %v2718_v52, %v2690_v46  ;;  %v2674_v9 = vadd.f32 %v2649_v61, %v2556_v31  ;;  %v2560_v52 = vadd.f32 %v4396_v22, %v2442_v50 }
 0x303   : > { %v3550_v58 = vpop.f32.mrf.mxu1  ;;  %v2728_v20 = vsel %vm1401_vm8, %v2725_v43, %v2727_v16 }
 0x304   : > { %v3028_v27 = vpack.c.bf16 %v2762_v42, %v2762_v42  ;;  %v2753_v39 = vmax.f32 %v2743_v54, 0.0  ;;  %v2691_v10 = vadd.f32 %v4403_v48, %v2674_v9 }
 0x305   : > { %v2654_v30 = vpop.f32.mrf.mxu1 }
 0x306   : > { %2813 = vst.msk [vmem:[%s4419_s25 + $0xc] sm:$0xf] %vm2809_vm10, %v3028_v27  ;;  %v2763_v47 = vmul.f32 %v2753_v39, %v4158_v29  ;;  %v2744_v44 = vadd.f32 %v2720_v25, %v2691_v10  ;;  %v2675_v17 = vadd.f32 %v2654_v30, %v2557_v6 }
 0x307   : > { %v3553_v0 = vpop.f32.mrf.mxu1 }
 0x308   : > { %v3029_v19 = vpack.c.bf16 %v2763_v47, %v2763_v47  ;;  %v2754_v45 = vmax.f32 %v2744_v44, 0.0  ;;  %v2692_v63 = vadd.f32 %v4403_v48, %v2675_v17 }
 0x309   : > { %v2657_v14 = vpop.f32.mrf.mxu1 }
 0x30a   : > { %2814 = vst.msk [vmem:[%s4419_s25 + $0x10] sm:$0xf] %vm2809_vm10, %v3029_v19  ;;  %v2764_v29 = vmul.f32 %v2754_v45, %v4167_v23  ;;  %v2745_v36 = vadd.f32 %v2722_v26, %v2692_v63  ;;  %v2676_v51 = vadd.f32 %v2657_v14, %v2558_v12 }
 0x30b   : > { %v3554_v7 = vpop.f32.mrf.mxu1 }
 0x30c   : > { %v3030_v1 = vpack.c.bf16 %v2764_v29, %v2764_v29  ;;  %v2755_v4 = vmax.f32 %v2745_v36, 0.0  ;;  %v2693_v11 = vadd.f32 %v4403_v48, %v2676_v51 }
 0x30d   : > { %v2662_v28 = vpop.f32.mrf.mxu1 }
 0x30e   : > { %2815 = vst.msk [vmem:[%s4419_s25 + $0x14] sm:$0xf] %vm2809_vm10, %v3030_v1  ;;  %v2765_v23 = vmul.f32 %v2755_v4, %v4180_v13  ;;  %v2746_v21 = vadd.f32 %v2724_v35, %v2693_v11  ;;  %v2677_v41 = vadd.f32 %v2662_v28, %v2559_v49 }
 0x30f   : > { %v3557_v34 = vpop.f32.mrf.mxu1 }
 0x310   : > { %v3031_v59 = vpack.c.bf16 %v2765_v23, %v2765_v23  ;;  %v2756_v3 = vmax.f32 %v2746_v21, 0.0  ;;  %v2694_v15 = vadd.f32 %v4403_v48, %v2677_v41 }
 0x311   : > { %v2665_v60 = vpop.f32.mrf.mxu1 }
 0x312   : > { %2816 = vst.msk [vmem:[%s4419_s25 + $0x18] sm:$0xf] %vm2809_vm10, %v3031_v59  ;;  %v2766_v18 = vmul.f32 %v2756_v3, %v4188_v53  ;;  %v2747_v13 = vadd.f32 %v2726_v37, %v2694_v15  ;;  %v2678_v31 = vadd.f32 %v2665_v60, %v2560_v52 }
 0x313   : > { %v3558_v8 = vpop.f32.mrf.mxu1 }
 0x314   : > { %v3032_v46 = vpack.c.bf16 %v2766_v18, %v2766_v18  ;;  %v2757_v61 = vmax.f32 %v2747_v13, 0.0  ;;  %v2695_v22 = vadd.f32 %v4403_v48, %v2678_v31 }
 0x316   : > { %2817 = vst.msk [vmem:[%s4419_s25 + $0x1c] sm:$0xf] %vm2809_vm10, %v3032_v46  ;;  %v2767_v42 = vmul.f32 %v2757_v61, %v4200_v40  ;;  %v2748_v54 = vadd.f32 %v2728_v20, %v2695_v22 }
 0x318   : > { %v3033_v9 = vpack.c.bf16 %v2767_v42, %v2767_v42  ;;  %v2758_v6 = vmax.f32 %v2748_v54, 0.0 }
 0x31a   : > { %2818 = vst.msk [vmem:[%s4419_s25 + $0x20] sm:$0xf] %vm2809_vm10, %v3033_v9  ;;  %v2768_v53 = vmul.f32 %v2758_v6, %v4205_v62 }
 0x31c   : > { %v3034_v25 = vpack.c.bf16 %v2768_v53, %v2768_v53 }
 0x31e   : > { %2819 = vst.msk [vmem:[%s4419_s25 + $0x24] sm:$0xf] %vm2809_vm10, %v3034_v25 }
 0x31f PF: > { %s16_s21 = sadd.s32 1, %s3602_s21  }
 0x320   : > { %p13_p4 = scmp.ge.s32.totalorder %s16_s21, 4  }
 0x322   :  { %15 = sbr.rel (!%p13_p4) target bundleno = 1 (0x1), region = 90 }

// kernel: _lambda_.8
= control target key start
LH: loop header
LB: loop body
LE: loop exit
PB: predicated region body
PF: predicated region fallthrough
CT: control target
= control target key end

     0   :  { %s2930_s13 = smov 0   ;;  %s3243_s0 = inlined_call_operand.vmem [shape: bf16[2,32,8], index: 0, kind: input, shape index: {}]   ;;  %s3244_s1 = inlined_call_operand.vmem [shape: bf16[2,32,8], index: 1, kind: input, shape index: {}]   ;;  %s3245_s2 = inlined_call_operand.vmem [shape: bf16[2,32,8], index: 2, kind: input, shape index: {}]   ;;  %s3246_s3 = inlined_call_operand.vmem [shape: bf16[2,32,8], index: 3, kind: input, shape index: {}]   ;;  %s3247_s4 = inlined_call_operand.vmem [shape: f32[24,1], index: 4, kind: input, shape index: {}]   ;;  %s3248_s5 = inlined_call_operand.vmem [shape: bf16[9,8,16], index: 5, kind: input, shape index: {}]   ;;  %s3249_s6 = inlined_call_operand.vmem [shape: f32[1,16], index: 6, kind: input, shape index: {}]   ;;  %s3250_s7 = inlined_call_operand.vmem [shape: bf16[9,16,16], index: 7, kind: input, shape index: {}]   ;;  %s3251_s8 = inlined_call_operand.vmem [shape: f32[1,16], index: 8, kind: input, shape index: {}]   ;;  %s3252_s9 = inlined_call_operand.vmem [shape: bf16[9,8,16], index: 9, kind: input, shape index: {}]   ;;  %s3253_s10 = inlined_call_operand.vmem [shape: bf16[2,24,16], index: 10, kind: output, shape index: {}]  }
   0x1 LB: > { %s2425_s14 = sadd.s32 4294967295, %s2871_s13   ;;  %p2429_p0 = scmp.ge.s32.totalorder %s2871_s13, 1  ;;  %s2871_s13 = sphi %s2930_s13, %s20_s13  }
   0x2   : > { %p342_p1 = scmp.lt.s32.totalorder %s2871_s13, 3 }
   0x4   : > { %p343_p2 = pnand %p2429_p0, %p342_p1 }
   0x5   : > { %p395_p3 = scmp.lt.s32.totalorder (!%p343_p2), %s2425_s14, 1 }
   0x6   : > { %346 = sbr.rel (%p343_p2) target bundleno = 543 (0x21f), region = 60 }
   0xb   : > { %v2439_v0 = vld [vmem:[%s3248_s5 + $0x4] sm:$0xf]  ;;  %vm449_vm0 = vcmask 1043456   ;;  %v427_v1 = vld [vmem:[%s3248_s5] sm:$0xf]  ;;  %s3255_s14 = smov (!%p395_p3, %s2425_s14), 1 }
   0xc   : > { %2808 = vmatprep.subr.msk.bf16.mxu0 %vm449_vm0, %v2439_v0  ;;  %v451_v2 = vsel %vm449_vm0, %v2439_v0, 0  ;;  %2809 = vmatprep.subr.msk.bf16.mxu1 %vm449_vm0, %v427_v1  ;;  %v516_v3 = vsel %vm449_vm0, %v427_v1, 0  ;;  %v2448_v4 = vld [vmem:[%s3252_s9 + $0x4] sm:$0xf]  ;;  %v428_v5 = vld [vmem:[%s3252_s9] sm:$0xf] }
   0xd   : > { %2647 = vmatpush3.bf16.msra.mxu0 %v451_v2  ;;  %2653 = vmatpush3.bf16.msra.mxu1 %v516_v3  ;;  %s2558_s23 = sshll.u32 %s3255_s14, 4  ;;  %vm442_vm1 = vcmask 64512   ;;  %v569_v7 = vsel %vm449_vm0, %v2448_v4, 0  ;;  %v620_v9 = vsel %vm449_vm0, %v428_v5, 0  ;;  %v2453_v11 = vld [vmem:[%s3248_s5 + $0x8] sm:$0xf] }
   0xe   : > { %2810 = vmatprep.subr.msk.bf16.mxu0 %vm449_vm0, %v2448_v4  ;;  %2811 = vmatprep.subr.msk.bf16.mxu1 %vm449_vm0, %v428_v5  ;;  %s2962_s26 = scalar_lea.vmem %s3243_s0, %s2558_s23  ;;  %s2967_s29 = scalar_lea.vmem %s3244_s1, %s2558_s23  ;;  %v2458_v13 = vld [vmem:[%s3252_s9 + $0x8] sm:$0xf]  ;;  %v2873_v24 = vmov 0   ;;  %v421_v25 = vld [vmem:[%s3247_s4] sm:$0xff]  ;;  %vm686_vm2 = vsmask.f32 7424 }
   0xf   : > { %v2839_v6 = vld [vmem:[%s2967_s29] sm:$0xff]   ;;  %v2841_v10 = vld [vmem:[%s2967_s29 + $0x8] ss:$0 sps:$4 sm:$0xff]   ;;  %s2990_s18 = scalar_lea.vmem %s3245_s2, %s2558_s23  ;;  %v673_v17 = vld [vmem:[%s2962_s26 + $0xc] sm:$0x1]  ;;  %s3003_s21 = scalar_lea.vmem %s3246_s3, %s2558_s23  ;;  %2837 = vset.pattern.permute.xlu0 %v2873_v24  ;;  %2838 = vset.pattern.permute.xlu1 %v2873_v24  ;;  %v709_v27 = vsel %vm449_vm0, %v2453_v11, 0 }
  0x10   : > { %v2840_v8 = vld [vmem:[%s2962_s26] sm:$0xff]   ;;  %2648 = vmatprep.mubr.msk.bf16.mxu0 %vm442_vm1, %v2839_v6  ;;  %v2842_v12 = vld [vmem:[%s2962_s26 + $0x8] ss:$0 sps:$4 sm:$0xff]   ;;  %1643 = vperm.xlu0 %2837, %v421_v25   ;;  %v765_v29 = vsel %vm449_vm0, %v2458_v13, 0  ;;  %v2461_v32 = vld [vmem:[%s3248_s5 + $0xc] sm:$0xf] }
  0x11   : > { %2654 = vmatprep.mubr.msk.bf16.mxu1 %vm442_vm1, %v2840_v8  ;;  %v670_v14 = vld [vmem:[%s2962_s26] sm:$0xf]  ;;  %v2985_v15 = vld [vmem:[%s2962_s26 + $0x4] sm:$0xf]  ;;  %2649 = vmatmul.mubr.msk.bf16.vlgmr.msra.gmra.mxu0 %vm442_vm1, %v2841_v10  ;;  %v2994_v16 = vld [vmem:[%s2962_s26 + $0x8] sm:$0xf] }
  0x12   : > { %v2454_v18 = vcombine.low %v670_v14, %v2985_v15  ;;  %2655 = vmatmul.mubr.msk.bf16.vlgmr.msra.gmra.mxu1 %vm442_vm1, %v2842_v12  ;;  %2659 = vmatpush3.bf16.msra.mxu0 %v569_v7  ;;  %v2455_v19 = vcombine.low %v2994_v16, %v673_v17  ;;  %v2466_v33 = vld [vmem:[%s3252_s9 + $0xc] sm:$0xf]  ;;  %v423_v34 = vld [vmem:[%s3247_s4 + $0x10] sm:$0xff]  ;;  %v2849_v37 = vld [vmem:[%s2990_s18] sm:$0xff]   ;;  %v838_v38 = vsel %vm449_vm0, %v2461_v32, 0  ;;  %vm1233_vm3 = vcmask 1044480  }
  0x13   : > { %2665 = vmatpush3.bf16.msra.mxu1 %v620_v9  ;;  %2660 = vmatprep.mubr.msk.bf16.mxu0 %vm442_vm1, %v2839_v6  ;;  %v422_v35 = vld [vmem:[%s3247_s4 + $0x8] sm:$0xff]  ;;  %v2845_v39 = vld [vmem:[%s2990_s18] sm:$0xff]   ;;  %v2469_v40 = vld [vmem:[%s3248_s5 + $0x10] sm:$0xf]  ;;  %v894_v41 = vsel %vm449_vm0, %v2466_v33, 0  ;;  %v1095_v44 = vshll.u32 %v2849_v37, 16 }
  0x14   : > { %v688_v20 = vshrl.u32 %v2454_v18, 16  ;;  %v690_v21 = vshll.u32 %v2454_v18, 16  ;;  %2666 = vmatprep.mubr.msk.bf16.mxu1 %vm442_vm1, %v2840_v8  ;;  %2812 = vmatprep.subr.msk.bf16.mxu0 %vm449_vm0, %v2453_v11  ;;  %v695_v22 = vshll.u32 %v2455_v19, 16  ;;  %v699_v31 = vshrl.u32 %v2455_v19, 16  ;;  %v2474_v42 = vld [vmem:[%s3252_s9 + $0x10] sm:$0xf] }
  0x15   : > { %2813 = vmatprep.subr.msk.bf16.mxu1 %vm449_vm0, %v2458_v13  ;;  %1653 = vperm.xlu1 %2838, %v423_v34   ;;  %v2850_v43 = vld [vmem:[%s2990_s18 + $0x8] sm:$0x1f]   ;;  %v967_v45 = vsel %vm449_vm0, %v2469_v40, 0  ;;  %v1023_v47 = vsel %vm449_vm0, %v2474_v42, 0  ;;  %v1093_v48 = vshrl.u32 %v2849_v37, 16  ;;  %v2847_v49 = vld [vmem:[%s3003_s21] sm:$0xff]  }
  0x16   : > { %v692_v23 = vrot.slane %v690_v21, 1  ;;  %v697_v26 = vrot.slane %v695_v22, 1  ;;  %1648 = vperm.xlu0 %2837, %v422_v35   ;;  %v2846_v46 = vld [vmem:[%s2990_s18 + $0x8] ss:$0 sps:$4 sm:$0xff]   ;;  %v1097_v50 = vrot.slane %v1095_v44, 1  ;;  %v1100_v51 = vshll.u32 %v2850_v43, 16 }
  0x17   : > { %v2477_v52 = vld [vmem:[%s3248_s5 + $0x14] sm:$0xf]  ;;  %v2848_v56 = vld [vmem:[%s3003_s21 + $0x8] ss:$0 sps:$4 sm:$0xff]   ;;  %v1223_v57 = vld [vmem:[%s2962_s26] sm:$0x8] }
  0x18   : > { %v693_v28 = vor.u32 %v692_v23, %v688_v20  ;;  %v701_v36 = vor.u32 %v699_v31, %v697_v26  ;;  %v2482_v53 = vld [vmem:[%s3252_s9 + $0x14] sm:$0xf]  ;;  %v1098_v54 = vor.u32 %v1097_v50, %v1093_v48  ;;  %v1102_v55 = vrot.slane %v1100_v51, 1  ;;  %v1224_v58 = vld [vmem:[%s2962_s26 + $0xc] sm:$0x7]  ;;  %v2857_v37 = vld [vmem:[%s3250_s7] sm:$0xff]  }
  0x19   : > { %2661 = vmatmul.mubr.msk.bf16.vlgmr.msra.gmra.mxu0 %vm442_vm1, %v2841_v10  ;;  %v1114_v59 = vsel %vm449_vm0, %v2477_v52, 0  ;;  %v1170_v60 = vsel %vm449_vm0, %v2482_v53, 0  ;;  %v2486_v62 = vcombine.low %v1223_v57, %v2985_v15  ;;  %v2487_v63 = vcombine.low %v2994_v16, %v1224_v58  ;;  %v2485_v1 = vld [vmem:[%s3248_s5 + $0x18] sm:$0xf]  ;;  %v1488_v6 = vld [vmem:[%s2962_s26 + $0xc] sm:$0xf] }
  0x1a   : > { %v698_v30 = vsel %vm686_vm2, %v693_v28, %v697_v26  ;;  %2667 = vmatmul.mubr.msk.bf16.vlgmr.msra.gmra.mxu1 %vm442_vm1, %v2842_v12  ;;  %2671 = vmatpush3.bf16.msra.mxu0 %v709_v27  ;;  %v1103_v61 = vsel %vm686_vm2, %v1098_v54, %v1102_v55  ;;  %v1104_v0 = vshrl.u32 %v2850_v43, 16  ;;  %v2490_v2 = vld [vmem:[%s3252_s9 + $0x18] sm:$0xf]  ;;  %v1244_v7 = vsel %vm449_vm0, %v2485_v1, 0  ;;  %v2853_v8 = vld [vmem:[%s2967_s29] sm:$0xf8]  }
  0x1b   : > { %2677 = vmatpush3.bf16.msra.mxu1 %v765_v29  ;;  %2672 = vmatprep.mubr.msk.bf16.mxu0 %vm442_vm1, %v698_v30  ;;  %v1234_v3 = vrot.slane %v2486_v62, 3  ;;  %v1235_v4 = vrot.slane %v2487_v63, 3  ;;  %v1300_v9 = vsel %vm449_vm0, %v2490_v2, 0  ;;  %v2854_v11 = vld [vmem:[%s2967_s29 + $0x8] sm:$0x7f]   ;;  %v2502_v12 = vcombine.low %v2994_v16, %v1488_v6  ;;  %s2826_s18 = smul.u32 12, %s3255_s14 }
  0x1c   : > { %2678 = vmatprep.mubr.msk.bf16.mxu1 %vm442_vm1, %v698_v30  ;;  %2814 = vmatprep.subr.msk.bf16.mxu0 %vm449_vm0, %v2461_v32  ;;  %v1106_v5 = vor.u32 %v1104_v0, %v1102_v55  ;;  %v2493_v13 = vld [vmem:[%s3248_s5 + $0x1c] sm:$0xf]  ;;  %v1369_v15 = vrot.slane %v2853_v8, 3  ;;  %v1496_v17 = vshrl.u32 %v2486_v62, 16  ;;  %v1370_v16 = vrot.slane %v2854_v11, 3 }
  0x1d   : > { %2815 = vmatprep.subr.msk.bf16.mxu1 %vm449_vm0, %v2466_v33  ;;  %v1236_v10 = vsel %vm1233_vm3, %v1234_v3, %v1235_v4  ;;  %v2498_v14 = vld [vmem:[%s3252_s9 + $0x1c] sm:$0xf]  ;;  %v1499_v18 = vshll.u32 %v2486_v62, 16  ;;  %v1504_v19 = vshrl.u32 %v2502_v12, 16  ;;  %v1507_v20 = vshll.u32 %v2502_v12, 16  ;;  %s419_s21 = scalar_lea.vmem %s3253_s10, %s2826_s18 }
  0x1e   : > { %v1379_v21 = vsel %vm449_vm0, %v2493_v13, 0  ;;  %v1435_v22 = vsel %vm449_vm0, %v2498_v14, 0  ;;  %v1498_v23 = vrot.slane %v1496_v17, 3  ;;  %v1371_v24 = vsel %vm1233_vm3, %v1369_v15, %v1370_v16  ;;  %v2501_v28 = vld [vmem:[%s3248_s5 + $0x20] sm:$0xf] }
  0x1f   : > { %v1501_v25 = vrot.slane %v1499_v18, 4  ;;  %v1506_v26 = vrot.slane %v1504_v19, 3  ;;  %v1509_v27 = vrot.slane %v1507_v20, 4  ;;  %v2505_v29 = vld [vmem:[%s3252_s9 + $0x20] sm:$0xf]  ;;  %v1519_v32 = vsel %vm449_vm0, %v2501_v28, 0 }
  0x20   : > { %vm1494_vm4 = vsmask.f32 4352  ;;  %v1575_v33 = vsel %vm449_vm0, %v2505_v29, 0  ;;  %vm1659_vm5 = vcmask 129024   ;;  %v2874_v35 = vmov 0.0  }
  0x21   : > { %2673 = vmatmul.mubr.msk.bf16.vlgmr.msra.gmra.mxu0 %vm442_vm1, %v701_v36  ;;  %v1502_v30 = vor.u32 %v1501_v25, %v1498_v23  ;;  %v1510_v31 = vor.u32 %v1509_v27, %v1506_v26  ;;  %1660 = vst.msk [vmem:[#allocation2] sm:$0x7f] %vm1659_vm5, %v2874_v35  ;;  %1661 = vst.msk [vmem:[#allocation2 + $0x1f] sm:$0x7f] %vm1659_vm5, %v2874_v35  ;;  %vm1662_vm6 = vcmask 130048   ;;  %vm2330_vm7 = vcmask 125952  }
  0x22   : > { %2679 = vmatmul.mubr.msk.bf16.vlgmr.msra.gmra.mxu1 %vm442_vm1, %v701_v36  ;;  %2683 = vmatpush3.bf16.msra.mxu0 %v838_v38  ;;  %v2856_v36 = vld [vmem:[%s3250_s7 + $0x8] sm:$0xff]   ;;  %v3137_v38 = vld [vmem:[%s3250_s7 + $0x10] sm:$0xff]  }
  0x23   : > { %2689 = vmatpush3.bf16.msra.mxu1 %v894_v41  ;;  %2684 = vmatprep.mubr.msk.bf16.mxu0 %vm442_vm1, %v2845_v39  ;;  %v1511_v34 = vsel %vm1494_vm4, %v1502_v30, %v1510_v31 }
  0x24   : > { %2690 = vmatprep.mubr.msk.bf16.mxu1 %vm442_vm1, %v2845_v39  ;;  %2816 = vmatprep.subr.msk.bf16.mxu0 %vm449_vm0, %v2469_v40  ;;  %v3143_v39 = vld [vmem:[%s3250_s7 + $0x18] sm:$0xff]  }
  0x25   : > { %2817 = vmatprep.subr.msk.bf16.mxu1 %vm449_vm0, %v2474_v42 }
  0x29   : > { %2685 = vmatmul.mubr.msk.bf16.vlgmr.msra.gmra.mxu0 %vm442_vm1, %v2846_v46 }
  0x2a   : > { %2691 = vmatmul.mubr.msk.bf16.vlgmr.msra.gmra.mxu1 %vm442_vm1, %v2846_v46  ;;  %2695 = vmatpush3.bf16.msra.mxu0 %v967_v45 }
  0x2b   : > { %2701 = vmatpush3.bf16.msra.mxu1 %v1023_v47  ;;  %2696 = vmatprep.mubr.msk.bf16.mxu0 %vm442_vm1, %v2847_v49 }
  0x2c   : > { %2702 = vmatprep.mubr.msk.bf16.mxu1 %vm442_vm1, %v2847_v49  ;;  %2818 = vmatprep.subr.msk.bf16.mxu0 %vm449_vm0, %v2477_v52 }
  0x2d   : > { %2819 = vmatprep.subr.msk.bf16.mxu1 %vm449_vm0, %v2482_v53 }
  0x31   : > { %2697 = vmatmul.mubr.msk.bf16.vlgmr.msra.gmra.mxu0 %vm442_vm1, %v2848_v56 }
  0x32   : > { %2703 = vmatmul.mubr.msk.bf16.vlgmr.msra.gmra.mxu1 %vm442_vm1, %v2848_v56  ;;  %2707 = vmatpush3.bf16.msra.mxu0 %v1114_v59 }
  0x33   : > { %2713 = vmatpush3.bf16.msra.mxu1 %v1170_v60  ;;  %2708 = vmatprep.mubr.msk.bf16.mxu0 %vm442_vm1, %v1103_v61 }
  0x34   : > { %2714 = vmatprep.mubr.msk.bf16.mxu1 %vm442_vm1, %v1103_v61  ;;  %2820 = vmatprep.subr.msk.bf16.mxu0 %vm449_vm0, %v2485_v1 }
  0x35   : > { %2821 = vmatprep.subr.msk.bf16.mxu1 %vm449_vm0, %v2490_v2 }
  0x39   : > { %2709 = vmatmul.mubr.msk.bf16.vlgmr.msra.gmra.mxu0 %vm442_vm1, %v1106_v5 }
  0x3a   : > { %2715 = vmatmul.mubr.msk.bf16.vlgmr.msra.gmra.mxu1 %vm442_vm1, %v1106_v5  ;;  %2719 = vmatpush3.bf16.msra.mxu0 %v1244_v7 }
  0x3b   : > { %2725 = vmatpush3.bf16.msra.mxu1 %v1300_v9  ;;  %2720 = vmatprep.mubr.msk.bf16.mxu0 %vm442_vm1, %v1236_v10 }
  0x3c   : > { %2726 = vmatprep.mubr.msk.bf16.mxu1 %vm442_vm1, %v1236_v10  ;;  %2822 = vmatprep.subr.msk.bf16.mxu0 %vm449_vm0, %v2493_v13 }
  0x3d   : > { %2823 = vmatprep.subr.msk.bf16.mxu1 %vm449_vm0, %v2498_v14 }
  0x41   : > { %2721 = vmatmul.mubr.msk.bf16.vlgmr.msra.gmra.mxu0 %vm442_vm1, %v1235_v4 }
  0x42   : > { %2727 = vmatmul.mubr.msk.bf16.vlgmr.msra.gmra.mxu1 %vm442_vm1, %v1235_v4  ;;  %2731 = vmatpush3.bf16.msra.mxu0 %v1379_v21 }
  0x43   : > { %2737 = vmatpush3.bf16.msra.mxu1 %v1435_v22  ;;  %2732 = vmatprep.mubr.msk.bf16.mxu0 %vm442_vm1, %v1371_v24 }
  0x44   : > { %2738 = vmatprep.mubr.msk.bf16.mxu1 %vm442_vm1, %v1371_v24  ;;  %2824 = vmatprep.subr.msk.bf16.mxu0 %vm449_vm0, %v2501_v28 }
  0x45   : > { %2825 = vmatprep.subr.msk.bf16.mxu1 %vm449_vm0, %v2505_v29 }
  0x49   : > { %2733 = vmatmul.mubr.msk.bf16.vlgmr.msra.gmra.mxu0 %vm442_vm1, %v1370_v16 }
  0x4a   : > { %2739 = vmatmul.mubr.msk.bf16.vlgmr.msra.gmra.mxu1 %vm442_vm1, %v1370_v16  ;;  %2743 = vmatpush3.bf16.msra.mxu0 %v1519_v32 }
  0x4b   : > { %2749 = vmatpush3.bf16.msra.mxu1 %v1575_v33  ;;  %2744 = vmatprep.mubr.msk.bf16.mxu0 %vm442_vm1, %v1511_v34 }
  0x4c   : > { %2750 = vmatprep.mubr.msk.bf16.mxu1 %vm442_vm1, %v1511_v34  ;;  %2754 = vmatprep.subr.bf16.mxu0 %v2856_v36 }
  0x4d   : > { %2760 = vmatprep.subr.bf16.mxu1 %v2857_v37 }
  0x51   : > { %2745 = vmatmul.mubr.msk.bf16.vlgmr.msra.gmra.mxu0 %vm442_vm1, %v1510_v31 }
  0x52   : > { %2751 = vmatmul.mubr.msk.bf16.vlgmr.msra.gmra.mxu1 %vm442_vm1, %v1510_v31  ;;  %2755 = vmatpush3.bf16.msra.mxu0 %v2856_v36 }
  0x53   : > { %2761 = vmatpush3.bf16.msra.mxu1 %v2857_v37  ;;  %2766 = vmatprep.subr.bf16.mxu0 %v3137_v38 }
  0x54   : > { %2772 = vmatprep.subr.bf16.mxu1 %v3143_v39 }
  0xd1   : > { %v3146_v40 = vpop.f32.mrf.mxu0 }
  0xd2   : > { %v3148_v41 = vpop.f32.mrf.mxu1 }
  0xd3   : > { %v3150_v42 = vpop.f32.mrf.mxu0 }
  0xd4   : > { %v3152_v43 = vpop.f32.mrf.mxu1 }
  0xd5   : > { %v2651_v44 = vpop.f32.mrf.mxu0 }
  0xd6   : > { %v2657_v45 = vpop.f32.mrf.mxu1 }
  0xd7   : > { %v3154_v46 = vpop.f32.mrf.mxu0 }
  0xd8   : > { %v3156_v47 = vpop.f32.mrf.mxu1 }
  0xd9   : > { %v2662_v48 = vpop.f32.mrf.mxu0 }
  0xda   : > { %v2668_v49 = vpop.f32.mrf.mxu1 }
  0xdb   : > { %v665_v50 = vadd.f32 %v2668_v49, %v2662_v48  ;;  %v605_v51 = vpop.f32.mrf.mxu0 }
  0xdc   : > { %v656_v52 = vpop.f32.mrf.mxu1 }
  0xdd   : > { %v657_v53 = vadd.f32 %v656_v52, %v605_v51  ;;  %v2663_v54 = vpop.f32.mrf.mxu0  ;;  %v561_v51 = vadd.f32 %v3148_v41, %v3146_v40 }
  0xde   : > { %v2669_v55 = vpop.f32.mrf.mxu1 }
  0xdf   : > { %v608_v56 = vpop.f32.mrf.mxu0  ;;  %v553_v55 = vadd.f32 %v3152_v43, %v3150_v42 }
  0xe0   : > { %v659_v57 = vpop.f32.mrf.mxu1 }
  0xe1   : > { %v660_v58 = vadd.f32 %v659_v57, %v608_v56  ;;  %v2674_v59 = vpop.f32.mrf.mxu0 }
  0xe2   : > { %v2680_v60 = vpop.f32.mrf.mxu1  ;;  %v761_v56 = vadd.f32 %v2674_v59, %v561_v51 }
  0xe3   : > { %v817_v61 = vadd.f32 %v2680_v60, %v665_v50  ;;  %v745_v62 = vpop.f32.mrf.mxu0 }
  0xe4   : > { %v801_v63 = vpop.f32.mrf.mxu1  ;;  %v759_v60 = vadd.f32 %v745_v62, %v553_v55 }
  0xe5   : > { %v815_v0 = vadd.f32 %v801_v63, %v657_v53  ;;  %v2675_v1 = vpop.f32.mrf.mxu0 }
  0xe6   : > { %v2681_v2 = vpop.f32.mrf.mxu1 }
  0xe7   : > { %v748_v3 = vpop.f32.mrf.mxu0  ;;  %v556_v2 = vadd.f32 %v3156_v47, %v3154_v46 }
  0xe8   : > { %v804_v4 = vpop.f32.mrf.mxu1 }
  0xe9   : > { %v816_v5 = vadd.f32 %v804_v4, %v660_v58  ;;  %v2686_v6 = vpop.f32.mrf.mxu0 }
  0xea   : > { %v2692_v7 = vpop.f32.mrf.mxu1 }
  0xeb   : > { %v946_v8 = vadd.f32 %v2692_v7, %v817_v61  ;;  %v874_v9 = vpop.f32.mrf.mxu0  ;;  %v890_v61 = vadd.f32 %v2686_v6, %v761_v56 }
  0xec   : > { %v930_v10 = vpop.f32.mrf.mxu1  ;;  %v888_v4 = vadd.f32 %v874_v9, %v759_v60 }
  0xed   : > { %v944_v11 = vadd.f32 %v930_v10, %v815_v0  ;;  %v2687_v12 = vpop.f32.mrf.mxu0 }
  0xee   : > { %v2693_v13 = vpop.f32.mrf.mxu1 }
  0xef   : > { %v877_v14 = vpop.f32.mrf.mxu0 }
  0xf0   : > { %v933_v15 = vpop.f32.mrf.mxu1 }
  0xf1   : > { %v945_v17 = vadd.f32 %v933_v15, %v816_v5  ;;  %v2698_v16 = vpop.f32.mrf.mxu0 }
  0xf2   : > { %v2704_v18 = vpop.f32.mrf.mxu1  ;;  %v1019_v5 = vadd.f32 %v2698_v16, %v890_v61 }
  0xf3   : > { %v1075_v19 = vadd.f32 %v2704_v18, %v946_v8  ;;  %v1003_v20 = vpop.f32.mrf.mxu0  ;;  %v760_v8 = vadd.f32 %v748_v3, %v556_v2  ;;  %v2508_v3 = vld [vmem:[%s3249_s6] ss:$0 sm:$0xff] }
  0xf4   : > { %v1059_v21 = vpop.f32.mrf.mxu1  ;;  %v1017_v10 = vadd.f32 %v1003_v20, %v888_v4 }
  0xf5   : > { %v1073_v22 = vadd.f32 %v1059_v21, %v944_v11  ;;  %v2699_v23 = vpop.f32.mrf.mxu0  ;;  %v889_v12 = vadd.f32 %v877_v14, %v760_v8 }
  0xf6   : > { %v2705_v24 = vpop.f32.mrf.mxu1 }
  0xf7   : > { %v1006_v25 = vpop.f32.mrf.mxu0 }
  0xf8   : > { %v1062_v26 = vpop.f32.mrf.mxu1 }
  0xf9   : > { %v1074_v27 = vadd.f32 %v1062_v26, %v945_v17  ;;  %v2710_v28 = vpop.f32.mrf.mxu0  ;;  %v1018_v17 = vadd.f32 %v1006_v25, %v889_v12 }
  0xfa   : > { %v2716_v29 = vpop.f32.mrf.mxu1  ;;  %v1166_v11 = vadd.f32 %v2710_v28, %v1019_v5 }
  0xfb   : > { %v1222_v30 = vadd.f32 %v2716_v29, %v1075_v19  ;;  %v1150_v31 = vpop.f32.mrf.mxu0 }
  0xfc   : > { %v1206_v32 = vpop.f32.mrf.mxu1  ;;  %v1164_v62 = vadd.f32 %v1150_v31, %v1017_v10 }
  0xfd   : > { %v1220_v33 = vadd.f32 %v1206_v32, %v1073_v22  ;;  %v2711_v34 = vpop.f32.mrf.mxu0 }
  0xfe   : > { %v2717_v35 = vpop.f32.mrf.mxu1 }
  0xff   : > { %v1153_v36 = vpop.f32.mrf.mxu0  ;;  %v3175_v35 = vpop.permute.xlu0 %1643 }
 0x100   : > { %v1209_v37 = vpop.f32.mrf.mxu1  ;;  %v1165_v16 = vadd.f32 %v1153_v36, %v1018_v17 }
 0x101   : > { %v1221_v44 = vadd.f32 %v1209_v37, %v1074_v27  ;;  %v2722_v45 = vpop.f32.mrf.mxu0 }
 0x102   : > { %v2728_v48 = vpop.f32.mrf.mxu1  ;;  %v1296_v6 = vadd.f32 %v2722_v45, %v1166_v11 }
 0x103   : > { %v1352_v49 = vadd.f32 %v2728_v48, %v1222_v30  ;;  %v1280_v50 = vpop.f32.mrf.mxu0  ;;  %v3173_v30 = vpop.permute.xlu1 %1653 }
 0x104   : > { %v1336_v52 = vpop.f32.mrf.mxu1  ;;  %v1294_v18 = vadd.f32 %v1280_v50, %v1164_v62  ;;  %v3181_v51 = vpop.permute.xlu0 %1648 }
 0x105   : > { %v1350_v53 = vadd.f32 %v1336_v52, %v1220_v33  ;;  %v2723_v54 = vpop.f32.mrf.mxu0 }
 0x106   : > { %v2729_v57 = vpop.f32.mrf.mxu1 }
 0x107   : > { %v1283_v58 = vpop.f32.mrf.mxu0 }
 0x108   : > { %v1339_v63 = vpop.f32.mrf.mxu1  ;;  %v1295_v24 = vadd.f32 %v1283_v58, %v1165_v16 }
 0x109   : > { %v1351_v0 = vadd.f32 %v1339_v63, %v1221_v44  ;;  %v2734_v1 = vpop.f32.mrf.mxu0 }
 0x10a   : > { %v2740_v40 = vpop.f32.mrf.mxu1  ;;  %v1431_v19 = vadd.f32 %v2734_v1, %v1296_v6  ;;  %v2862_v6 = vld [vmem:[%s3250_s7 + $0x30] sm:$0xff]  }
 0x10b   : > { %v1487_v41 = vadd.f32 %v2740_v40, %v1352_v49  ;;  %v1415_v7 = vpop.f32.mrf.mxu0 }
 0x10c   : > { %v1471_v42 = vpop.f32.mrf.mxu1  ;;  %v1429_v20 = vadd.f32 %v1415_v7, %v1294_v18  ;;  %v2861_v7 = vld [vmem:[%s3250_s7 + $0x28] sm:$0xff]  }
 0x10d   : > { %v1485_v43 = vadd.f32 %v1471_v42, %v1350_v53  ;;  %v2735_v59 = vpop.f32.mrf.mxu0 }
 0x10e   : > { %v2741_v13 = vpop.f32.mrf.mxu1 }
 0x10f   : > { %v1418_v15 = vpop.f32.mrf.mxu0 }
 0x110   : > { %v1474_v46 = vpop.f32.mrf.mxu1  ;;  %v1430_v31 = vadd.f32 %v1418_v15, %v1295_v24 }
 0x111   : > { %v3164_v47 = vadd.f32 %v1474_v46, %v1351_v0  ;;  %v2746_v9 = vpop.f32.mrf.mxu0 }
 0x112   : > { %v1571_v21 = vadd.f32 %v2746_v9, %v1431_v19  ;;  %v2752_v22 = vpop.f32.mrf.mxu1 }
 0x113   : > { %v3169_v14 = vadd.f32 %v2752_v22, %v1487_v41  ;;  %v1555_v23 = vpop.f32.mrf.mxu0  ;;  %v2860_v41 = vld [vmem:[%s3250_s7 + $0x20] sm:$0xff]  }
 0x114   : > { %v1637_v26 = vadd.f32 %v2508_v3, %v1571_v21  ;;  %v1569_v25 = vadd.f32 %v1555_v23, %v1429_v20  ;;  %v1611_v27 = vpop.f32.mrf.mxu1  ;;  %v2864_v20 = vld [vmem:[%s3250_s7 + $0x40] sm:$0xff]  }
 0x115   : > { %v3171_v28 = vadd.f32 %v1611_v27, %v1485_v43  ;;  %v2747_v29 = vpop.f32.mrf.mxu0 }
 0x116   : > { %v1635_v32 = vadd.f32 %v2508_v3, %v1569_v25  ;;  %v2753_v33 = vpop.f32.mrf.mxu1  ;;  %v1640_v34 = vmax.f32 %v1637_v26, 0.0 }
 0x117   : > { %v1558_v36 = vpop.f32.mrf.mxu0 }
 0x118   : > { %v1638_v37 = vmax.f32 %v1635_v32, 0.0  ;;  %v1658_v44 = vmul.f32 %v3173_v30, %v1640_v34  ;;  %v1570_v45 = vadd.f32 %v1558_v36, %v1430_v31  ;;  %v3224_v31 = vpop.f32.mrf.mxu1 }
 0x11a   : > { %v1656_v48 = vmul.f32 %v3175_v35, %v1638_v37  ;;  %1665 = vst.msk [vmem:[#allocation2 + $0x17] sm:$0xff] %vm1662_vm6, %v1658_v44  ;;  %v1636_v49 = vadd.f32 %v2508_v3, %v1570_v45 }
 0x11c   : > { %1663 = vst.msk [vmem:[#allocation2 + $0x7] sm:$0xff] %vm1662_vm6, %v1656_v48  ;;  %v1639_v50 = vmax.f32 %v1636_v49, 0.0 }
 0x11e   : > { %v1657_v52 = vmul.f32 %v3181_v51, %v1639_v50 }
 0x120   : > { %1664 = vst.msk [vmem:[#allocation2 + $0xf] sm:$0xff] %vm1662_vm6, %v1657_v52 }
 0x121   : > { %v1945_v13 = vld [vmem:[#allocation2 + $0x17] sm:$0xff] }
 0x122   : > { %v2016_v15 = vld [vmem:[#allocation2 + $0x18] sm:$0xff]  ;;  %v1947_v9 = vpack.c.bf16 %v1945_v13, %v1945_v13 }
 0x123   : > { %v1673_v53 = vld [vmem:[#allocation2 + $0x1] sm:$0xff]  ;;  %v2018_v3 = vpack.c.bf16 %v2016_v15, %v2016_v15 }
 0x124   : > { %v1666_v54 = vld [vmem:[#allocation2] sm:$0xff] }
 0x125   : > { %v1801_v4 = vld [vmem:[#allocation2 + $0x2] sm:$0xff] }
 0x126   : > { %v1872_v40 = vld [vmem:[#allocation2 + $0x6] sm:$0xff]  ;;  %v2087_v22 = vld [vmem:[#allocation2 + $0x1c] sm:$0xff] }
 0x127   : > { %v1674_v55 = vld [vmem:[#allocation2 + $0x9] sm:$0xff]  ;;  %v1675_v57 = vld [vmem:[#allocation2 + $0x11] sm:$0xff]  ;;  %v2158_v23 = vld [vmem:[#allocation2 + $0x1d] sm:$0xff]  ;;  %v2089_v24 = vpack.c.bf16 %v2087_v22, %v2087_v22 }
 0x128   : > { %v1667_v56 = vld [vmem:[#allocation2 + $0x8] sm:$0xff]  ;;  %v1676_v58 = vpack.c.bf16 %v1674_v55, %v1673_v53  ;;  %v1677_v61 = vpack.c.bf16 %v1675_v57, %v1675_v57  ;;  %v1668_v63 = vld [vmem:[#allocation2 + $0x10] sm:$0xff]  ;;  %v2160_v26 = vpack.c.bf16 %v2158_v23, %v2158_v23  ;;  %v2229_v27 = vld [vmem:[#allocation2 + $0x1e] sm:$0xff] }
 0x129   : > { %v1669_v60 = vpack.c.bf16 %v1667_v56, %v1666_v54  ;;  %v1802_v0 = vld [vmem:[#allocation2 + $0xa] sm:$0xff]  ;;  %v1670_v2 = vpack.c.bf16 %v1668_v63, %v1668_v63  ;;  %v1803_v10 = vld [vmem:[#allocation2 + $0x12] sm:$0xff]  ;;  %v2231_v29 = vpack.c.bf16 %v2229_v27, %v2229_v27  ;;  %v2552_v22 = vld [vmem:[%s3251_s8] ss:$0 sm:$0xff] }
 0x12a   : > { %v3185_v1 = vld [vmem:[#allocation2 + $0xe] sm:$0xff]  ;;  %2756 = vmatprep.mubr.msk.bf16.mxu0 %vm1662_vm6, %v1676_v58  ;;  %v1804_v5 = vpack.c.bf16 %v1802_v0, %v1801_v4  ;;  %v1874_v11 = vld [vmem:[#allocation2 + $0x16] sm:$0xff]  ;;  %v1805_v43 = vpack.c.bf16 %v1803_v10, %v1803_v10 }
 0x12b   : > { %2762 = vmatprep.mubr.msk.bf16.mxu1 %vm1662_vm6, %v1669_v60  ;;  %2757 = vmatmul.mubr.msk.bf16.vlgmr.msra.gmra.mxu0 %vm1662_vm6, %v1677_v61  ;;  %v1875_v8 = vpack.c.bf16 %v3185_v1, %v1872_v40  ;;  %v1944_v42 = vld [vmem:[#allocation2 + $0xf] sm:$0xff]  ;;  %v1876_v59 = vpack.c.bf16 %v1874_v11, %v1874_v11  ;;  %v1943_v12 = vld [vmem:[#allocation2 + $0x7] sm:$0xff]  ;;  %v2230_v25 = vpack.c.bf16 %v1874_v11, %v3185_v1 }
 0x12c   : > { %2763 = vmatmul.mubr.msk.bf16.vlgmr.msra.gmra.mxu1 %vm1662_vm6, %v1670_v2  ;;  %2767 = vmatpush3.bf16.msra.mxu0 %v3137_v38  ;;  %v1946_v62 = vpack.c.bf16 %v1944_v42, %v1943_v12  ;;  %v2863_v38 = vld [vmem:[%s3250_s7 + $0x38] sm:$0xff]   ;;  %v2085_v17 = vld [vmem:[#allocation2 + $0xc] sm:$0xff] }
 0x12d   : > { %2768 = vmatprep.mubr.msk.bf16.mxu0 %vm1662_vm6, %v1804_v5  ;;  %2774 = vmatprep.mubr.msk.bf16.mxu1 %vm1662_vm6, %v1875_v8  ;;  %v2086_v18 = vld [vmem:[#allocation2 + $0x14] sm:$0xff] }
 0x12e   : > { %2773 = vmatpush3.bf16.msra.mxu1 %v3143_v39  ;;  %2778 = vmatprep.subr.bf16.mxu0 %v2860_v41  ;;  %v2017_v39 = vpack.c.bf16 %v1668_v63, %v1667_v56  ;;  %v2156_v19 = vld [vmem:[#allocation2 + $0xd] sm:$0xff]  ;;  %v2157_v46 = vld [vmem:[#allocation2 + $0x15] sm:$0xff]  ;;  %v2088_v16 = vpack.c.bf16 %v2086_v18, %v2085_v17 }
 0x12f   : > { %2784 = vmatprep.subr.bf16.mxu1 %v2861_v7  ;;  %v2159_v21 = vpack.c.bf16 %v2157_v46, %v2156_v19 }
 0x133   : > { %2769 = vmatmul.mubr.msk.bf16.vlgmr.msra.gmra.mxu0 %vm1662_vm6, %v1805_v43 }
 0x134   : > { %2775 = vmatmul.mubr.msk.bf16.vlgmr.msra.gmra.mxu1 %vm1662_vm6, %v1876_v59  ;;  %2779 = vmatpush3.bf16.msra.mxu0 %v2860_v41 }
 0x135   : > { %2780 = vmatprep.mubr.msk.bf16.mxu0 %vm1662_vm6, %v1946_v62  ;;  %2786 = vmatprep.mubr.msk.bf16.mxu1 %vm1662_vm6, %v2017_v39 }
 0x136   : > { %2785 = vmatpush3.bf16.msra.mxu1 %v2861_v7  ;;  %2790 = vmatprep.subr.bf16.mxu0 %v2862_v6 }
 0x137   : > { %2796 = vmatprep.subr.bf16.mxu1 %v2863_v38 }
 0x13b   : > { %2781 = vmatmul.mubr.msk.bf16.vlgmr.msra.gmra.mxu0 %vm1662_vm6, %v1947_v9 }
 0x13c   : > { %2787 = vmatmul.mubr.msk.bf16.vlgmr.msra.gmra.mxu1 %vm1662_vm6, %v2018_v3  ;;  %2791 = vmatpush3.bf16.msra.mxu0 %v2862_v6 }
 0x13d   : > { %2792 = vmatprep.mubr.msk.bf16.mxu0 %vm1662_vm6, %v2088_v16  ;;  %2798 = vmatprep.mubr.msk.bf16.mxu1 %vm1662_vm6, %v2159_v21 }
 0x13e   : > { %2797 = vmatpush3.bf16.msra.mxu1 %v2863_v38  ;;  %2802 = vmatprep.subr.bf16.mxu0 %v2864_v20 }
 0x143   : > { %2793 = vmatmul.mubr.msk.bf16.vlgmr.msra.gmra.mxu0 %vm1662_vm6, %v2089_v24 }
 0x144   : > { %2799 = vmatmul.mubr.msk.bf16.vlgmr.msra.gmra.mxu1 %vm1662_vm6, %v2160_v26  ;;  %2803 = vmatpush3.bf16.msra.mxu0 %v2864_v20 }
 0x145   : > { %2804 = vmatprep.mubr.msk.bf16.mxu0 %vm1662_vm6, %v2230_v25 }
 0x14b   : > { %2805 = vmatmul.mubr.msk.bf16.vlgmr.msra.gmra.mxu0 %vm1662_vm6, %v2231_v29 }
 0x1eb   : > { %v2758_v32 = vpop.f32.mrf.mxu0 }
 0x1ec   : > { %v2764_v33 = vpop.f32.mrf.mxu1 }
 0x1ed   : > { %v1727_v34 = vpop.f32.mrf.mxu0  ;;  %v1796_v56 = vadd.f32 %v2764_v33, %v2758_v32 }
 0x1ee   : > { %v1787_v36 = vpop.f32.mrf.mxu1 }
 0x1ef   : > { %v2759_v37 = vpop.f32.mrf.mxu0  ;;  %v1788_v60 = vadd.f32 %v1787_v36, %v1727_v34 }
 0x1f0   : > { %v2765_v44 = vpop.f32.mrf.mxu1 }
 0x1f1   : > { %v1730_v45 = vpop.f32.mrf.mxu0 }
 0x1f2   : > { %v1790_v48 = vpop.f32.mrf.mxu1 }
 0x1f3   : > { %v2770_v49 = vpop.f32.mrf.mxu0  ;;  %v1791_v5 = vadd.f32 %v1790_v48, %v1730_v45 }
 0x1f4   : > { %v2776_v50 = vpop.f32.mrf.mxu1  ;;  %v1871_v61 = vadd.f32 %v2770_v49, %v1796_v56 }
 0x1f5   : > { %v1855_v52 = vpop.f32.mrf.mxu0 }
 0x1f6   : > { %v1926_v53 = vpop.f32.mrf.mxu1  ;;  %v1869_v1 = vadd.f32 %v1855_v52, %v1788_v60  ;;  %v1942_v40 = vadd.f32 %v2776_v50, %v1871_v61  ;;  %v1626_v50 = vadd.f32 %v3224_v31, %v3164_v47 }
 0x1f7   : > { %v2771_v54 = vpop.f32.mrf.mxu0 }
 0x1f8   : > { %v2777_v55 = vpop.f32.mrf.mxu1  ;;  %v1940_v8 = vadd.f32 %v1926_v53, %v1869_v1 }
 0x1f9   : > { %v1858_v57 = vpop.f32.mrf.mxu0 }
 0x1fa   : > { %v1929_v58 = vpop.f32.mrf.mxu1  ;;  %v1870_v10 = vadd.f32 %v1858_v57, %v1791_v5 }
 0x1fb   : > { %v2782_v63 = vpop.f32.mrf.mxu0 }
 0x1fc   : > { %v2788_v0 = vpop.f32.mrf.mxu1  ;;  %v2013_v11 = vadd.f32 %v2782_v63, %v1942_v40  ;;  %v1941_v6 = vadd.f32 %v1929_v58, %v1870_v10 }
 0x1fd   : > { %v1997_v2 = vpop.f32.mrf.mxu0 }
 0x1fe   : > { %v2068_v4 = vpop.f32.mrf.mxu1  ;;  %v2011_v59 = vadd.f32 %v1997_v2, %v1940_v8  ;;  %v2084_v38 = vadd.f32 %v2788_v0, %v2013_v11 }
 0x1ff   : > { %v2783_v41 = vpop.f32.mrf.mxu0 }
 0x200   : > { %v2789_v7 = vpop.f32.mrf.mxu1  ;;  %v2082_v15 = vadd.f32 %v2068_v4, %v2011_v59 }
 0x201   : > { %v2000_v42 = vpop.f32.mrf.mxu0 }
 0x202   : > { %v2071_v43 = vpop.f32.mrf.mxu1  ;;  %v2012_v17 = vadd.f32 %v2000_v42, %v1941_v6 }
 0x203   : > { %v2794_v12 = vpop.f32.mrf.mxu0 }
 0x204   : > { %v2800_v62 = vpop.f32.mrf.mxu1  ;;  %v2155_v18 = vadd.f32 %v2794_v12, %v2084_v38  ;;  %v2083_v16 = vadd.f32 %v2071_v43, %v2012_v17 }
 0x205   : > { %v2139_v39 = vpop.f32.mrf.mxu0 }
 0x206   : > { %v2210_v13 = vpop.f32.mrf.mxu1  ;;  %v2153_v9 = vadd.f32 %v2139_v39, %v2082_v15  ;;  %v2226_v20 = vadd.f32 %v2800_v62, %v2155_v18 }
 0x207   : > { %v2795_v19 = vpop.f32.mrf.mxu0 }
 0x208   : > { %v2801_v46 = vpop.f32.mrf.mxu1  ;;  %v2224_v23 = vadd.f32 %v2210_v13, %v2153_v9 }
 0x209   : > { %v2142_v3 = vpop.f32.mrf.mxu0 }
 0x20a   : > { %v2154_v24 = vadd.f32 %v2142_v3, %v2083_v16  ;;  %v2213_v32 = vpop.f32.mrf.mxu1 }
 0x20b   : > { %v2806_v21 = vpop.f32.mrf.mxu0 }
 0x20c   : > { %v2297_v26 = vadd.f32 %v2806_v21, %v2226_v20  ;;  %v2225_v34 = vadd.f32 %v2213_v32, %v2154_v24 }
 0x20d   : > { %v2281_v25 = vpop.f32.mrf.mxu0 }
 0x20e   : > { %v2307_v27 = vadd.f32 %v2552_v22, %v2297_v26  ;;  %v2295_v29 = vadd.f32 %v2281_v25, %v2224_v23 }
 0x20f   : > { %v2807_v33 = vpop.f32.mrf.mxu0 }
 0x210   : > { %v2310_v36 = vadd.f32 %v2307_v27, %v3169_v14  ;;  %v2305_v37 = vadd.f32 %v2552_v22, %v2295_v29 }
 0x211   : > { %v2284_v44 = vpop.f32.mrf.mxu0 }
 0x212   : > { %v2313_v45 = vmax.f32 %v2310_v36, 0.0  ;;  %v2308_v48 = vadd.f32 %v2305_v37, %v3171_v28  ;;  %v2296_v49 = vadd.f32 %v2284_v44, %v2225_v34 }
 0x214   : > { %v2316_v52 = vmul.f32 %v2313_v45, %v3173_v30  ;;  %v2311_v53 = vmax.f32 %v2308_v48, 0.0  ;;  %v2306_v54 = vadd.f32 %v2552_v22, %v2296_v49 }
 0x216   : > { %v2564_v14 = vpack.c.bf16 %v2316_v52, %v2316_v52  ;;  %v2314_v55 = vmul.f32 %v2311_v53, %v3175_v35  ;;  %v2309_v56 = vadd.f32 %v2306_v54, %v1626_v50 }
 0x218   : > { %2333 = vst.msk [vmem:[%s419_s21 + $0x8] sm:$0xf] %vm2330_vm7, %v2564_v14  ;;  %v2562_v57 = vpack.c.bf16 %v2314_v55, %v2314_v55  ;;  %v2312_v28 = vmax.f32 %v2309_v56, 0.0 }
 0x21a   : > { %2331 = vst.msk [vmem:[%s419_s21] sm:$0xf] %vm2330_vm7, %v2562_v57  ;;  %v2315_v58 = vmul.f32 %v2312_v28, %v3181_v51 }
 0x21c   : > { %v2563_v47 = vpack.c.bf16 %v2315_v58, %v2315_v58 }
 0x21e   : > { %2332 = vst.msk [vmem:[%s419_s21 + $0x4] sm:$0xf] %vm2330_vm7, %v2563_v47 }
 0x21f PF: > { %s20_s13 = sadd.s32 1, %s2871_s13  }
 0x220   : > { %p17_p4 = scmp.ge.s32.totalorder %s20_s13, 4  }
 0x222   :  { %19 = sbr.rel (!%p17_p4) target bundleno = 1 (0x1), region = 123 }

// kernel: _lambda_.6
= control target key start
LH: loop header
LB: loop body
LE: loop exit
PB: predicated region body
PF: predicated region fallthrough
CT: control target
= control target key end

     0   :  { %s5032_s13 = smov 0   ;;  %s6394_s0 = inlined_call_operand.vmem [shape: bf16[2,92,4], index: 0, kind: input, shape index: {}]   ;;  %s6395_s1 = inlined_call_operand.vmem [shape: bf16[2,92,4], index: 1, kind: input, shape index: {}]   ;;  %s6396_s2 = inlined_call_operand.vmem [shape: bf16[2,92,4], index: 2, kind: input, shape index: {}]   ;;  %s6397_s3 = inlined_call_operand.vmem [shape: bf16[2,92,4], index: 3, kind: input, shape index: {}]   ;;  %s6398_s4 = inlined_call_operand.vmem [shape: f32[80,1], index: 4, kind: input, shape index: {}]   ;;  %s6399_s5 = inlined_call_operand.vmem [shape: bf16[9,4,8], index: 5, kind: input, shape index: {}]   ;;  %s6400_s6 = inlined_call_operand.vmem [shape: f32[1,8], index: 6, kind: input, shape index: {}]   ;;  %s6401_s7 = inlined_call_operand.vmem [shape: bf16[9,8,8], index: 7, kind: input, shape index: {}]   ;;  %s6402_s8 = inlined_call_operand.vmem [shape: f32[1,8], index: 8, kind: input, shape index: {}]   ;;  %s6403_s9 = inlined_call_operand.vmem [shape: bf16[9,4,8], index: 9, kind: input, shape index: {}]   ;;  %s6404_s10 = inlined_call_operand.vmem [shape: bf16[2,80,8], index: 10, kind: output, shape index: {}]  }
   0x1 LB: > { %s3910_s14 = sadd.s32 4294967295, %s4972_s13   ;;  %p3914_p0 = scmp.ge.s32.totalorder %s4972_s13, 1  ;;  %s4972_s13 = sphi %s5032_s13, %s20_s13  }
   0x2   : > { %p342_p1 = scmp.lt.s32.totalorder %s4972_s13, 3 }
   0x4   : > { %p343_p2 = pnand %p3914_p0, %p342_p1 }
   0x5   : > { %p395_p3 = scmp.lt.s32.totalorder (!%p343_p2), %s3910_s14, 1 }
   0x6   : > { %346 = sbr.rel (%p343_p2) target bundleno = 933 (0x3a5), region = 60 }
   0xb   : > { %v3920_v0 = vld [vmem:[%s6399_s5 + $0x2] sm:$0x3]  ;;  %vm496_vm0 = vcmask 1041408   ;;  %v4974_v1 = vmov 0.0   ;;  %s6406_s14 = smov (!%p395_p3, %s3910_s14), 1  ;;  %vm4975_vm1 = vmmov 0  }
   0xc   : > { %4310 = vmatprep.subr.bf16.mxu0 %v4974_v1  ;;  %4904 = vmatprep.subr.bf16.mxu1 %v4974_v1  ;;  %v498_v2 = vsel %vm496_vm0, %v3920_v0, 0  ;;  %s5054_s17 = smul.u32 48, %s6406_s14  ;;  %v3941_v3 = vld [vmem:[%s6403_s9 + $0x2] sm:$0x3]  ;;  %vm480_vm2 = vcmask 31744   ;;  %vm1885_vm4 = vcmask 1046528  }
   0xd   : > { %4311 = vmatpush3.bf16.msra.mxu0 %v498_v2  ;;  %4905 = vmatpush3.bf16.msra.mxu1 %v498_v2  ;;  %v441_v4 = vld [vmem:[%s6399_s5] sm:$0x3]  ;;  %v692_v6 = vsel %vm496_vm0, %v3941_v3, 0  ;;  %v3952_v15 = vld [vmem:[%s6399_s5 + $0x4] sm:$0x3]  ;;  %vm2727_vm6 = vcmask 1043456  }
   0xe   : > { %4312 = vmatprep.mubr.msk.bf16.mxu0 %vm4975_vm1, %v4974_v1  ;;  %4324 = vmatprep.mubr.msk.bf16.mxu1 %vm4975_vm1, %v4974_v1  ;;  %s5064_s22 = scalar_lea.vmem %s6395_s1, %s5054_s17  ;;  %v614_v8 = vsel %vm496_vm0, %v441_v4, 0  ;;  %s5079_s27 = scalar_lea.vmem %s6394_s0, %s5054_s17  ;;  %v442_v12 = vld [vmem:[%s6403_s9] sm:$0x3]  ;;  %v945_v17 = vsel %vm496_vm0, %v3952_v15, 0  ;;  %v3964_v24 = vld [vmem:[%s6403_s9 + $0x4] sm:$0x3] }
   0xf   : > { %4354 = vmatprep.subr.bf16.mxu0 %v4974_v1  ;;  %4332 = vmatprep.subr.bf16.mxu1 %v4974_v1  ;;  %v4921_v5 = vld [vmem:[%s5064_s22] sm:$0xff]   ;;  %v4922_v7 = vld [vmem:[%s5064_s22 + $0x18] sm:$0xff]   ;;  %v4923_v9 = vld [vmem:[%s5064_s22 + $0x8] sm:$0xff]   ;;  %s5104_s12 = scalar_lea.vmem %s6396_s2, %s5054_s17  ;;  %v768_v14 = vsel %vm496_vm0, %v442_v12, 0  ;;  %s5121_s20 = scalar_lea.vmem %s6397_s3, %s5054_s17  ;;  %v1033_v28 = vsel %vm496_vm0, %v3964_v24, 0  ;;  %vm2663_vm7 = vcmask 64512  }
  0x10   : > { %4313 = vmatmul.mubr.msk.bf16.vlgmr.msra.gmra.mxu0 %vm480_vm2, %v4921_v5  ;;  %4325 = vmatmul.mubr.msk.bf16.vlgmr.msra.gmra.mxu1 %vm480_vm2, %v4922_v7  ;;  %v4924_v10 = vld [vmem:[%s5064_s22 + $0x20] sm:$0xff]   ;;  %v4925_v11 = vld [vmem:[%s5064_s22 + $0x10] sm:$0xff]   ;;  %v4927_v16 = vld [vmem:[%s5079_s27 + $0x8] sm:$0xff]   ;;  %vm884_vm3 = vsmask.f32 7424  ;;  %2664 = vst.msk [vmem:[#allocation2] sm:$0xff] %vm2663_vm7, %v4974_v1 }
  0x11   : > { %4355 = vmatpush3.bf16.msra.mxu0 %v692_v6  ;;  %4316 = vmatprep.mubr.msk.bf16.mxu0 %vm4975_vm1, %v4974_v1  ;;  %v4926_v13 = vld [vmem:[%s5079_s27] sm:$0xff]   ;;  %v4928_v18 = vld [vmem:[%s5079_s27 + $0x10] sm:$0xff]   ;;  %v4929_v19 = vld [vmem:[%s5079_s27 + $0x18] sm:$0xff]   ;;  %vm2333_vm5 = vsmask.f32 6400  ;;  %2667 = vst.msk [vmem:[#allocation2 + $0x5b] sm:$0xff] %vm2663_vm7, %v4974_v1 }
  0x12   : > { %4328 = vmatprep.mubr.msk.bf16.mxu1 %vm4975_vm1, %v4974_v1  ;;  %4333 = vmatpush3.bf16.msra.mxu1 %v614_v8  ;;  %v4930_v20 = vld [vmem:[%s5079_s27 + $0x20] sm:$0xff]   ;;  %v4932_v22 = vld [vmem:[%s5079_s27 + $0x8] sm:$0xff]   ;;  %v4933_v31 = vld [vmem:[%s5079_s27 + $0x10] sm:$0xff]   ;;  %vm2665_vm8 = vcmask 59392   ;;  %vm3808_vm9 = vcmask 60416  }
  0x13   : > { %4398 = vmatprep.subr.bf16.mxu0 %v4974_v1  ;;  %4376 = vmatprep.subr.bf16.mxu1 %v4974_v1  ;;  %v4931_v21 = vld [vmem:[%s5079_s27] sm:$0xff]   ;;  %v893_v27 = vshll.u32 %v4932_v22, 16  ;;  %v897_v34 = vshrl.u32 %v4932_v22, 16  ;;  %v901_v35 = vshll.u32 %v4933_v31, 16  ;;  %v4934_v39 = vld [vmem:[%s5079_s27 + $0x18] sm:$0xff]   ;;  %v905_v41 = vshrl.u32 %v4933_v31, 16 }
  0x14   : > { %v888_v23 = vshll.u32 %v4931_v21, 16  ;;  %v886_v25 = vshrl.u32 %v4931_v21, 16  ;;  %v3970_v32 = vld [vmem:[%s6399_s5 + $0x6] sm:$0x3]  ;;  %v909_v42 = vshll.u32 %v4934_v39, 16  ;;  %v913_v47 = vshrl.u32 %v4934_v39, 16 }
  0x15   : > { %v895_v30 = vrot.slane %v893_v27, 1  ;;  %v1171_v36 = vsel %vm496_vm0, %v3970_v32, 0  ;;  %v903_v38 = vrot.slane %v901_v35, 1  ;;  %v4935_v45 = vld [vmem:[%s5079_s27 + $0x20] sm:$0xff]   ;;  %v3987_v60 = vld [vmem:[%s6399_s5 + $0x8] sm:$0x3] }
  0x16   : > { %v890_v26 = vrot.slane %v888_v23, 1  ;;  %v911_v44 = vrot.slane %v909_v42, 1  ;;  %v917_v48 = vshll.u32 %v4935_v45, 16  ;;  %v4936_v51 = vld [vmem:[%s5079_s27 + $0x28] ss:$0 sps:$4 sm:$0x11]  }
  0x17   : > { %v899_v37 = vor.u32 %v897_v34, %v895_v30  ;;  %v907_v43 = vor.u32 %v905_v41, %v903_v38  ;;  %v921_v53 = vshrl.u32 %v4935_v45, 16  ;;  %v925_v54 = vshll.u32 %v4936_v51, 16  ;;  %v3981_v57 = vld [vmem:[%s6403_s9 + $0x6] sm:$0x3]  ;;  %v4938_v63 = vld [vmem:[%s5104_s12 + $0x8] sm:$0xff]   ;;  %v4939_v0 = vld [vmem:[%s5104_s12 + $0x10] sm:$0xff]  }
  0x18   : > { %4317 = vmatmul.mubr.msk.bf16.gmra.mxu0 %vm480_vm2, %v4923_v9  ;;  %4329 = vmatmul.mubr.msk.bf16.gmra.mxu1 %vm480_vm2, %v4924_v10  ;;  %v891_v29 = vor.u32 %v890_v26, %v886_v25  ;;  %v915_v49 = vor.u32 %v913_v47, %v911_v44  ;;  %v919_v50 = vrot.slane %v917_v48, 1  ;;  %v1259_v59 = vsel %vm496_vm0, %v3981_v57, 0  ;;  %v4937_v61 = vld [vmem:[%s5104_s12] sm:$0xff]   ;;  %v4940_v2 = vld [vmem:[%s5104_s12 + $0x18] sm:$0xff]   ;;  %v3998_v4 = vld [vmem:[%s6403_s9 + $0x8] sm:$0x3] }
  0x19   : > { %4320 = vmatprep.mubr.msk.bf16.mxu0 %vm4975_vm1, %v4974_v1  ;;  %4334 = vmatprep.mubr.msk.bf16.mxu1 %vm4975_vm1, %v4974_v1  ;;  %v904_v40 = vsel %vm884_vm3, %v899_v37, %v903_v38  ;;  %v912_v46 = vsel %vm884_vm3, %v907_v43, %v911_v44  ;;  %v927_v56 = vrot.slane %v925_v54, 1  ;;  %v1397_v62 = vsel %vm496_vm0, %v3987_v60, 0  ;;  %v4941_v3 = vld [vmem:[%s5104_s12 + $0x20] sm:$0xff]   ;;  %v4004_v6 = vld [vmem:[%s6399_s5 + $0xa] sm:$0x3]  ;;  %v4949_v23 = vld [vmem:[%s5104_s12 + $0x10] sm:$0xff]  }
  0x1a   : > { %v896_v33 = vsel %vm884_vm3, %v891_v29, %v895_v30  ;;  %v920_v52 = vsel %vm884_vm3, %v915_v49, %v919_v50  ;;  %v923_v55 = vor.u32 %v921_v53, %v919_v50  ;;  %v1671_v8 = vsel %vm496_vm0, %v4004_v6, 0  ;;  %v4947_v12 = vld [vmem:[%s5104_s12] sm:$0xff]   ;;  %v4022_v24 = vld [vmem:[%s6399_s5 + $0xc] sm:$0x3]  ;;  %v4950_v31 = vld [vmem:[%s5104_s12 + $0x18] sm:$0xff]  }
  0x1b   : > { %v5296_v15 = vld [vmem:[%s5121_s20 + $0x20] sm:$0xff]   ;;  %v1627_v27 = vshll.u32 %v4949_v23, 16  ;;  %v1635_v34 = vshll.u32 %v4950_v31, 16  ;;  %v1639_v45 = vshrl.u32 %v4950_v31, 16  ;;  %2666 = vst.msk [vmem:[#allocation2 + $0x8] sm:$0x7] %vm2665_vm8, %v4974_v1 }
  0x1c   : > { %v928_v58 = vsel %vm884_vm3, %v923_v55, %v927_v56  ;;  %v4951_v39 = vld [vmem:[%s5104_s12 + $0x20] sm:$0xff]   ;;  %v4952_v53 = vld [vmem:[%s5104_s12 + $0x28] ss:$0 sps:$4 sm:$0x11]   ;;  %2668 = vst.msk [vmem:[#allocation2 + $0x63] sm:$0x7] %vm2665_vm8, %v4974_v1 }
  0x1d   : > { %v1629_v30 = vrot.slane %v1627_v27, 1  ;;  %v1637_v38 = vrot.slane %v1635_v34, 1  ;;  %v1651_v60 = vshll.u32 %v4952_v53, 16 }
  0x1f   : > { %v1641_v51 = vor.u32 %v1639_v45, %v1637_v38  ;;  %v5434_v45 = vld [vmem:[%s5079_s27 + $0x1c] sm:$0xff]  }
  0x20   : > { %4321 = vmatmul.mubr.msk.bf16.gmra.mxu0 %vm480_vm2, %v4925_v11  ;;  %4335 = vmatmul.mubr.msk.bf16.vlgmr.msra.gmra.mxu1 %vm480_vm2, %v4926_v13 }
  0x21   : > { %4356 = vmatprep.mubr.msk.bf16.mxu0 %vm4975_vm1, %v4974_v1  ;;  %4338 = vmatprep.mubr.msk.bf16.mxu1 %vm4975_vm1, %v4974_v1 }
  0x22   : > { %4377 = vmatpush3.bf16.msra.mxu1 %v768_v14  ;;  %v1614_v14 = vshll.u32 %v4947_v12, 16 }
  0x23   : > { %4420 = vmatprep.subr.bf16.mxu1 %v4974_v1 }
  0x28   : > { %4357 = vmatmul.mubr.msk.bf16.vlgmr.msra.gmra.mxu0 %vm480_vm2, %v4921_v5  ;;  %4339 = vmatmul.mubr.msk.bf16.gmra.mxu1 %vm480_vm2, %v4927_v16  ;;  %v1485_v5 = vsel %vm496_vm0, %v3998_v4, 0 }
  0x29   : > { %4399 = vmatpush3.bf16.msra.mxu0 %v945_v17  ;;  %4342 = vmatprep.mubr.msk.bf16.mxu1 %vm4975_vm1, %v4974_v1  ;;  %v1612_v17 = vshrl.u32 %v4947_v12, 16  ;;  %v5380_v12 = vld [vmem:[%s5079_s27 + $0xc] sm:$0xff]  }
  0x2a   : > { %4360 = vmatprep.mubr.msk.bf16.mxu0 %vm4975_vm1, %v4974_v1  ;;  %4442 = vmatprep.subr.bf16.mxu0 %v4974_v1 }
  0x30   : > { %4361 = vmatmul.mubr.msk.bf16.gmra.mxu0 %vm480_vm2, %v4923_v9  ;;  %4343 = vmatmul.mubr.msk.bf16.gmra.mxu1 %vm480_vm2, %v4928_v18  ;;  %v4943_v9 = vld [vmem:[%s5121_s20 + $0x8] sm:$0xff]  }
  0x31   : > { %4364 = vmatprep.mubr.msk.bf16.mxu0 %vm4975_vm1, %v4974_v1  ;;  %4346 = vmatprep.mubr.msk.bf16.mxu1 %vm4975_vm1, %v4974_v1 }
  0x38   : > { %4365 = vmatmul.mubr.msk.bf16.gmra.mxu0 %vm480_vm2, %v4925_v11  ;;  %4347 = vmatmul.mubr.msk.bf16.gmra.mxu1 %vm480_vm2, %v4929_v19  ;;  %v4945_v11 = vld [vmem:[%s5121_s20 + $0x18] sm:$0xff]  }
  0x39   : > { %4368 = vmatprep.mubr.msk.bf16.mxu0 %vm4975_vm1, %v4974_v1  ;;  %4350 = vmatprep.mubr.msk.bf16.mxu1 %vm4975_vm1, %v4974_v1 }
  0x40   : > { %4369 = vmatmul.mubr.msk.bf16.gmra.mxu0 %vm480_vm2, %v4922_v7  ;;  %4351 = vmatmul.mubr.msk.bf16.gmra.mxu1 %vm480_vm2, %v4930_v20  ;;  %v4942_v7 = vld [vmem:[%s5121_s20] sm:$0xff]  }
  0x41   : > { %4372 = vmatprep.mubr.msk.bf16.mxu0 %vm4975_vm1, %v4974_v1  ;;  %4378 = vmatprep.mubr.msk.bf16.mxu1 %vm4975_vm1, %v4974_v1 }
  0x48   : > { %4373 = vmatmul.mubr.msk.bf16.gmra.mxu0 %vm480_vm2, %v4924_v10  ;;  %4379 = vmatmul.mubr.msk.bf16.vlgmr.msra.gmra.mxu1 %vm480_vm2, %v4926_v13  ;;  %v4944_v10 = vld [vmem:[%s5121_s20 + $0x10] sm:$0xff]   ;;  %v4948_v13 = vld [vmem:[%s5104_s12 + $0x8] sm:$0xff]   ;;  %s4907_s12 = smul.u32 40, %s6406_s14 }
  0x49   : > { %4400 = vmatprep.mubr.msk.bf16.mxu0 %vm4975_vm1, %v4974_v1  ;;  %4382 = vmatprep.mubr.msk.bf16.mxu1 %vm4975_vm1, %v4974_v1  ;;  %v1623_v26 = vshrl.u32 %v4948_v13, 16 }
  0x4a   : > { %4421 = vmatpush3.bf16.msra.mxu1 %v1033_v28  ;;  %v1913_v28 = vsel %vm496_vm0, %v4022_v24, 0  ;;  %v4040_v24 = vld [vmem:[%s6399_s5 + $0xe] sm:$0x3]  ;;  %s6330_s24 = scalar_lea.vmem %s6404_s10, %s4907_s12 }
  0x4b   : > { %4464 = vmatprep.subr.bf16.mxu1 %v4974_v1  ;;  %v2154_v31 = vsel %vm496_vm0, %v4040_v24, 0 }
  0x50   : > { %4401 = vmatmul.mubr.msk.bf16.vlgmr.msra.gmra.mxu0 %vm480_vm2, %v896_v33  ;;  %4383 = vmatmul.mubr.msk.bf16.gmra.mxu1 %vm480_vm2, %v4927_v16  ;;  %v4016_v16 = vld [vmem:[%s6403_s9 + $0xa] sm:$0x3] }
  0x51   : > { %4443 = vmatpush3.bf16.msra.mxu0 %v1171_v36  ;;  %4386 = vmatprep.mubr.msk.bf16.mxu1 %vm4975_vm1, %v4974_v1 }
  0x52   : > { %4404 = vmatprep.mubr.msk.bf16.mxu0 %vm4975_vm1, %v4974_v1  ;;  %4486 = vmatprep.subr.bf16.mxu0 %v4974_v1 }
  0x58   : > { %4405 = vmatmul.mubr.msk.bf16.gmra.mxu0 %vm480_vm2, %v904_v40  ;;  %4387 = vmatmul.mubr.msk.bf16.gmra.mxu1 %vm480_vm2, %v4928_v18  ;;  %v1616_v18 = vrot.slane %v1614_v14, 1 }
  0x59   : > { %4408 = vmatprep.mubr.msk.bf16.mxu0 %vm4975_vm1, %v4974_v1  ;;  %4390 = vmatprep.mubr.msk.bf16.mxu1 %vm4975_vm1, %v4974_v1 }
  0x5a   : > { %v1617_v21 = vor.u32 %v1616_v18, %v1612_v17 }
  0x60   : > { %4409 = vmatmul.mubr.msk.bf16.gmra.mxu0 %vm480_vm2, %v912_v46  ;;  %4391 = vmatmul.mubr.msk.bf16.gmra.mxu1 %vm480_vm2, %v4929_v19  ;;  %v1619_v19 = vshll.u32 %v4948_v13, 16 }
  0x61   : > { %4412 = vmatprep.mubr.msk.bf16.mxu0 %vm4975_vm1, %v4974_v1  ;;  %4394 = vmatprep.mubr.msk.bf16.mxu1 %vm4975_vm1, %v4974_v1 }
  0x62   : > { %v1621_v22 = vrot.slane %v1619_v19, 1 }
  0x64   : > { %v5315_v25 = vsel %vm884_vm3, %v1617_v21, %v1621_v22  ;;  %v1625_v29 = vor.u32 %v1623_v26, %v1621_v22 }
  0x66   : > { %v5328_v32 = vsel %vm884_vm3, %v1625_v29, %v1629_v30 }
  0x68   : > { %4413 = vmatmul.mubr.msk.bf16.gmra.mxu0 %vm480_vm2, %v920_v52  ;;  %4395 = vmatmul.mubr.msk.bf16.gmra.mxu1 %vm480_vm2, %v4930_v20  ;;  %v1759_v20 = vsel %vm496_vm0, %v4016_v16, 0 }
  0x69   : > { %4416 = vmatprep.mubr.msk.bf16.mxu0 %vm4975_vm1, %v4974_v1  ;;  %4422 = vmatprep.mubr.msk.bf16.mxu1 %vm4975_vm1, %v4974_v1 }
  0x70   : > { %4417 = vmatmul.mubr.msk.bf16.gmra.mxu0 %vm480_vm2, %v928_v58  ;;  %4423 = vmatmul.mubr.msk.bf16.vlgmr.msra.gmra.mxu1 %vm480_vm2, %v896_v33  ;;  %v1631_v33 = vshrl.u32 %v4949_v23, 16 }
  0x71   : > { %4444 = vmatprep.mubr.msk.bf16.mxu0 %vm4975_vm1, %v4974_v1  ;;  %4426 = vmatprep.mubr.msk.bf16.mxu1 %vm4975_vm1, %v4974_v1 }
  0x72   : > { %4465 = vmatpush3.bf16.msra.mxu1 %v1259_v59  ;;  %v1633_v37 = vor.u32 %v1631_v33, %v1629_v30  ;;  %v1647_v59 = vshrl.u32 %v4951_v39, 16 }
  0x73   : > { %4508 = vmatprep.subr.bf16.mxu1 %v4974_v1 }
  0x74   : > { %v5343_v44 = vsel %vm884_vm3, %v1633_v37, %v1637_v38 }
  0x78   : > { %4445 = vmatmul.mubr.msk.bf16.vlgmr.msra.gmra.mxu0 %vm480_vm2, %v4937_v61  ;;  %4427 = vmatmul.mubr.msk.bf16.gmra.mxu1 %vm480_vm2, %v904_v40 }
  0x79   : > { %4487 = vmatpush3.bf16.msra.mxu0 %v1397_v62  ;;  %4430 = vmatprep.mubr.msk.bf16.mxu1 %vm4975_vm1, %v4974_v1 }
  0x7a   : > { %4448 = vmatprep.mubr.msk.bf16.mxu0 %vm4975_vm1, %v4974_v1  ;;  %4530 = vmatprep.subr.bf16.mxu0 %v4974_v1 }
  0x80   : > { %4449 = vmatmul.mubr.msk.bf16.gmra.mxu0 %vm480_vm2, %v4938_v63  ;;  %4431 = vmatmul.mubr.msk.bf16.gmra.mxu1 %vm480_vm2, %v912_v46  ;;  %v1643_v46 = vshll.u32 %v4951_v39, 16 }
  0x81   : > { %4452 = vmatprep.mubr.msk.bf16.mxu0 %vm4975_vm1, %v4974_v1  ;;  %4434 = vmatprep.mubr.msk.bf16.mxu1 %vm4975_vm1, %v4974_v1 }
  0x88   : > { %4453 = vmatmul.mubr.msk.bf16.gmra.mxu0 %vm480_vm2, %v4939_v0  ;;  %4435 = vmatmul.mubr.msk.bf16.gmra.mxu1 %vm480_vm2, %v920_v52  ;;  %v1645_v52 = vrot.slane %v1643_v46, 1 }
  0x89   : > { %4456 = vmatprep.mubr.msk.bf16.mxu0 %vm4975_vm1, %v4974_v1  ;;  %4438 = vmatprep.mubr.msk.bf16.mxu1 %vm4975_vm1, %v4974_v1 }
  0x90   : > { %4457 = vmatmul.mubr.msk.bf16.gmra.mxu0 %vm480_vm2, %v4940_v2  ;;  %4439 = vmatmul.mubr.msk.bf16.gmra.mxu1 %vm480_vm2, %v928_v58  ;;  %v5358_v58 = vsel %vm884_vm3, %v1641_v51, %v1645_v52 }
  0x91   : > { %4460 = vmatprep.mubr.msk.bf16.mxu0 %vm4975_vm1, %v4974_v1  ;;  %4466 = vmatprep.mubr.msk.bf16.mxu1 %vm4975_vm1, %v4974_v1 }
  0x98   : > { %4461 = vmatmul.mubr.msk.bf16.gmra.mxu0 %vm480_vm2, %v4941_v3  ;;  %4467 = vmatmul.mubr.msk.bf16.vlgmr.msra.gmra.mxu1 %vm480_vm2, %v4937_v61 }
  0x99   : > { %4488 = vmatprep.mubr.msk.bf16.mxu0 %vm4975_vm1, %v4974_v1  ;;  %4470 = vmatprep.mubr.msk.bf16.mxu1 %vm4975_vm1, %v4974_v1 }
  0x9a   : > { %4509 = vmatpush3.bf16.msra.mxu1 %v1485_v5 }
  0x9b   : > { %4552 = vmatprep.subr.bf16.mxu1 %v4974_v1 }
  0xa0   : > { %4489 = vmatmul.mubr.msk.bf16.vlgmr.msra.gmra.mxu0 %vm480_vm2, %v4942_v7  ;;  %4471 = vmatmul.mubr.msk.bf16.gmra.mxu1 %vm480_vm2, %v4938_v63 }
  0xa1   : > { %4531 = vmatpush3.bf16.msra.mxu0 %v1671_v8  ;;  %4474 = vmatprep.mubr.msk.bf16.mxu1 %vm4975_vm1, %v4974_v1  ;;  %v4034_v8 = vld [vmem:[%s6403_s9 + $0xc] sm:$0x3] }
  0xa2   : > { %4492 = vmatprep.mubr.msk.bf16.mxu0 %vm4975_vm1, %v4974_v1  ;;  %4574 = vmatprep.subr.bf16.mxu0 %v4974_v1  ;;  %v2001_v16 = vsel %vm496_vm0, %v4034_v8, 0 }
  0xa8   : > { %4493 = vmatmul.mubr.msk.bf16.gmra.mxu0 %vm480_vm2, %v4943_v9  ;;  %4475 = vmatmul.mubr.msk.bf16.gmra.mxu1 %vm480_vm2, %v4939_v0 }
  0xa9   : > { %4496 = vmatprep.mubr.msk.bf16.mxu0 %vm4975_vm1, %v4974_v1  ;;  %4478 = vmatprep.mubr.msk.bf16.mxu1 %vm4975_vm1, %v4974_v1 }
  0xb0   : > { %4497 = vmatmul.mubr.msk.bf16.gmra.mxu0 %vm480_vm2, %v4944_v10  ;;  %4479 = vmatmul.mubr.msk.bf16.gmra.mxu1 %vm480_vm2, %v4940_v2  ;;  %v1649_v2 = vor.u32 %v1647_v59, %v1645_v52  ;;  %v1891_v52 = vrot.slane %v5434_v45, 1  ;;  %v421_v59 = vld [vmem:[%s6398_s4] sm:$0xff] }
  0xb1   : > { %4500 = vmatprep.mubr.msk.bf16.mxu0 %vm4975_vm1, %v4974_v1  ;;  %4482 = vmatprep.mubr.msk.bf16.mxu1 %vm4975_vm1, %v4974_v1 }
  0xb8   : > { %4501 = vmatmul.mubr.msk.bf16.gmra.mxu0 %vm480_vm2, %v4945_v11  ;;  %4483 = vmatmul.mubr.msk.bf16.gmra.mxu1 %vm480_vm2, %v4941_v3  ;;  %v1653_v3 = vrot.slane %v1651_v60, 1 }
  0xb9   : > { %4504 = vmatprep.mubr.msk.bf16.mxu0 %vm4975_vm1, %v4974_v1  ;;  %4510 = vmatprep.mubr.msk.bf16.mxu1 %vm4975_vm1, %v4974_v1 }
  0xc0   : > { %4505 = vmatmul.mubr.msk.bf16.gmra.mxu0 %vm480_vm2, %v5296_v15  ;;  %4511 = vmatmul.mubr.msk.bf16.vlgmr.msra.gmra.mxu1 %vm480_vm2, %v4942_v7 }
  0xc1   : > { %4532 = vmatprep.mubr.msk.bf16.mxu0 %vm4975_vm1, %v4974_v1  ;;  %4514 = vmatprep.mubr.msk.bf16.mxu1 %vm4975_vm1, %v4974_v1 }
  0xc2   : > { %4553 = vmatpush3.bf16.msra.mxu1 %v1759_v20  ;;  %v1887_v20 = vrot.slane %v5380_v12, 1 }
  0xc3   : > { %4596 = vmatprep.subr.bf16.mxu1 %v4974_v1 }
  0xc8   : > { %4533 = vmatmul.mubr.msk.bf16.vlgmr.msra.gmra.mxu0 %vm480_vm2, %v5315_v25  ;;  %4515 = vmatmul.mubr.msk.bf16.gmra.mxu1 %vm480_vm2, %v4943_v9 }
  0xc9   : > { %4575 = vmatpush3.bf16.msra.mxu0 %v1913_v28  ;;  %4518 = vmatprep.mubr.msk.bf16.mxu1 %vm4975_vm1, %v4974_v1  ;;  %v5409_v28 = vld [vmem:[%s5079_s27 + $0x14] sm:$0xff]  }
  0xca   : > { %4536 = vmatprep.mubr.msk.bf16.mxu0 %vm4975_vm1, %v4974_v1  ;;  %4618 = vmatprep.subr.bf16.mxu0 %v4974_v1  ;;  %v1889_v37 = vrot.slane %v5409_v28, 1 }
  0xd0   : > { %v534_v35 = vpop.f32.mrf.mxu0  ;;  %4537 = vmatmul.mubr.msk.bf16.gmra.mxu0 %vm480_vm2, %v5328_v32  ;;  %v5332_v36 = vpop.f32.mrf.mxu1  ;;  %4519 = vmatmul.mubr.msk.bf16.gmra.mxu1 %vm480_vm2, %v4944_v10  ;;  %v5374_v10 = vsel %vm884_vm3, %v1649_v2, %v1653_v3  ;;  %v422_v2 = vld [vmem:[%s6398_s4 + $0x8] sm:$0xff] }
  0xd1   : > { %4540 = vmatprep.mubr.msk.bf16.mxu0 %vm4975_vm1, %v4974_v1  ;;  %4522 = vmatprep.mubr.msk.bf16.mxu1 %vm4975_vm1, %v4974_v1 }
  0xd2   : > { %v4314_v40 = vpop.f32.mrf.mxu0  ;;  %v4326_v41 = vpop.f32.mrf.mxu1 }
  0xd4   : > { %v537_v42 = vpop.f32.mrf.mxu0  ;;  %v5340_v43 = vpop.f32.mrf.mxu1 }
  0xd6   : > { %v4315_v47 = vpop.f32.mrf.mxu0  ;;  %v4327_v48 = vpop.f32.mrf.mxu1 }
  0xd8   : > { %v542_v49 = vpop.f32.mrf.mxu0  ;;  %4541 = vmatmul.mubr.msk.bf16.gmra.mxu0 %vm480_vm2, %v5343_v44  ;;  %v5347_v50 = vpop.f32.mrf.mxu1  ;;  %4523 = vmatmul.mubr.msk.bf16.gmra.mxu1 %vm480_vm2, %v4945_v11  ;;  %v5377_v11 = vld [vmem:[%s5079_s27 + $0x4] sm:$0xfe]  }
  0xd9   : > { %4544 = vmatprep.mubr.msk.bf16.mxu0 %vm4975_vm1, %v4974_v1  ;;  %4526 = vmatprep.mubr.msk.bf16.mxu1 %vm4975_vm1, %v4974_v1  ;;  %v1886_v19 = vrot.slane %v5377_v11, 1 }
  0xda   : > { %v4318_v54 = vpop.f32.mrf.mxu0  ;;  %v4330_v55 = vpop.f32.mrf.mxu1 }
  0xdb   : > { %v5406_v27 = vsel %vm1885_vm4, %v1886_v19, %v1887_v20 }
  0xdc   : > { %v545_v56 = vpop.f32.mrf.mxu0  ;;  %v5355_v57 = vpop.f32.mrf.mxu1 }
  0xde   : > { %v4319_v61 = vpop.f32.mrf.mxu0  ;;  %v4331_v62 = vpop.f32.mrf.mxu1 }
  0xdf   : > { %v5458_v61 = vsel %vm1885_vm4, %v1889_v37, %v1891_v52 }
  0xe0   : > { %v550_v63 = vpop.f32.mrf.mxu0  ;;  %4545 = vmatmul.mubr.msk.bf16.gmra.mxu0 %vm480_vm2, %v5358_v58  ;;  %v650_v0 = vpop.f32.mrf.mxu1  ;;  %4527 = vmatmul.mubr.msk.bf16.gmra.mxu1 %vm480_vm2, %v5296_v15 }
  0xe1   : > { %4548 = vmatprep.mubr.msk.bf16.mxu0 %vm4975_vm1, %v4974_v1  ;;  %v5366_v4 = vadd.f32 %v650_v0, %v534_v35  ;;  %4554 = vmatprep.mubr.msk.bf16.mxu1 %vm4975_vm1, %v4974_v1 }
  0xe2   : > { %v4322_v5 = vpop.f32.mrf.mxu0  ;;  %v4336_v6 = vpop.f32.mrf.mxu1 }
  0xe4   : > { %v553_v7 = vpop.f32.mrf.mxu0  ;;  %v653_v9 = vpop.f32.mrf.mxu1 }
  0xe5   : > { %v5382_v13 = vadd.f32 %v653_v9, %v537_v42  ;;  %v423_v9 = vld [vmem:[%s6398_s4 + $0x10] sm:$0xff] }
  0xe6   : > { %v4323_v14 = vpop.f32.mrf.mxu0  ;;  %v4337_v15 = vpop.f32.mrf.mxu1 }
  0xe8   : > { %v5385_v17 = vpop.f32.mrf.mxu0  ;;  %4549 = vmatmul.mubr.msk.bf16.gmra.mxu0 %vm480_vm2, %v5374_v10  ;;  %v658_v18 = vpop.f32.mrf.mxu1  ;;  %4555 = vmatmul.mubr.msk.bf16.vlgmr.msra.gmra.mxu1 %vm480_vm2, %v5315_v25 }
  0xe9   : > { %4576 = vmatprep.mubr.msk.bf16.mxu0 %vm4975_vm1, %v4974_v1  ;;  %v5395_v21 = vadd.f32 %v658_v18, %v542_v49  ;;  %4558 = vmatprep.mubr.msk.bf16.mxu1 %vm4975_vm1, %v4974_v1 }
  0xea   : > { %v4358_v22 = vpop.f32.mrf.mxu0  ;;  %4597 = vmatpush3.bf16.msra.mxu1 %v2001_v16  ;;  %v4340_v23 = vpop.f32.mrf.mxu1  ;;  %v4958_v16 = vld [vmem:[%s5079_s27 + $0x2c] ss:$0 sps:$4 sm:$0x11]  }
  0xeb   : > { %4640 = vmatprep.subr.bf16.mxu1 %v4974_v1  ;;  %v424_v22 = vld [vmem:[%s6398_s4 + $0x18] sm:$0xff]  ;;  %v427_v23 = vld [vmem:[%s6398_s4 + $0x30] sm:$0xff] }
  0xec   : > { %v5403_v25 = vpop.f32.mrf.mxu0  ;;  %v661_v26 = vpop.f32.mrf.mxu1 }
  0xed   : > { %v5411_v29 = vadd.f32 %v661_v26, %v545_v56  ;;  %v4976_v56 = vmov 0  }
  0xee   : > { %v4359_v30 = vpop.f32.mrf.mxu0  ;;  %v4341_v33 = vpop.f32.mrf.mxu1  ;;  %4919 = vset.pattern.permute.xlu0 %v4976_v56  ;;  %4920 = vset.pattern.permute.xlu1 %v4976_v56 }
  0xef   : > { %2605 = vperm.xlu0 %4919, %v421_v59   ;;  %2615 = vperm.xlu1 %4920, %v423_v9   ;;  %v4961_v9 = vld [vmem:[%s5064_s22 + $0x14] sm:$0xff]  }
  0xf0   : > { %v5414_v34 = vpop.f32.mrf.mxu0  ;;  %4577 = vmatmul.mubr.msk.bf16.vlgmr.msra.gmra.mxu0 %vm480_vm2, %v5406_v27  ;;  %v666_v35 = vpop.f32.mrf.mxu1  ;;  %4559 = vmatmul.mubr.msk.bf16.gmra.mxu1 %vm480_vm2, %v5328_v32  ;;  %v5431_v32 = vsel %vm1885_vm4, %v1887_v20, %v1889_v37 }
  0xf1   : > { %4619 = vmatpush3.bf16.msra.mxu0 %v2154_v31  ;;  %v5421_v38 = vadd.f32 %v666_v35, %v550_v63  ;;  %4562 = vmatprep.mubr.msk.bf16.mxu1 %vm4975_vm1, %v4974_v1  ;;  %v426_v35 = vld [vmem:[%s6398_s4 + $0x28] sm:$0xff] }
  0xf2   : > { %v4362_v39 = vpop.f32.mrf.mxu0  ;;  %4580 = vmatprep.mubr.msk.bf16.mxu0 %vm4975_vm1, %v4974_v1  ;;  %v4344_v40 = vpop.f32.mrf.mxu1  ;;  %4662 = vmatprep.subr.bf16.mxu0 %v4974_v1 }
  0xf3   : > { %2610 = vperm.xlu0 %4919, %v422_v2   ;;  %2620 = vperm.xlu1 %4920, %v424_v22  }
  0xf4   : > { %v5428_v41 = vpop.f32.mrf.mxu0  ;;  %v669_v42 = vpop.f32.mrf.mxu1 }
  0xf5   : > { %v5436_v46 = vadd.f32 %v669_v42, %v553_v7  ;;  %v4959_v42 = vld [vmem:[%s5064_s22 + $0x4] sm:$0xfe]  }
  0xf6   : > { %v4363_v47 = vpop.f32.mrf.mxu0  ;;  %v4345_v48 = vpop.f32.mrf.mxu1 }
  0xf7   : > { %2630 = vperm.xlu1 %4920, %v426_v35   ;;  %v4960_v47 = vld [vmem:[%s5064_s22 + $0xc] sm:$0xff]  }
  0xf8   : > { %v5438_v49 = vpop.f32.mrf.mxu0  ;;  %4581 = vmatmul.mubr.msk.bf16.gmra.mxu0 %vm480_vm2, %v5431_v32  ;;  %v674_v51 = vpop.f32.mrf.mxu1  ;;  %4563 = vmatmul.mubr.msk.bf16.gmra.mxu1 %vm480_vm2, %v5343_v44 }
  0xf9   : > { %4584 = vmatprep.mubr.msk.bf16.mxu0 %vm4975_vm1, %v4974_v1  ;;  %v5448_v53 = vadd.f32 %v674_v51, %v5332_v36  ;;  %4566 = vmatprep.mubr.msk.bf16.mxu1 %vm4975_vm1, %v4974_v1  ;;  %v5461_v36 = vld [vmem:[%s5079_s27 + $0x24] sm:$0xff]  }
  0xfa   : > { %v4366_v54 = vpop.f32.mrf.mxu0  ;;  %v4348_v55 = vpop.f32.mrf.mxu1 }
  0xfb   : > { %v428_v55 = vld [vmem:[%s6398_s4 + $0x38] sm:$0xff] }
  0xfc   : > { %v5455_v44 = vpop.f32.mrf.mxu0  ;;  %v677_v60 = vpop.f32.mrf.mxu1  ;;  %2640 = vperm.xlu1 %4920, %v428_v55  }
  0xfd   : > { %v5464_v62 = vadd.f32 %v677_v60, %v5340_v43  ;;  %v1893_v43 = vrot.slane %v5461_v36, 1 }
  0xfe   : > { %v4367_v63 = vpop.f32.mrf.mxu0  ;;  %v4349_v0 = vpop.f32.mrf.mxu1 }
  0xff   : > { %v2128_v63 = vrot.slane %v4960_v47, 1 }
 0x100   : > { %v5469_v3 = vpop.f32.mrf.mxu0  ;;  %4585 = vmatmul.mubr.msk.bf16.gmra.mxu0 %vm480_vm2, %v5458_v61  ;;  %v682_v5 = vpop.f32.mrf.mxu1  ;;  %4567 = vmatmul.mubr.msk.bf16.gmra.mxu1 %vm480_vm2, %v5358_v58  ;;  %v425_v58 = vld [vmem:[%s6398_s4 + $0x20] sm:$0xff] }
 0x101   : > { %4588 = vmatprep.mubr.msk.bf16.mxu0 %vm4975_vm1, %v4974_v1  ;;  %v5479_v6 = vadd.f32 %v682_v5, %v5347_v50  ;;  %4570 = vmatprep.mubr.msk.bf16.mxu1 %vm4975_vm1, %v4974_v1  ;;  %v5492_v50 = vsel %vm1885_vm4, %v1891_v52, %v1893_v43 }
 0x102   : > { %v4370_v7 = vpop.f32.mrf.mxu0  ;;  %v4352_v8 = vpop.f32.mrf.mxu1  ;;  %2625 = vperm.xlu0 %4919, %v425_v58  }
 0x104   : > { %v5489_v14 = vpop.f32.mrf.mxu0  ;;  %v685_v15 = vpop.f32.mrf.mxu1 }
 0x105   : > { %v5496_v18 = vadd.f32 %v685_v15, %v5355_v57  ;;  %v1895_v57 = vrot.slane %v4958_v16, 1 }
 0x106   : > { %v4371_v19 = vpop.f32.mrf.mxu0  ;;  %v4353_v20 = vpop.f32.mrf.mxu1  ;;  %2635 = vperm.xlu0 %4919, %v427_v23   ;;  %v2130_v23 = vrot.slane %v4961_v9, 1 }
 0x107   : > { %v5529_v40 = vsel %vm1885_vm4, %v1893_v43, %v1895_v57 }
 0x108   : > { %v5504_v24 = vpop.f32.mrf.mxu0  ;;  %4589 = vmatmul.mubr.msk.bf16.gmra.mxu0 %vm480_vm2, %v5492_v50  ;;  %v804_v26 = vpop.f32.mrf.mxu1  ;;  %4571 = vmatmul.mubr.msk.bf16.gmra.mxu1 %vm480_vm2, %v5374_v10  ;;  %v429_v10 = vld [vmem:[%s6398_s4 + $0x40] sm:$0xff] }
 0x109   : > { %4592 = vmatprep.mubr.msk.bf16.mxu0 %vm4975_vm1, %v4974_v1  ;;  %v5513_v30 = vadd.f32 %v804_v26, %v5385_v17  ;;  %4598 = vmatprep.mubr.msk.bf16.mxu1 %vm4975_vm1, %v4974_v1  ;;  %v4052_v17 = vld [vmem:[%s6403_s9 + $0xe] sm:$0x3] }
 0x10a   : > { %v4374_v31 = vpop.f32.mrf.mxu0  ;;  %v4380_v33 = vpop.f32.mrf.mxu1  ;;  %2645 = vperm.xlu0 %4919, %v429_v10   ;;  %v2242_v54 = vsel %vm496_vm0, %v4052_v17, 0 }
 0x10c   : > { %v5523_v37 = vpop.f32.mrf.mxu0  ;;  %v807_v39 = vpop.f32.mrf.mxu1 }
 0x10d   : > { %v5534_v48 = vadd.f32 %v807_v39, %v5403_v25  ;;  %v2127_v25 = vrot.slane %v4959_v42, 1 }
 0x10e   : > { %v4375_v51 = vpop.f32.mrf.mxu0  ;;  %v4381_v52 = vpop.f32.mrf.mxu1 }
 0x10f   : > { %v5565_v8 = vsel %vm1885_vm4, %v2127_v25, %v2128_v63 }
 0x110   : > { %v981_v56 = vpop.f32.mrf.mxu0  ;;  %4593 = vmatmul.mubr.msk.bf16.gmra.mxu0 %vm480_vm2, %v5529_v40  ;;  %v812_v59 = vpop.f32.mrf.mxu1  ;;  %4599 = vmatmul.mubr.msk.bf16.vlgmr.msra.gmra.mxu1 %vm480_vm2, %v5406_v27  ;;  %v430_v27 = vld [vmem:[%s6398_s4 + $0x48] sm:$0xff] }
 0x111   : > { %v5543_v60 = vadd.f32 %v981_v56, %v5366_v4  ;;  %4620 = vmatprep.mubr.msk.bf16.mxu0 %vm4975_vm1, %v4974_v1  ;;  %v5550_v0 = vadd.f32 %v812_v59, %v5414_v34  ;;  %4602 = vmatprep.mubr.msk.bf16.mxu1 %vm4975_vm1, %v4974_v1  ;;  %v4058_v4 = vld [vmem:[%s6399_s5 + $0x10] sm:$0x3] }
 0x112   : > { %v4402_v2 = vpop.f32.mrf.mxu0  ;;  %4641 = vmatpush3.bf16.msra.mxu1 %v2242_v54  ;;  %v4384_v5 = vpop.f32.mrf.mxu1  ;;  %2650 = vperm.xlu1 %4920, %v430_v27   ;;  %v2403_v16 = vsel %vm496_vm0, %v4058_v4, 0 }
 0x113   : > { %4684 = vmatprep.subr.bf16.mxu1 %v4974_v1 }
 0x114   : > { %v984_v43 = vpop.f32.mrf.mxu0  ;;  %v815_v34 = vpop.f32.mrf.mxu1 }
 0x115   : > { %v5562_v7 = vadd.f32 %v984_v43, %v5382_v13  ;;  %v5569_v58 = vadd.f32 %v815_v34, %v5428_v41 }
 0x116   : > { %v4403_v15 = vpop.f32.mrf.mxu0  ;;  %v4385_v19 = vpop.f32.mrf.mxu1 }
 0x118   : > { %v989_v20 = vpop.f32.mrf.mxu0  ;;  %4621 = vmatmul.mubr.msk.bf16.vlgmr.msra.gmra.mxu0 %vm480_vm2, %v5565_v8  ;;  %v820_v22 = vpop.f32.mrf.mxu1  ;;  %4603 = vmatmul.mubr.msk.bf16.gmra.mxu1 %vm480_vm2, %v5431_v32  ;;  %v5591_v32 = vsel %vm1885_vm4, %v2128_v63, %v2130_v23 }
 0x119   : > { %v5575_v13 = vadd.f32 %v989_v20, %v5395_v21  ;;  %4663 = vmatpush3.bf16.msra.mxu0 %v2403_v16  ;;  %v5580_v41 = vadd.f32 %v820_v22, %v5438_v49  ;;  %4606 = vmatprep.mubr.msk.bf16.mxu1 %vm4975_vm1, %v4974_v1  ;;  %v4962_v49 = vld [vmem:[%s5064_s22 + $0x1c] sm:$0xff]   ;;  %v2335_v20 = vshrl.u32 %v5377_v11, 16  ;;  %v2338_v22 = vshll.u32 %v5377_v11, 16 }
 0x11a   : > { %v4406_v26 = vpop.f32.mrf.mxu0  ;;  %4624 = vmatprep.mubr.msk.bf16.mxu0 %vm4975_vm1, %v4974_v1  ;;  %v4388_v57 = vpop.f32.mrf.mxu1  ;;  %4706 = vmatprep.subr.bf16.mxu0 %v4974_v1 }
 0x11b   : > { %v2343_v26 = vshrl.u32 %v5380_v12, 16  ;;  %v2346_v57 = vshll.u32 %v5380_v12, 16 }
 0x11c   : > { %v992_v21 = vpop.f32.mrf.mxu0  ;;  %v823_v31 = vpop.f32.mrf.mxu1 }
 0x11d   : > { %v5588_v33 = vadd.f32 %v992_v21, %v5411_v29  ;;  %v5595_v35 = vadd.f32 %v823_v31, %v5455_v44  ;;  %v2132_v29 = vrot.slane %v4962_v49, 1  ;;  %v2337_v49 = vrot.slane %v2335_v20, 1 }
 0x11e   : > { %v4407_v10 = vpop.f32.mrf.mxu0  ;;  %v4389_v17 = vpop.f32.mrf.mxu1 }
 0x11f   : > { %v5615_v56 = vsel %vm1885_vm4, %v2130_v23, %v2132_v29  ;;  %v2340_v10 = vrot.slane %v2338_v22, 2  ;;  %v2364_v22 = vshll.u32 %v5434_v45, 16 }
 0x120   : > { %v997_v39 = vpop.f32.mrf.mxu0  ;;  %4625 = vmatmul.mubr.msk.bf16.gmra.mxu0 %vm480_vm2, %v5591_v32  ;;  %v828_v42 = vpop.f32.mrf.mxu1  ;;  %4607 = vmatmul.mubr.msk.bf16.gmra.mxu1 %vm480_vm2, %v5458_v61  ;;  %v4963_v61 = vld [vmem:[%s5064_s22 + $0x24] sm:$0xff]  }
 0x121   : > { %v5600_v47 = vadd.f32 %v997_v39, %v5421_v38  ;;  %4628 = vmatprep.mubr.msk.bf16.mxu0 %vm4975_vm1, %v4974_v1  ;;  %v5607_v44 = vadd.f32 %v828_v42, %v5469_v3  ;;  %4610 = vmatprep.mubr.msk.bf16.mxu1 %vm4975_vm1, %v4974_v1  ;;  %v2348_v42 = vrot.slane %v2346_v57, 2 }
 0x122   : > { %v4410_v51 = vpop.f32.mrf.mxu0  ;;  %v4392_v52 = vpop.f32.mrf.mxu1 }
 0x124   : > { %v1000_v54 = vpop.f32.mrf.mxu0  ;;  %v831_v55 = vpop.f32.mrf.mxu1 }
 0x125   : > { %v5612_v38 = vadd.f32 %v1000_v54, %v5436_v46  ;;  %v5619_v59 = vadd.f32 %v831_v55, %v5489_v14  ;;  %v2134_v46 = vrot.slane %v4963_v61, 1  ;;  %v2341_v61 = vor.u32 %v2340_v10, %v2337_v49 }
 0x126   : > { %v4411_v25 = vpop.f32.mrf.mxu0  ;;  %v4393_v3 = vpop.f32.mrf.mxu1 }
 0x127   : > { %v5639_v9 = vsel %vm1885_vm4, %v2132_v29, %v2134_v46  ;;  %v2352_v3 = vshrl.u32 %v5409_v28, 16 }
 0x128   : > { %v1005_v63 = vpop.f32.mrf.mxu0  ;;  %4629 = vmatmul.mubr.msk.bf16.gmra.mxu0 %vm480_vm2, %v5615_v56  ;;  %v836_v2 = vpop.f32.mrf.mxu1  ;;  %4611 = vmatmul.mubr.msk.bf16.gmra.mxu1 %vm480_vm2, %v5492_v50  ;;  %v4964_v50 = vld [vmem:[%s5064_s22 + $0x2c] ss:$0 sps:$4 sm:$0x11]  }
 0x129   : > { %v5624_v5 = vadd.f32 %v1005_v63, %v5448_v53  ;;  %4632 = vmatprep.mubr.msk.bf16.mxu0 %vm4975_vm1, %v4974_v1  ;;  %v5631_v14 = vadd.f32 %v836_v2, %v5504_v24  ;;  %4614 = vmatprep.mubr.msk.bf16.mxu1 %vm4975_vm1, %v4974_v1  ;;  %v2355_v63 = vshll.u32 %v5409_v28, 16  ;;  %v2354_v28 = vrot.slane %v2352_v3, 1 }
 0x12a   : > { %v4414_v4 = vpop.f32.mrf.mxu0  ;;  %v4396_v27 = vpop.f32.mrf.mxu1 }
 0x12c   : > { %v1008_v43 = vpop.f32.mrf.mxu0  ;;  %v839_v34 = vpop.f32.mrf.mxu1 }
 0x12d   : > { %v5636_v53 = vadd.f32 %v1008_v43, %v5464_v62  ;;  %v5643_v15 = vadd.f32 %v839_v34, %v5523_v37  ;;  %v2136_v37 = vrot.slane %v4964_v50, 1 }
 0x12e   : > { %v4415_v16 = vpop.f32.mrf.mxu0  ;;  %v4397_v24 = vpop.f32.mrf.mxu1 }
 0x12f   : > { %v5670_v12 = vsel %vm1885_vm4, %v2134_v46, %v2136_v37 }
 0x130   : > { %v1013_v19 = vpop.f32.mrf.mxu0  ;;  %4633 = vmatmul.mubr.msk.bf16.gmra.mxu0 %vm480_vm2, %v5639_v9  ;;  %v1069_v23 = vpop.f32.mrf.mxu1  ;;  %4615 = vmatmul.mubr.msk.bf16.gmra.mxu1 %vm480_vm2, %v5529_v40  ;;  %v4065_v40 = vld [vmem:[%s6403_s9 + $0x10] sm:$0x3] }
 0x131   : > { %v5650_v62 = vadd.f32 %v1013_v19, %v5479_v6  ;;  %4636 = vmatprep.mubr.msk.bf16.mxu0 %vm4975_vm1, %v4974_v1  ;;  %v5659_v21 = vadd.f32 %v1069_v23, %v5513_v30  ;;  %4642 = vmatprep.mubr.msk.bf16.mxu1 %vm4975_vm1, %v4974_v1  ;;  %v2345_v30 = vrot.slane %v2343_v26, 1  ;;  %v2491_v54 = vsel %vm496_vm0, %v4065_v40, 0 }
 0x132   : > { %v4418_v31 = vpop.f32.mrf.mxu0  ;;  %v4424_v11 = vpop.f32.mrf.mxu1 }
 0x134   : > { %v1016_v6 = vpop.f32.mrf.mxu0  ;;  %v1072_v39 = vpop.f32.mrf.mxu1 }
 0x135   : > { %v5667_v17 = vadd.f32 %v1016_v6, %v5496_v18  ;;  %v5673_v29 = vadd.f32 %v1072_v39, %v5534_v48  ;;  %v2349_v48 = vor.u32 %v2348_v42, %v2345_v30  ;;  %v2366_v6 = vrot.slane %v2364_v22, 2 }
 0x136   : > { %v4419_v51 = vpop.f32.mrf.mxu0  ;;  %v4425_v52 = vpop.f32.mrf.mxu1  ;;  %v2373_v30 = vshll.u32 %v5461_v36, 16 }
 0x137   : > { %v5697_v43 = vsel %vm2333_vm5, %v2341_v61, %v2349_v48 }
 0x138   : > { %v1207_v55 = vpop.f32.mrf.mxu0  ;;  %4637 = vmatmul.mubr.msk.bf16.gmra.mxu0 %vm480_vm2, %v5670_v12  ;;  %v1077_v18 = vpop.f32.mrf.mxu1  ;;  %4643 = vmatmul.mubr.msk.bf16.vlgmr.msra.gmra.mxu1 %vm480_vm2, %v5565_v8 }
 0x139   : > { %v5679_v25 = vadd.f32 %v1207_v55, %v5543_v60  ;;  %4664 = vmatprep.mubr.msk.bf16.mxu0 %vm4975_vm1, %v4974_v1  ;;  %v5688_v2 = vadd.f32 %v1077_v18, %v5550_v0  ;;  %4646 = vmatprep.mubr.msk.bf16.mxu1 %vm4975_vm1, %v4974_v1  ;;  %v2357_v0 = vrot.slane %v2355_v63, 2  ;;  %v2375_v18 = vrot.slane %v2373_v30, 2 }
 0x13a   : > { %v4446_v46 = vpop.f32.mrf.mxu0  ;;  %4685 = vmatpush3.bf16.msra.mxu1 %v2491_v54  ;;  %v4428_v60 = vpop.f32.mrf.mxu1 }
 0x13b   : > { %4728 = vmatprep.subr.bf16.mxu1 %v4974_v1 }
 0x13c   : > { %v1210_v8 = vpop.f32.mrf.mxu0  ;;  %v1080_v4 = vpop.f32.mrf.mxu1 }
 0x13d   : > { %v5694_v27 = vadd.f32 %v1210_v8, %v5562_v7  ;;  %v5700_v34 = vadd.f32 %v1080_v4, %v5569_v58  ;;  %v2358_v7 = vor.u32 %v2357_v0, %v2354_v28  ;;  %v2361_v58 = vshrl.u32 %v5434_v45, 16 }
 0x13e   : > { %v4447_v50 = vpop.f32.mrf.mxu0  ;;  %v4429_v16 = vpop.f32.mrf.mxu1 }
 0x13f   : > { %v5722_v31 = vsel %vm2333_vm5, %v2349_v48, %v2358_v7  ;;  %v2363_v11 = vrot.slane %v2361_v58, 1  ;;  %v4965_v48 = vld [vmem:[%s5079_s27 + $0x2c] ss:$0 sps:$4 sm:$0x33]  }
 0x140   : > { %v1215_v24 = vpop.f32.mrf.mxu0  ;;  %4665 = vmatmul.mubr.msk.bf16.vlgmr.msra.gmra.mxu0 %vm480_vm2, %v5697_v43  ;;  %v1085_v19 = vpop.f32.mrf.mxu1  ;;  %4647 = vmatmul.mubr.msk.bf16.gmra.mxu1 %vm480_vm2, %v5591_v32  ;;  %v2379_v8 = vshrl.u32 %v4965_v48, 16 }
 0x141   : > { %v5705_v20 = vadd.f32 %v1215_v24, %v5575_v13  ;;  %4668 = vmatprep.mubr.msk.bf16.mxu0 %vm4975_vm1, %v4974_v1  ;;  %v5714_v23 = vadd.f32 %v1085_v19, %v5580_v41  ;;  %4650 = vmatprep.mubr.msk.bf16.mxu1 %vm4975_vm1, %v4974_v1 }
 0x142   : > { %v4450_v37 = vpop.f32.mrf.mxu0  ;;  %v4432_v13 = vpop.f32.mrf.mxu1  ;;  %v2381_v24 = vrot.slane %v2379_v8, 1 }
 0x144   : > { %v1218_v26 = vpop.f32.mrf.mxu0  ;;  %v1088_v57 = vpop.f32.mrf.mxu1 }
 0x145   : > { %v5719_v32 = vadd.f32 %v1218_v26, %v5588_v33  ;;  %v5725_v45 = vadd.f32 %v1088_v57, %v5595_v35  ;;  %v2367_v33 = vor.u32 %v2366_v6, %v2363_v11  ;;  %v2370_v35 = vshrl.u32 %v5461_v36, 16 }
 0x146   : > { %v4451_v41 = vpop.f32.mrf.mxu0  ;;  %v4433_v49 = vpop.f32.mrf.mxu1 }
 0x147   : > { %v5747_v55 = vsel %vm2333_vm5, %v2358_v7, %v2367_v33  ;;  %v2372_v61 = vrot.slane %v2370_v35, 1 }
 0x148   : > { %v1223_v10 = vpop.f32.mrf.mxu0  ;;  %4669 = vmatmul.mubr.msk.bf16.gmra.mxu0 %vm480_vm2, %v5722_v31  ;;  %v1093_v40 = vpop.f32.mrf.mxu1  ;;  %4651 = vmatmul.mubr.msk.bf16.gmra.mxu1 %vm480_vm2, %v5615_v56 }
 0x149   : > { %v5730_v39 = vadd.f32 %v1223_v10, %v5600_v47  ;;  %4672 = vmatprep.mubr.msk.bf16.mxu0 %vm4975_vm1, %v4974_v1  ;;  %v5739_v42 = vadd.f32 %v1093_v40, %v5607_v44  ;;  %4654 = vmatprep.mubr.msk.bf16.mxu1 %vm4975_vm1, %v4974_v1 }
 0x14a   : > { %v4454_v51 = vpop.f32.mrf.mxu0  ;;  %v4436_v47 = vpop.f32.mrf.mxu1 }
 0x14c   : > { %v1226_v52 = vpop.f32.mrf.mxu0  ;;  %v1096_v54 = vpop.f32.mrf.mxu1 }
 0x14d   : > { %v5744_v56 = vadd.f32 %v1226_v52, %v5612_v38  ;;  %v5751_v36 = vadd.f32 %v1096_v54, %v5619_v59  ;;  %v2376_v38 = vor.u32 %v2375_v18, %v2372_v61  ;;  %v2382_v59 = vshll.u32 %v4965_v48, 16 }
 0x14e   : > { %v4455_v44 = vpop.f32.mrf.mxu0  ;;  %v4437_v3 = vpop.f32.mrf.mxu1 }
 0x14f   : > { %v2384_v19 = vrot.slane %v2382_v59, 2 }
 0x150   : > { %v1231_v63 = vpop.f32.mrf.mxu0  ;;  %4673 = vmatmul.mubr.msk.bf16.gmra.mxu0 %vm480_vm2, %v5747_v55  ;;  %v1101_v46 = vpop.f32.mrf.mxu1  ;;  %4655 = vmatmul.mubr.msk.bf16.gmra.mxu1 %vm480_vm2, %v5639_v9  ;;  %v5771_v9 = vsel %vm2333_vm5, %v2367_v33, %v2376_v38 }
 0x151   : > { %v5756_v60 = vadd.f32 %v1231_v63, %v5624_v5  ;;  %4676 = vmatprep.mubr.msk.bf16.mxu0 %vm4975_vm1, %v4974_v1  ;;  %v5763_v4 = vadd.f32 %v1101_v46, %v5631_v14  ;;  %4658 = vmatprep.mubr.msk.bf16.mxu1 %vm4975_vm1, %v4974_v1 }
 0x152   : > { %v4458_v28 = vpop.f32.mrf.mxu0  ;;  %v4440_v0 = vpop.f32.mrf.mxu1 }
 0x154   : > { %v1234_v50 = vpop.f32.mrf.mxu0  ;;  %v1104_v5 = vpop.f32.mrf.mxu1 }
 0x155   : > { %v5768_v16 = vadd.f32 %v1234_v50, %v5636_v53  ;;  %v5774_v7 = vadd.f32 %v1104_v5, %v5643_v15  ;;  %v2385_v53 = vor.u32 %v2384_v19, %v2381_v24 }
 0x156   : > { %v4459_v14 = vpop.f32.mrf.mxu0  ;;  %v4441_v58 = vpop.f32.mrf.mxu1 }
 0x157   : > { %v5794_v41 = vsel %vm2333_vm5, %v2376_v38, %v2385_v53 }
 0x158   : > { %v1239_v22 = vpop.f32.mrf.mxu0  ;;  %4677 = vmatmul.mubr.msk.bf16.gmra.mxu0 %vm480_vm2, %v5771_v9  ;;  %v1295_v13 = vpop.f32.mrf.mxu1  ;;  %4659 = vmatmul.mubr.msk.bf16.gmra.mxu1 %vm480_vm2, %v5670_v12 }
 0x159   : > { %v5779_v37 = vadd.f32 %v1239_v22, %v5650_v62  ;;  %4680 = vmatprep.mubr.msk.bf16.mxu0 %vm4975_vm1, %v4974_v1  ;;  %v5786_v15 = vadd.f32 %v1295_v13, %v5659_v21  ;;  %4686 = vmatprep.mubr.msk.bf16.mxu1 %vm4975_vm1, %v4974_v1 }
 0x15a   : > { %v4462_v26 = vpop.f32.mrf.mxu0  ;;  %v4468_v57 = vpop.f32.mrf.mxu1 }
 0x15c   : > { %v1242_v11 = vpop.f32.mrf.mxu0  ;;  %v1298_v6 = vpop.f32.mrf.mxu1 }
 0x15d   : > { %v5791_v62 = vadd.f32 %v1242_v11, %v5667_v17  ;;  %v5797_v12 = vadd.f32 %v1298_v6, %v5673_v29 }
 0x15e   : > { %v4463_v49 = vpop.f32.mrf.mxu0  ;;  %v4469_v10 = vpop.f32.mrf.mxu1 }
 0x160   : > { %v1433_v21 = vpop.f32.mrf.mxu0  ;;  %4681 = vmatmul.mubr.msk.bf16.gmra.mxu0 %vm480_vm2, %v5794_v41  ;;  %v1303_v40 = vpop.f32.mrf.mxu1  ;;  %4687 = vmatmul.mubr.msk.bf16.vlgmr.msra.gmra.mxu1 %vm480_vm2, %v5697_v43 }
 0x161   : > { %v5802_v33 = vadd.f32 %v1433_v21, %v5679_v25  ;;  %4708 = vmatprep.mubr.msk.bf16.mxu0 %vm4975_vm1, %v4974_v1  ;;  %v5809_v17 = vadd.f32 %v1303_v40, %v5688_v2  ;;  %4690 = vmatprep.mubr.msk.bf16.mxu1 %vm4975_vm1, %v4974_v1 }
 0x162   : > { %v4490_v29 = vpop.f32.mrf.mxu0  ;;  %v4472_v35 = vpop.f32.mrf.mxu1 }
 0x164   : > { %v1436_v30 = vpop.f32.mrf.mxu0  ;;  %v1306_v51 = vpop.f32.mrf.mxu1 }
 0x165   : > { %v5814_v47 = vadd.f32 %v1436_v30, %v5694_v27  ;;  %v5817_v25 = vadd.f32 %v1306_v51, %v5700_v34  ;;  %v4072_v34 = vld [vmem:[%s6401_s7 + $0x4] sm:$0xf] }
 0x166   : > { %v4491_v43 = vpop.f32.mrf.mxu0  ;;  %v4473_v52 = vpop.f32.mrf.mxu1 }
 0x168   : > { %v1441_v54 = vpop.f32.mrf.mxu0  ;;  %v1311_v61 = vpop.f32.mrf.mxu1  ;;  %4691 = vmatmul.mubr.msk.bf16.gmra.mxu1 %vm480_vm2, %v5722_v31 }
 0x169   : > { %v5820_v2 = vadd.f32 %v1441_v54, %v5705_v20  ;;  %v5825_v18 = vadd.f32 %v1311_v61, %v5714_v23  ;;  %4694 = vmatprep.mubr.msk.bf16.mxu1 %vm4975_vm1, %v4974_v1  ;;  %v2729_v20 = vsel %vm2727_vm6, %v4072_v34, 0 }
 0x16a   : > { %v4494_v48 = vpop.f32.mrf.mxu0  ;;  %v4476_v27 = vpop.f32.mrf.mxu1  ;;  %4707 = vmatpush3.bf16.msra.mxu0 %v2729_v20 }
 0x16b   : > { %4750 = vmatprep.subr.bf16.mxu0 %v4974_v1 }
 0x16c   : > { %v1444_v44 = vpop.f32.mrf.mxu0  ;;  %v1314_v3 = vpop.f32.mrf.mxu1 }
 0x16d   : > { %v5834_v63 = vadd.f32 %v1444_v44, %v5719_v32  ;;  %v5837_v23 = vadd.f32 %v1314_v3, %v5725_v45 }
 0x16e   : > { %v4495_v31 = vpop.f32.mrf.mxu0  ;;  %v4477_v46 = vpop.f32.mrf.mxu1 }
 0x170   : > { %v1449_v38 = vpop.f32.mrf.mxu0  ;;  %v1319_v8 = vpop.f32.mrf.mxu1  ;;  %4695 = vmatmul.mubr.msk.bf16.gmra.mxu1 %vm480_vm2, %v5747_v55 }
 0x171   : > { %v5841_v59 = vadd.f32 %v1449_v38, %v5730_v39  ;;  %v5846_v28 = vadd.f32 %v1319_v8, %v5739_v42  ;;  %4698 = vmatprep.mubr.msk.bf16.mxu1 %vm4975_vm1, %v4974_v1 }
 0x172   : > { %v4498_v32 = vpop.f32.mrf.mxu0  ;;  %v4480_v45 = vpop.f32.mrf.mxu1 }
 0x174   : > { %v1452_v0 = vpop.f32.mrf.mxu0  ;;  %v1322_v50 = vpop.f32.mrf.mxu1 }
 0x175   : > { %v5851_v5 = vadd.f32 %v1452_v0, %v5744_v56  ;;  %v5854_v24 = vadd.f32 %v1322_v50, %v5751_v36 }
 0x176   : > { %v4499_v39 = vpop.f32.mrf.mxu0  ;;  %v4481_v19 = vpop.f32.mrf.mxu1 }
 0x178   : > { %v1457_v14 = vpop.f32.mrf.mxu0  ;;  %v1327_v55 = vpop.f32.mrf.mxu1  ;;  %4699 = vmatmul.mubr.msk.bf16.gmra.mxu1 %vm480_vm2, %v5771_v9 }
 0x179   : > { %v5857_v42 = vadd.f32 %v1457_v14, %v5756_v60  ;;  %v5862_v58 = vadd.f32 %v1327_v55, %v5763_v4  ;;  %4702 = vmatprep.mubr.msk.bf16.mxu1 %vm4975_vm1, %v4974_v1 }
 0x17a   : > { %v4502_v22 = vpop.f32.mrf.mxu0  ;;  %v4484_v56 = vpop.f32.mrf.mxu1 }
 0x17c   : > { %v1460_v36 = vpop.f32.mrf.mxu0  ;;  %v1330_v13 = vpop.f32.mrf.mxu1 }
 0x17d   : > { %v5867_v53 = vadd.f32 %v1460_v36, %v5768_v16  ;;  %v5870_v26 = vadd.f32 %v1330_v13, %v5774_v7 }
 0x17e   : > { %v4503_v60 = vpop.f32.mrf.mxu0  ;;  %v4485_v57 = vpop.f32.mrf.mxu1 }
 0x180   : > { %v1465_v11 = vpop.f32.mrf.mxu0  ;;  %v1521_v4 = vpop.f32.mrf.mxu1  ;;  %4703 = vmatmul.mubr.msk.bf16.gmra.mxu1 %vm480_vm2, %v5794_v41 }
 0x181   : > { %v5873_v9 = vadd.f32 %v1465_v11, %v5779_v37  ;;  %v5878_v6 = vadd.f32 %v1521_v4, %v5786_v15  ;;  %4730 = vmatprep.mubr.msk.bf16.mxu1 %vm4975_vm1, %v4974_v1 }
 0x182   : > { %v4506_v49 = vpop.f32.mrf.mxu0  ;;  %v4512_v16 = vpop.f32.mrf.mxu1 }
 0x184   : > { %v1468_v7 = vpop.f32.mrf.mxu0  ;;  %v1524_v21 = vpop.f32.mrf.mxu1 }
 0x185   : > { %v5883_v10 = vadd.f32 %v1468_v7, %v5791_v62  ;;  %v5886_v37 = vadd.f32 %v1524_v21, %v5797_v12 }
 0x186   : > { %v4507_v40 = vpop.f32.mrf.mxu0  ;;  %v4513_v29 = vpop.f32.mrf.mxu1 }
 0x188   : > { %v1707_v41 = vpop.f32.mrf.mxu0  ;;  %v1529_v15 = vpop.f32.mrf.mxu1 }
 0x189   : > { %v5893_v35 = vadd.f32 %v1707_v41, %v5802_v33  ;;  %v5896_v62 = vadd.f32 %v1529_v15, %v5809_v17  ;;  %v2694_v17 = vld [vmem:[%s6401_s7] sm:$0xf] }
 0x18a   : > { %v4534_v12 = vpop.f32.mrf.mxu0  ;;  %v4516_v30 = vpop.f32.mrf.mxu1  ;;  %v2820_v27 = vsel %vm2727_vm6, %v2694_v17, 0 }
 0x18b   : > { %4729 = vmatpush3.bf16.msra.mxu1 %v2820_v27 }
 0x18c   : > { %v1710_v51 = vpop.f32.mrf.mxu0  ;;  %v1532_v43 = vpop.f32.mrf.mxu1  ;;  %4772 = vmatprep.subr.bf16.mxu1 %v4974_v1 }
 0x18d   : > { %v5901_v52 = vadd.f32 %v1710_v51, %v5814_v47  ;;  %v5904_v54 = vadd.f32 %v1532_v43, %v5817_v25 }
 0x18e   : > { %v4535_v33 = vpop.f32.mrf.mxu0  ;;  %v4517_v61 = vpop.f32.mrf.mxu1 }
 0x190   : > { %v1715_v48 = vpop.f32.mrf.mxu0  ;;  %v1537_v34 = vpop.f32.mrf.mxu1 }
 0x191   : > { %v1748_v44 = vadd.f32 %v1715_v48, %v5820_v2  ;;  %v1564_v20 = vadd.f32 %v1537_v34, %v5825_v18 }
 0x192   : > { %v4538_v47 = vpop.f32.mrf.mxu0  ;;  %v4520_v25 = vpop.f32.mrf.mxu1 }
 0x194   : > { %v1718_v3 = vpop.f32.mrf.mxu0  ;;  %v1540_v31 = vpop.f32.mrf.mxu1 }
 0x195   : > { %v1749_v46 = vadd.f32 %v1718_v3, %v5834_v63  ;;  %v1565_v38 = vadd.f32 %v1540_v31, %v5837_v23 }
 0x196   : > { %v4539_v8 = vpop.f32.mrf.mxu0  ;;  %v4521_v32 = vpop.f32.mrf.mxu1 }
 0x198   : > { %v1723_v45 = vpop.f32.mrf.mxu0  ;;  %v1545_v0 = vpop.f32.mrf.mxu1 }
 0x199   : > { %v1750_v50 = vadd.f32 %v1723_v45, %v5841_v59  ;;  %v1566_v2 = vadd.f32 %v1545_v0, %v5846_v28 }
 0x19a   : > { %v4542_v39 = vpop.f32.mrf.mxu0  ;;  %v4524_v18 = vpop.f32.mrf.mxu1 }
 0x19c   : > { %v1726_v19 = vpop.f32.mrf.mxu0  ;;  %v1548_v14 = vpop.f32.mrf.mxu1 }
 0x19d   : > { %v1751_v55 = vadd.f32 %v1726_v19, %v5851_v5  ;;  %v1567_v22 = vadd.f32 %v1548_v14, %v5854_v24 }
 0x19e   : > { %v4543_v56 = vpop.f32.mrf.mxu0  ;;  %v4525_v63 = vpop.f32.mrf.mxu1 }
 0x1a0   : > { %v1731_v36 = vpop.f32.mrf.mxu0  ;;  %v1553_v23 = vpop.f32.mrf.mxu1 }
 0x1a1   : > { %v1752_v13 = vadd.f32 %v1731_v36, %v5857_v42  ;;  %v1568_v60 = vadd.f32 %v1553_v23, %v5862_v58 }
 0x1a2   : > { %v4546_v57 = vpop.f32.mrf.mxu0  ;;  %v4528_v59 = vpop.f32.mrf.mxu1 }
 0x1a4   : > { %v1734_v11 = vpop.f32.mrf.mxu0  ;;  %v1556_v28 = vpop.f32.mrf.mxu1 }
 0x1a5   : > { %v1753_v4 = vadd.f32 %v1734_v11, %v5867_v53  ;;  %v1569_v49 = vadd.f32 %v1556_v28, %v5870_v26 }
 0x1a6   : > { %v4547_v16 = vpop.f32.mrf.mxu0  ;;  %v4529_v5 = vpop.f32.mrf.mxu1 }
 0x1a8   : > { %v1739_v7 = vpop.f32.mrf.mxu0  ;;  %v1795_v21 = vpop.f32.mrf.mxu1 }
 0x1a9   : > { %v1754_v24 = vadd.f32 %v1739_v7, %v5873_v9  ;;  %v1834_v40 = vadd.f32 %v1795_v21, %v5878_v6 }
 0x1aa   : > { %v4550_v29 = vpop.f32.mrf.mxu0  ;;  %v4556_v42 = vpop.f32.mrf.mxu1 }
 0x1ac   : > { %v1742_v41 = vpop.f32.mrf.mxu0  ;;  %v1798_v15 = vpop.f32.mrf.mxu1 }
 0x1ad   : > { %v1755_v58 = vadd.f32 %v1742_v41, %v5883_v10  ;;  %v1835_v12 = vadd.f32 %v1798_v15, %v5886_v37 }
 0x1ae   : > { %v4551_v30 = vpop.f32.mrf.mxu0  ;;  %v4557_v53 = vpop.f32.mrf.mxu1 }
 0x1b0   : > { %v1949_v51 = vpop.f32.mrf.mxu0  ;;  %v1803_v26 = vpop.f32.mrf.mxu1 }
 0x1b1   : > { %v5928_v43 = vadd.f32 %v1949_v51, %v5893_v35  ;;  %v1836_v9 = vadd.f32 %v1803_v26, %v5896_v62 }
 0x1b2   : > { %v4578_v33 = vpop.f32.mrf.mxu0  ;;  %v4560_v61 = vpop.f32.mrf.mxu1 }
 0x1b4   : > { %v1952_v6 = vpop.f32.mrf.mxu0  ;;  %v1806_v17 = vpop.f32.mrf.mxu1 }
 0x1b5   : > { %v5932_v48 = vadd.f32 %v1952_v6, %v5901_v52  ;;  %v1837_v10 = vadd.f32 %v1806_v17, %v5904_v54 }
 0x1b6   : > { %v4579_v27 = vpop.f32.mrf.mxu0  ;;  %v4561_v37 = vpop.f32.mrf.mxu1 }
 0x1b8   : > { %v1957_v34 = vpop.f32.mrf.mxu0  ;;  %v1811_v47 = vpop.f32.mrf.mxu1 }
 0x1b9   : > { %v5935_v25 = vadd.f32 %v1957_v34, %v1748_v44  ;;  %v1838_v3 = vadd.f32 %v1811_v47, %v1564_v20 }
 0x1ba   : > { %v4582_v35 = vpop.f32.mrf.mxu0  ;;  %v4564_v31 = vpop.f32.mrf.mxu1 }
 0x1bc   : > { %v1960_v8 = vpop.f32.mrf.mxu0  ;;  %v1814_v62 = vpop.f32.mrf.mxu1 }
 0x1bd   : > { %v5937_v32 = vadd.f32 %v1960_v8, %v1749_v46  ;;  %v1839_v45 = vadd.f32 %v1814_v62, %v1565_v38 }
 0x1be   : > { %v4583_v0 = vpop.f32.mrf.mxu0  ;;  %v4565_v39 = vpop.f32.mrf.mxu1 }
 0x1c0   : > { %v1965_v52 = vpop.f32.mrf.mxu0  ;;  %v1819_v18 = vpop.f32.mrf.mxu1 }
 0x1c1   : > { %v5939_v19 = vadd.f32 %v1965_v52, %v1750_v50  ;;  %v1840_v54 = vadd.f32 %v1819_v18, %v1566_v2 }
 0x1c2   : > { %v4586_v14 = vpop.f32.mrf.mxu0  ;;  %v4568_v56 = vpop.f32.mrf.mxu1 }
 0x1c4   : > { %v1968_v63 = vpop.f32.mrf.mxu0  ;;  %v1822_v44 = vpop.f32.mrf.mxu1 }
 0x1c5   : > { %v5941_v36 = vadd.f32 %v1968_v63, %v1751_v55  ;;  %v1841_v20 = vadd.f32 %v1822_v44, %v1567_v22 }
 0x1c6   : > { %v4587_v23 = vpop.f32.mrf.mxu0  ;;  %v4569_v57 = vpop.f32.mrf.mxu1 }
 0x1c8   : > { %v1973_v59 = vpop.f32.mrf.mxu0  ;;  %v1827_v46 = vpop.f32.mrf.mxu1 }
 0x1c9   : > { %v5943_v11 = vadd.f32 %v1973_v59, %v1752_v13  ;;  %v1842_v38 = vadd.f32 %v1827_v46, %v1568_v60 }
 0x1ca   : > { %v4590_v28 = vpop.f32.mrf.mxu0  ;;  %v4572_v16 = vpop.f32.mrf.mxu1 }
 0x1cc   : > { %v1976_v5 = vpop.f32.mrf.mxu0  ;;  %v1830_v50 = vpop.f32.mrf.mxu1 }
 0x1cd   : > { %v5945_v7 = vadd.f32 %v1976_v5, %v1753_v4  ;;  %v1843_v2 = vadd.f32 %v1830_v50, %v1569_v49 }
 0x1ce   : > { %v4591_v21 = vpop.f32.mrf.mxu0  ;;  %v4573_v29 = vpop.f32.mrf.mxu1 }
 0x1d0   : > { %v1981_v42 = vpop.f32.mrf.mxu0  ;;  %v2037_v22 = vpop.f32.mrf.mxu1 }
 0x1d1   : > { %v5947_v55 = vadd.f32 %v1981_v42, %v1754_v24  ;;  %v2076_v41 = vadd.f32 %v2037_v22, %v1834_v40 }
 0x1d2   : > { %v4594_v15 = vpop.f32.mrf.mxu0  ;;  %v4600_v30 = vpop.f32.mrf.mxu1 }
 0x1d4   : > { %v1984_v53 = vpop.f32.mrf.mxu0  ;;  %v2040_v60 = vpop.f32.mrf.mxu1 }
 0x1d5   : > { %v5949_v13 = vadd.f32 %v1984_v53, %v1755_v58  ;;  %v2077_v51 = vadd.f32 %v2040_v60, %v1835_v12 }
 0x1d6   : > { %v4595_v26 = vpop.f32.mrf.mxu0  ;;  %v4601_v33 = vpop.f32.mrf.mxu1 }
 0x1d8   : > { %v2190_v61 = vpop.f32.mrf.mxu0  ;;  %v2045_v4 = vpop.f32.mrf.mxu1 }
 0x1d9   : > { %v2078_v6 = vadd.f32 %v2045_v4, %v1836_v9  ;;  %v2229_v33 = vadd.f32 %v2190_v61, %v5928_v43 }
 0x1da   : > { %v4622_v49 = vpop.f32.mrf.mxu0  ;;  %v4604_v17 = vpop.f32.mrf.mxu1 }
 0x1db   : > { %v5985_v49 = vld [vmem:[%s6400_s6] ss:$0 sm:$0xff] }
 0x1dc   : > { %v2193_v27 = vpop.f32.mrf.mxu0  ;;  %v2048_v37 = vpop.f32.mrf.mxu1 }
 0x1dd   : > { %v2079_v24 = vadd.f32 %v2048_v37, %v1837_v10 }
 0x1de   : > { %v4623_v34 = vpop.f32.mrf.mxu0  ;;  %v4605_v47 = vpop.f32.mrf.mxu1 }
 0x1df   : > { %v2230_v47 = vadd.f32 %v2193_v27, %v5932_v48 }
 0x1e0   : > { %v2198_v40 = vpop.f32.mrf.mxu0  ;;  %v2053_v35 = vpop.f32.mrf.mxu1 }
 0x1e1   : > { %v5951_v31 = vadd.f32 %v2053_v35, %v1838_v3 }
 0x1e2   : > { %v4626_v58 = vpop.f32.mrf.mxu0  ;;  %v4608_v8 = vpop.f32.mrf.mxu1 }
 0x1e3   : > { %v5991_v58 = vpop.permute.xlu0 %2605 }
 0x1e4   : > { %v5953_v62 = vpop.f32.mrf.mxu0  ;;  %v2056_v12 = vpop.f32.mrf.mxu1 }
 0x1e5   : > { %v5955_v0 = vadd.f32 %v2056_v12, %v1839_v45 }
 0x1e6   : > { %v4627_v39 = vpop.f32.mrf.mxu0  ;;  %v4609_v9 = vpop.f32.mrf.mxu1 }
 0x1e8   : > { %v5957_v52 = vpop.f32.mrf.mxu0  ;;  %v2061_v18 = vpop.f32.mrf.mxu1 }
 0x1e9   : > { %v5959_v14 = vadd.f32 %v2061_v18, %v1840_v54  ;;  %v2231_v18 = vadd.f32 %v2198_v40, %v5935_v25  ;;  %v2232_v25 = vadd.f32 %v5953_v62, %v5937_v32  ;;  %v2695_v62 = vld [vmem:[#allocation2 + $0x1] sm:$0xff] }
 0x1ea   : > { %v4630_v10 = vpop.f32.mrf.mxu0  ;;  %v4612_v56 = vpop.f32.mrf.mxu1 }
 0x1ec   : > { %v5961_v63 = vpop.f32.mrf.mxu0  ;;  %v2064_v3 = vpop.f32.mrf.mxu1 }
 0x1ed   : > { %v5963_v44 = vadd.f32 %v2064_v3, %v1841_v20 }
 0x1ee   : > { %v4631_v23 = vpop.f32.mrf.mxu0  ;;  %v4613_v57 = vpop.f32.mrf.mxu1 }
 0x1ef   : > { %v5999_v57 = vpop.permute.xlu0 %2610 }
 0x1f0   : > { %v5965_v59 = vpop.f32.mrf.mxu0  ;;  %v2069_v45 = vpop.f32.mrf.mxu1 }
 0x1f1   : > { %v5967_v46 = vadd.f32 %v2069_v45, %v1842_v38 }
 0x1f2   : > { %v4634_v28 = vpop.f32.mrf.mxu0  ;;  %v4616_v16 = vpop.f32.mrf.mxu1 }
 0x1f4   : > { %v5969_v5 = vpop.f32.mrf.mxu0  ;;  %v2072_v54 = vpop.f32.mrf.mxu1 }
 0x1f5   : > { %v5971_v50 = vadd.f32 %v2072_v54, %v1843_v2  ;;  %v6008_v54 = vpop.permute.xlu1 %2615 }
 0x1f6   : > { %v4635_v21 = vpop.f32.mrf.mxu0  ;;  %v4617_v29 = vpop.f32.mrf.mxu1 }
 0x1f8   : > { %v5973_v42 = vpop.f32.mrf.mxu0  ;;  %v2278_v20 = vpop.f32.mrf.mxu1 }
 0x1f9   : > { %v5975_v22 = vadd.f32 %v2278_v20, %v2076_v41 }
 0x1fa   : > { %v4638_v15 = vpop.f32.mrf.mxu0  ;;  %v4644_v30 = vpop.f32.mrf.mxu1 }
 0x1fc   : > { %v5977_v53 = vpop.f32.mrf.mxu0  ;;  %v2281_v38 = vpop.f32.mrf.mxu1 }
 0x1fd   : > { %v5979_v60 = vadd.f32 %v2281_v38, %v2077_v51  ;;  %v2679_v38 = vld [vmem:[#allocation2] sm:$0xff] }
 0x1fe   : > { %v4639_v26 = vpop.f32.mrf.mxu0  ;;  %v4645_v4 = vpop.f32.mrf.mxu1 }
 0x1ff   : > { %v2233_v26 = vadd.f32 %v5957_v52, %v5939_v19 }
 0x200   : > { %v2439_v2 = vpop.f32.mrf.mxu0  ;;  %v2286_v17 = vpop.f32.mrf.mxu1 }
 0x201   : > { %v2478_v41 = vadd.f32 %v2439_v2, %v2229_v33  ;;  %v5987_v37 = vadd.f32 %v2286_v17, %v2078_v6  ;;  %v4089_v17 = vld [vmem:[%s6401_s7 + $0xc] sm:$0xf] }
 0x202   : > { %v4666_v34 = vpop.f32.mrf.mxu0  ;;  %v4648_v35 = vpop.f32.mrf.mxu1 }
 0x203   : > { %v2583_v51 = vadd.f32 %v5985_v49, %v2478_v41 }
 0x204   : > { %v2442_v43 = vpop.f32.mrf.mxu0  ;;  %v2289_v8 = vpop.f32.mrf.mxu1 }
 0x205   : > { %v2593_v61 = vmax.f32 %v2583_v51, 0.0  ;;  %v2479_v12 = vadd.f32 %v2442_v43, %v2230_v47  ;;  %v5993_v39 = vadd.f32 %v2289_v8, %v2079_v24 }
 0x206   : > { %v4667_v9 = vpop.f32.mrf.mxu0  ;;  %v4649_v56 = vpop.f32.mrf.mxu1 }
 0x207   : > { %v2653_v6 = vmul.f32 %v5991_v58, %v2593_v61  ;;  %v2584_v10 = vadd.f32 %v5985_v49, %v2479_v12  ;;  %v6026_v61 = vpop.permute.xlu1 %2620  ;;  %v3046_v9 = vsel %vm2727_vm6, %v4089_v17, 0 }
 0x208   : > { %v2447_v48 = vpop.f32.mrf.mxu0  ;;  %v2294_v3 = vpop.f32.mrf.mxu1 }
 0x209   : > { %2669 = vst.msk [vmem:[#allocation2 + $0xb] sm:$0xff] %vm2663_vm7, %v2653_v6  ;;  %v2594_v27 = vmax.f32 %v2584_v10, 0.0  ;;  %v2480_v23 = vadd.f32 %v2447_v48, %v2231_v18  ;;  %v6002_v45 = vadd.f32 %v2294_v3, %v5951_v31  ;;  %v4083_v31 = vld [vmem:[%s6401_s7 + $0x8] sm:$0xf]  ;;  %v2234_v18 = vadd.f32 %v5961_v63, %v5941_v36  ;;  %v6043_v36 = vpop.permute.xlu0 %2625 }
 0x20a   : > { %v4670_v24 = vpop.f32.mrf.mxu0  ;;  %v4652_v16 = vpop.f32.mrf.mxu1 }
 0x20b   : > { %v2654_v40 = vmul.f32 %v5999_v57, %v2594_v27  ;;  %v2585_v28 = vadd.f32 %v5985_v49, %v2480_v23  ;;  %v2235_v24 = vadd.f32 %v5965_v59, %v5943_v11 }
 0x20c   : > { %v2450_v21 = vpop.f32.mrf.mxu0  ;;  %v2297_v20 = vpop.f32.mrf.mxu1 }
 0x20d   : > { %2670 = vst.msk [vmem:[#allocation2 + $0x13] sm:$0xff] %vm2663_vm7, %v2654_v40  ;;  %v2595_v29 = vmax.f32 %v2585_v28, 0.0  ;;  %v2481_v15 = vadd.f32 %v2450_v21, %v2232_v25  ;;  %v6015_v30 = vadd.f32 %v2297_v20, %v5955_v0  ;;  %v2928_v0 = vsel %vm2727_vm6, %v4083_v31, 0 }
 0x20e   : > { %v4671_v32 = vpop.f32.mrf.mxu0  ;;  %v4653_v2 = vpop.f32.mrf.mxu1 }
 0x20f   : > { %v2655_v33 = vmul.f32 %v6008_v54, %v2595_v29  ;;  %v2586_v4 = vadd.f32 %v5985_v49, %v2481_v15 }
 0x210   : > { %v2455_v41 = vpop.f32.mrf.mxu0  ;;  %v2696_v34 = vld [vmem:[#allocation2 + $0x9] sm:$0xff]  ;;  %v2302_v35 = vpop.f32.mrf.mxu1 }
 0x211   : > { %v2680_v47 = vld [vmem:[#allocation2 + $0x8] sm:$0xff]  ;;  %2671 = vst.msk [vmem:[#allocation2 + $0x1b] sm:$0xff] %vm2663_vm7, %v2655_v33  ;;  %v2596_v51 = vmax.f32 %v2586_v4, 0.0  ;;  %v2482_v43 = vadd.f32 %v2455_v41, %v2233_v26  ;;  %v2705_v19 = vpack.c.bf16 %v2696_v34, %v2695_v62  ;;  %v6029_v8 = vadd.f32 %v2302_v35, %v5959_v14  ;;  %v6055_v26 = vpop.permute.xlu1 %2630  ;;  %v6071_v34 = vpop.permute.xlu0 %2635 }
 0x212   : > { %v2689_v52 = vpack.c.bf16 %v2680_v47, %v2679_v38  ;;  %v4674_v12 = vpop.f32.mrf.mxu0  ;;  %v4656_v56 = vpop.f32.mrf.mxu1  ;;  %v2236_v33 = vadd.f32 %v5969_v5, %v5945_v7 }
 0x213   : > { %v2656_v6 = vmul.f32 %v6026_v61, %v2596_v51  ;;  %v2587_v10 = vadd.f32 %v5985_v49, %v2482_v43  ;;  %4709 = vmatmul.mubr.msk.bf16.vlgmr.msra.gmra.mxu0 %vm2663_vm7, %v2705_v19  ;;  %v2237_v51 = vadd.f32 %v5973_v42, %v5947_v55 }
 0x214   : > { %4731 = vmatmul.mubr.msk.bf16.vlgmr.msra.gmra.mxu1 %vm2663_vm7, %v2689_v52  ;;  %4751 = vmatpush3.bf16.msra.mxu0 %v2928_v0  ;;  %v2458_v48 = vpop.f32.mrf.mxu0  ;;  %v2305_v27 = vpop.f32.mrf.mxu1  ;;  %v2697_v16 = vld [vmem:[#allocation2 + $0x11] sm:$0xff] }
 0x215   : > { %4712 = vmatprep.mubr.msk.bf16.mxu0 %vm4975_vm1, %v4974_v1  ;;  %2672 = vst.msk [vmem:[#allocation2 + $0x23] sm:$0xff] %vm2663_vm7, %v2656_v6  ;;  %v2597_v14 = vmax.f32 %v2587_v10, 0.0  ;;  %v2483_v3 = vadd.f32 %v2458_v48, %v2234_v18  ;;  %4734 = vmatprep.mubr.msk.bf16.mxu1 %vm4975_vm1, %v4974_v1  ;;  %v6046_v63 = vadd.f32 %v2305_v27, %v5963_v44  ;;  %v2681_v20 = vld [vmem:[#allocation2 + $0x10] sm:$0xff]  ;;  %v6081_v27 = vpop.permute.xlu1 %2640 }
 0x216   : > { %4773 = vmatpush3.bf16.msra.mxu1 %v3046_v9  ;;  %v4675_v23 = vpop.f32.mrf.mxu0  ;;  %4794 = vmatprep.subr.bf16.mxu0 %v4974_v1  ;;  %v4657_v28 = vpop.f32.mrf.mxu1 }
 0x217   : > { %4816 = vmatprep.subr.bf16.mxu1 %v4974_v1  ;;  %v2657_v25 = vmul.f32 %v6043_v36, %v2597_v14  ;;  %v2588_v40 = vadd.f32 %v5985_v49, %v2483_v3  ;;  %v2238_v3 = vadd.f32 %v5977_v53, %v5949_v13  ;;  %v6097_v28 = vpop.permute.xlu0 %2645 }
 0x218   : > { %v2463_v21 = vpop.f32.mrf.mxu0  ;;  %v2698_v29 = vld [vmem:[#allocation2 + $0x19] sm:$0xff]  ;;  %v2310_v31 = vpop.f32.mrf.mxu1 }
 0x219   : > { %v2682_v15 = vld [vmem:[#allocation2 + $0x18] sm:$0xff]  ;;  %2673 = vst.msk [vmem:[#allocation2 + $0x2b] sm:$0xff] %vm2663_vm7, %v2657_v25  ;;  %v2598_v44 = vmax.f32 %v2588_v40, 0.0  ;;  %v2484_v32 = vadd.f32 %v2463_v21, %v2235_v24  ;;  %v2706_v62 = vpack.c.bf16 %v2698_v29, %v2697_v16  ;;  %v6058_v11 = vadd.f32 %v2310_v31, %v5967_v46 }
 0x21a   : > { %v2690_v38 = vpack.c.bf16 %v2682_v15, %v2681_v20  ;;  %v4678_v59 = vpop.f32.mrf.mxu0  ;;  %v4660_v17 = vpop.f32.mrf.mxu1 }
 0x21b   : > { %v2658_v4 = vmul.f32 %v6055_v26, %v2598_v44  ;;  %v2589_v2 = vadd.f32 %v5985_v49, %v2484_v32  ;;  %4713 = vmatmul.mubr.msk.bf16.gmra.mxu0 %vm2663_vm7, %v2706_v62 }
 0x21c   : > { %4735 = vmatmul.mubr.msk.bf16.gmra.mxu1 %vm2663_vm7, %v2690_v38  ;;  %v2466_v41 = vpop.f32.mrf.mxu0  ;;  %4716 = vmatprep.mubr.msk.bf16.mxu0 %vm4975_vm1, %v4974_v1  ;;  %v2313_v7 = vpop.f32.mrf.mxu1  ;;  %v2699_v52 = vld [vmem:[#allocation2 + $0x21] sm:$0xff] }
 0x21d   : > { %4738 = vmatprep.mubr.msk.bf16.mxu1 %vm4975_vm1, %v4974_v1  ;;  %2674 = vst.msk [vmem:[#allocation2 + $0x33] sm:$0xff] %vm2663_vm7, %v2658_v4  ;;  %v2599_v46 = vmax.f32 %v2589_v2, 0.0  ;;  %v2485_v5 = vadd.f32 %v2466_v41, %v2236_v33  ;;  %v6074_v47 = vadd.f32 %v2313_v7, %v5971_v50  ;;  %v2683_v18 = vld [vmem:[#allocation2 + $0x20] sm:$0xff]  ;;  %v6105_v2 = vpop.permute.xlu1 %2650 }
 0x21e   : > { %v4679_v0 = vpop.f32.mrf.mxu0  ;;  %v4661_v19 = vpop.f32.mrf.mxu1 }
 0x21f   : > { %v2659_v35 = vmul.f32 %v6071_v34, %v2599_v46  ;;  %v2590_v43 = vadd.f32 %v5985_v49, %v2485_v5 }
 0x220   : > { %v2471_v12 = vpop.f32.mrf.mxu0  ;;  %v2700_v9 = vld [vmem:[#allocation2 + $0x29] sm:$0xff]  ;;  %v2527_v50 = vpop.f32.mrf.mxu1 }
 0x221   : > { %v2684_v6 = vld [vmem:[#allocation2 + $0x28] sm:$0xff]  ;;  %2675 = vst.msk [vmem:[#allocation2 + $0x3b] sm:$0xff] %vm2663_vm7, %v2659_v35  ;;  %v2600_v10 = vmax.f32 %v2590_v43, 0.0  ;;  %v2486_v56 = vadd.f32 %v2471_v12, %v2237_v51  ;;  %v2707_v48 = vpack.c.bf16 %v2700_v9, %v2699_v52  ;;  %v6084_v55 = vadd.f32 %v2527_v50, %v5975_v22  ;;  %v4101_v50 = vld [vmem:[%s6401_s7 + $0x14] sm:$0xf] }
 0x222   : > { %v2691_v14 = vpack.c.bf16 %v2684_v6, %v2683_v18  ;;  %v4682_v42 = vpop.f32.mrf.mxu0  ;;  %v4688_v25 = vpop.f32.mrf.mxu1  ;;  %v2895_v9 = vld [vmem:[#allocation2 + $0x2] sm:$0xff]  ;;  %v2896_v6 = vld [vmem:[#allocation2 + $0xa] sm:$0xff] }
 0x223   : > { %v2660_v23 = vmul.f32 %v6081_v27, %v2600_v10  ;;  %v2591_v24 = vadd.f32 %v5985_v49, %v2486_v56  ;;  %4717 = vmatmul.mubr.msk.bf16.gmra.mxu0 %vm2663_vm7, %v2707_v48  ;;  %v3014_v10 = vld [vmem:[#allocation2 + $0x12] sm:$0xff] }
 0x224   : > { %4739 = vmatmul.mubr.msk.bf16.gmra.mxu1 %vm2663_vm7, %v2691_v14  ;;  %v2474_v40 = vpop.f32.mrf.mxu0  ;;  %4720 = vmatprep.mubr.msk.bf16.mxu0 %vm4975_vm1, %v4974_v1  ;;  %v2530_v53 = vpop.f32.mrf.mxu1  ;;  %v2701_v44 = vld [vmem:[#allocation2 + $0x31] sm:$0xff]  ;;  %v2905_v14 = vpack.c.bf16 %v2896_v6, %v2895_v9  ;;  %v3023_v42 = vpack.c.bf16 %v3014_v10, %v2896_v6  ;;  %v3134_v6 = vld [vmem:[#allocation2 + $0x23] sm:$0xff] }
 0x225   : > { %4742 = vmatprep.mubr.msk.bf16.mxu1 %vm4975_vm1, %v4974_v1  ;;  %2676 = vst.msk [vmem:[#allocation2 + $0x43] sm:$0xff] %vm2663_vm7, %v2660_v23  ;;  %v2601_v22 = vmax.f32 %v2591_v24, 0.0  ;;  %v2487_v13 = vadd.f32 %v2474_v40, %v2238_v3  ;;  %v6100_v16 = vadd.f32 %v2530_v53, %v5979_v60  ;;  %v2685_v32 = vld [vmem:[#allocation2 + $0x30] sm:$0xff] }
 0x226   : > { %v4683_v21 = vpop.f32.mrf.mxu0  ;;  %v4689_v15 = vpop.f32.mrf.mxu1 }
 0x227   : > { %v2661_v29 = vmul.f32 %v6097_v28, %v2601_v22  ;;  %v2592_v20 = vadd.f32 %v5985_v49, %v2487_v13  ;;  %v3016_v22 = vld [vmem:[#allocation2 + $0x22] sm:$0xff] }
 0x228   : > { %v2702_v31 = vld [vmem:[#allocation2 + $0x39] sm:$0xff]  ;;  %v2535_v59 = vpop.f32.mrf.mxu1 }
 0x229   : > { %v2686_v62 = vld [vmem:[#allocation2 + $0x38] sm:$0xff]  ;;  %2677 = vst.msk [vmem:[#allocation2 + $0x4b] sm:$0xff] %vm2663_vm7, %v2661_v29  ;;  %v2602_v38 = vmax.f32 %v2592_v20, 0.0  ;;  %v2708_v33 = vpack.c.bf16 %v2702_v31, %v2701_v44  ;;  %v6108_v60 = vadd.f32 %v2535_v59, %v5987_v37  ;;  %v2900_v31 = vld [vmem:[#allocation2 + $0x2a] sm:$0xff] }
 0x22a   : > { %v2692_v4 = vpack.c.bf16 %v2686_v62, %v2685_v32  ;;  %v4692_v41 = vpop.f32.mrf.mxu1  ;;  %v3018_v32 = vld [vmem:[#allocation2 + $0x32] sm:$0xff]  ;;  %v2902_v59 = vld [vmem:[#allocation2 + $0x3a] sm:$0xff] }
 0x22b   : > { %v2662_v17 = vmul.f32 %v6105_v2, %v2602_v38  ;;  %4721 = vmatmul.mubr.msk.bf16.gmra.mxu0 %vm2663_vm7, %v2708_v33  ;;  %v3025_v38 = vpack.c.bf16 %v3018_v32, %v2900_v31 }
 0x22c   : > { %4743 = vmatmul.mubr.msk.bf16.gmra.mxu1 %vm2663_vm7, %v2692_v4  ;;  %4724 = vmatprep.mubr.msk.bf16.mxu0 %vm4975_vm1, %v4974_v1  ;;  %v2538_v49 = vpop.f32.mrf.mxu1  ;;  %v2703_v7 = vld [vmem:[#allocation2 + $0x41] sm:$0xff]  ;;  %v2908_v4 = vpack.c.bf16 %v2902_v59, %v3018_v32 }
 0x22d   : > { %4746 = vmatprep.mubr.msk.bf16.mxu1 %vm4975_vm1, %v4974_v1  ;;  %2678 = vst.msk [vmem:[#allocation2 + $0x53] sm:$0xff] %vm2663_vm7, %v2662_v17  ;;  %v6119_v46 = vadd.f32 %v2538_v49, %v5993_v39  ;;  %v2687_v0 = vld [vmem:[#allocation2 + $0x40] sm:$0xff] }
 0x22e   : > { %v4693_v37 = vpop.f32.mrf.mxu1  ;;  %v3020_v33 = vld [vmem:[#allocation2 + $0x42] sm:$0xff] }
 0x230   : > { %v2704_v5 = vld [vmem:[#allocation2 + $0x49] sm:$0xff]  ;;  %v2543_v35 = vpop.f32.mrf.mxu1 }
 0x231   : > { %v2688_v51 = vld [vmem:[#allocation2 + $0x48] sm:$0xff]  ;;  %v2709_v43 = vpack.c.bf16 %v2704_v5, %v2703_v7  ;;  %v6122_v52 = vadd.f32 %v2543_v35, %v6002_v45  ;;  %v4095_v45 = vld [vmem:[%s6401_s7 + $0x10] sm:$0xf]  ;;  %v6185_v5 = vld [vmem:[#allocation2 + $0x14] sm:$0xff] }
 0x232   : > { %v2693_v19 = vpack.c.bf16 %v2688_v51, %v2687_v0  ;;  %v4696_v12 = vpop.f32.mrf.mxu1  ;;  %v3164_v3 = vsel %vm2727_vm6, %v4095_v45, 0  ;;  %v2904_v17 = vld [vmem:[#allocation2 + $0x4a] sm:$0xff]  ;;  %v3132_v7 = vld [vmem:[#allocation2 + $0x13] sm:$0xff]  ;;  %v4113_v51 = vld [vmem:[%s6401_s7 + $0x1c] sm:$0xf] }
 0x233   : > { %4725 = vmatmul.mubr.msk.bf16.gmra.mxu0 %vm2663_vm7, %v2709_v43  ;;  %v2909_v49 = vpack.c.bf16 %v2904_v17, %v3020_v33  ;;  %v4107_v0 = vld [vmem:[%s6401_s7 + $0x18] sm:$0xf]  ;;  %v3131_v35 = vld [vmem:[#allocation2 + $0xb] sm:$0xff]  ;;  %v3518_v9 = vsel %vm2727_vm6, %v4113_v51, 0 }
 0x234   : > { %4747 = vmatmul.mubr.msk.bf16.gmra.mxu1 %vm2663_vm7, %v2693_v19  ;;  %4752 = vmatprep.mubr.msk.bf16.mxu0 %vm4975_vm1, %v4974_v1  ;;  %v2546_v39 = vpop.f32.mrf.mxu1  ;;  %v3022_v41 = vld [vmem:[#allocation2 + $0x52] sm:$0xff]  ;;  %v3141_v19 = vpack.c.bf16 %v3132_v7, %v3131_v35  ;;  %v3133_v45 = vld [vmem:[#allocation2 + $0x1b] sm:$0xff] }
 0x235   : > { %4774 = vmatprep.mubr.msk.bf16.mxu1 %vm4975_vm1, %v4974_v1  ;;  %v6131_v18 = vadd.f32 %v2546_v39, %v6015_v30  ;;  %v3282_v30 = vsel %vm2727_vm6, %v4101_v50, 0  ;;  %v3027_v37 = vpack.c.bf16 %v3022_v41, %v2904_v17  ;;  %v3249_v43 = vld [vmem:[#allocation2 + $0xc] sm:$0xff]  ;;  %v3400_v39 = vsel %vm2727_vm6, %v4107_v0, 0  ;;  %v3489_v0 = vld [vmem:[#allocation2 + $0x35] sm:$0xff] }
 0x236   : > { %v4697_v56 = vpop.f32.mrf.mxu1  ;;  %v3259_v12 = vpack.c.bf16 %v6185_v5, %v3249_v43  ;;  %v3142_v50 = vpack.c.bf16 %v3134_v6, %v3133_v45  ;;  %v3139_v32 = vld [vmem:[#allocation2 + $0x4b] sm:$0xff]  ;;  %v3493_v6 = vld [vmem:[#allocation2 + $0x55] sm:$0xff] }
 0x237   : > { %v3251_v56 = vld [vmem:[#allocation2 + $0x1c] sm:$0xff]  ;;  %v3488_v41 = vld [vmem:[#allocation2 + $0x2d] sm:$0xff] }
 0x238   : > { %v2551_v48 = vpop.f32.mrf.mxu1  ;;  %v3492_v43 = vld [vmem:[#allocation2 + $0x4d] sm:$0xff] }
 0x239   : > { %v6141_v23 = vadd.f32 %v2551_v48, %v6029_v8  ;;  %v2898_v8 = vld [vmem:[#allocation2 + $0x1a] sm:$0xff] }
 0x23a   : > { %v4700_v24 = vpop.f32.mrf.mxu1  ;;  %v2906_v21 = vpack.c.bf16 %v2898_v8, %v3014_v10  ;;  %v3024_v29 = vpack.c.bf16 %v3016_v22, %v2898_v8  ;;  %v3252_v10 = vld [vmem:[#allocation2 + $0x24] sm:$0xff] }
 0x23b   : > { %4753 = vmatmul.mubr.msk.bf16.vlgmr.msra.gmra.mxu0 %vm2663_vm7, %v2905_v14  ;;  %v3260_v48 = vpack.c.bf16 %v3252_v10, %v3251_v56  ;;  %v3136_v14 = vld [vmem:[#allocation2 + $0x33] sm:$0xff]  ;;  %v3138_v8 = vld [vmem:[#allocation2 + $0x43] sm:$0xff] }
 0x23c   : > { %4775 = vmatmul.mubr.msk.bf16.vlgmr.msra.gmra.mxu1 %vm2663_vm7, %v3023_v42  ;;  %4795 = vmatpush3.bf16.msra.mxu0 %v3164_v3  ;;  %v2554_v25 = vpop.f32.mrf.mxu1  ;;  %v3254_v42 = vld [vmem:[#allocation2 + $0x34] sm:$0xff]  ;;  %v3135_v3 = vld [vmem:[#allocation2 + $0x2b] sm:$0xff] }
 0x23d   : > { %4756 = vmatprep.mubr.msk.bf16.mxu0 %vm4975_vm1, %v4974_v1  ;;  %4778 = vmatprep.mubr.msk.bf16.mxu1 %vm4975_vm1, %v4974_v1  ;;  %v6151_v40 = vadd.f32 %v2554_v25, %v6046_v63  ;;  %v3143_v24 = vpack.c.bf16 %v3136_v14, %v3135_v3  ;;  %v3605_v3 = vld [vmem:[#allocation2 + $0x26] sm:$0xff] }
 0x23e   : > { %4817 = vmatpush3.bf16.msra.mxu1 %v3282_v30  ;;  %4838 = vmatprep.subr.bf16.mxu0 %v4974_v1  ;;  %v4701_v13 = vpop.f32.mrf.mxu1  ;;  %v3253_v30 = vld [vmem:[#allocation2 + $0x2c] sm:$0xff] }
 0x23f   : > { %4860 = vmatprep.subr.bf16.mxu1 %v4974_v1  ;;  %v3261_v25 = vpack.c.bf16 %v3254_v42, %v3253_v30  ;;  %v3137_v13 = vld [vmem:[#allocation2 + $0x3b] sm:$0xff] }
 0x240   : > { %v2559_v53 = vpop.f32.mrf.mxu1 }
 0x241   : > { %v6156_v20 = vadd.f32 %v2559_v53, %v6058_v11  ;;  %v2907_v11 = vpack.c.bf16 %v2900_v31, %v3016_v22  ;;  %v3256_v22 = vld [vmem:[#allocation2 + $0x44] sm:$0xff]  ;;  %v3255_v53 = vld [vmem:[#allocation2 + $0x3c] sm:$0xff]  ;;  %v3258_v31 = vld [vmem:[#allocation2 + $0x54] sm:$0xff] }
 0x242   : > { %v4704_v15 = vpop.f32.mrf.mxu1  ;;  %v3379_v51 = vpack.c.bf16 %v3255_v53, %v3254_v42  ;;  %v3606_v42 = vld [vmem:[#allocation2 + $0x2e] sm:$0xff] }
 0x243   : > { %4757 = vmatmul.mubr.msk.bf16.gmra.mxu0 %vm2663_vm7, %v2906_v21  ;;  %v3144_v21 = vpack.c.bf16 %v3138_v8, %v3137_v13  ;;  %v3140_v15 = vld [vmem:[#allocation2 + $0x53] sm:$0xff]  ;;  %v3609_v13 = vld [vmem:[#allocation2 + $0x46] sm:$0xff] }
 0x244   : > { %4779 = vmatmul.mubr.msk.bf16.gmra.mxu1 %vm2663_vm7, %v3024_v29  ;;  %4760 = vmatprep.mubr.msk.bf16.mxu0 %vm4975_vm1, %v4974_v1  ;;  %v2562_v63 = vpop.f32.mrf.mxu1  ;;  %v3262_v29 = vpack.c.bf16 %v3256_v22, %v3255_v53 }
 0x245   : > { %4782 = vmatprep.mubr.msk.bf16.mxu1 %vm4975_vm1, %v4974_v1  ;;  %v6165_v44 = vadd.f32 %v2562_v63, %v6074_v47  ;;  %v3026_v47 = vpack.c.bf16 %v3020_v33, %v2902_v59  ;;  %v3257_v63 = vld [vmem:[#allocation2 + $0x4c] sm:$0xff]  ;;  %v4119_v59 = vld [vmem:[%s6401_s7 + $0x20] sm:$0xf]  ;;  %v3485_v33 = vld [vmem:[#allocation2 + $0x15] sm:$0xff] }
 0x246   : > { %v4705_v62 = vpop.f32.mrf.mxu1  ;;  %v3636_v17 = vsel %vm2727_vm6, %v4119_v59, 0 }
 0x247   : > { %v3145_v62 = vpack.c.bf16 %v3140_v15, %v3139_v32 }
 0x24b   : > { %4761 = vmatmul.mubr.msk.bf16.gmra.mxu0 %vm2663_vm7, %v2907_v11  ;;  %v3263_v11 = vpack.c.bf16 %v3258_v31, %v3257_v63 }
 0x24c   : > { %4783 = vmatmul.mubr.msk.bf16.gmra.mxu1 %vm2663_vm7, %v3025_v38  ;;  %4764 = vmatprep.mubr.msk.bf16.mxu0 %vm4975_vm1, %v4974_v1  ;;  %v3486_v38 = vld [vmem:[#allocation2 + $0x1d] sm:$0xff] }
 0x24d   : > { %4786 = vmatprep.mubr.msk.bf16.mxu1 %vm4975_vm1, %v4974_v1 }
 0x253   : > { %4765 = vmatmul.mubr.msk.bf16.gmra.mxu0 %vm2663_vm7, %v2908_v4  ;;  %v3377_v4 = vpack.c.bf16 %v3251_v56, %v6185_v5  ;;  %v3490_v5 = vld [vmem:[#allocation2 + $0x3d] sm:$0xff] }
 0x254   : > { %4787 = vmatmul.mubr.msk.bf16.gmra.mxu1 %vm2663_vm7, %v3026_v47  ;;  %4768 = vmatprep.mubr.msk.bf16.mxu0 %vm4975_vm1, %v4974_v1  ;;  %v3495_v47 = vpack.c.bf16 %v3486_v38, %v3485_v33  ;;  %v3497_v35 = vpack.c.bf16 %v3490_v5, %v3489_v0 }
 0x255   : > { %4790 = vmatprep.mubr.msk.bf16.mxu1 %vm4975_vm1, %v4974_v1 }
 0x25b   : > { %4769 = vmatmul.mubr.msk.bf16.gmra.mxu0 %vm2663_vm7, %v2909_v49  ;;  %v3487_v49 = vld [vmem:[#allocation2 + $0x25] sm:$0xff] }
 0x25c   : > { %4791 = vmatmul.mubr.msk.bf16.gmra.mxu1 %vm2663_vm7, %v3027_v37  ;;  %4796 = vmatprep.mubr.msk.bf16.mxu0 %vm4975_vm1, %v4974_v1  ;;  %v3378_v37 = vpack.c.bf16 %v3253_v30, %v3252_v10  ;;  %v3496_v7 = vpack.c.bf16 %v3488_v41, %v3487_v49  ;;  %v3494_v10 = vld [vmem:[#allocation2 + $0x5d] sm:$0xff]  ;;  %v3614_v30 = vpack.c.bf16 %v3606_v42, %v3605_v3 }
 0x25d   : > { %4818 = vmatprep.mubr.msk.bf16.mxu1 %vm4975_vm1, %v4974_v1  ;;  %v3499_v56 = vpack.c.bf16 %v3494_v10, %v3493_v6 }
 0x263   : > { %4797 = vmatmul.mubr.msk.bf16.vlgmr.msra.gmra.mxu0 %vm2663_vm7, %v3141_v19  ;;  %v3491_v19 = vld [vmem:[#allocation2 + $0x45] sm:$0xff] }
 0x264   : > { %4819 = vmatmul.mubr.msk.bf16.vlgmr.msra.gmra.mxu1 %vm2663_vm7, %v3259_v12  ;;  %4839 = vmatpush3.bf16.msra.mxu0 %v3400_v39  ;;  %v3380_v12 = vpack.c.bf16 %v3257_v63, %v3256_v22  ;;  %v3498_v39 = vpack.c.bf16 %v3492_v43, %v3491_v19  ;;  %v3610_v22 = vld [vmem:[#allocation2 + $0x4e] sm:$0xff] }
 0x265   : > { %4800 = vmatprep.mubr.msk.bf16.mxu0 %vm4975_vm1, %v4974_v1  ;;  %4822 = vmatprep.mubr.msk.bf16.mxu1 %vm4975_vm1, %v4974_v1  ;;  %v3616_v53 = vpack.c.bf16 %v3610_v22, %v3609_v13 }
 0x266   : > { %4861 = vmatpush3.bf16.msra.mxu1 %v3518_v9  ;;  %4882 = vmatprep.subr.bf16.mxu0 %v4974_v1  ;;  %v3376_v9 = vld [vmem:[#allocation2 + $0x5c] sm:$0xff] }
 0x267   : > { %v3381_v45 = vpack.c.bf16 %v3376_v9, %v3258_v31 }
 0x26b   : > { %4801 = vmatmul.mubr.msk.bf16.gmra.mxu0 %vm2663_vm7, %v3142_v50  ;;  %v3604_v50 = vld [vmem:[#allocation2 + $0x1e] sm:$0xff] }
 0x26c   : > { %4823 = vmatmul.mubr.msk.bf16.gmra.mxu1 %vm2663_vm7, %v3260_v48  ;;  %4804 = vmatprep.mubr.msk.bf16.mxu0 %vm4975_vm1, %v4974_v1  ;;  %v3603_v48 = vld [vmem:[#allocation2 + $0x16] sm:$0xff] }
 0x26d   : > { %4826 = vmatprep.mubr.msk.bf16.mxu1 %vm4975_vm1, %v4974_v1  ;;  %v3613_v14 = vpack.c.bf16 %v3604_v50, %v3603_v48 }
 0x273   : > { %4805 = vmatmul.mubr.msk.bf16.gmra.mxu0 %vm2663_vm7, %v3143_v24  ;;  %v3608_v24 = vld [vmem:[#allocation2 + $0x3e] sm:$0xff] }
 0x274   : > { %4827 = vmatmul.mubr.msk.bf16.gmra.mxu1 %vm2663_vm7, %v3261_v25  ;;  %4808 = vmatprep.mubr.msk.bf16.mxu0 %vm4975_vm1, %v4974_v1  ;;  %v3607_v25 = vld [vmem:[#allocation2 + $0x36] sm:$0xff] }
 0x275   : > { %4830 = vmatprep.mubr.msk.bf16.mxu1 %vm4975_vm1, %v4974_v1  ;;  %v3615_v8 = vpack.c.bf16 %v3608_v24, %v3607_v25 }
 0x27b   : > { %4809 = vmatmul.mubr.msk.bf16.gmra.mxu0 %vm2663_vm7, %v3144_v21  ;;  %v3611_v21 = vld [vmem:[#allocation2 + $0x56] sm:$0xff] }
 0x27c   : > { %4831 = vmatmul.mubr.msk.bf16.gmra.mxu1 %vm2663_vm7, %v3262_v29  ;;  %4812 = vmatprep.mubr.msk.bf16.mxu0 %vm4975_vm1, %v4974_v1  ;;  %v3612_v29 = vld [vmem:[#allocation2 + $0x5e] sm:$0xff] }
 0x27d   : > { %4834 = vmatprep.mubr.msk.bf16.mxu1 %vm4975_vm1, %v4974_v1  ;;  %v3617_v15 = vpack.c.bf16 %v3612_v29, %v3611_v21 }
 0x283   : > { %4813 = vmatmul.mubr.msk.bf16.gmra.mxu0 %vm2663_vm7, %v3145_v62 }
 0x284   : > { %4835 = vmatmul.mubr.msk.bf16.gmra.mxu1 %vm2663_vm7, %v3263_v11  ;;  %4840 = vmatprep.mubr.msk.bf16.mxu0 %vm4975_vm1, %v4974_v1 }
 0x285   : > { %4862 = vmatprep.mubr.msk.bf16.mxu1 %vm4975_vm1, %v4974_v1 }
 0x28b   : > { %4841 = vmatmul.mubr.msk.bf16.vlgmr.msra.gmra.mxu0 %vm2663_vm7, %v3377_v4 }
 0x28c   : > { %4863 = vmatmul.mubr.msk.bf16.vlgmr.msra.gmra.mxu1 %vm2663_vm7, %v3495_v47  ;;  %4883 = vmatpush3.bf16.msra.mxu0 %v3636_v17 }
 0x28d   : > { %4844 = vmatprep.mubr.msk.bf16.mxu0 %vm4975_vm1, %v4974_v1  ;;  %4866 = vmatprep.mubr.msk.bf16.mxu1 %vm4975_vm1, %v4974_v1 }
 0x293   : > { %4845 = vmatmul.mubr.msk.bf16.gmra.mxu0 %vm2663_vm7, %v3378_v37 }
 0x294   : > { %4867 = vmatmul.mubr.msk.bf16.gmra.mxu1 %vm2663_vm7, %v3496_v7  ;;  %4848 = vmatprep.mubr.msk.bf16.mxu0 %vm4975_vm1, %v4974_v1 }
 0x295   : > { %4870 = vmatprep.mubr.msk.bf16.mxu1 %vm4975_vm1, %v4974_v1 }
 0x29b   : > { %4849 = vmatmul.mubr.msk.bf16.gmra.mxu0 %vm2663_vm7, %v3379_v51 }
 0x29c   : > { %4871 = vmatmul.mubr.msk.bf16.gmra.mxu1 %vm2663_vm7, %v3497_v35  ;;  %4852 = vmatprep.mubr.msk.bf16.mxu0 %vm4975_vm1, %v4974_v1 }
 0x29d   : > { %4874 = vmatprep.mubr.msk.bf16.mxu1 %vm4975_vm1, %v4974_v1 }
 0x2a3   : > { %4853 = vmatmul.mubr.msk.bf16.gmra.mxu0 %vm2663_vm7, %v3380_v12 }
 0x2a4   : > { %4875 = vmatmul.mubr.msk.bf16.gmra.mxu1 %vm2663_vm7, %v3498_v39  ;;  %4856 = vmatprep.mubr.msk.bf16.mxu0 %vm4975_vm1, %v4974_v1 }
 0x2a5   : > { %4878 = vmatprep.mubr.msk.bf16.mxu1 %vm4975_vm1, %v4974_v1 }
 0x2ab   : > { %4857 = vmatmul.mubr.msk.bf16.gmra.mxu0 %vm2663_vm7, %v3381_v45 }
 0x2ac   : > { %4879 = vmatmul.mubr.msk.bf16.gmra.mxu1 %vm2663_vm7, %v3499_v56  ;;  %4884 = vmatprep.mubr.msk.bf16.mxu0 %vm4975_vm1, %v4974_v1 }
 0x2b3   : > { %4885 = vmatmul.mubr.msk.bf16.vlgmr.msra.gmra.mxu0 %vm2663_vm7, %v3613_v14 }
 0x2b4   : > { %4888 = vmatprep.mubr.msk.bf16.mxu0 %vm4975_vm1, %v4974_v1 }
 0x2bb   : > { %4889 = vmatmul.mubr.msk.bf16.gmra.mxu0 %vm2663_vm7, %v3614_v30 }
 0x2bc   : > { %4892 = vmatprep.mubr.msk.bf16.mxu0 %vm4975_vm1, %v4974_v1 }
 0x2c3   : > { %4893 = vmatmul.mubr.msk.bf16.gmra.mxu0 %vm2663_vm7, %v3615_v8 }
 0x2c4   : > { %4896 = vmatprep.mubr.msk.bf16.mxu0 %vm4975_vm1, %v4974_v1 }
 0x2cb   : > { %4897 = vmatmul.mubr.msk.bf16.gmra.mxu0 %vm2663_vm7, %v3616_v53 }
 0x2cc   : > { %4900 = vmatprep.mubr.msk.bf16.mxu0 %vm4975_vm1, %v4974_v1 }
 0x2d3   : > { %v2765_v63 = vpop.f32.mrf.mxu0  ;;  %4901 = vmatmul.mubr.msk.bf16.gmra.mxu0 %vm2663_vm7, %v3617_v15 }
 0x2d4   : > { %v2856_v31 = vpop.f32.mrf.mxu1 }
 0x2d5   : > { %v2857_v32 = vadd.f32 %v2856_v31, %v2765_v63  ;;  %v4710_v62 = vpop.f32.mrf.mxu0 }
 0x2d6   : > { %v4732_v11 = vpop.f32.mrf.mxu1 }
 0x2d7   : > { %v2768_v38 = vpop.f32.mrf.mxu0 }
 0x2d8   : > { %v2859_v59 = vpop.f32.mrf.mxu1 }
 0x2d9   : > { %v2860_v33 = vadd.f32 %v2859_v59, %v2768_v38  ;;  %v4711_v4 = vpop.f32.mrf.mxu0 }
 0x2da   : > { %v4733_v47 = vpop.f32.mrf.mxu1 }
 0x2db   : > { %v2773_v17 = vpop.f32.mrf.mxu0 }
 0x2dc   : > { %v2864_v41 = vpop.f32.mrf.mxu1 }
 0x2dd   : > { %v2865_v49 = vadd.f32 %v2864_v41, %v2773_v17  ;;  %v4714_v37 = vpop.f32.mrf.mxu0 }
 0x2de   : > { %v4736_v1 = vpop.f32.mrf.mxu1 }
 0x2df   : > { %v2776_v7 = vpop.f32.mrf.mxu0 }
 0x2e0   : > { %v2867_v5 = vpop.f32.mrf.mxu1 }
 0x2e1   : > { %v2868_v0 = vadd.f32 %v2867_v5, %v2776_v7  ;;  %v4715_v51 = vpop.f32.mrf.mxu0 }
 0x2e2   : > { %v4737_v35 = vpop.f32.mrf.mxu1 }
 0x2e3   : > { %v2781_v43 = vpop.f32.mrf.mxu0 }
 0x2e4   : > { %v2872_v19 = vpop.f32.mrf.mxu1 }
 0x2e5   : > { %v2873_v12 = vadd.f32 %v2872_v19, %v2781_v43  ;;  %v4718_v39 = vpop.f32.mrf.mxu0 }
 0x2e6   : > { %v4740_v9 = vpop.f32.mrf.mxu1 }
 0x2e7   : > { %v2784_v6 = vpop.f32.mrf.mxu0 }
 0x2e8   : > { %v2875_v10 = vpop.f32.mrf.mxu1 }
 0x2e9   : > { %v2876_v45 = vadd.f32 %v2875_v10, %v2784_v6  ;;  %v4719_v56 = vpop.f32.mrf.mxu0 }
 0x2ea   : > { %v4741_v50 = vpop.f32.mrf.mxu1 }
 0x2eb   : > { %v2789_v48 = vpop.f32.mrf.mxu0 }
 0x2ec   : > { %v2880_v14 = vpop.f32.mrf.mxu1 }
 0x2ed   : > { %v2881_v42 = vadd.f32 %v2880_v14, %v2789_v48  ;;  %v4722_v3 = vpop.f32.mrf.mxu0 }
 0x2ee   : > { %v4744_v30 = vpop.f32.mrf.mxu1 }
 0x2ef   : > { %v2792_v24 = vpop.f32.mrf.mxu0 }
 0x2f0   : > { %v2883_v25 = vpop.f32.mrf.mxu1 }
 0x2f1   : > { %v2884_v8 = vadd.f32 %v2883_v25, %v2792_v24  ;;  %v4723_v22 = vpop.f32.mrf.mxu0 }
 0x2f2   : > { %v4745_v13 = vpop.f32.mrf.mxu1 }
 0x2f3   : > { %v2797_v53 = vpop.f32.mrf.mxu0 }
 0x2f4   : > { %v2888_v21 = vpop.f32.mrf.mxu1 }
 0x2f5   : > { %v2889_v29 = vadd.f32 %v2888_v21, %v2797_v53  ;;  %v4726_v15 = vpop.f32.mrf.mxu0 }
 0x2f6   : > { %v4748_v63 = vpop.f32.mrf.mxu1 }
 0x2f7   : > { %v2800_v31 = vpop.f32.mrf.mxu0 }
 0x2f8   : > { %v2891_v62 = vpop.f32.mrf.mxu1 }
 0x2f9   : > { %v2892_v11 = vadd.f32 %v2891_v62, %v2800_v31  ;;  %v4727_v38 = vpop.f32.mrf.mxu0 }
 0x2fa   : > { %v4749_v59 = vpop.f32.mrf.mxu1 }
 0x2fb   : > { %v2964_v4 = vpop.f32.mrf.mxu0 }
 0x2fc   : > { %v3082_v47 = vpop.f32.mrf.mxu1  ;;  %v3003_v17 = vadd.f32 %v2964_v4, %v2857_v32 }
 0x2fd   : > { %v4754_v41 = vpop.f32.mrf.mxu0 }
 0x2fe   : > { %v4776_v37 = vpop.f32.mrf.mxu1  ;;  %v3121_v1 = vadd.f32 %v3082_v47, %v3003_v17 }
 0x2ff   : > { %v2967_v7 = vpop.f32.mrf.mxu0 }
 0x300   : > { %v3085_v5 = vpop.f32.mrf.mxu1  ;;  %v3004_v51 = vadd.f32 %v2967_v7, %v2860_v33 }
 0x301   : > { %v4755_v35 = vpop.f32.mrf.mxu0 }
 0x302   : > { %v4777_v43 = vpop.f32.mrf.mxu1  ;;  %v3122_v19 = vadd.f32 %v3085_v5, %v3004_v51 }
 0x303   : > { %v2972_v39 = vpop.f32.mrf.mxu0 }
 0x304   : > { %v3090_v9 = vpop.f32.mrf.mxu1  ;;  %v3005_v6 = vadd.f32 %v2972_v39, %v2865_v49 }
 0x305   : > { %v4758_v10 = vpop.f32.mrf.mxu0 }
 0x306   : > { %v4780_v56 = vpop.f32.mrf.mxu1  ;;  %v3123_v50 = vadd.f32 %v3090_v9, %v3005_v6 }
 0x307   : > { %v2975_v48 = vpop.f32.mrf.mxu0 }
 0x308   : > { %v3093_v14 = vpop.f32.mrf.mxu1  ;;  %v3006_v3 = vadd.f32 %v2975_v48, %v2868_v0 }
 0x309   : > { %v4759_v30 = vpop.f32.mrf.mxu0 }
 0x30a   : > { %v4781_v32 = vpop.f32.mrf.mxu1  ;;  %v3124_v24 = vadd.f32 %v3093_v14, %v3006_v3 }
 0x30b   : > { %v2980_v25 = vpop.f32.mrf.mxu0 }
 0x30c   : > { %v3098_v22 = vpop.f32.mrf.mxu1  ;;  %v3007_v13 = vadd.f32 %v2980_v25, %v2873_v12 }
 0x30d   : > { %v4762_v53 = vpop.f32.mrf.mxu0 }
 0x30e   : > { %v4784_v33 = vpop.f32.mrf.mxu1  ;;  %v3125_v21 = vadd.f32 %v3098_v22, %v3007_v13 }
 0x30f   : > { %v2983_v15 = vpop.f32.mrf.mxu0 }
 0x310   : > { %v3101_v63 = vpop.f32.mrf.mxu1  ;;  %v3008_v31 = vadd.f32 %v2983_v15, %v2876_v45 }
 0x311   : > { %v4763_v62 = vpop.f32.mrf.mxu0 }
 0x312   : > { %v4785_v49 = vpop.f32.mrf.mxu1  ;;  %v3126_v38 = vadd.f32 %v3101_v63, %v3008_v31 }
 0x313   : > { %v2988_v59 = vpop.f32.mrf.mxu0 }
 0x314   : > { %v3106_v4 = vpop.f32.mrf.mxu1  ;;  %v3009_v47 = vadd.f32 %v2988_v59, %v2881_v42 }
 0x315   : > { %v4766_v17 = vpop.f32.mrf.mxu0 }
 0x316   : > { %v4788_v0 = vpop.f32.mrf.mxu1  ;;  %v3127_v41 = vadd.f32 %v3106_v4, %v3009_v47 }
 0x317   : > { %v2991_v37 = vpop.f32.mrf.mxu0 }
 0x318   : > { %v3109_v7 = vpop.f32.mrf.mxu1  ;;  %v3010_v5 = vadd.f32 %v2991_v37, %v2884_v8 }
 0x319   : > { %v4767_v51 = vpop.f32.mrf.mxu0 }
 0x31a   : > { %v4789_v12 = vpop.f32.mrf.mxu1  ;;  %v3128_v35 = vadd.f32 %v3109_v7, %v3010_v5 }
 0x31b   : > { %v2996_v43 = vpop.f32.mrf.mxu0 }
 0x31c   : > { %v3114_v39 = vpop.f32.mrf.mxu1  ;;  %v3011_v9 = vadd.f32 %v2996_v43, %v2889_v29 }
 0x31d   : > { %v4770_v6 = vpop.f32.mrf.mxu0 }
 0x31e   : > { %v4792_v45 = vpop.f32.mrf.mxu1  ;;  %v3129_v10 = vadd.f32 %v3114_v39, %v3011_v9 }
 0x31f   : > { %v2999_v56 = vpop.f32.mrf.mxu0 }
 0x320   : > { %v3117_v48 = vpop.f32.mrf.mxu1  ;;  %v3012_v14 = vadd.f32 %v2999_v56, %v2892_v11 }
 0x321   : > { %v4771_v3 = vpop.f32.mrf.mxu0 }
 0x322   : > { %v4793_v42 = vpop.f32.mrf.mxu1  ;;  %v3130_v30 = vadd.f32 %v3117_v48, %v3012_v14 }
 0x323   : > { %v3200_v32 = vpop.f32.mrf.mxu0 }
 0x324   : > { %v3318_v25 = vpop.f32.mrf.mxu1  ;;  %v3239_v22 = vadd.f32 %v3200_v32, %v3121_v1 }
 0x325   : > { %v4798_v13 = vpop.f32.mrf.mxu0 }
 0x326   : > { %v4820_v8 = vpop.f32.mrf.mxu1  ;;  %v6273_v53 = vadd.f32 %v3318_v25, %v3239_v22 }
 0x327   : > { %v3203_v33 = vpop.f32.mrf.mxu0 }
 0x328   : > { %v3321_v15 = vpop.f32.mrf.mxu1  ;;  %v3240_v63 = vadd.f32 %v3203_v33, %v3122_v19 }
 0x329   : > { %v4799_v29 = vpop.f32.mrf.mxu0 }
 0x32a   : > { %v4821_v31 = vpop.f32.mrf.mxu1  ;;  %v6275_v62 = vadd.f32 %v3321_v15, %v3240_v63 }
 0x32b   : > { %v3208_v49 = vpop.f32.mrf.mxu0 }
 0x32c   : > { %v3326_v59 = vpop.f32.mrf.mxu1  ;;  %v3241_v11 = vadd.f32 %v3208_v49, %v3123_v50 }
 0x32d   : > { %v4802_v4 = vpop.f32.mrf.mxu0 }
 0x32e   : > { %v4824_v47 = vpop.f32.mrf.mxu1  ;;  %v6277_v17 = vadd.f32 %v3326_v59, %v3241_v11 }
 0x32f   : > { %v3211_v0 = vpop.f32.mrf.mxu0 }
 0x330   : > { %v3329_v1 = vpop.f32.mrf.mxu1  ;;  %v3242_v37 = vadd.f32 %v3211_v0, %v3124_v24 }
 0x331   : > { %v4803_v7 = vpop.f32.mrf.mxu0 }
 0x332   : > { %v4825_v5 = vpop.f32.mrf.mxu1  ;;  %v6279_v51 = vadd.f32 %v3329_v1, %v3242_v37 }
 0x333   : > { %v3216_v12 = vpop.f32.mrf.mxu0 }
 0x334   : > { %v3334_v19 = vpop.f32.mrf.mxu1  ;;  %v3243_v43 = vadd.f32 %v3216_v12, %v3125_v21 }
 0x335   : > { %v4806_v39 = vpop.f32.mrf.mxu0 }
 0x336   : > { %v4828_v9 = vpop.f32.mrf.mxu1  ;;  %v6281_v6 = vadd.f32 %v3334_v19, %v3243_v43 }
 0x337   : > { %v3219_v45 = vpop.f32.mrf.mxu0 }
 0x338   : > { %v3337_v50 = vpop.f32.mrf.mxu1  ;;  %v3244_v56 = vadd.f32 %v3219_v45, %v3126_v38 }
 0x339   : > { %v4807_v48 = vpop.f32.mrf.mxu0 }
 0x33a   : > { %v4829_v14 = vpop.f32.mrf.mxu1  ;;  %v6283_v3 = vadd.f32 %v3337_v50, %v3244_v56 }
 0x33b   : > { %v3224_v42 = vpop.f32.mrf.mxu0 }
 0x33c   : > { %v3342_v24 = vpop.f32.mrf.mxu1  ;;  %v3245_v32 = vadd.f32 %v3224_v42, %v3127_v41 }
 0x33d   : > { %v4810_v25 = vpop.f32.mrf.mxu0 }
 0x33e   : > { %v4832_v22 = vpop.f32.mrf.mxu1  ;;  %v6285_v13 = vadd.f32 %v3342_v24, %v3245_v32 }
 0x33f   : > { %v3227_v8 = vpop.f32.mrf.mxu0 }
 0x340   : > { %v3345_v21 = vpop.f32.mrf.mxu1  ;;  %v3246_v33 = vadd.f32 %v3227_v8, %v3128_v35 }
 0x341   : > { %v4811_v15 = vpop.f32.mrf.mxu0 }
 0x342   : > { %v4833_v63 = vpop.f32.mrf.mxu1  ;;  %v6287_v29 = vadd.f32 %v3345_v21, %v3246_v33 }
 0x343   : > { %v3232_v31 = vpop.f32.mrf.mxu0 }
 0x344   : > { %v3350_v38 = vpop.f32.mrf.mxu1  ;;  %v3247_v49 = vadd.f32 %v3232_v31, %v3129_v10 }
 0x345   : > { %v4814_v59 = vpop.f32.mrf.mxu0 }
 0x346   : > { %v4836_v11 = vpop.f32.mrf.mxu1  ;;  %v6289_v4 = vadd.f32 %v3350_v38, %v3247_v49 }
 0x347   : > { %v3235_v47 = vpop.f32.mrf.mxu0 }
 0x348   : > { %v3353_v41 = vpop.f32.mrf.mxu1  ;;  %v3248_v0 = vadd.f32 %v3235_v47, %v3130_v30 }
 0x349   : > { %v4815_v1 = vpop.f32.mrf.mxu0 }
 0x34a   : > { %v4837_v37 = vpop.f32.mrf.mxu1  ;;  %v6291_v7 = vadd.f32 %v3353_v41, %v3248_v0 }
 0x34b   : > { %v3436_v5 = vpop.f32.mrf.mxu0 }
 0x34c   : > { %v3554_v35 = vpop.f32.mrf.mxu1 }
 0x34d   : > { %v4842_v12 = vpop.f32.mrf.mxu0 }
 0x34e   : > { %v4864_v19 = vpop.f32.mrf.mxu1 }
 0x34f   : > { %v3439_v43 = vpop.f32.mrf.mxu0 }
 0x350   : > { %v3557_v39 = vpop.f32.mrf.mxu1 }
 0x351   : > { %v4843_v9 = vpop.f32.mrf.mxu0 }
 0x352   : > { %v4865_v45 = vpop.f32.mrf.mxu1  ;;  %v3475_v9 = vadd.f32 %v3436_v5, %v6273_v53 }
 0x353   : > { %v3444_v10 = vpop.f32.mrf.mxu0 }
 0x354   : > { %v3562_v50 = vpop.f32.mrf.mxu1  ;;  %v3477_v53 = vadd.f32 %v3444_v10, %v6277_v17 }
 0x355   : > { %v4846_v56 = vpop.f32.mrf.mxu0 }
 0x356   : > { %v4868_v48 = vpop.f32.mrf.mxu1 }
 0x357   : > { %v3447_v14 = vpop.f32.mrf.mxu0 }
 0x358   : > { %v3565_v42 = vpop.f32.mrf.mxu1 }
 0x359   : > { %v4847_v24 = vpop.f32.mrf.mxu0 }
 0x35a   : > { %v4869_v30 = vpop.f32.mrf.mxu1 }
 0x35b   : > { %v3452_v32 = vpop.f32.mrf.mxu0  ;;  %v3593_v30 = vadd.f32 %v3554_v35, %v3475_v9 }
 0x35c   : > { %v3570_v25 = vpop.f32.mrf.mxu1  ;;  %v3479_v10 = vadd.f32 %v3452_v32, %v6281_v6 }
 0x35d   : > { %v4850_v22 = vpop.f32.mrf.mxu0 }
 0x35e   : > { %v4872_v8 = vpop.f32.mrf.mxu1  ;;  %v3476_v22 = vadd.f32 %v3439_v43, %v6275_v62  ;;  %v3595_v62 = vadd.f32 %v3562_v50, %v3477_v53  ;;  %v3478_v43 = vadd.f32 %v3447_v14, %v6279_v51 }
 0x35f   : > { %v3455_v21 = vpop.f32.mrf.mxu0 }
 0x360   : > { %v6293_v33 = vpop.f32.mrf.mxu1  ;;  %v3596_v51 = vadd.f32 %v3565_v42, %v3478_v43 }
 0x361   : > { %v4851_v15 = vpop.f32.mrf.mxu0 }
 0x362   : > { %v4873_v63 = vpop.f32.mrf.mxu1  ;;  %v6316_v15 = vld [vmem:[%s6402_s8] ss:$0 sm:$0xff] }
 0x363   : > { %v6295_v31 = vpop.f32.mrf.mxu0 }
 0x364   : > { %v6297_v38 = vpop.f32.mrf.mxu1 }
 0x365   : > { %v4854_v49 = vpop.f32.mrf.mxu0 }
 0x366   : > { %v4876_v59 = vpop.f32.mrf.mxu1 }
 0x367   : > { %v6299_v11 = vpop.f32.mrf.mxu0  ;;  %v3594_v59 = vadd.f32 %v3557_v39, %v3476_v22  ;;  %v3597_v22 = vadd.f32 %v3570_v25, %v3479_v10 }
 0x368   : > { %v6301_v47 = vpop.f32.mrf.mxu1 }
 0x369   : > { %v4855_v41 = vpop.f32.mrf.mxu0 }
 0x36a   : > { %v4877_v0 = vpop.f32.mrf.mxu1 }
 0x36b   : > { %v6303_v1 = vpop.f32.mrf.mxu0 }
 0x36c   : > { %v6305_v37 = vpop.f32.mrf.mxu1 }
 0x36d   : > { %v4858_v12 = vpop.f32.mrf.mxu0 }
 0x36e   : > { %v4880_v19 = vpop.f32.mrf.mxu1 }
 0x36f   : > { %v6308_v45 = vpop.f32.mrf.mxu0 }
 0x370   : > { %v6310_v56 = vpop.f32.mrf.mxu1 }
 0x371   : > { %v4859_v48 = vpop.f32.mrf.mxu0 }
 0x372   : > { %v4881_v24 = vpop.f32.mrf.mxu1 }
 0x373   : > { %v3672_v8 = vpop.f32.mrf.mxu0 }
 0x374   : > { %v3711_v63 = vadd.f32 %v3672_v8, %v3593_v30 }
 0x375   : > { %v4886_v49 = vpop.f32.mrf.mxu0 }
 0x376   : > { %v3728_v5 = vadd.f32 %v6316_v15, %v3711_v63  ;;  %v3480_v63 = vadd.f32 %v3455_v21, %v6283_v3 }
 0x377   : > { %v3675_v41 = vpop.f32.mrf.mxu0 }
 0x378   : > { %v3738_v0 = vadd.f32 %v3728_v5, %v6084_v55  ;;  %v3712_v12 = vadd.f32 %v3675_v41, %v3594_v59 }
 0x379   : > { %v4887_v35 = vpop.f32.mrf.mxu0 }
 0x37a   : > { %v3748_v19 = vmax.f32 %v3738_v0, 0.0  ;;  %v3729_v9 = vadd.f32 %v6316_v15, %v3712_v12  ;;  %v3598_v0 = vadd.f32 %v6293_v33, %v3480_v63 }
 0x37b   : > { %v3680_v48 = vpop.f32.mrf.mxu0 }
 0x37c   : > { %v3758_v24 = vmul.f32 %v3748_v19, %v5991_v58  ;;  %v3739_v39 = vadd.f32 %v3729_v9, %v6100_v16  ;;  %v3713_v17 = vadd.f32 %v3680_v48, %v3595_v62 }
 0x37d   : > { %v4890_v55 = vpop.f32.mrf.mxu0 }
 0x37e   : > { %v4138_v50 = vpack.c.bf16 %v3758_v24, %v3758_v24  ;;  %v3749_v14 = vmax.f32 %v3739_v39, 0.0  ;;  %v3730_v30 = vadd.f32 %v6316_v15, %v3713_v17 }
 0x37f   : > { %v3683_v58 = vpop.f32.mrf.mxu0 }
 0x380   : > { %3809 = vst.msk [vmem:[%s6330_s24] sm:$0xf] %vm3808_vm9, %v4138_v50  ;;  %v3759_v16 = vmul.f32 %v3749_v14, %v5999_v57  ;;  %v3740_v6 = vadd.f32 %v3730_v30, %v6108_v60  ;;  %v3714_v32 = vadd.f32 %v3683_v58, %v3596_v51  ;;  %v3481_v60 = vadd.f32 %v6295_v31, %v6285_v13 }
 0x381   : > { %v4891_v8 = vpop.f32.mrf.mxu0  ;;  %v3482_v13 = vadd.f32 %v6299_v11, %v6287_v29 }
 0x382   : > { %v4139_v49 = vpack.c.bf16 %v3759_v16, %v3759_v16  ;;  %v3750_v42 = vmax.f32 %v3740_v6, 0.0  ;;  %v3731_v59 = vadd.f32 %v6316_v15, %v3714_v32  ;;  %v3599_v43 = vadd.f32 %v6297_v38, %v3481_v60 }
 0x383   : > { %v3688_v53 = vpop.f32.mrf.mxu0  ;;  %v3483_v38 = vadd.f32 %v6303_v1, %v6289_v4  ;;  %v3600_v17 = vadd.f32 %v6301_v47, %v3482_v13  ;;  %v3484_v4 = vadd.f32 %v6308_v45, %v6291_v7 }
 0x384   : > { %3810 = vst.msk [vmem:[%s6330_s24 + $0x4] sm:$0xf] %vm3808_vm9, %v4139_v49  ;;  %v3760_v5 = vmul.f32 %v3750_v42, %v6008_v54  ;;  %v3741_v41 = vadd.f32 %v3731_v59, %v6119_v46  ;;  %v3715_v57 = vadd.f32 %v3688_v53, %v3597_v22 }
 0x385   : > { %v4894_v25 = vpop.f32.mrf.mxu0  ;;  %v3601_v50 = vadd.f32 %v6305_v37, %v3483_v38  ;;  %v3602_v37 = vadd.f32 %v6310_v56, %v3484_v4 }
 0x386   : > { %v4140_v3 = vpack.c.bf16 %v3760_v5, %v3760_v5  ;;  %v3751_v21 = vmax.f32 %v3741_v41, 0.0  ;;  %v3732_v12 = vadd.f32 %v6316_v15, %v3715_v57 }
 0x387   : > { %v3691_v35 = vpop.f32.mrf.mxu0 }
 0x388   : > { %3811 = vst.msk [vmem:[%s6330_s24 + $0x8] sm:$0xf] %vm3808_vm9, %v4140_v3  ;;  %v3761_v62 = vmul.f32 %v3751_v21, %v6026_v61  ;;  %v3742_v54 = vadd.f32 %v3732_v12, %v6122_v52  ;;  %v3716_v46 = vadd.f32 %v3691_v35, %v3598_v0 }
 0x389   : > { %v4895_v19 = vpop.f32.mrf.mxu0 }
 0x38a   : > { %v4141_v33 = vpack.c.bf16 %v3761_v62, %v3761_v62  ;;  %v3752_v31 = vmax.f32 %v3742_v54, 0.0  ;;  %v3733_v9 = vadd.f32 %v6316_v15, %v3716_v46 }
 0x38b   : > { %v3696_v48 = vpop.f32.mrf.mxu0 }
 0x38c   : > { %3812 = vst.msk [vmem:[%s6330_s24 + $0xc] sm:$0xf] %vm3808_vm9, %v4141_v33  ;;  %v3762_v24 = vmul.f32 %v3752_v31, %v6043_v36  ;;  %v3743_v61 = vadd.f32 %v3733_v9, %v6131_v18  ;;  %v3717_v52 = vadd.f32 %v3696_v48, %v3599_v43 }
 0x38d   : > { %v4898_v39 = vpop.f32.mrf.mxu0 }
 0x38e   : > { %v4142_v29 = vpack.c.bf16 %v3762_v24, %v3762_v24  ;;  %v3753_v11 = vmax.f32 %v3743_v61, 0.0  ;;  %v3734_v10 = vadd.f32 %v6316_v15, %v3717_v52 }
 0x38f   : > { %v3699_v55 = vpop.f32.mrf.mxu0 }
 0x390   : > { %3813 = vst.msk [vmem:[%s6330_s24 + $0x10] sm:$0xf] %vm3808_vm9, %v4142_v29  ;;  %v3763_v51 = vmul.f32 %v3753_v11, %v6055_v26  ;;  %v3744_v36 = vadd.f32 %v3734_v10, %v6141_v23  ;;  %v3718_v18 = vadd.f32 %v3699_v55, %v3600_v17 }
 0x391   : > { %v4899_v14 = vpop.f32.mrf.mxu0 }
 0x392   : > { %v4143_v47 = vpack.c.bf16 %v3763_v51, %v3763_v51  ;;  %v3754_v1 = vmax.f32 %v3744_v36, 0.0  ;;  %v3735_v30 = vadd.f32 %v6316_v15, %v3718_v18 }
 0x393   : > { %v3704_v58 = vpop.f32.mrf.mxu0 }
 0x394   : > { %3814 = vst.msk [vmem:[%s6330_s24 + $0x14] sm:$0xf] %vm3808_vm9, %v4143_v47  ;;  %v3764_v16 = vmul.f32 %v3754_v1, %v6071_v34  ;;  %v3745_v26 = vadd.f32 %v3735_v30, %v6151_v40  ;;  %v3719_v23 = vadd.f32 %v3704_v58, %v3601_v50 }
 0x395   : > { %v4902_v6 = vpop.f32.mrf.mxu0 }
 0x396   : > { %v4144_v32 = vpack.c.bf16 %v3764_v16, %v3764_v16  ;;  %v3755_v22 = vmax.f32 %v3745_v26, 0.0  ;;  %v3736_v7 = vadd.f32 %v6316_v15, %v3719_v23 }
 0x397   : > { %v3707_v45 = vpop.f32.mrf.mxu0 }
 0x398   : > { %3815 = vst.msk [vmem:[%s6330_s24 + $0x18] sm:$0xf] %vm3808_vm9, %v4144_v32  ;;  %v3765_v8 = vmul.f32 %v3755_v22, %v6081_v27  ;;  %v3746_v34 = vadd.f32 %v3736_v7, %v6156_v20  ;;  %v3720_v63 = vadd.f32 %v3707_v45, %v3602_v37 }
 0x399   : > { %v4903_v40 = vpop.f32.mrf.mxu0 }
 0x39a   : > { %v4145_v49 = vpack.c.bf16 %v3765_v8, %v3765_v8  ;;  %v3756_v42 = vmax.f32 %v3746_v34, 0.0  ;;  %v3737_v59 = vadd.f32 %v6316_v15, %v3720_v63 }
 0x39c   : > { %3816 = vst.msk [vmem:[%s6330_s24 + $0x1c] sm:$0xf] %vm3808_vm9, %v4145_v49  ;;  %v3766_v56 = vmul.f32 %v3756_v42, %v6097_v28  ;;  %v3747_v53 = vadd.f32 %v3737_v59, %v6165_v44 }
 0x39e   : > { %v4146_v5 = vpack.c.bf16 %v3766_v56, %v3766_v56  ;;  %v3757_v41 = vmax.f32 %v3747_v53, 0.0 }
 0x3a0   : > { %3817 = vst.msk [vmem:[%s6330_s24 + $0x20] sm:$0xf] %vm3808_vm9, %v4146_v5  ;;  %v3767_v27 = vmul.f32 %v3757_v41, %v6105_v2 }
 0x3a2   : > { %v4147_v57 = vpack.c.bf16 %v3767_v27, %v3767_v27 }
 0x3a4   : > { %3818 = vst.msk [vmem:[%s6330_s24 + $0x24] sm:$0xf] %vm3808_vm9, %v4147_v57 }
 0x3a5 PF: > { %s20_s13 = sadd.s32 1, %s4972_s13  }
 0x3a6   : > { %p17_p4 = scmp.ge.s32.totalorder %s20_s13, 4  }
 0x3a8   :  { %19 = sbr.rel (!%p17_p4) target bundleno = 1 (0x1), region = 123 }

// kernel: _lambda_.9
= control target key start
LH: loop header
LB: loop body
LE: loop exit
PB: predicated region body
PF: predicated region fallthrough
CT: control target
= control target key end

     0   :  { %s2121_s21 = smov 0   ;;  %s2347_s0 = inlined_call_operand.vmem [shape: bf16[2,38,16], index: 0, kind: input, shape index: {}]   ;;  %s2348_s1 = inlined_call_operand.vmem [shape: f32[24,1], index: 1, kind: input, shape index: {}]   ;;  %s2349_s2 = inlined_call_operand.vmem [shape: bf16[9,16,16], index: 2, kind: input, shape index: {}]   ;;  %s2350_s3 = inlined_call_operand.vmem [shape: f32[1,16], index: 3, kind: input, shape index: {}]   ;;  %s2351_s4 = inlined_call_operand.vmem [shape: bf16[9,16,16], index: 4, kind: input, shape index: {}]   ;;  %s2352_s5 = inlined_call_operand.vmem [shape: f32[1,16], index: 5, kind: input, shape index: {}]   ;;  %s2353_s6 = inlined_call_operand.vmem [shape: bf16[2,24,16], index: 6, kind: output, shape index: {}]  }
   0x1 LB: > { %s1748_s22 = sadd.s32 4294967295, %s2082_s21   ;;  %p1752_p0 = scmp.ge.s32.totalorder %s2082_s21, 1  ;;  %s2082_s21 = sphi %s2121_s21, %s16_s21  }
   0x2   : > { %p212_p1 = scmp.lt.s32.totalorder %s2082_s21, 3 }
   0x4   : > { %p213_p2 = pnand %p1752_p0, %p212_p1 }
   0x5   : > { %p242_p3 = scmp.lt.s32.totalorder (!%p213_p2), %s1748_s22, 1 }
   0x6   : > { %216 = sbr.rel (%p213_p2) target bundleno = 520 (0x208), region = 44 }
   0xb   : > { %v2045_v0 = vld [vmem:[%s2349_s2 + $0x8] sm:$0xff]   ;;  %v2046_v1 = vld [vmem:[%s2349_s2] sm:$0xff]   ;;  %s2355_s22 = smov (!%p242_p3, %s1748_s22), 1  ;;  %v2140_v2 = vld [vmem:[%s2349_s2 + $0x10] sm:$0xff]   ;;  %vm297_vm0 = vcmask 130048   ;;  %vm419_vm2 = vcmask 1046528  }
   0xc   : > { %1923 = vmatprep.subr.bf16.mxu0 %v2045_v0  ;;  %1929 = vmatprep.subr.bf16.mxu1 %v2046_v1  ;;  %s2031_s29 = smul.u32 20, %s2355_s22  ;;  %v2051_v3 = vld [vmem:[%s2349_s2 + $0x18] sm:$0xff]   ;;  %vm275_vm1 = vsmask.f32 7424  ;;  %vm497_vm3 = vcmask 1044480   ;;  %v2162_v7 = vld [vmem:[%s2349_s2 + $0x28] sm:$0xff]  }
   0xd   : > { %1924 = vmatpush3.bf16.msra.mxu0 %v2045_v0  ;;  %1930 = vmatpush3.bf16.msra.mxu1 %v2046_v1  ;;  %v2055_v41 = vld [vmem:[%s2349_s2 + $0x20] sm:$0xff]   ;;  %vm571_vm4 = vsmask.f32 4352  ;;  %v2061_v51 = vld [vmem:[%s2349_s2 + $0x38] sm:$0xff]   ;;  %vm811_vm5 = vsmask.f32 5376 }
   0xe   : > { %1935 = vmatprep.subr.bf16.mxu0 %v2140_v2  ;;  %s2150_s10 = scalar_lea.vmem %s2347_s0, %s2031_s29  ;;  %1941 = vmatprep.subr.bf16.mxu1 %v2051_v3  ;;  %v2084_v53 = vmov 0   ;;  %v253_v58 = vld [vmem:[%s2348_s1] sm:$0xff]  ;;  %v255_v62 = vld [vmem:[%s2348_s1 + $0x10] sm:$0xff]  ;;  %vm737_vm6 = vcmask 1045504   ;;  %vm996_vm7 = vcmask 129024   ;;  %vm1656_vm8 = vcmask 1040384  }
   0xf   : > { %v256_v4 = vld [vmem:[%s2150_s10] sm:$0xf]  ;;  %v2154_v5 = vld [vmem:[%s2150_s10 + $0x4] sm:$0xf]  ;;  %v2157_v6 = vld [vmem:[%s2150_s10 + $0x8] sm:$0xf]  ;;  %2043 = vset.pattern.permute.xlu0 %v2084_v53  ;;  %2044 = vset.pattern.permute.xlu1 %v2084_v53 }
  0x10   : > { %v261_v8 = vld [vmem:[%s2150_s10 + $0xc] sm:$0x1]  ;;  %v1757_v9 = vcombine.low %v256_v4, %v2154_v5  ;;  %v1762_v10 = vcombine.low %v2157_v6, %v2157_v6  ;;  %v412_v11 = vld [vmem:[%s2150_s10] sm:$0xe]  ;;  %v720_v33 = vld [vmem:[%s2150_s10 + $0x4] sm:$0xc]  ;;  %v1787_v49 = vcombine.low %v2154_v5, %v2157_v6  ;;  %980 = vperm.xlu0 %2043, %v253_v58   ;;  %990 = vperm.xlu1 %2044, %v255_v62  }
  0x11   : > { %v486_v12 = vld [vmem:[%s2150_s10] sm:$0x8]  ;;  %v2171_v13 = vcombine.low %v2157_v6, %v261_v8  ;;  %v1768_v14 = vcombine.low %v412_v11, %v2154_v5  ;;  %v487_v15 = vld [vmem:[%s2150_s10 + $0xc] sm:$0x7]  ;;  %v2191_v37 = vld [vmem:[%s2150_s10 + $0x8] sm:$0xf] }
  0x12   : > { %v1774_v16 = vcombine.low %v486_v12, %v2154_v5  ;;  %v2177_v17 = vld [vmem:[%s2150_s10 + $0xc] sm:$0xf]  ;;  %v277_v18 = vshrl.u32 %v1757_v9, 16  ;;  %v279_v19 = vshll.u32 %v1757_v9, 16  ;;  %1931 = vmatprep.mubr.msk.bf16.mxu1 %vm297_vm0, %v1757_v9  ;;  %v1775_v20 = vcombine.low %v2157_v6, %v487_v15  ;;  %v804_v44 = vld [vmem:[%s2150_s10 + $0x10] sm:$0x7] }
  0x13   : > { %v1781_v21 = vcombine.low %v2157_v6, %v2177_v17  ;;  %v284_v22 = vshll.u32 %v2171_v13, 16  ;;  %v288_v23 = vshrl.u32 %v2171_v13, 16  ;;  %1932 = vmatmul.mubr.msk.bf16.vlgmr.msra.gmra.mxu1 %vm297_vm0, %v1762_v10  ;;  %v420_v24 = vrot.slane %v1768_v14, 1  ;;  %v722_v38 = vld [vmem:[%s2150_s10 + $0xc] sm:$0xf]  ;;  %s2032_s29 = smul.u32 12, %s2355_s22 }
  0x14   : > { %v421_v25 = vrot.slane %v2171_v13, 1  ;;  %v281_v26 = vrot.slane %v279_v19, 1  ;;  %1942 = vmatpush3.bf16.msra.mxu1 %v2051_v3  ;;  %v498_v27 = vrot.slane %v1774_v16, 3  ;;  %v499_v28 = vrot.slane %v1775_v20, 3  ;;  %v723_v54 = vld [vmem:[%s2150_s10 + $0x10] sm:$0x3] }
  0x15   : > { %v573_v29 = vshrl.u32 %v1774_v16, 16  ;;  %v286_v30 = vrot.slane %v284_v22, 1  ;;  %1953 = vmatprep.subr.bf16.mxu1 %v2162_v7  ;;  %v576_v31 = vshll.u32 %v1774_v16, 16  ;;  %v581_v32 = vshrl.u32 %v1781_v21, 16  ;;  %v2059_v3 = vld [vmem:[%s2349_s2 + $0x30] sm:$0xff]   ;;  %v2065_v13 = vld [vmem:[%s2349_s2 + $0x40] sm:$0xff]   ;;  %s251_s8 = scalar_lea.vmem %s2353_s6, %s2032_s29 }
  0x16   : > { %v282_v34 = vor.u32 %v281_v26, %v277_v18  ;;  %v500_v35 = vsel %vm497_vm3, %v498_v27, %v499_v28  ;;  %v584_v36 = vshll.u32 %v1781_v21, 16  ;;  %v422_v40 = vsel %vm419_vm2, %v420_v24, %v421_v25  ;;  %v892_v12 = vld [vmem:[%s2150_s10 + $0x4] sm:$0x8]  ;;  %v2067_v20 = vld [vmem:[%s2351_s4 + $0x8] sm:$0xff]   ;;  %v2265_v22 = vld [vmem:[%s2351_s4 + $0x10] sm:$0xff]  }
  0x17   : > { %v290_v39 = vor.u32 %v288_v23, %v286_v30  ;;  %1943 = vmatprep.mubr.msk.bf16.mxu1 %vm297_vm0, %v500_v35  ;;  %v575_v42 = vrot.slane %v573_v29, 3  ;;  %v578_v43 = vrot.slane %v576_v31, 4  ;;  %v583_v46 = vrot.slane %v581_v32, 3  ;;  %v2068_v21 = vld [vmem:[%s2351_s4] sm:$0xff]   ;;  %v2271_v23 = vld [vmem:[%s2351_s4 + $0x18] sm:$0xff]  }
  0x18   : > { %v287_v45 = vsel %vm275_vm1, %v282_v34, %v286_v30  ;;  %v586_v47 = vrot.slane %v584_v36, 4  ;;  %v1794_v48 = vcombine.low %v720_v33, %v2191_v37  ;;  %v2207_v50 = vcombine.low %v722_v38, %v804_v44 }
  0x19   : > { %1925 = vmatprep.mubr.msk.bf16.mxu0 %vm297_vm0, %v287_v45  ;;  %v579_v59 = vor.u32 %v578_v43, %v575_v42  ;;  %v1795_v8 = vcombine.low %v722_v38, %v723_v54  ;;  %v1807_v15 = vcombine.low %v892_v12, %v2191_v37  ;;  %v2085_v19 = vmov 0.0  }
  0x1a   : > { %1926 = vmatmul.mubr.msk.bf16.vlgmr.msra.gmra.mxu0 %vm297_vm0, %v290_v39  ;;  %v813_v52 = vshrl.u32 %v1794_v48, 16  ;;  %v816_v55 = vshll.u32 %v1794_v48, 16  ;;  %v821_v56 = vshrl.u32 %v2207_v50, 16  ;;  %v824_v57 = vshll.u32 %v2207_v50, 16  ;;  %997 = vst.msk [vmem:[#allocation2] sm:$0x7f] %vm996_vm7, %v2085_v19 }
  0x1b   : > { %1936 = vmatpush3.bf16.msra.mxu0 %v2140_v2  ;;  %1937 = vmatprep.mubr.msk.bf16.mxu0 %vm297_vm0, %v422_v40  ;;  %v587_v60 = vor.u32 %v586_v47, %v583_v46  ;;  %v254_v2 = vld [vmem:[%s2348_s1 + $0x8] sm:$0xff]  ;;  %v738_v10 = vrot.slane %v1794_v48, 2  ;;  %v739_v11 = vrot.slane %v1795_v8, 2  ;;  %v899_v16 = vrot.slane %v1807_v15, 3  ;;  %998 = vst.msk [vmem:[#allocation2 + $0x1f] sm:$0x7f] %vm996_vm7, %v2085_v19 }
  0x1c   : > { %1947 = vmatprep.subr.bf16.mxu0 %v2055_v41  ;;  %1944 = vmatmul.mubr.msk.bf16.vlgmr.msra.gmra.mxu1 %vm297_vm0, %v499_v28  ;;  %v815_v61 = vrot.slane %v813_v52, 2  ;;  %v818_v63 = vrot.slane %v816_v55, 3  ;;  %v823_v0 = vrot.slane %v821_v56, 2  ;;  %v826_v1 = vrot.slane %v824_v57, 3 }
  0x1d   : > { %1954 = vmatpush3.bf16.msra.mxu1 %v2162_v7  ;;  %1955 = vmatprep.mubr.msk.bf16.mxu1 %vm297_vm0, %v1787_v49  ;;  %v588_v6 = vsel %vm571_vm4, %v579_v59, %v587_v60  ;;  %v1788_v7 = vcombine.low %v2177_v17, %v2177_v17  ;;  %v740_v14 = vsel %vm737_vm6, %v738_v10, %v739_v11  ;;  %v900_v17 = vrot.slane %v2207_v50, 3  ;;  %v1811_v10 = vld [vmem:[%s2350_s3] ss:$0 sm:$0xff] }
  0x1e   : > { %1965 = vmatprep.subr.bf16.mxu1 %v2061_v51  ;;  %v819_v4 = vor.u32 %v818_v63, %v815_v61  ;;  %v827_v5 = vor.u32 %v826_v1, %v823_v0  ;;  %985 = vperm.xlu0 %2043, %v254_v2   ;;  %vm1689_vm9 = vcmask 125952  }
  0x1f   : > { %v901_v18 = vsel %vm497_vm3, %v899_v16, %v900_v17 }
  0x20   : > { %v828_v9 = vsel %vm811_vm5, %v819_v4, %v827_v5 }
  0x22   : > { %1938 = vmatmul.mubr.msk.bf16.vlgmr.msra.gmra.mxu0 %vm297_vm0, %v421_v25 }
  0x23   : > { %1948 = vmatpush3.bf16.msra.mxu0 %v2055_v41  ;;  %1949 = vmatprep.mubr.msk.bf16.mxu0 %vm297_vm0, %v588_v6 }
  0x24   : > { %1959 = vmatprep.subr.bf16.mxu0 %v2059_v3  ;;  %1956 = vmatmul.mubr.msk.bf16.vlgmr.msra.gmra.mxu1 %vm297_vm0, %v1788_v7 }
  0x25   : > { %1966 = vmatpush3.bf16.msra.mxu1 %v2061_v51  ;;  %1967 = vmatprep.mubr.msk.bf16.mxu1 %vm297_vm0, %v828_v9 }
  0x26   : > { %1977 = vmatprep.subr.bf16.mxu1 %v2067_v20 }
  0x2a   : > { %1950 = vmatmul.mubr.msk.bf16.vlgmr.msra.gmra.mxu0 %vm297_vm0, %v587_v60 }
  0x2b   : > { %1960 = vmatpush3.bf16.msra.mxu0 %v2059_v3  ;;  %1961 = vmatprep.mubr.msk.bf16.mxu0 %vm297_vm0, %v740_v14 }
  0x2c   : > { %1971 = vmatprep.subr.bf16.mxu0 %v2065_v13  ;;  %1968 = vmatmul.mubr.msk.bf16.vlgmr.msra.gmra.mxu1 %vm297_vm0, %v827_v5 }
  0x2d   : > { %1978 = vmatpush3.bf16.msra.mxu1 %v2067_v20 }
  0x2e   : > { %1989 = vmatprep.subr.bf16.mxu1 %v2265_v22 }
  0x32   : > { %1962 = vmatmul.mubr.msk.bf16.vlgmr.msra.gmra.mxu0 %vm297_vm0, %v739_v11 }
  0x33   : > { %1972 = vmatpush3.bf16.msra.mxu0 %v2065_v13  ;;  %1973 = vmatprep.mubr.msk.bf16.mxu0 %vm297_vm0, %v901_v18 }
  0x34   : > { %1983 = vmatprep.subr.bf16.mxu0 %v2068_v21 }
  0x3a   : > { %1974 = vmatmul.mubr.msk.bf16.vlgmr.msra.gmra.mxu0 %vm297_vm0, %v900_v17 }
  0x3b   : > { %1984 = vmatpush3.bf16.msra.mxu0 %v2068_v21 }
  0x3c   : > { %1995 = vmatprep.subr.bf16.mxu0 %v2271_v23 }
  0x8b   : > { %v2277_v17 = vpop.permute.xlu1 %990 }
  0xd3   : > { %v1933_v24 = vpop.f32.mrf.mxu1 }
  0xd5   : > { %v398_v25 = vpop.f32.mrf.mxu1 }
  0xd7   : > { %v1934_v26 = vpop.f32.mrf.mxu1 }
  0xd9   : > { %v401_v27 = vpop.f32.mrf.mxu1 }
  0xda   : > { %v1927_v28 = vpop.f32.mrf.mxu0 }
  0xdb   : > { %v407_v41 = vadd.f32 %v1933_v24, %v1927_v28 }
  0xdc   : > { %v338_v29 = vpop.f32.mrf.mxu0  ;;  %v1945_v30 = vpop.f32.mrf.mxu1 }
  0xdd   : > { %v399_v44 = vadd.f32 %v398_v25, %v338_v29  ;;  %v2279_v25 = vpop.permute.xlu0 %980 }
  0xde   : > { %v1928_v31 = vpop.f32.mrf.mxu0  ;;  %v547_v32 = vpop.f32.mrf.mxu1 }
  0xe0   : > { %v341_v33 = vpop.f32.mrf.mxu0  ;;  %v1946_v34 = vpop.f32.mrf.mxu1 }
  0xe1   : > { %v402_v51 = vadd.f32 %v401_v27, %v341_v33  ;;  %v2285_v33 = vpop.permute.xlu0 %985 }
  0xe2   : > { %v1939_v35 = vpop.f32.mrf.mxu0  ;;  %v550_v36 = vpop.f32.mrf.mxu1 }
  0xe3   : > { %v485_v45 = vadd.f32 %v1939_v35, %v407_v41 }
  0xe4   : > { %v469_v37 = vpop.f32.mrf.mxu0  ;;  %v1957_v38 = vpop.f32.mrf.mxu1 }
  0xe5   : > { %v483_v48 = vadd.f32 %v469_v37, %v399_v44  ;;  %v563_v52 = vadd.f32 %v1945_v30, %v485_v45 }
  0xe6   : > { %v1940_v39 = vpop.f32.mrf.mxu0  ;;  %v703_v40 = vpop.f32.mrf.mxu1 }
  0xe7   : > { %v561_v55 = vadd.f32 %v547_v32, %v483_v48 }
  0xe8   : > { %v472_v42 = vpop.f32.mrf.mxu0  ;;  %v1958_v43 = vpop.f32.mrf.mxu1 }
  0xe9   : > { %v484_v56 = vadd.f32 %v472_v42, %v402_v51  ;;  %v2072_v51 = vld [vmem:[%s2351_s4 + $0x28] sm:$0xff]  }
  0xea   : > { %v1951_v46 = vpop.f32.mrf.mxu0  ;;  %v706_v47 = vpop.f32.mrf.mxu1 }
  0xeb   : > { %v651_v57 = vadd.f32 %v1951_v46, %v563_v52  ;;  %v562_v62 = vadd.f32 %v550_v36, %v484_v56 }
  0xec   : > { %v635_v49 = vpop.f32.mrf.mxu0  ;;  %v1969_v50 = vpop.f32.mrf.mxu1 }
  0xed   : > { %v649_v60 = vadd.f32 %v635_v49, %v561_v55  ;;  %v719_v63 = vadd.f32 %v1957_v38, %v651_v57 }
  0xee   : > { %v1952_v53 = vpop.f32.mrf.mxu0  ;;  %v875_v54 = vpop.f32.mrf.mxu1 }
  0xef   : > { %v717_v1 = vadd.f32 %v703_v40, %v649_v60  ;;  %v2073_v60 = vld [vmem:[%s2351_s4 + $0x30] sm:$0xff]  }
  0xf0   : > { %v638_v58 = vpop.f32.mrf.mxu0  ;;  %v1970_v59 = vpop.f32.mrf.mxu1 }
  0xf1   : > { %v650_v2 = vadd.f32 %v638_v58, %v562_v62 }
  0xf2   : > { %v1963_v61 = vpop.f32.mrf.mxu0  ;;  %v878_v18 = vpop.f32.mrf.mxu1 }
  0xf3   : > { %v803_v3 = vadd.f32 %v1963_v61, %v719_v63  ;;  %v718_v7 = vadd.f32 %v706_v47, %v650_v2 }
  0xf4   : > { %v787_v0 = vpop.f32.mrf.mxu0 }
  0xf5   : > { %v801_v5 = vadd.f32 %v787_v0, %v717_v1  ;;  %v891_v8 = vadd.f32 %v1969_v50, %v803_v3  ;;  %v2071_v50 = vld [vmem:[%s2351_s4 + $0x20] sm:$0xff]  }
  0xf6   : > { %v1964_v4 = vpop.f32.mrf.mxu0 }
  0xf7   : > { %v889_v11 = vadd.f32 %v875_v54, %v801_v5 }
  0xf8   : > { %v790_v6 = vpop.f32.mrf.mxu0 }
  0xf9   : > { %v802_v12 = vadd.f32 %v790_v6, %v718_v7  ;;  %v2075_v6 = vld [vmem:[%s2351_s4 + $0x40] sm:$0xff]  }
  0xfa   : > { %v1975_v9 = vpop.f32.mrf.mxu0 }
  0xfb   : > { %v964_v14 = vadd.f32 %v1975_v9, %v891_v8  ;;  %v890_v20 = vadd.f32 %v878_v18, %v802_v12 }
  0xfc   : > { %v948_v13 = vpop.f32.mrf.mxu0 }
  0xfd   : > { %v974_v15 = vadd.f32 %v1811_v10, %v964_v14  ;;  %v962_v16 = vadd.f32 %v948_v13, %v889_v11 }
  0xfe   : > { %v1976_v19 = vpop.f32.mrf.mxu0 }
  0xff   : > { %v972_v21 = vadd.f32 %v1811_v10, %v962_v16  ;;  %v977_v24 = vmax.f32 %v974_v15, 0.0 }
 0x100   : > { %v951_v26 = vpop.f32.mrf.mxu0 }
 0x101   : > { %v975_v27 = vmax.f32 %v972_v21, 0.0  ;;  %v995_v28 = vmul.f32 %v2277_v17, %v977_v24  ;;  %v963_v29 = vadd.f32 %v951_v26, %v890_v20 }
 0x103   : > { %v993_v30 = vmul.f32 %v2279_v25, %v975_v27  ;;  %1001 = vst.msk [vmem:[#allocation2 + $0x17] sm:$0xff] %vm297_vm0, %v995_v28  ;;  %v973_v31 = vadd.f32 %v1811_v10, %v963_v29 }
 0x105   : > { %999 = vst.msk [vmem:[#allocation2 + $0x7] sm:$0xff] %vm297_vm0, %v993_v30  ;;  %v976_v32 = vmax.f32 %v973_v31, 0.0 }
 0x107   : > { %v994_v34 = vmul.f32 %v2285_v33, %v976_v32 }
 0x109   : > { %1000 = vst.msk [vmem:[#allocation2 + $0xf] sm:$0xff] %vm297_vm0, %v994_v34 }
 0x10a   : > { %v1289_v61 = vld [vmem:[#allocation2 + $0x17] sm:$0xff] }
 0x10b   : > { %v1360_v62 = vld [vmem:[#allocation2 + $0x18] sm:$0xff]  ;;  %v1291_v3 = vpack.c.bf16 %v1289_v61, %v1289_v61 }
 0x10c   : > { %v1017_v35 = vld [vmem:[#allocation2 + $0x1] sm:$0xff]  ;;  %v1362_v4 = vpack.c.bf16 %v1360_v62, %v1360_v62 }
 0x10d   : > { %v1010_v36 = vld [vmem:[#allocation2] sm:$0xff] }
 0x10e   : > { %v1145_v47 = vld [vmem:[#allocation2 + $0x2] sm:$0xff] }
 0x10f   : > { %v1216_v49 = vld [vmem:[#allocation2 + $0x6] sm:$0xff]  ;;  %v1431_v8 = vld [vmem:[#allocation2 + $0x1c] sm:$0xff] }
 0x110   : > { %v1018_v37 = vld [vmem:[#allocation2 + $0x9] sm:$0xff]  ;;  %v1019_v39 = vld [vmem:[#allocation2 + $0x11] sm:$0xff]  ;;  %v1502_v9 = vld [vmem:[#allocation2 + $0x1d] sm:$0xff]  ;;  %v1433_v10 = vpack.c.bf16 %v1431_v8, %v1431_v8 }
 0x111   : > { %v1011_v38 = vld [vmem:[#allocation2 + $0x8] sm:$0xff]  ;;  %v1020_v40 = vpack.c.bf16 %v1018_v37, %v1017_v35  ;;  %v1021_v42 = vpack.c.bf16 %v1019_v39, %v1019_v39  ;;  %v1012_v43 = vld [vmem:[#allocation2 + $0x10] sm:$0xff]  ;;  %v1504_v11 = vpack.c.bf16 %v1502_v9, %v1502_v9  ;;  %v1573_v14 = vld [vmem:[#allocation2 + $0x1e] sm:$0xff] }
 0x112   : > { %v1013_v41 = vpack.c.bf16 %v1011_v38, %v1010_v36  ;;  %v1146_v44 = vld [vmem:[#allocation2 + $0xa] sm:$0xff]  ;;  %v1014_v46 = vpack.c.bf16 %v1012_v43, %v1012_v43  ;;  %v1147_v53 = vld [vmem:[#allocation2 + $0x12] sm:$0xff]  ;;  %v1575_v13 = vpack.c.bf16 %v1573_v14, %v1573_v14  ;;  %v1855_v14 = vld [vmem:[%s2352_s5] ss:$0 sm:$0xff] }
 0x113   : > { %v2289_v45 = vld [vmem:[#allocation2 + $0xe] sm:$0xff]  ;;  %1979 = vmatprep.mubr.msk.bf16.mxu1 %vm297_vm0, %v1020_v40  ;;  %v1148_v48 = vpack.c.bf16 %v1146_v44, %v1145_v47  ;;  %v1218_v54 = vld [vmem:[#allocation2 + $0x16] sm:$0xff]  ;;  %v1149_v56 = vpack.c.bf16 %v1147_v53, %v1147_v53 }
 0x114   : > { %1985 = vmatprep.mubr.msk.bf16.mxu0 %vm297_vm0, %v1013_v41  ;;  %1980 = vmatmul.mubr.msk.bf16.vlgmr.msra.gmra.mxu1 %vm297_vm0, %v1021_v42  ;;  %v1219_v52 = vpack.c.bf16 %v2289_v45, %v1216_v49  ;;  %v1288_v55 = vld [vmem:[#allocation2 + $0xf] sm:$0xff]  ;;  %v1220_v57 = vpack.c.bf16 %v1218_v54, %v1218_v54  ;;  %v1287_v58 = vld [vmem:[#allocation2 + $0x7] sm:$0xff]  ;;  %v1574_v12 = vpack.c.bf16 %v1218_v54, %v2289_v45 }
 0x115   : > { %1986 = vmatmul.mubr.msk.bf16.vlgmr.msra.gmra.mxu0 %vm297_vm0, %v1014_v46  ;;  %1990 = vmatpush3.bf16.msra.mxu1 %v2265_v22  ;;  %v1290_v59 = vpack.c.bf16 %v1288_v55, %v1287_v58  ;;  %v2074_v22 = vld [vmem:[%s2351_s4 + $0x38] sm:$0xff]   ;;  %v1429_v63 = vld [vmem:[#allocation2 + $0xc] sm:$0xff] }
 0x116   : > { %1991 = vmatprep.mubr.msk.bf16.mxu1 %vm297_vm0, %v1148_v48  ;;  %1997 = vmatprep.mubr.msk.bf16.mxu0 %vm297_vm0, %v1219_v52  ;;  %v1430_v0 = vld [vmem:[#allocation2 + $0x14] sm:$0xff]  ;;  %v1868_v54 = vld [vmem:[%s2150_s10 + $0x8] sm:$0xff]  }
 0x117   : > { %1996 = vmatpush3.bf16.msra.mxu0 %v2271_v23  ;;  %2001 = vmatprep.subr.bf16.mxu1 %v2071_v50  ;;  %v1361_v23 = vpack.c.bf16 %v1012_v43, %v1011_v38  ;;  %v1500_v1 = vld [vmem:[#allocation2 + $0xd] sm:$0xff]  ;;  %v1501_v2 = vld [vmem:[#allocation2 + $0x15] sm:$0xff]  ;;  %v1432_v5 = vpack.c.bf16 %v1430_v0, %v1429_v63  ;;  %v1866_v61 = vunpack.c.l.bf16 %v1868_v54  ;;  %v1867_v62 = vunpack.c.h.bf16 %v1868_v54 }
 0x118   : > { %2007 = vmatprep.subr.bf16.mxu0 %v2072_v51  ;;  %v1503_v7 = vpack.c.bf16 %v1501_v2, %v1500_v1 }
 0x119   : > { %v1660_v8 = vrot.slane %v1866_v61, 7  ;;  %v1662_v9 = vrot.slane %v1867_v62, 7 }
 0x11c   : > { %1992 = vmatmul.mubr.msk.bf16.vlgmr.msra.gmra.mxu1 %vm297_vm0, %v1149_v56 }
 0x11d   : > { %1998 = vmatmul.mubr.msk.bf16.vlgmr.msra.gmra.mxu0 %vm297_vm0, %v1220_v57  ;;  %2002 = vmatpush3.bf16.msra.mxu1 %v2071_v50 }
 0x11e   : > { %2003 = vmatprep.mubr.msk.bf16.mxu1 %vm297_vm0, %v1290_v59  ;;  %2009 = vmatprep.mubr.msk.bf16.mxu0 %vm297_vm0, %v1361_v23  ;;  %v1002_v59 = vld [vmem:[%s2150_s10] sm:$0x8] }
 0x11f   : > { %2008 = vmatpush3.bf16.msra.mxu0 %v2072_v51  ;;  %2013 = vmatprep.subr.bf16.mxu1 %v2073_v60 }
 0x120   : > { %2019 = vmatprep.subr.bf16.mxu0 %v2074_v22 }
 0x124   : > { %2004 = vmatmul.mubr.msk.bf16.vlgmr.msra.gmra.mxu1 %vm297_vm0, %v1291_v3 }
 0x125   : > { %2010 = vmatmul.mubr.msk.bf16.vlgmr.msra.gmra.mxu0 %vm297_vm0, %v1362_v4  ;;  %2014 = vmatpush3.bf16.msra.mxu1 %v2073_v60  ;;  %v1003_v60 = vld [vmem:[%s2150_s10 + $0x4] sm:$0xf]  ;;  %v1006_v4 = vunpack.c.l.bf16 %v1002_v59 }
 0x126   : > { %2015 = vmatprep.mubr.msk.bf16.mxu1 %vm297_vm0, %v1432_v5  ;;  %2021 = vmatprep.mubr.msk.bf16.mxu0 %vm297_vm0, %v1503_v7  ;;  %v1007_v5 = vunpack.c.l.bf16 %v1003_v60 }
 0x127   : > { %2020 = vmatpush3.bf16.msra.mxu0 %v2074_v22  ;;  %2025 = vmatprep.subr.bf16.mxu1 %v2075_v6 }
 0x12c   : > { %2016 = vmatmul.mubr.msk.bf16.vlgmr.msra.gmra.mxu1 %vm297_vm0, %v1433_v10 }
 0x12d   : > { %2022 = vmatmul.mubr.msk.bf16.vlgmr.msra.gmra.mxu0 %vm297_vm0, %v1504_v11  ;;  %2026 = vmatpush3.bf16.msra.mxu1 %v2075_v6 }
 0x12e   : > { %2027 = vmatprep.mubr.msk.bf16.mxu1 %vm297_vm0, %v1574_v12 }
 0x134   : > { %2028 = vmatmul.mubr.msk.bf16.vlgmr.msra.gmra.mxu1 %vm297_vm0, %v1575_v13  ;;  %v1657_v13 = vrot.slane %v1006_v4, 7 }
 0x1d4   : > { %v1981_v15 = vpop.f32.mrf.mxu1 }
 0x1d5   : > { %v1987_v16 = vpop.f32.mrf.mxu0 }
 0x1d6   : > { %v1071_v18 = vpop.f32.mrf.mxu1  ;;  %v1140_v34 = vadd.f32 %v1987_v16, %v1981_v15  ;;  %v1658_v15 = vrot.slane %v1007_v5, 7 }
 0x1d7   : > { %v1131_v19 = vpop.f32.mrf.mxu0 }
 0x1d8   : > { %v1982_v20 = vpop.f32.mrf.mxu1  ;;  %v1132_v37 = vadd.f32 %v1131_v19, %v1071_v18 }
 0x1d9   : > { %v1988_v21 = vpop.f32.mrf.mxu0  ;;  %v1663_v20 = vsel %vm1656_vm8, %v1660_v8, %v1662_v9 }
 0x1da   : > { %v1074_v24 = vpop.f32.mrf.mxu1 }
 0x1db   : > { %v1134_v26 = vpop.f32.mrf.mxu0 }
 0x1dc   : > { %v1993_v27 = vpop.f32.mrf.mxu1  ;;  %v1135_v44 = vadd.f32 %v1134_v26, %v1074_v24 }
 0x1dd   : > { %v1999_v28 = vpop.f32.mrf.mxu0  ;;  %v1215_v38 = vadd.f32 %v1993_v27, %v1140_v34 }
 0x1de   : > { %v1199_v29 = vpop.f32.mrf.mxu1 }
 0x1df   : > { %v1270_v30 = vpop.f32.mrf.mxu0  ;;  %v1213_v41 = vadd.f32 %v1199_v29, %v1132_v37  ;;  %v1286_v45 = vadd.f32 %v1999_v28, %v1215_v38  ;;  %v1659_v28 = vsel %vm1656_vm8, %v1657_v13, %v1658_v15  ;;  %v1661_v38 = vsel %vm1656_vm8, %v1658_v15, %v1660_v8 }
 0x1e0   : > { %v1994_v31 = vpop.f32.mrf.mxu1 }
 0x1e1   : > { %v2000_v32 = vpop.f32.mrf.mxu0  ;;  %v1284_v48 = vadd.f32 %v1270_v30, %v1213_v41 }
 0x1e2   : > { %v1202_v35 = vpop.f32.mrf.mxu1 }
 0x1e3   : > { %v1273_v36 = vpop.f32.mrf.mxu0  ;;  %v1214_v49 = vadd.f32 %v1202_v35, %v1135_v44 }
 0x1e4   : > { %v2005_v39 = vpop.f32.mrf.mxu1 }
 0x1e5   : > { %v2011_v40 = vpop.f32.mrf.mxu0  ;;  %v1357_v50 = vadd.f32 %v2005_v39, %v1286_v45  ;;  %v1285_v57 = vadd.f32 %v1273_v36, %v1214_v49 }
 0x1e6   : > { %v1341_v42 = vpop.f32.mrf.mxu1 }
 0x1e7   : > { %v1412_v43 = vpop.f32.mrf.mxu0  ;;  %v1355_v53 = vadd.f32 %v1341_v42, %v1284_v48  ;;  %v1428_v58 = vadd.f32 %v2011_v40, %v1357_v50 }
 0x1e8   : > { %v2006_v46 = vpop.f32.mrf.mxu1 }
 0x1e9   : > { %v2012_v47 = vpop.f32.mrf.mxu0  ;;  %v1426_v63 = vadd.f32 %v1412_v43, %v1355_v53 }
 0x1ea   : > { %v1344_v51 = vpop.f32.mrf.mxu1 }
 0x1eb   : > { %v1415_v52 = vpop.f32.mrf.mxu0  ;;  %v1356_v0 = vadd.f32 %v1344_v51, %v1285_v57 }
 0x1ec   : > { %v2017_v55 = vpop.f32.mrf.mxu1 }
 0x1ed   : > { %v2023_v56 = vpop.f32.mrf.mxu0  ;;  %v1499_v1 = vadd.f32 %v2017_v55, %v1428_v58  ;;  %v1427_v10 = vadd.f32 %v1415_v52, %v1356_v0 }
 0x1ee   : > { %v1483_v22 = vpop.f32.mrf.mxu1 }
 0x1ef   : > { %v1554_v23 = vpop.f32.mrf.mxu0  ;;  %v1497_v6 = vadd.f32 %v1483_v22, %v1426_v63  ;;  %v1570_v11 = vadd.f32 %v2023_v56, %v1499_v1 }
 0x1f0   : > { %v2018_v2 = vpop.f32.mrf.mxu1 }
 0x1f1   : > { %v2024_v3 = vpop.f32.mrf.mxu0  ;;  %v1568_v16 = vadd.f32 %v1554_v23, %v1497_v6 }
 0x1f2   : > { %v1486_v7 = vpop.f32.mrf.mxu1 }
 0x1f3   : > { %v1498_v18 = vadd.f32 %v1486_v7, %v1427_v10  ;;  %v1557_v27 = vpop.f32.mrf.mxu0 }
 0x1f4   : > { %v2029_v12 = vpop.f32.mrf.mxu1 }
 0x1f5   : > { %v1641_v19 = vadd.f32 %v2029_v12, %v1570_v11  ;;  %v1569_v30 = vadd.f32 %v1557_v27, %v1498_v18 }
 0x1f6   : > { %v1625_v21 = vpop.f32.mrf.mxu1 }
 0x1f7   : > { %v1651_v24 = vadd.f32 %v1855_v14, %v1641_v19  ;;  %v1639_v26 = vadd.f32 %v1625_v21, %v1568_v16 }
 0x1f8   : > { %v2030_v29 = vpop.f32.mrf.mxu1 }
 0x1f9   : > { %v1669_v31 = vadd.f32 %v1663_v20, %v1651_v24  ;;  %v1649_v32 = vadd.f32 %v1855_v14, %v1639_v26 }
 0x1fa   : > { %v1628_v34 = vpop.f32.mrf.mxu1 }
 0x1fb   : > { %v1672_v35 = vmax.f32 %v1669_v31, 0.0  ;;  %v1667_v36 = vadd.f32 %v1659_v28, %v1649_v32  ;;  %v1640_v37 = vadd.f32 %v1628_v34, %v1569_v30 }
 0x1fd   : > { %v1675_v39 = vmul.f32 %v1672_v35, %v2277_v17  ;;  %v1670_v40 = vmax.f32 %v1667_v36, 0.0  ;;  %v1650_v41 = vadd.f32 %v1855_v14, %v1640_v37 }
 0x1ff   : > { %v1863_v42 = vpack.c.bf16 %v1675_v39, %v1675_v39  ;;  %v1673_v43 = vmul.f32 %v1670_v40, %v2279_v25  ;;  %v1668_v44 = vadd.f32 %v1661_v38, %v1650_v41 }
 0x201   : > { %1692 = vst.msk [vmem:[%s251_s8 + $0x8] sm:$0xf] %vm1689_vm9, %v1863_v42  ;;  %v1861_v45 = vpack.c.bf16 %v1673_v43, %v1673_v43  ;;  %v1671_v46 = vmax.f32 %v1668_v44, 0.0 }
 0x203   : > { %1690 = vst.msk [vmem:[%s251_s8] sm:$0xf] %vm1689_vm9, %v1861_v45  ;;  %v1674_v47 = vmul.f32 %v1671_v46, %v2285_v33 }
 0x205   : > { %v1862_v48 = vpack.c.bf16 %v1674_v47, %v1674_v47 }
 0x207   : > { %1691 = vst.msk [vmem:[%s251_s8 + $0x4] sm:$0xf] %vm1689_vm9, %v1862_v48 }
 0x208 PF: > { %s16_s21 = sadd.s32 1, %s2082_s21  }
 0x209   : > { %p13_p4 = scmp.ge.s32.totalorder %s16_s21, 4  }
 0x20b   :  { %15 = sbr.rel (!%p13_p4) target bundleno = 1 (0x1), region = 90 }

// kernel: _lambda_.11
= control target key start
LH: loop header
LB: loop body
LE: loop exit
PB: predicated region body
PF: predicated region fallthrough
CT: control target
= control target key end

     0   :  { %s1960_s21 = smov 0   ;;  %s2210_s0 = inlined_call_operand.vmem [shape: bf16[2,18,32], index: 0, kind: input, shape index: {}]   ;;  %s2211_s1 = inlined_call_operand.vmem [shape: f32[8,1], index: 1, kind: input, shape index: {}]   ;;  %s2212_s2 = inlined_call_operand.vmem [shape: bf16[9,32,32], index: 2, kind: input, shape index: {}]   ;;  %s2213_s3 = inlined_call_operand.vmem [shape: f32[1,32], index: 3, kind: input, shape index: {}]   ;;  %s2214_s4 = inlined_call_operand.vmem [shape: bf16[9,32,32], index: 4, kind: input, shape index: {}]   ;;  %s2215_s5 = inlined_call_operand.vmem [shape: f32[1,32], index: 5, kind: input, shape index: {}]   ;;  %s2216_s6 = inlined_call_operand.vmem [shape: bf16[2,8,32], index: 6, kind: output, shape index: {}]  }
   0x1 LB: > { %s1524_s22 = sadd.s32 4294967295, %s1920_s21   ;;  %p1528_p0 = scmp.ge.s32.totalorder %s1920_s21, 1  ;;  %s1920_s21 = sphi %s1960_s21, %s16_s21  }
   0x2   : > { %p212_p1 = scmp.lt.s32.totalorder %s1920_s21, 3 }
   0x4   : > { %p213_p2 = pnand %p1528_p0, %p212_p1 }
   0x5   : > { %p241_p3 = scmp.lt.s32.totalorder (!%p213_p2), %s1524_s22, 1 }
   0x6   : > { %216 = sbr.rel (%p213_p2) target bundleno = 505 (0x1f9), region = 44 }
   0xb   : > { %v1871_v0 = vld [vmem:[%s2212_s2 + $0x18] sm:$0xff]   ;;  %v1922_v1 = vmov 0.0   ;;  %v1872_v2 = vld [vmem:[%s2212_s2 + $0x8] sm:$0xff]   ;;  %v1873_v3 = vld [vmem:[%s2212_s2 + $0x10] sm:$0xff]   ;;  %vm1923_vm0 = vmmov 0   ;;  %s2218_s22 = smov (!%p241_p3, %s1524_s22), 1 }
   0xc   : > { %1714 = vmatprep.subr.bf16.mxu0 %v1922_v1  ;;  %1722 = vmatprep.subr.bf16.mxu1 %v1922_v1  ;;  %v1874_v4 = vld [vmem:[%s2212_s2] sm:$0xff]   ;;  %s1858_s7 = smul.u32 12, %s2218_s22  ;;  %v1924_v5 = vmov 0   ;;  %vm287_vm1 = vcmask 261120   ;;  %v1877_v6 = vld [vmem:[%s2212_s2 + $0x38] sm:$0xff]   ;;  %v1879_v10 = vld [vmem:[%s2212_s2 + $0x30] sm:$0xff]  }
   0xd   : > { %1715 = vmatpush3.bf16.msra.mxu0 %v1871_v0  ;;  %1718 = vmatprep.mubr.msk.bf16.mxu0 %vm1923_vm0, %v1922_v1  ;;  %v1876_v17 = vld [vmem:[%s2212_s2 + $0x28] sm:$0xff]   ;;  %v1884_v22 = vld [vmem:[%s2212_s2 + $0x58] sm:$0xff]   ;;  %v1878_v28 = vld [vmem:[%s2212_s2 + $0x20] sm:$0xff]   ;;  %vm878_vm2 = vcmask 258048   ;;  %vm1460_vm3 = vcmask 1042432   ;;  %s1530_s17 = sshll.u32 %s2218_s22, 2 }
   0xe   : > { %1723 = vmatpush3.bf16.msra.mxu1 %v1872_v2  ;;  %1716 = vmatprep.subr.bf16.mxu0 %v1922_v1  ;;  %s1998_s12 = scalar_lea.vmem %s2210_s0, %s1858_s7  ;;  %v1886_v29 = vld [vmem:[%s2212_s2 + $0x50] sm:$0xff]   ;;  %v1883_v35 = vld [vmem:[%s2212_s2 + $0x48] sm:$0xff]   ;;  %v251_v38 = vld [vmem:[%s2211_s1] sm:$0xff]  ;;  %879 = vst.msk [vmem:[#allocation2] sm:$0x1f] %vm878_vm2, %v1922_v1  ;;  %s249_s20 = scalar_lea.vmem %s2216_s6, %s1530_s17  ;;  %vm1469_vm4 = vcmask 257024  }
   0xf   : > { %1724 = vmatprep.subr.bf16.mxu1 %v1922_v1  ;;  %1726 = vmatprep.mubr.msk.bf16.mxu1 %vm1923_vm0, %v1922_v1  ;;  %v252_v7 = vld [vmem:[%s1998_s12] sm:$0xf]  ;;  %v257_v8 = vld [vmem:[%s1998_s12 + $0x4] sm:$0x1]  ;;  %v723_v32 = vld [vmem:[%s1998_s12 + $0x8] sm:$0x1] }
  0x10   : > { %1870 = vset.pattern.permute.xlu0 %v1924_v5  ;;  %v1535_v9 = vcombine.low %v252_v7, %v257_v8  ;;  %v452_v11 = vld [vmem:[%s1998_s12] sm:$0xc]  ;;  %v453_v12 = vld [vmem:[%s1998_s12 + $0x4] sm:$0x3]  ;;  %v1889_v40 = vld [vmem:[%s2212_s2 + $0x78] sm:$0xff]  }
  0x11   : > { %1717 = vmatpush3.bf16.msra.mxu0 %v1873_v3  ;;  %v1554_v13 = vcombine.low %v452_v11, %v453_v12  ;;  %v521_v14 = vld [vmem:[%s1998_s12 + $0x4] sm:$0x7]  ;;  %v386_v19 = vld [vmem:[%s1998_s12] sm:$0xe]  ;;  %874 = vperm.xlu0 %1870, %v251_v38   ;;  %v1891_v45 = vld [vmem:[%s2212_s2 + $0x70] sm:$0xff]  }
  0x12   : > { %1725 = vmatpush3.bf16.msra.mxu1 %v1874_v4  ;;  %1730 = vmatprep.subr.bf16.mxu0 %v1922_v1  ;;  %v269_v15 = vshrl.u32 %v1535_v9, 16  ;;  %v271_v16 = vshll.u32 %v1535_v9, 16  ;;  %v1562_v21 = vcombine.low %v452_v11, %v521_v14  ;;  %v594_v24 = vld [vmem:[%s1998_s12] sm:$0x8]  ;;  %v1546_v25 = vcombine.low %v386_v19, %v257_v8  ;;  %v722_v31 = vld [vmem:[%s1998_s12 + $0x4] sm:$0xf] }
  0x13   : > { %1738 = vmatprep.subr.bf16.mxu1 %v1922_v1  ;;  %v464_v20 = vrot.slane %v1554_v13, 2  ;;  %v1570_v30 = vcombine.low %v594_v24, %v521_v14  ;;  %v1585_v33 = vcombine.low %v722_v31, %v723_v32  ;;  %v1885_v42 = vld [vmem:[%s2212_s2 + $0x40] sm:$0xff]   ;;  %v1888_v46 = vld [vmem:[%s2212_s2 + $0x68] sm:$0xff]   ;;  %v1896_v56 = vld [vmem:[%s2214_s4 + $0x18] sm:$0xff]   ;;  %880 = vst.msk [vmem:[#allocation2 + $0xd] sm:$0x1f] %vm878_vm2, %v1922_v1 }
  0x14   : > { %v273_v18 = vrot.slane %v271_v16, 1  ;;  %v531_v26 = vshrl.u32 %v1562_v21, 16  ;;  %v534_v27 = vshll.u32 %v1562_v21, 16  ;;  %v395_v34 = vrot.slane %v1546_v25, 1  ;;  %v1890_v49 = vld [vmem:[%s2212_s2 + $0x60] sm:$0xff]   ;;  %v1893_v51 = vld [vmem:[%s2212_s2 + $0x88] sm:$0xff]  }
  0x15   : > { %1727 = vmatmul.mubr.msk.bf16.vlgmr.msra.gmra.mxu1 %vm287_vm1, %v252_v7  ;;  %v603_v39 = vrot.slane %v1570_v30, 3  ;;  %v737_v41 = vshll.u32 %v1585_v33, 16  ;;  %v735_v43 = vshrl.u32 %v1585_v33, 16  ;;  %v660_v50 = vld [vmem:[%s1998_s12 + $0x4] sm:$0xf]  ;;  %v1897_v57 = vld [vmem:[%s2214_s4 + $0x8] sm:$0xff]  }
  0x16   : > { %1739 = vmatpush3.bf16.msra.mxu1 %v1877_v6  ;;  %1742 = vmatprep.mubr.msk.bf16.mxu1 %vm1923_vm0, %v1922_v1  ;;  %v274_v23 = vor.u32 %v273_v18, %v269_v15  ;;  %v533_v36 = vrot.slane %v531_v26, 2  ;;  %v536_v37 = vrot.slane %v534_v27, 3  ;;  %v797_v52 = vld [vmem:[%s1998_s12 + $0x4] sm:$0xe]  ;;  %v1898_v58 = vld [vmem:[%s2214_s4 + $0x10] sm:$0xff]  }
  0x17   : > { %1740 = vmatprep.subr.bf16.mxu1 %v1922_v1  ;;  %v739_v44 = vrot.slane %v737_v41, 1  ;;  %v1593_v53 = vcombine.low %v797_v52, %v723_v32  ;;  %v1894_v54 = vld [vmem:[%s2212_s2 + $0x80] sm:$0xff]  }
  0x18   : > { %1719 = vmatmul.mubr.msk.bf16.vlgmr.msra.gmra.mxu0 %vm287_vm1, %v274_v23  ;;  %v537_v47 = vor.u32 %v536_v37, %v533_v36  ;;  %v1899_v59 = vld [vmem:[%s2214_s4] sm:$0xff]  }
  0x19   : > { %1731 = vmatpush3.bf16.msra.mxu0 %v1876_v17  ;;  %1734 = vmatprep.mubr.msk.bf16.mxu0 %vm1923_vm0, %v1922_v1  ;;  %v740_v48 = vor.u32 %v739_v44, %v735_v43  ;;  %v806_v55 = vrot.slane %v1593_v53, 1  ;;  %v1597_v37 = vld [vmem:[%s2213_s3] ss:$0 sm:$0xff]  ;;  %v1903_v53 = vld [vmem:[%s2214_s4 + $0x30] sm:$0xff]  }
  0x1a   : > { %1741 = vmatpush3.bf16.msra.mxu1 %v1879_v10  ;;  %1732 = vmatprep.subr.bf16.mxu0 %v1922_v1  ;;  %v1902_v52 = vld [vmem:[%s2214_s4 + $0x20] sm:$0xff]  }
  0x1b   : > { %1754 = vmatprep.subr.bf16.mxu1 %v1922_v1 }
  0x1d   : > { %1743 = vmatmul.mubr.msk.bf16.vlgmr.msra.gmra.mxu1 %vm287_vm1, %v464_v20  ;;  %1733 = vmatpush3.bf16.msra.mxu0 %v1878_v28 }
  0x1e   : > { %1755 = vmatpush3.bf16.msra.mxu1 %v1884_v22  ;;  %1758 = vmatprep.mubr.msk.bf16.mxu1 %vm1923_vm0, %v1922_v1 }
  0x1f   : > { %1756 = vmatprep.subr.bf16.mxu1 %v1922_v1  ;;  %1746 = vmatprep.subr.bf16.mxu0 %v1922_v1 }
  0x20   : > { %1735 = vmatmul.mubr.msk.bf16.vlgmr.msra.gmra.mxu0 %vm287_vm1, %v395_v34 }
  0x21   : > { %1747 = vmatpush3.bf16.msra.mxu0 %v1883_v35  ;;  %1750 = vmatprep.mubr.msk.bf16.mxu0 %vm1923_vm0, %v1922_v1 }
  0x22   : > { %1757 = vmatpush3.bf16.msra.mxu1 %v1886_v29  ;;  %1748 = vmatprep.subr.bf16.mxu0 %v1922_v1 }
  0x23   : > { %1770 = vmatprep.subr.bf16.mxu1 %v1922_v1 }
  0x25   : > { %1759 = vmatmul.mubr.msk.bf16.vlgmr.msra.gmra.mxu1 %vm287_vm1, %v603_v39  ;;  %1749 = vmatpush3.bf16.msra.mxu0 %v1885_v42 }
  0x26   : > { %1771 = vmatpush3.bf16.msra.mxu1 %v1889_v40  ;;  %1774 = vmatprep.mubr.msk.bf16.mxu1 %vm1923_vm0, %v1922_v1 }
  0x27   : > { %1772 = vmatprep.subr.bf16.mxu1 %v1922_v1  ;;  %1762 = vmatprep.subr.bf16.mxu0 %v1922_v1 }
  0x28   : > { %1751 = vmatmul.mubr.msk.bf16.vlgmr.msra.gmra.mxu0 %vm287_vm1, %v537_v47 }
  0x29   : > { %1763 = vmatpush3.bf16.msra.mxu0 %v1888_v46  ;;  %1766 = vmatprep.mubr.msk.bf16.mxu0 %vm1923_vm0, %v1922_v1  ;;  %v1900_v46 = vld [vmem:[%s2214_s4 + $0x28] sm:$0xff]  }
  0x2a   : > { %1773 = vmatpush3.bf16.msra.mxu1 %v1891_v45  ;;  %1764 = vmatprep.subr.bf16.mxu0 %v1922_v1 }
  0x2b   : > { %1786 = vmatprep.subr.bf16.mxu1 %v1922_v1 }
  0x2d   : > { %1775 = vmatmul.mubr.msk.bf16.vlgmr.msra.gmra.mxu1 %vm287_vm1, %v740_v48  ;;  %1765 = vmatpush3.bf16.msra.mxu0 %v1890_v49  ;;  %v1901_v49 = vld [vmem:[%s2214_s4 + $0x38] sm:$0xff]  }
  0x2e   : > { %1790 = vmatprep.mubr.msk.bf16.mxu1 %vm1923_vm0, %v1922_v1  ;;  %1778 = vmatprep.subr.bf16.mxu0 %v1922_v1 }
  0x2f   : > { %1787 = vmatpush3.bf16.msra.mxu1 %v1896_v56  ;;  %v1904_v56 = vld [vmem:[%s2214_s4 + $0x48] sm:$0xff]  }
  0x30   : > { %1767 = vmatmul.mubr.msk.bf16.vlgmr.msra.gmra.mxu0 %vm287_vm1, %v660_v50  ;;  %1788 = vmatprep.subr.bf16.mxu1 %v1922_v1 }
  0x31   : > { %1779 = vmatpush3.bf16.msra.mxu0 %v1893_v51  ;;  %1782 = vmatprep.mubr.msk.bf16.mxu0 %vm1923_vm0, %v1922_v1 }
  0x32   : > { %1780 = vmatprep.subr.bf16.mxu0 %v1922_v1 }
  0x33   : > { %1789 = vmatpush3.bf16.msra.mxu1 %v1898_v58 }
  0x34   : > { %1802 = vmatprep.subr.bf16.mxu1 %v1922_v1 }
  0x35   : > { %1781 = vmatpush3.bf16.msra.mxu0 %v1894_v54 }
  0x36   : > { %1794 = vmatprep.subr.bf16.mxu0 %v1922_v1 }
  0x38   : > { %1783 = vmatmul.mubr.msk.bf16.vlgmr.msra.gmra.mxu0 %vm287_vm1, %v806_v55 }
  0x39   : > { %1798 = vmatprep.mubr.msk.bf16.mxu0 %vm1923_vm0, %v1922_v1  ;;  %1795 = vmatpush3.bf16.msra.mxu0 %v1897_v57  ;;  %v1905_v57 = vld [vmem:[%s2214_s4 + $0x58] sm:$0xff]  }
  0x3a   : > { %1796 = vmatprep.subr.bf16.mxu0 %v1922_v1 }
  0x3d   : > { %1797 = vmatpush3.bf16.msra.mxu0 %v1899_v59 }
  0x3e   : > { %1810 = vmatprep.subr.bf16.mxu0 %v1922_v1 }
  0x8c   : > { %v2116_v42 = vpop.permute.xlu0 %874 }
  0xd5   : > { %v380_v60 = vpop.f32.mrf.mxu1 }
  0xd7   : > { %v1728_v61 = vpop.f32.mrf.mxu1 }
  0xd8   : > { %v325_v0 = vpop.f32.mrf.mxu0  ;;  %v1907_v61 = vld [vmem:[%s2214_s4 + $0x50] sm:$0xff]  }
  0xd9   : > { %v383_v62 = vpop.f32.mrf.mxu1  ;;  %v381_v14 = vadd.f32 %v380_v60, %v325_v0  ;;  %v1906_v60 = vld [vmem:[%s2214_s4 + $0x40] sm:$0xff]   ;;  %v1908_v0 = vld [vmem:[%s2214_s4 + $0x68] sm:$0xff]  }
  0xda   : > { %v1720_v3 = vpop.f32.mrf.mxu0 }
  0xdb   : > { %v1729_v63 = vpop.f32.mrf.mxu1 }
  0xdc   : > { %v328_v5 = vpop.f32.mrf.mxu0 }
  0xdd   : > { %v514_v2 = vpop.f32.mrf.mxu1  ;;  %v1910_v5 = vld [vmem:[%s2214_s4 + $0x60] sm:$0xff]  }
  0xde   : > { %v1721_v7 = vpop.f32.mrf.mxu0 }
  0xdf   : > { %v1744_v4 = vpop.f32.mrf.mxu1 }
  0xe0   : > { %v445_v9 = vpop.f32.mrf.mxu0 }
  0xe1   : > { %v517_v6 = vpop.f32.mrf.mxu1  ;;  %v451_v17 = vadd.f32 %v445_v9, %v381_v14  ;;  %v1912_v9 = vld [vmem:[%s2214_s4 + $0x88] sm:$0xff]  }
  0xe2   : > { %v1736_v10 = vpop.f32.mrf.mxu0  ;;  %v1911_v6 = vld [vmem:[%s2214_s4 + $0x70] sm:$0xff]  }
  0xe3   : > { %v1745_v8 = vpop.f32.mrf.mxu1  ;;  %v520_v22 = vadd.f32 %v514_v2, %v451_v17  ;;  %v1909_v2 = vld [vmem:[%s2214_s4 + $0x78] sm:$0xff]  }
  0xe4   : > { %v448_v12 = vpop.f32.mrf.mxu0 }
  0xe5   : > { %v653_v11 = vpop.f32.mrf.mxu1  ;;  %v1913_v12 = vld [vmem:[%s2214_s4 + $0x80] sm:$0xff]  }
  0xe6   : > { %v1737_v15 = vpop.f32.mrf.mxu0 }
  0xe7   : > { %v1760_v13 = vpop.f32.mrf.mxu1 }
  0xe8   : > { %v587_v18 = vpop.f32.mrf.mxu0 }
  0xe9   : > { %v656_v16 = vpop.f32.mrf.mxu1  ;;  %v593_v25 = vadd.f32 %v587_v18, %v520_v22 }
  0xea   : > { %v1752_v20 = vpop.f32.mrf.mxu0 }
  0xeb   : > { %v1761_v19 = vpop.f32.mrf.mxu1  ;;  %v659_v30 = vadd.f32 %v653_v11, %v593_v25 }
  0xec   : > { %v590_v23 = vpop.f32.mrf.mxu0 }
  0xed   : > { %v790_v21 = vpop.f32.mrf.mxu1 }
  0xee   : > { %v1753_v26 = vpop.f32.mrf.mxu0 }
  0xef   : > { %v1776_v24 = vpop.f32.mrf.mxu1 }
  0xf0   : > { %v715_v28 = vpop.f32.mrf.mxu0 }
  0xf1   : > { %v793_v27 = vpop.f32.mrf.mxu1  ;;  %v721_v32 = vadd.f32 %v715_v28, %v659_v30 }
  0xf2   : > { %v1768_v31 = vpop.f32.mrf.mxu0 }
  0xf3   : > { %v1777_v29 = vpop.f32.mrf.mxu1  ;;  %v796_v35 = vadd.f32 %v790_v21, %v721_v32 }
  0xf4   : > { %v718_v33 = vpop.f32.mrf.mxu0 }
  0xf6   : > { %v1769_v34 = vpop.f32.mrf.mxu0 }
  0xf8   : > { %v856_v36 = vpop.f32.mrf.mxu0 }
  0xf9   : > { %v862_v38 = vadd.f32 %v856_v36, %v796_v35 }
  0xfa   : > { %v1784_v39 = vpop.f32.mrf.mxu0 }
  0xfb   : > { %v870_v40 = vadd.f32 %v1597_v37, %v862_v38 }
  0xfc   : > { %v859_v41 = vpop.f32.mrf.mxu0 }
  0xfd   : > { %v871_v43 = vmax.f32 %v870_v40, 0.0 }
  0xfe   : > { %v1785_v44 = vpop.f32.mrf.mxu0 }
  0xff   : > { %v877_v45 = vmul.f32 %v2116_v42, %v871_v43  ;;  %v882_v43 = vld [vmem:[%s1998_s12] sm:$0xc]  ;;  %v883_v44 = vld [vmem:[%s1998_s12 + $0x4] sm:$0x7] }
 0x101   : > { %881 = vst.msk [vmem:[#allocation2 + $0x5] sm:$0xff] %vm287_vm1, %v877_v45 }
 0x108   : > { %v892_v47 = vld [vmem:[#allocation2 + $0x1] sm:$0xff]  ;;  %v1324_v8 = vld [vmem:[#allocation2 + $0x9] sm:$0xff] }
 0x109   : > { %v886_v48 = vld [vmem:[#allocation2] sm:$0xff]  ;;  %v893_v50 = vpack.c.bf16 %v892_v47, %v892_v47  ;;  %v1261_v7 = vld [vmem:[#allocation2 + $0x8] sm:$0xff]  ;;  %v1325_v11 = vpack.c.bf16 %v1324_v8, %v1324_v8 }
 0x10a   : > { %v887_v51 = vpack.c.bf16 %v886_v48, %v886_v48  ;;  %v1009_v54 = vld [vmem:[#allocation2 + $0x2] sm:$0xff]  ;;  %v1262_v10 = vpack.c.bf16 %v1261_v7, %v1261_v7  ;;  %v1387_v13 = vld [vmem:[#allocation2 + $0xa] sm:$0xff] }
 0x10b   : > { %1791 = vmatmul.mubr.msk.bf16.vlgmr.msra.gmra.mxu1 %vm287_vm1, %v893_v50  ;;  %v1072_v55 = vld [vmem:[#allocation2 + $0x4] sm:$0xff]  ;;  %v1010_v58 = vpack.c.bf16 %v1009_v54, %v1009_v54  ;;  %v1388_v14 = vpack.c.bf16 %v1387_v13, %v1387_v13  ;;  %v884_v50 = vunpack.c.l.bf16 %v882_v43 }
 0x10c   : > { %1799 = vmatmul.mubr.msk.bf16.vlgmr.msra.gmra.mxu0 %vm287_vm1, %v887_v51  ;;  %1803 = vmatpush3.bf16.msra.mxu1 %v1900_v46  ;;  %v1073_v59 = vpack.c.bf16 %v1072_v55, %v1072_v55  ;;  %v1135_v62 = vld [vmem:[#allocation2 + $0x5] sm:$0xff]  ;;  %v885_v51 = vunpack.c.l.bf16 %v883_v44 }
 0x10d   : > { %1811 = vmatpush3.bf16.msra.mxu0 %v1901_v49  ;;  %1804 = vmatprep.subr.bf16.mxu1 %v1922_v1  ;;  %v1198_v63 = vld [vmem:[#allocation2 + $0x6] sm:$0xff]  ;;  %v1136_v3 = vpack.c.bf16 %v1135_v62, %v1135_v62 }
 0x10e   : > { %1812 = vmatprep.subr.bf16.mxu0 %v1922_v1  ;;  %1806 = vmatprep.mubr.msk.bf16.mxu1 %vm1923_vm0, %v1922_v1  ;;  %v1199_v4 = vpack.c.bf16 %v1198_v63, %v1198_v63 }
 0x10f   : > { %1814 = vmatprep.mubr.msk.bf16.mxu0 %vm1923_vm0, %v1922_v1 }
 0x110   : > { %1805 = vmatpush3.bf16.msra.mxu1 %v1902_v52 }
 0x111   : > { %1813 = vmatpush3.bf16.msra.mxu0 %v1903_v53  ;;  %1818 = vmatprep.subr.bf16.mxu1 %v1922_v1 }
 0x112   : > { %1826 = vmatprep.subr.bf16.mxu0 %v1922_v1 }
 0x113   : > { %1807 = vmatmul.mubr.msk.bf16.vlgmr.msra.gmra.mxu1 %vm287_vm1, %v1010_v58  ;;  %v1462_v58 = vrot.slane %v885_v51, 5 }
 0x114   : > { %1815 = vmatmul.mubr.msk.bf16.vlgmr.msra.gmra.mxu0 %vm287_vm1, %v1073_v59  ;;  %1819 = vmatpush3.bf16.msra.mxu1 %v1904_v56 }
 0x115   : > { %1827 = vmatpush3.bf16.msra.mxu0 %v1905_v57  ;;  %1820 = vmatprep.subr.bf16.mxu1 %v1922_v1  ;;  %v1461_v57 = vrot.slane %v884_v50, 5 }
 0x116   : > { %1828 = vmatprep.subr.bf16.mxu0 %v1922_v1  ;;  %1822 = vmatprep.mubr.msk.bf16.mxu1 %vm1923_vm0, %v1922_v1 }
 0x117   : > { %1830 = vmatprep.mubr.msk.bf16.mxu0 %vm1923_vm0, %v1922_v1  ;;  %v1463_v63 = vsel %vm1460_vm3, %v1461_v57, %v1462_v58 }
 0x118   : > { %1821 = vmatpush3.bf16.msra.mxu1 %v1906_v60 }
 0x119   : > { %1829 = vmatpush3.bf16.msra.mxu0 %v1907_v61  ;;  %1834 = vmatprep.subr.bf16.mxu1 %v1922_v1  ;;  %v1657_v61 = vld [vmem:[%s2215_s5] ss:$0 sm:$0xff] }
 0x11a   : > { %1842 = vmatprep.subr.bf16.mxu0 %v1922_v1 }
 0x11b   : > { %1823 = vmatmul.mubr.msk.bf16.vlgmr.msra.gmra.mxu1 %vm287_vm1, %v1136_v3 }
 0x11c   : > { %1831 = vmatmul.mubr.msk.bf16.vlgmr.msra.gmra.mxu0 %vm287_vm1, %v1199_v4  ;;  %1835 = vmatpush3.bf16.msra.mxu1 %v1908_v0 }
 0x11d   : > { %1843 = vmatpush3.bf16.msra.mxu0 %v1909_v2  ;;  %1836 = vmatprep.subr.bf16.mxu1 %v1922_v1 }
 0x11e   : > { %1844 = vmatprep.subr.bf16.mxu0 %v1922_v1  ;;  %1838 = vmatprep.mubr.msk.bf16.mxu1 %vm1923_vm0, %v1922_v1 }
 0x11f   : > { %1846 = vmatprep.mubr.msk.bf16.mxu0 %vm1923_vm0, %v1922_v1 }
 0x120   : > { %1837 = vmatpush3.bf16.msra.mxu1 %v1910_v5 }
 0x121   : > { %1845 = vmatpush3.bf16.msra.mxu0 %v1911_v6  ;;  %1850 = vmatprep.subr.bf16.mxu1 %v1922_v1 }
 0x123   : > { %1839 = vmatmul.mubr.msk.bf16.vlgmr.msra.gmra.mxu1 %vm287_vm1, %v1262_v10 }
 0x124   : > { %1847 = vmatmul.mubr.msk.bf16.vlgmr.msra.gmra.mxu0 %vm287_vm1, %v1325_v11  ;;  %1851 = vmatpush3.bf16.msra.mxu1 %v1912_v9 }
 0x125   : > { %1854 = vmatprep.mubr.msk.bf16.mxu1 %vm1923_vm0, %v1922_v1  ;;  %1852 = vmatprep.subr.bf16.mxu1 %v1922_v1 }
 0x128   : > { %1853 = vmatpush3.bf16.msra.mxu1 %v1913_v12 }
 0x12b   : > { %1855 = vmatmul.mubr.msk.bf16.vlgmr.msra.gmra.mxu1 %vm287_vm1, %v1388_v14 }
 0x1cb   : > { %v948_v15 = vpop.f32.mrf.mxu1 }
 0x1cc   : > { %v1003_v16 = vpop.f32.mrf.mxu0 }
 0x1cd   : > { %v1792_v17 = vpop.f32.mrf.mxu1  ;;  %v1004_v28 = vadd.f32 %v1003_v16, %v948_v15 }
 0x1ce   : > { %v1800_v18 = vpop.f32.mrf.mxu0 }
 0x1cf   : > { %v951_v19 = vpop.f32.mrf.mxu1 }
 0x1d0   : > { %v1006_v20 = vpop.f32.mrf.mxu0 }
 0x1d1   : > { %v1793_v21 = vpop.f32.mrf.mxu1 }
 0x1d2   : > { %v1801_v22 = vpop.f32.mrf.mxu0 }
 0x1d3   : > { %v1065_v23 = vpop.f32.mrf.mxu1 }
 0x1d4   : > { %v1128_v24 = vpop.f32.mrf.mxu0  ;;  %v1071_v31 = vadd.f32 %v1065_v23, %v1004_v28 }
 0x1d5   : > { %v1808_v25 = vpop.f32.mrf.mxu1 }
 0x1d6   : > { %v1816_v26 = vpop.f32.mrf.mxu0  ;;  %v1134_v36 = vadd.f32 %v1128_v24, %v1071_v31 }
 0x1d7   : > { %v1068_v27 = vpop.f32.mrf.mxu1 }
 0x1d8   : > { %v1131_v1 = vpop.f32.mrf.mxu0 }
 0x1d9   : > { %v1809_v29 = vpop.f32.mrf.mxu1 }
 0x1da   : > { %v1817_v30 = vpop.f32.mrf.mxu0 }
 0x1db   : > { %v1191_v32 = vpop.f32.mrf.mxu1 }
 0x1dc   : > { %v1254_v33 = vpop.f32.mrf.mxu0  ;;  %v1197_v39 = vadd.f32 %v1191_v32, %v1134_v36 }
 0x1dd   : > { %v1824_v34 = vpop.f32.mrf.mxu1 }
 0x1de   : > { %v1832_v35 = vpop.f32.mrf.mxu0  ;;  %v1260_v47 = vadd.f32 %v1254_v33, %v1197_v39 }
 0x1df   : > { %v1194_v37 = vpop.f32.mrf.mxu1 }
 0x1e0   : > { %v1257_v38 = vpop.f32.mrf.mxu0 }
 0x1e1   : > { %v1825_v40 = vpop.f32.mrf.mxu1 }
 0x1e2   : > { %v1833_v41 = vpop.f32.mrf.mxu0 }
 0x1e3   : > { %v1317_v45 = vpop.f32.mrf.mxu1 }
 0x1e4   : > { %v1380_v46 = vpop.f32.mrf.mxu0  ;;  %v1323_v52 = vadd.f32 %v1317_v45, %v1260_v47 }
 0x1e5   : > { %v1840_v48 = vpop.f32.mrf.mxu1 }
 0x1e6   : > { %v1848_v49 = vpop.f32.mrf.mxu0  ;;  %v1386_v59 = vadd.f32 %v1380_v46, %v1323_v52 }
 0x1e7   : > { %v1320_v53 = vpop.f32.mrf.mxu1 }
 0x1e8   : > { %v1383_v54 = vpop.f32.mrf.mxu0 }
 0x1e9   : > { %v1841_v55 = vpop.f32.mrf.mxu1 }
 0x1ea   : > { %v1849_v56 = vpop.f32.mrf.mxu0 }
 0x1eb   : > { %v1443_v60 = vpop.f32.mrf.mxu1 }
 0x1ec   : > { %v1449_v62 = vadd.f32 %v1443_v60, %v1386_v59 }
 0x1ed   : > { %v1856_v0 = vpop.f32.mrf.mxu1 }
 0x1ee   : > { %v1457_v2 = vadd.f32 %v1657_v61, %v1449_v62 }
 0x1ef   : > { %v1446_v3 = vpop.f32.mrf.mxu1 }
 0x1f0   : > { %v1465_v4 = vadd.f32 %v1463_v63, %v1457_v2 }
 0x1f1   : > { %v1857_v5 = vpop.f32.mrf.mxu1 }
 0x1f2   : > { %v1466_v6 = vmax.f32 %v1465_v4, 0.0 }
 0x1f4   : > { %v1467_v7 = vmul.f32 %v1466_v6, %v2116_v42 }
 0x1f6   : > { %v1468_v8 = vpack.c.bf16 %v1467_v7, %v1467_v7 }
 0x1f8   : > { %1470 = vst.msk [vmem:[%s249_s20] sm:$0xf] %vm1469_vm4, %v1468_v8 }
 0x1f9 PF: > { %s16_s21 = sadd.s32 1, %s1920_s21  }
 0x1fa   : > { %p13_p4 = scmp.ge.s32.totalorder %s16_s21, 4  }
 0x1fc   :  { %15 = sbr.rel (!%p13_p4) target bundleno = 1 (0x1), region = 90 }

// kernel: _lambda_.10
= control target key start
LH: loop header
LB: loop body
LE: loop exit
PB: predicated region body
PF: predicated region fallthrough
CT: control target
= control target key end

     0   :  { %s2605_s13 = smov 0   ;;  %s2900_s0 = inlined_call_operand.vmem [shape: bf16[2,14,16], index: 0, kind: input, shape index: {}]   ;;  %s2901_s1 = inlined_call_operand.vmem [shape: bf16[2,14,16], index: 1, kind: input, shape index: {}]   ;;  %s2902_s2 = inlined_call_operand.vmem [shape: bf16[2,14,16], index: 2, kind: input, shape index: {}]   ;;  %s2903_s3 = inlined_call_operand.vmem [shape: bf16[2,14,16], index: 3, kind: input, shape index: {}]   ;;  %s2904_s4 = inlined_call_operand.vmem [shape: f32[8,1], index: 4, kind: input, shape index: {}]   ;;  %s2905_s5 = inlined_call_operand.vmem [shape: bf16[9,16,32], index: 5, kind: input, shape index: {}]   ;;  %s2906_s6 = inlined_call_operand.vmem [shape: f32[1,32], index: 6, kind: input, shape index: {}]   ;;  %s2907_s7 = inlined_call_operand.vmem [shape: bf16[9,32,32], index: 7, kind: input, shape index: {}]   ;;  %s2908_s8 = inlined_call_operand.vmem [shape: f32[1,32], index: 8, kind: input, shape index: {}]   ;;  %s2909_s9 = inlined_call_operand.vmem [shape: bf16[9,16,32], index: 9, kind: input, shape index: {}]   ;;  %s2910_s10 = inlined_call_operand.vmem [shape: bf16[2,8,32], index: 10, kind: output, shape index: {}]  }
   0x1 LB: > { %s2089_s14 = sadd.s32 4294967295, %s2545_s13   ;;  %p2093_p0 = scmp.ge.s32.totalorder %s2545_s13, 1  ;;  %s2545_s13 = sphi %s2605_s13, %s20_s13  }
   0x2   : > { %p342_p1 = scmp.lt.s32.totalorder %s2545_s13, 3 }
   0x4   : > { %p343_p2 = pnand %p2093_p0, %p342_p1 }
   0x5   : > { %p394_p3 = scmp.lt.s32.totalorder (!%p343_p2), %s2089_s14, 1 }
   0x6   : > { %346 = sbr.rel (%p343_p2) target bundleno = 529 (0x211), region = 60 }
   0xb   : > { %v2498_v0 = vld [vmem:[%s2905_s5 + $0x8] sm:$0xff]   ;;  %v2547_v1 = vmov 0.0   ;;  %v2499_v2 = vld [vmem:[%s2905_s5] sm:$0xff]   ;;  %vm2548_vm0 = vmmov 0   ;;  %s2912_s14 = smov (!%p394_p3, %s2089_s14), 1  ;;  %v2549_v3 = vmov 0  }
   0xc   : > { %2306 = vmatprep.subr.bf16.mxu0 %v2547_v1  ;;  %2312 = vmatprep.subr.bf16.mxu1 %v2547_v1  ;;  %s2630_s19 = sshll.u32 %s2912_s14, 3  ;;  %vm435_vm1 = vcmask 130048   ;;  %v2501_v4 = vld [vmem:[%s2909_s9 + $0x8] sm:$0xff]   ;;  %v2502_v5 = vld [vmem:[%s2909_s9] sm:$0xff]   ;;  %v2503_v10 = vld [vmem:[%s2905_s5 + $0x10] sm:$0xff]   ;;  %vm1417_vm2 = vcmask 258048  }
   0xd   : > { %2307 = vmatpush3.bf16.msra.mxu0 %v2498_v0  ;;  %2308 = vmatprep.mubr.msk.bf16.mxu0 %vm2548_vm0, %v2547_v1  ;;  %s2642_s26 = scalar_lea.vmem %s2901_s1, %s2630_s19  ;;  %s2649_s29 = scalar_lea.vmem %s2900_s0, %s2630_s19  ;;  %v2504_v11 = vld [vmem:[%s2909_s9 + $0x10] sm:$0xff]   ;;  %v2506_v15 = vld [vmem:[%s2905_s5 + $0x18] sm:$0xff]   ;;  %v419_v17 = vld [vmem:[%s2904_s4] sm:$0xff]  ;;  %1418 = vst.msk [vmem:[#allocation2] sm:$0x1f] %vm1417_vm2, %v2547_v1  ;;  %vm1420_vm3 = vcmask 261120  }
   0xe   : > { %2313 = vmatpush3.bf16.msra.mxu1 %v2499_v2  ;;  %2314 = vmatprep.mubr.msk.bf16.mxu1 %vm2548_vm0, %v2547_v1  ;;  %v425_v6 = vld [vmem:[%s2642_s26] sm:$0xf]  ;;  %s2659_s12 = scalar_lea.vmem %s2902_s2, %s2630_s19  ;;  %v2507_v16 = vld [vmem:[%s2909_s9 + $0x18] sm:$0xff]   ;;  %s413_s17 = scalar_lea.vmem %s2903_s3, %s2630_s19  ;;  %v2511_v24 = vld [vmem:[%s2905_s5 + $0x28] sm:$0xff]   ;;  %1419 = vst.msk [vmem:[#allocation2 + $0xd] sm:$0x1f] %vm1417_vm2, %v2547_v1 }
   0xf   : > { %2318 = vmatprep.subr.bf16.mxu0 %v2547_v1  ;;  %2324 = vmatprep.subr.bf16.mxu1 %v2547_v1  ;;  %v420_v7 = vld [vmem:[%s2649_s29] sm:$0xf]  ;;  %v2512_v25 = vld [vmem:[%s2909_s9 + $0x28] sm:$0xff]   ;;  %v2513_v29 = vld [vmem:[%s2905_s5 + $0x30] sm:$0xff]   ;;  %s2102_s20 = sshll.u32 %s2912_s14, 2  ;;  %vm1998_vm4 = vcmask 257024  }
  0x10   : > { %2497 = vset.pattern.permute.xlu0 %v2549_v3  ;;  %2309 = vmatmul.mubr.msk.bf16.vlgmr.msra.gmra.mxu0 %vm435_vm1, %v425_v6  ;;  %v2505_v8 = vld [vmem:[%s2649_s29] sm:$0x1f]   ;;  %v2514_v32 = vld [vmem:[%s2909_s9 + $0x30] sm:$0xff]   ;;  %v2517_v36 = vld [vmem:[%s2905_s5 + $0x38] sm:$0xff]   ;;  %s417_s22 = scalar_lea.vmem %s2910_s10, %s2102_s20 }
  0x11   : > { %2315 = vmatmul.mubr.msk.bf16.vlgmr.msra.gmra.mxu1 %vm435_vm1, %v420_v7  ;;  %2319 = vmatpush3.bf16.msra.mxu0 %v2501_v4  ;;  %v636_v9 = vshll.u32 %v2505_v8, 16  ;;  %v634_v12 = vshrl.u32 %v2505_v8, 16  ;;  %v740_v18 = vld [vmem:[%s2659_s12] sm:$0xf]  ;;  %v1066_v31 = vld [vmem:[%s2649_s29 + $0x4] sm:$0x3] }
  0x12   : > { %2325 = vmatpush3.bf16.msra.mxu1 %v2502_v5  ;;  %2320 = vmatprep.mubr.msk.bf16.mxu0 %vm2548_vm0, %v2547_v1  ;;  %v2509_v19 = vld [vmem:[%s2905_s5 + $0x20] sm:$0xff]   ;;  %v2518_v37 = vld [vmem:[%s2909_s9 + $0x38] sm:$0xff]   ;;  %v2522_v49 = vld [vmem:[%s2907_s7 + $0x8] sm:$0xff]  }
  0x13   : > { %2326 = vmatprep.mubr.msk.bf16.mxu1 %vm2548_vm0, %v2547_v1  ;;  %2330 = vmatprep.subr.bf16.mxu0 %v2547_v1  ;;  %v638_v13 = vrot.slane %v636_v9, 1  ;;  %v2510_v20 = vld [vmem:[%s2909_s9 + $0x20] sm:$0xff]   ;;  %v2521_v48 = vld [vmem:[%s2907_s7 + $0x18] sm:$0xff]   ;;  %v2523_v50 = vld [vmem:[%s2907_s7 + $0x10] sm:$0xff]  }
  0x14   : > { %2336 = vmatprep.subr.bf16.mxu1 %v2547_v1  ;;  %1413 = vperm.xlu0 %2497, %v419_v17   ;;  %v2508_v21 = vld [vmem:[%s2659_s12] sm:$0x1f]  }
  0x15   : > { %v639_v14 = vor.u32 %v638_v13, %v634_v12  ;;  %v961_v22 = vshll.u32 %v2508_v21, 16  ;;  %v844_v23 = vld [vmem:[%s413_s17] sm:$0xf]  ;;  %v959_v26 = vshrl.u32 %v2508_v21, 16  ;;  %v1287_v35 = vld [vmem:[%s2649_s29 + $0x4] sm:$0x7] }
  0x16   : > { %v1065_v30 = vld [vmem:[%s2649_s29] sm:$0xc] }
  0x17   : > { %v963_v27 = vrot.slane %v961_v22, 1  ;;  %v2151_v33 = vcombine.low %v1065_v30, %v1066_v31  ;;  %v2500_v38 = vld [vmem:[%s2642_s26] sm:$0x3c]   ;;  %v2169_v39 = vcombine.low %v1065_v30, %v1287_v35 }
  0x18   : > { %2321 = vmatmul.mubr.msk.bf16.vlgmr.msra.gmra.mxu0 %vm435_vm1, %v425_v6  ;;  %v1186_v40 = vrot.slane %v2500_v38, 2  ;;  %v2519_v43 = vld [vmem:[%s2905_s5 + $0x40] sm:$0xff]  }
  0x19   : > { %2327 = vmatmul.mubr.msk.bf16.vlgmr.msra.gmra.mxu1 %vm435_vm1, %v420_v7  ;;  %2331 = vmatpush3.bf16.msra.mxu0 %v2503_v10  ;;  %v964_v28 = vor.u32 %v963_v27, %v959_v26  ;;  %v1075_v34 = vrot.slane %v2151_v33, 2  ;;  %v1295_v41 = vshrl.u32 %v2169_v39, 16  ;;  %v1298_v42 = vshll.u32 %v2169_v39, 16  ;;  %v2520_v44 = vld [vmem:[%s2909_s9 + $0x40] sm:$0xff]  }
  0x1a   : > { %2337 = vmatpush3.bf16.msra.mxu1 %v2504_v11  ;;  %2332 = vmatprep.mubr.msk.bf16.mxu0 %vm2548_vm0, %v2547_v1  ;;  %v2524_v51 = vld [vmem:[%s2907_s7] sm:$0xff]  }
  0x1b   : > { %2338 = vmatprep.mubr.msk.bf16.mxu1 %vm2548_vm0, %v2547_v1  ;;  %2342 = vmatprep.subr.bf16.mxu0 %v2547_v1  ;;  %v1297_v45 = vrot.slane %v1295_v41, 2  ;;  %v1300_v46 = vrot.slane %v1298_v42, 3 }
  0x1c   : > { %2348 = vmatprep.subr.bf16.mxu1 %v2547_v1 }
  0x1d   : > { %v1301_v47 = vor.u32 %v1300_v46, %v1297_v45 }
  0x20   : > { %2333 = vmatmul.mubr.msk.bf16.vlgmr.msra.gmra.mxu0 %vm435_vm1, %v639_v14 }
  0x21   : > { %2339 = vmatmul.mubr.msk.bf16.vlgmr.msra.gmra.mxu1 %vm435_vm1, %v639_v14  ;;  %2343 = vmatpush3.bf16.msra.mxu0 %v2506_v15 }
  0x22   : > { %2349 = vmatpush3.bf16.msra.mxu1 %v2507_v16  ;;  %2344 = vmatprep.mubr.msk.bf16.mxu0 %vm2548_vm0, %v2547_v1 }
  0x23   : > { %2350 = vmatprep.mubr.msk.bf16.mxu1 %vm2548_vm0, %v2547_v1  ;;  %2354 = vmatprep.subr.bf16.mxu0 %v2547_v1 }
  0x24   : > { %2360 = vmatprep.subr.bf16.mxu1 %v2547_v1 }
  0x28   : > { %2345 = vmatmul.mubr.msk.bf16.vlgmr.msra.gmra.mxu0 %vm435_vm1, %v740_v18 }
  0x29   : > { %2351 = vmatmul.mubr.msk.bf16.vlgmr.msra.gmra.mxu1 %vm435_vm1, %v740_v18  ;;  %2355 = vmatpush3.bf16.msra.mxu0 %v2509_v19 }
  0x2a   : > { %2361 = vmatpush3.bf16.msra.mxu1 %v2510_v20  ;;  %2356 = vmatprep.mubr.msk.bf16.mxu0 %vm2548_vm0, %v2547_v1 }
  0x2b   : > { %2362 = vmatprep.mubr.msk.bf16.mxu1 %vm2548_vm0, %v2547_v1  ;;  %2366 = vmatprep.subr.bf16.mxu0 %v2547_v1 }
  0x2c   : > { %2372 = vmatprep.subr.bf16.mxu1 %v2547_v1 }
  0x30   : > { %2357 = vmatmul.mubr.msk.bf16.vlgmr.msra.gmra.mxu0 %vm435_vm1, %v844_v23 }
  0x31   : > { %2363 = vmatmul.mubr.msk.bf16.vlgmr.msra.gmra.mxu1 %vm435_vm1, %v844_v23  ;;  %2367 = vmatpush3.bf16.msra.mxu0 %v2511_v24 }
  0x32   : > { %2373 = vmatpush3.bf16.msra.mxu1 %v2512_v25  ;;  %2368 = vmatprep.mubr.msk.bf16.mxu0 %vm2548_vm0, %v2547_v1 }
  0x33   : > { %2374 = vmatprep.mubr.msk.bf16.mxu1 %vm2548_vm0, %v2547_v1  ;;  %2378 = vmatprep.subr.bf16.mxu0 %v2547_v1 }
  0x34   : > { %2384 = vmatprep.subr.bf16.mxu1 %v2547_v1 }
  0x38   : > { %2369 = vmatmul.mubr.msk.bf16.vlgmr.msra.gmra.mxu0 %vm435_vm1, %v964_v28 }
  0x39   : > { %2375 = vmatmul.mubr.msk.bf16.vlgmr.msra.gmra.mxu1 %vm435_vm1, %v964_v28  ;;  %2379 = vmatpush3.bf16.msra.mxu0 %v2513_v29 }
  0x3a   : > { %2385 = vmatpush3.bf16.msra.mxu1 %v2514_v32  ;;  %2380 = vmatprep.mubr.msk.bf16.mxu0 %vm2548_vm0, %v2547_v1 }
  0x3b   : > { %2386 = vmatprep.mubr.msk.bf16.mxu1 %vm2548_vm0, %v2547_v1  ;;  %2390 = vmatprep.subr.bf16.mxu0 %v2547_v1 }
  0x3c   : > { %2396 = vmatprep.subr.bf16.mxu1 %v2547_v1 }
  0x40   : > { %2381 = vmatmul.mubr.msk.bf16.vlgmr.msra.gmra.mxu0 %vm435_vm1, %v1075_v34 }
  0x41   : > { %2387 = vmatmul.mubr.msk.bf16.vlgmr.msra.gmra.mxu1 %vm435_vm1, %v1075_v34  ;;  %2391 = vmatpush3.bf16.msra.mxu0 %v2517_v36 }
  0x42   : > { %2397 = vmatpush3.bf16.msra.mxu1 %v2518_v37  ;;  %2392 = vmatprep.mubr.msk.bf16.mxu0 %vm2548_vm0, %v2547_v1 }
  0x43   : > { %2398 = vmatprep.mubr.msk.bf16.mxu1 %vm2548_vm0, %v2547_v1  ;;  %2402 = vmatprep.subr.bf16.mxu0 %v2547_v1 }
  0x44   : > { %2408 = vmatprep.subr.bf16.mxu1 %v2547_v1 }
  0x48   : > { %2393 = vmatmul.mubr.msk.bf16.vlgmr.msra.gmra.mxu0 %vm435_vm1, %v1186_v40 }
  0x49   : > { %2399 = vmatmul.mubr.msk.bf16.vlgmr.msra.gmra.mxu1 %vm435_vm1, %v1186_v40  ;;  %2403 = vmatpush3.bf16.msra.mxu0 %v2519_v43 }
  0x4a   : > { %2409 = vmatpush3.bf16.msra.mxu1 %v2520_v44  ;;  %2404 = vmatprep.mubr.msk.bf16.mxu0 %vm2548_vm0, %v2547_v1 }
  0x4b   : > { %2410 = vmatprep.mubr.msk.bf16.mxu1 %vm2548_vm0, %v2547_v1  ;;  %2414 = vmatprep.subr.bf16.mxu0 %v2547_v1 }
  0x4c   : > { %2422 = vmatprep.subr.bf16.mxu1 %v2547_v1 }
  0x50   : > { %2405 = vmatmul.mubr.msk.bf16.vlgmr.msra.gmra.mxu0 %vm435_vm1, %v1301_v47 }
  0x51   : > { %2411 = vmatmul.mubr.msk.bf16.vlgmr.msra.gmra.mxu1 %vm435_vm1, %v1301_v47  ;;  %2418 = vmatprep.mubr.msk.bf16.mxu0 %vm2548_vm0, %v2547_v1 }
  0x52   : > { %2426 = vmatprep.mubr.msk.bf16.mxu1 %vm2548_vm0, %v2547_v1  ;;  %2415 = vmatpush3.bf16.msra.mxu0 %v2521_v48 }
  0x53   : > { %2423 = vmatpush3.bf16.msra.mxu1 %v2522_v49  ;;  %2416 = vmatprep.subr.bf16.mxu0 %v2547_v1 }
  0x54   : > { %2424 = vmatprep.subr.bf16.mxu1 %v2547_v1 }
  0x56   : > { %2417 = vmatpush3.bf16.msra.mxu0 %v2523_v50 }
  0x57   : > { %2425 = vmatpush3.bf16.msra.mxu1 %v2524_v51  ;;  %2430 = vmatprep.subr.bf16.mxu0 %v2547_v1 }
  0x58   : > { %2438 = vmatprep.subr.bf16.mxu1 %v2547_v1 }
  0xd0   : > { %v473_v52 = vpop.f32.mrf.mxu0 }
  0xd1   : > { %v522_v53 = vpop.f32.mrf.mxu1 }
  0xd2   : > { %v2310_v54 = vpop.f32.mrf.mxu0  ;;  %v523_v46 = vadd.f32 %v522_v53, %v473_v52 }
  0xd3   : > { %v2316_v55 = vpop.f32.mrf.mxu1 }
  0xd4   : > { %v476_v56 = vpop.f32.mrf.mxu0 }
  0xd5   : > { %v525_v57 = vpop.f32.mrf.mxu1 }
  0xd6   : > { %v2311_v58 = vpop.f32.mrf.mxu0 }
  0xd7   : > { %v2317_v59 = vpop.f32.mrf.mxu1 }
  0xd8   : > { %v571_v60 = vpop.f32.mrf.mxu0 }
  0xd9   : > { %v617_v61 = vpop.f32.mrf.mxu1 }
  0xda   : > { %v618_v62 = vadd.f32 %v617_v61, %v571_v60  ;;  %v2322_v63 = vpop.f32.mrf.mxu0 }
  0xdb   : > { %v2328_v0 = vpop.f32.mrf.mxu1 }
  0xdc   : > { %v574_v2 = vpop.f32.mrf.mxu0 }
  0xdd   : > { %v620_v3 = vpop.f32.mrf.mxu1 }
  0xde   : > { %v2323_v4 = vpop.f32.mrf.mxu0 }
  0xdf   : > { %v2329_v5 = vpop.f32.mrf.mxu1 }
  0xe0   : > { %v683_v6 = vpop.f32.mrf.mxu0  ;;  %v2176_v5 = vld [vmem:[%s2906_s6] ss:$0 sm:$0xff] }
  0xe1   : > { %v733_v7 = vpop.f32.mrf.mxu1  ;;  %v689_v49 = vadd.f32 %v683_v6, %v523_v46 }
  0xe2   : > { %v739_v8 = vadd.f32 %v733_v7, %v618_v62  ;;  %v2334_v9 = vpop.f32.mrf.mxu0 }
  0xe3   : > { %v2340_v10 = vpop.f32.mrf.mxu1 }
  0xe4   : > { %v686_v11 = vpop.f32.mrf.mxu0 }
  0xe5   : > { %v736_v12 = vpop.f32.mrf.mxu1 }
  0xe6   : > { %v2335_v13 = vpop.f32.mrf.mxu0 }
  0xe7   : > { %v2341_v14 = vpop.f32.mrf.mxu1  ;;  %v2807_v13 = vpop.permute.xlu0 %1413 }
  0xe8   : > { %v787_v15 = vpop.f32.mrf.mxu0 }
  0xe9   : > { %v837_v16 = vpop.f32.mrf.mxu1  ;;  %v793_v54 = vadd.f32 %v787_v15, %v689_v49 }
  0xea   : > { %v843_v17 = vadd.f32 %v837_v16, %v739_v8  ;;  %v2346_v18 = vpop.f32.mrf.mxu0 }
  0xeb   : > { %v2352_v19 = vpop.f32.mrf.mxu1 }
  0xec   : > { %v790_v20 = vpop.f32.mrf.mxu0  ;;  %v2525_v19 = vld [vmem:[%s2907_s7 + $0x28] sm:$0xff]  }
  0xed   : > { %v840_v21 = vpop.f32.mrf.mxu1 }
  0xee   : > { %v2347_v22 = vpop.f32.mrf.mxu0 }
  0xef   : > { %v2353_v23 = vpop.f32.mrf.mxu1  ;;  %v2526_v22 = vld [vmem:[%s2907_s7 + $0x38] sm:$0xff]  }
  0xf0   : > { %v891_v24 = vpop.f32.mrf.mxu0 }
  0xf1   : > { %v941_v25 = vpop.f32.mrf.mxu1  ;;  %v897_v57 = vadd.f32 %v891_v24, %v793_v54 }
  0xf2   : > { %v947_v26 = vadd.f32 %v941_v25, %v843_v17  ;;  %v2358_v27 = vpop.f32.mrf.mxu0  ;;  %v2527_v25 = vld [vmem:[%s2907_s7 + $0x20] sm:$0xff]  }
  0xf3   : > { %v2364_v28 = vpop.f32.mrf.mxu1 }
  0xf4   : > { %v894_v29 = vpop.f32.mrf.mxu0 }
  0xf5   : > { %v944_v30 = vpop.f32.mrf.mxu1  ;;  %v2529_v29 = vld [vmem:[%s2907_s7 + $0x48] sm:$0xff]  }
  0xf6   : > { %v2359_v31 = vpop.f32.mrf.mxu0  ;;  %v2530_v30 = vld [vmem:[%s2907_s7 + $0x58] sm:$0xff]  }
  0xf7   : > { %v2365_v32 = vpop.f32.mrf.mxu1 }
  0xf8   : > { %v1008_v33 = vpop.f32.mrf.mxu0 }
  0xf9   : > { %v1058_v34 = vpop.f32.mrf.mxu1  ;;  %v1014_v61 = vadd.f32 %v1008_v33, %v897_v57  ;;  %v2531_v33 = vld [vmem:[%s2907_s7 + $0x40] sm:$0xff]  }
  0xfa   : > { %v1064_v35 = vadd.f32 %v1058_v34, %v947_v26  ;;  %v2370_v36 = vpop.f32.mrf.mxu0  ;;  %v2528_v26 = vld [vmem:[%s2907_s7 + $0x30] sm:$0xff]  }
  0xfb   : > { %v2376_v37 = vpop.f32.mrf.mxu1  ;;  %v2532_v34 = vld [vmem:[%s2907_s7 + $0x50] sm:$0xff]  }
  0xfc   : > { %v1011_v38 = vpop.f32.mrf.mxu0  ;;  %v2533_v37 = vld [vmem:[%s2907_s7 + $0x68] sm:$0xff]  }
  0xfd   : > { %v1061_v39 = vpop.f32.mrf.mxu1  ;;  %v2534_v38 = vld [vmem:[%s2907_s7 + $0x78] sm:$0xff]  }
  0xfe   : > { %v2371_v40 = vpop.f32.mrf.mxu0 }
  0xff   : > { %v2377_v41 = vpop.f32.mrf.mxu1 }
 0x100   : > { %v1119_v42 = vpop.f32.mrf.mxu0  ;;  %v2535_v41 = vld [vmem:[%s2907_s7 + $0x60] sm:$0xff]  }
 0x101   : > { %v1169_v43 = vpop.f32.mrf.mxu1  ;;  %v1125_v0 = vadd.f32 %v1119_v42, %v1014_v61  ;;  %v2536_v42 = vld [vmem:[%s2907_s7 + $0x70] sm:$0xff]  }
 0x102   : > { %v1175_v44 = vadd.f32 %v1169_v43, %v1064_v35  ;;  %v2382_v45 = vpop.f32.mrf.mxu0 }
 0x103   : > { %v2388_v47 = vpop.f32.mrf.mxu1  ;;  %v2537_v45 = vld [vmem:[%s2907_s7 + $0x88] sm:$0xff]  }
 0x104   : > { %v1122_v48 = vpop.f32.mrf.mxu0 }
 0x105   : > { %v1172_v50 = vpop.f32.mrf.mxu1  ;;  %v2538_v48 = vld [vmem:[%s2907_s7 + $0x80] sm:$0xff]  }
 0x106   : > { %v2383_v51 = vpop.f32.mrf.mxu0 }
 0x107   : > { %v2389_v55 = vpop.f32.mrf.mxu1 }
 0x108   : > { %v1230_v56 = vpop.f32.mrf.mxu0 }
 0x109   : > { %v1280_v58 = vpop.f32.mrf.mxu1  ;;  %v1236_v4 = vadd.f32 %v1230_v56, %v1125_v0 }
 0x10a   : > { %v1286_v59 = vadd.f32 %v1280_v58, %v1175_v44  ;;  %v2394_v60 = vpop.f32.mrf.mxu0 }
 0x10b   : > { %v2400_v62 = vpop.f32.mrf.mxu1 }
 0x10c   : > { %v1233_v63 = vpop.f32.mrf.mxu0 }
 0x10d   : > { %v1283_v2 = vpop.f32.mrf.mxu1 }
 0x10e   : > { %v2395_v3 = vpop.f32.mrf.mxu0 }
 0x10f   : > { %v2401_v52 = vpop.f32.mrf.mxu1 }
 0x110   : > { %v1345_v53 = vpop.f32.mrf.mxu0 }
 0x111   : > { %v1351_v6 = vadd.f32 %v1345_v53, %v1236_v4  ;;  %v1395_v7 = vpop.f32.mrf.mxu1 }
 0x112   : > { %v2805_v8 = vadd.f32 %v1395_v7, %v1286_v59  ;;  %v2406_v9 = vpop.f32.mrf.mxu0 }
 0x113   : > { %v1409_v10 = vadd.f32 %v2176_v5, %v1351_v6  ;;  %v2412_v11 = vpop.f32.mrf.mxu1 }
 0x114   : > { %v1348_v12 = vpop.f32.mrf.mxu0 }
 0x115   : > { %v1410_v14 = vmax.f32 %v1409_v10, 0.0  ;;  %v1398_v15 = vpop.f32.mrf.mxu1 }
 0x116   : > { %v2407_v16 = vpop.f32.mrf.mxu0 }
 0x117   : > { %v1416_v17 = vmul.f32 %v2807_v13, %v1410_v14  ;;  %v2413_v18 = vpop.f32.mrf.mxu1 }
 0x119   : > { %1421 = vst.msk [vmem:[#allocation2 + $0x5] sm:$0xff] %vm1420_vm3, %v1416_v17 }
 0x120   : > { %v1428_v20 = vld [vmem:[#allocation2 + $0x1] sm:$0xff]  ;;  %v1860_v44 = vld [vmem:[#allocation2 + $0x9] sm:$0xff] }
 0x121   : > { %v1422_v21 = vld [vmem:[#allocation2] sm:$0xff]  ;;  %v1429_v23 = vpack.c.bf16 %v1428_v20, %v1428_v20  ;;  %v1797_v43 = vld [vmem:[#allocation2 + $0x8] sm:$0xff]  ;;  %v1861_v47 = vpack.c.bf16 %v1860_v44, %v1860_v44 }
 0x122   : > { %v1423_v24 = vpack.c.bf16 %v1422_v21, %v1422_v21  ;;  %v1545_v27 = vld [vmem:[#allocation2 + $0x2] sm:$0xff]  ;;  %v1798_v46 = vpack.c.bf16 %v1797_v43, %v1797_v43  ;;  %v1923_v49 = vld [vmem:[#allocation2 + $0xa] sm:$0xff] }
 0x123   : > { %2419 = vmatmul.mubr.msk.bf16.vlgmr.msra.gmra.mxu0 %vm1420_vm3, %v1429_v23  ;;  %v1608_v28 = vld [vmem:[#allocation2 + $0x4] sm:$0xff]  ;;  %v1546_v31 = vpack.c.bf16 %v1545_v27, %v1545_v27  ;;  %v1924_v50 = vpack.c.bf16 %v1923_v49, %v1923_v49 }
 0x124   : > { %2427 = vmatmul.mubr.msk.bf16.vlgmr.msra.gmra.mxu1 %vm1420_vm3, %v1423_v24  ;;  %2431 = vmatpush3.bf16.msra.mxu0 %v2525_v19  ;;  %v1609_v32 = vpack.c.bf16 %v1608_v28, %v1608_v28  ;;  %v1671_v35 = vld [vmem:[#allocation2 + $0x5] sm:$0xff] }
 0x125   : > { %2439 = vmatpush3.bf16.msra.mxu1 %v2526_v22  ;;  %2432 = vmatprep.subr.bf16.mxu0 %v2547_v1  ;;  %v1734_v36 = vld [vmem:[#allocation2 + $0x6] sm:$0xff]  ;;  %v1672_v39 = vpack.c.bf16 %v1671_v35, %v1671_v35 }
 0x126   : > { %2440 = vmatprep.subr.bf16.mxu1 %v2547_v1  ;;  %2434 = vmatprep.mubr.msk.bf16.mxu0 %vm2548_vm0, %v2547_v1  ;;  %v1735_v40 = vpack.c.bf16 %v1734_v36, %v1734_v36 }
 0x127   : > { %2442 = vmatprep.mubr.msk.bf16.mxu1 %vm2548_vm0, %v2547_v1 }
 0x128   : > { %2433 = vmatpush3.bf16.msra.mxu0 %v2527_v25 }
 0x129   : > { %2441 = vmatpush3.bf16.msra.mxu1 %v2528_v26  ;;  %2446 = vmatprep.subr.bf16.mxu0 %v2547_v1 }
 0x12a   : > { %2454 = vmatprep.subr.bf16.mxu1 %v2547_v1 }
 0x12b   : > { %2435 = vmatmul.mubr.msk.bf16.vlgmr.msra.gmra.mxu0 %vm1420_vm3, %v1546_v31 }
 0x12c   : > { %2443 = vmatmul.mubr.msk.bf16.vlgmr.msra.gmra.mxu1 %vm1420_vm3, %v1609_v32  ;;  %2447 = vmatpush3.bf16.msra.mxu0 %v2529_v29  ;;  %v2236_v29 = vld [vmem:[%s2908_s8] ss:$0 sm:$0xff] }
 0x12d   : > { %2455 = vmatpush3.bf16.msra.mxu1 %v2530_v30  ;;  %2448 = vmatprep.subr.bf16.mxu0 %v2547_v1 }
 0x12e   : > { %2456 = vmatprep.subr.bf16.mxu1 %v2547_v1  ;;  %2450 = vmatprep.mubr.msk.bf16.mxu0 %vm2548_vm0, %v2547_v1 }
 0x12f   : > { %2458 = vmatprep.mubr.msk.bf16.mxu1 %vm2548_vm0, %v2547_v1 }
 0x130   : > { %2449 = vmatpush3.bf16.msra.mxu0 %v2531_v33 }
 0x131   : > { %2457 = vmatpush3.bf16.msra.mxu1 %v2532_v34  ;;  %2462 = vmatprep.subr.bf16.mxu0 %v2547_v1 }
 0x132   : > { %2470 = vmatprep.subr.bf16.mxu1 %v2547_v1 }
 0x133   : > { %2451 = vmatmul.mubr.msk.bf16.vlgmr.msra.gmra.mxu0 %vm1420_vm3, %v1672_v39 }
 0x134   : > { %2459 = vmatmul.mubr.msk.bf16.vlgmr.msra.gmra.mxu1 %vm1420_vm3, %v1735_v40  ;;  %2463 = vmatpush3.bf16.msra.mxu0 %v2533_v37 }
 0x135   : > { %2471 = vmatpush3.bf16.msra.mxu1 %v2534_v38  ;;  %2464 = vmatprep.subr.bf16.mxu0 %v2547_v1 }
 0x136   : > { %2472 = vmatprep.subr.bf16.mxu1 %v2547_v1  ;;  %2466 = vmatprep.mubr.msk.bf16.mxu0 %vm2548_vm0, %v2547_v1 }
 0x137   : > { %2474 = vmatprep.mubr.msk.bf16.mxu1 %vm2548_vm0, %v2547_v1 }
 0x138   : > { %2465 = vmatpush3.bf16.msra.mxu0 %v2535_v41 }
 0x139   : > { %2473 = vmatpush3.bf16.msra.mxu1 %v2536_v42  ;;  %2478 = vmatprep.subr.bf16.mxu0 %v2547_v1 }
 0x13b   : > { %2467 = vmatmul.mubr.msk.bf16.vlgmr.msra.gmra.mxu0 %vm1420_vm3, %v1798_v46 }
 0x13c   : > { %2475 = vmatmul.mubr.msk.bf16.vlgmr.msra.gmra.mxu1 %vm1420_vm3, %v1861_v47  ;;  %2479 = vmatpush3.bf16.msra.mxu0 %v2537_v45 }
 0x13d   : > { %2482 = vmatprep.mubr.msk.bf16.mxu0 %vm2548_vm0, %v2547_v1  ;;  %2480 = vmatprep.subr.bf16.mxu0 %v2547_v1 }
 0x140   : > { %2481 = vmatpush3.bf16.msra.mxu0 %v2538_v48 }
 0x143   : > { %2483 = vmatmul.mubr.msk.bf16.vlgmr.msra.gmra.mxu0 %vm1420_vm3, %v1924_v50 }
 0x1e3   : > { %v1484_v51 = vpop.f32.mrf.mxu0 }
 0x1e4   : > { %v1539_v54 = vpop.f32.mrf.mxu1 }
 0x1e5   : > { %v2420_v55 = vpop.f32.mrf.mxu0  ;;  %v1540_v1 = vadd.f32 %v1539_v54, %v1484_v51 }
 0x1e6   : > { %v2428_v56 = vpop.f32.mrf.mxu1 }
 0x1e7   : > { %v1487_v57 = vpop.f32.mrf.mxu0 }
 0x1e8   : > { %v1542_v58 = vpop.f32.mrf.mxu1 }
 0x1e9   : > { %v2421_v59 = vpop.f32.mrf.mxu0 }
 0x1ea   : > { %v2429_v60 = vpop.f32.mrf.mxu1 }
 0x1eb   : > { %v1601_v61 = vpop.f32.mrf.mxu0 }
 0x1ec   : > { %v1664_v62 = vpop.f32.mrf.mxu1  ;;  %v1607_v53 = vadd.f32 %v1601_v61, %v1540_v1 }
 0x1ed   : > { %v2436_v63 = vpop.f32.mrf.mxu0 }
 0x1ee   : > { %v2444_v0 = vpop.f32.mrf.mxu1  ;;  %v1670_v10 = vadd.f32 %v1664_v62, %v1607_v53 }
 0x1ef   : > { %v1604_v2 = vpop.f32.mrf.mxu0 }
 0x1f0   : > { %v1667_v3 = vpop.f32.mrf.mxu1 }
 0x1f1   : > { %v2437_v4 = vpop.f32.mrf.mxu0 }
 0x1f2   : > { %v2445_v52 = vpop.f32.mrf.mxu1 }
 0x1f3   : > { %v1727_v5 = vpop.f32.mrf.mxu0 }
 0x1f4   : > { %v1790_v6 = vpop.f32.mrf.mxu1  ;;  %v1733_v14 = vadd.f32 %v1727_v5, %v1670_v10 }
 0x1f5   : > { %v2452_v7 = vpop.f32.mrf.mxu0 }
 0x1f6   : > { %v2460_v9 = vpop.f32.mrf.mxu1  ;;  %v1796_v19 = vadd.f32 %v1790_v6, %v1733_v14 }
 0x1f7   : > { %v1730_v11 = vpop.f32.mrf.mxu0 }
 0x1f8   : > { %v1793_v12 = vpop.f32.mrf.mxu1 }
 0x1f9   : > { %v2453_v15 = vpop.f32.mrf.mxu0 }
 0x1fa   : > { %v2461_v16 = vpop.f32.mrf.mxu1 }
 0x1fb   : > { %v1853_v17 = vpop.f32.mrf.mxu0 }
 0x1fc   : > { %v1916_v18 = vpop.f32.mrf.mxu1  ;;  %v1859_v22 = vadd.f32 %v1853_v17, %v1796_v19 }
 0x1fd   : > { %v2468_v20 = vpop.f32.mrf.mxu0 }
 0x1fe   : > { %v2476_v21 = vpop.f32.mrf.mxu1  ;;  %v1922_v27 = vadd.f32 %v1916_v18, %v1859_v22 }
 0x1ff   : > { %v1856_v23 = vpop.f32.mrf.mxu0 }
 0x200   : > { %v1919_v24 = vpop.f32.mrf.mxu1 }
 0x201   : > { %v2469_v25 = vpop.f32.mrf.mxu0 }
 0x202   : > { %v2477_v26 = vpop.f32.mrf.mxu1 }
 0x203   : > { %v1979_v28 = vpop.f32.mrf.mxu0 }
 0x204   : > { %v1985_v30 = vadd.f32 %v1979_v28, %v1922_v27 }
 0x205   : > { %v2484_v31 = vpop.f32.mrf.mxu0 }
 0x206   : > { %v1993_v32 = vadd.f32 %v2236_v29, %v1985_v30 }
 0x207   : > { %v1982_v33 = vpop.f32.mrf.mxu0 }
 0x208   : > { %v1994_v34 = vadd.f32 %v1993_v32, %v2805_v8 }
 0x209   : > { %v2485_v35 = vpop.f32.mrf.mxu0 }
 0x20a   : > { %v1995_v36 = vmax.f32 %v1994_v34, 0.0 }
 0x20c   : > { %v1996_v37 = vmul.f32 %v1995_v36, %v2807_v13 }
 0x20e   : > { %v1997_v38 = vpack.c.bf16 %v1996_v37, %v1996_v37 }
 0x210   : > { %1999 = vst.msk [vmem:[%s417_s22] sm:$0xf] %vm1998_vm4, %v1997_v38 }
 0x211 PF: > { %s20_s13 = sadd.s32 1, %s2545_s13  }
 0x212   : > { %p17_p4 = scmp.ge.s32.totalorder %s20_s13, 4  }
 0x214   :  { %19 = sbr.rel (!%p17_p4) target bundleno = 1 (0x1), region = 123 }

</bundles_post_ra>
